<compile_context>
chip_gen: v7x
topology: tpu7x:2x2x1
jax: 0.10.0
libtpu: 0.0.40
codegen_flags: <defaults>
</compile_context>

<pallas_src>
import functools
import math

import jax
import jax.numpy as jnp
from jax import lax
from jax.experimental import pallas as pl
from jax.experimental.pallas import tpu as pltpu

EPS = 1e-5


# ----------------------- kernel 1/2: intra / inter branch -------------------

def _branch_kernel(x_ref, g_ref, b_ref, wih_ref, bih_ref, whh_ref,
                   wlin_ref, blin_ref, *rest, hidden, fuse_qkv, eps):
    """Fused branch forward on time-major sequences x_ref:[L, S, C]:
       LayerNorm(C) -> bidirectional LSTM (fwd+rev stacked in one recurrence,
       block-diagonal W_hh) -> Linear(2H->C) -> residual add.
       Optionally also emits the fused Q/K/V 1x1-conv of the branch output."""
    if fuse_qkv:
        (wqkv_ref, bqkv_ref, o_ref, qkv_ref,
         xg_scr, hf_scr, hr_scr, h_scr, c_scr) = rest
    else:
        o_ref, xg_scr, hf_scr, hr_scr, h_scr, c_scr = rest

    H = hidden
    H2, H8 = 2 * H, 8 * H
    L, S, C = x_ref.shape

    # ---- LayerNorm over feature dim (biased variance, eps inside sqrt) ----
    x = x_ref[...]
    mu = jnp.mean(x, axis=-1, keepdims=True)
    var = jnp.mean((x - mu) ** 2, axis=-1, keepdims=True)
    xn = (x - mu) * lax.rsqrt(var + eps) * g_ref[...] + b_ref[...]

    # ---- gate pre-activations for BOTH directions in one matmul ----
    # column layout of wih / bih / whh: [i_f i_r | f_f f_r | g_f g_r | o_f o_r]
    xg = jnp.dot(xn.reshape(L * S, C), wih_ref[...],
                 preferred_element_type=jnp.float32) + bih_ref[...]
    xg_scr[...] = xg.reshape(L, S, H8)

    # ---- stacked fwd/rev recurrence: one [S,2H] x [2H,8H] matmul per step ----
    h_scr[...] = jnp.zeros_like(h_scr)
    c_scr[...] = jnp.zeros_like(c_scr)
    lane = lax.broadcasted_iota(jnp.int32, (S, H8), 1)
    is_fwd = (lane % H2) < H                       # hoisted out of the loop

    def step(t):
        g = jnp.dot(h_scr[...], whh_ref[...],
                    preferred_element_type=jnp.float32)
        # fwd gate columns take pre-activations from time t, rev from L-1-t
        g = g + jnp.where(is_fwd, xg_scr[t], xg_scr[L - 1 - t])
        ig = jax.nn.sigmoid(g[:, 0 * H2:1 * H2])
        fg = jax.nn.sigmoid(g[:, 1 * H2:2 * H2])
        gg = jnp.tanh(g[:, 2 * H2:3 * H2])
        og = jax.nn.sigmoid(g[:, 3 * H2:4 * H2])
        c = fg * c_scr[...] + ig * gg
        h = og * jnp.tanh(c)
        c_scr[...] = c
        h_scr[...] = h
        hf_scr[t] = h[:, :H]                       # forward hidden at time t
        hr_scr[L - 1 - t] = h[:, H:]               # reverse hidden at L-1-t

    if L <= 16:
        # fully unrolled -> static VMEM indices, full LLO scheduler visibility
        for t in range(L):
            step(t)
    else:
        lax.fori_loop(0, L, lambda t, c: (step(t), c)[1], 0, unroll=2)

    # ---- output projection + residual (fused epilogue) ----
    hcat = jnp.concatenate([hf_scr[...], hr_scr[...]], axis=-1)    # [L,S,2H]
    lin = jnp.dot(hcat.reshape(L * S, H2), wlin_ref[...],
                  preferred_element_type=jnp.float32) + blin_ref[...]
    out = lin.reshape(L, S, C) + x_ref[...]
    o_ref[...] = out

    if fuse_qkv:
        # fused Q/K/V 1x1 conv of the branch output.
        qkv_ref[...] = (jnp.dot(out.reshape(L * S, C), wqkv_ref[...],
                                preferred_element_type=jnp.float32)
                        + bqkv_ref[...])


def branch_forward(x_tmaj, norm_g, norm_b, wih, bih, whh, wlin, blin, *,
                   hidden, wqkv=None, bqkv=None):
    L, S, C = x_tmaj.shape
    H8 = 8 * hidden
    fuse_qkv = wqkv is not None
    kernel = functools.partial(_branch_kernel, hidden=hidden,
                               fuse_qkv=fuse_qkv, eps=EPS)

    def full(shape):
        return pl.BlockSpec(shape, lambda i: (0,) * len(shape))

    in_specs = [full((L, S, C)), full((1, C)), full((1, C)),
                full((C, H8)), full((1, H8)), full((2 * hidden, H8)),
                full((2 * hidden, C)), full((1, C))]
    args = [x_tmaj, norm_g.reshape(1, C), norm_b.reshape(1, C),
            wih, bih, whh, wlin, blin.reshape(1, C)]

    out_shape = jax.ShapeDtypeStruct((L, S, C), jnp.float32)
    out_specs = full((L, S, C))
    if fuse_qkv:
        D = wqkv.shape[1]
        in_specs += [full((C, D)), full((1, D))]
        args += [wqkv, bqkv.reshape(1, D)]
        out_shape = (out_shape, jax.ShapeDtypeStruct((L * S, D), jnp.float32))
        out_specs = (out_specs, full((L * S, D)))

    scratch = [pltpu.VMEM((L, S, H8), jnp.float32),         # gate pre-acts
               pltpu.VMEM((L, S, hidden), jnp.float32),     # fwd hidden seq
               pltpu.VMEM((L, S, hidden), jnp.float32),     # rev hidden seq
               pltpu.VMEM((S, 2 * hidden), jnp.float32),    # h state (fwd|rev)
               pltpu.VMEM((S, 2 * hidden), jnp.float32)]    # c state (fwd|rev)

    return pl.pallas_call(
        kernel, out_shape=out_shape, grid=(1,),
        in_specs=in_specs, out_specs=out_specs, scratch_shapes=scratch,
    )(*args)


# ---------------- kernel 3: per-head PReLU+norm + softmax attention ---------

def _attn_head_kernel(q_ref, k_ref, v_ref,
                      aq_ref, gq_ref, bq_ref,
                      ak_ref, gk_ref, bk_ref,
                      av_ref, gv_ref, bv_ref,
                      o_ref, *, scale, eps):
    """One (batch, head) per grid step.  Per-head PReLU + layer-norm of Q/K/V
    (affine params broadcast in-kernel), then softmax attention over time.
    K is contracted un-transposed (no materialized K^T)."""
    def pnorm(x, a_ref, g_ref, b_ref):
        y = jnp.where(x >= 0, x, a_ref[0] * x)
        mu = jnp.mean(y, axis=-1, keepdims=True)
        var = jnp.mean((y - mu) ** 2, axis=-1, keepdims=True)
        return (y - mu) * lax.rsqrt(var + eps) * g_ref[0] + b_ref[0]

    qn = pnorm(q_ref[0, 0], aq_ref, gq_ref, bq_ref)          # [T, Dqk]
    kn = pnorm(k_ref[0, 0], ak_ref, gk_ref, bk_ref)          # [T, Dqk]
    vn = pnorm(v_ref[0, 0], av_ref, gv_ref, bv_ref)          # [T, Dv]

    s = lax.dot_general(qn, kn, (((1,), (1,)), ((), ())),
                        preferred_element_type=jnp.float32) * scale   # [T, T]
    m = jnp.max(s, axis=-1, keepdims=True)
    p = jnp.exp(s - m)
    p = p * pl.reciprocal(jnp.sum(p, axis=-1, keepdims=True), approx=True)
    o_ref[0, 0] = jnp.dot(p, vn, preferred_element_type=jnp.float32)


def attention_heads(q4, k4, v4, aq, gq, bq, ak, gk, bk, av, gv, bv):
    """q4/k4/v4 : [B, n_head, T, D] per-head sequences."""
    B, nH, T, Dq = q4.shape
    Dv = v4.shape[-1]
    kernel = functools.partial(_attn_head_kernel,
                               scale=1.0 / math.sqrt(Dq), eps=EPS)
    bh = lambda b, h: (b, h, 0, 0)
    hd = lambda b, h: (h, 0, 0)
    qk_spec = pl.BlockSpec((1, 1, T, Dq), bh)
    v_spec = pl.BlockSpec((1, 1, T, Dv), bh)
    a_spec = pl.BlockSpec((1, 1, 1), hd)
    gq_spec = pl.BlockSpec((1, 1, Dq), hd)
    gv_spec = pl.BlockSpec((1, 1, Dv), hd)
    return pl.pallas_call(
        kernel,
        out_shape=jax.ShapeDtypeStruct((B, nH, T, Dv), jnp.float32),
        grid=(B, nH),
        in_specs=[qk_spec, qk_spec, v_spec,
                  a_spec, gq_spec, gq_spec,
                  a_spec, gq_spec, gq_spec,
                  a_spec, gv_spec, gv_spec],
        out_specs=pl.BlockSpec((1, 1, T, Dv), bh),
        compiler_params=pltpu.CompilerParams(
            dimension_semantics=("parallel", "parallel")),
    )(q4, k4, v4, aq, gq, bq, ak, gk, bk, av, gv, bv)


# ---------- kernel 4: attn_concat_proj (conv + PReLU + norm) + residual -----

def _proj_kernel(att_ref, wp_ref, bp_ref, ap_ref, gp_ref, btp_ref, res_ref,
                 o_ref, *, eps):
    """1x1 conv -> PReLU(1 param) -> LayerNorm over (C,F) per (b,t) ->
    residual add with the inter branch output, all fused.  Layout [R,F,C]."""
    R, F, C = att_ref.shape
    inv_n = 1.0 / float(F * C)
    y = jnp.dot(att_ref[...].reshape(R * F, C), wp_ref[...],
                preferred_element_type=jnp.float32) + bp_ref[...]
    y = y.reshape(R, F, C)
    y = jnp.where(y >= 0, y, ap_ref[...] * y)
    mu = jnp.sum(jnp.sum(y, axis=-1, keepdims=True),
                 axis=-2, keepdims=True) * inv_n
    d = y - mu
    var = jnp.sum(jnp.sum(d * d, axis=-1, keepdims=True),
                  axis=-2, keepdims=True) * inv_n
    y = d * lax.rsqrt(var + eps) * gp_ref[...] + btp_ref[...]
    o_ref[...] = y + res_ref[...]


def proj_norm_residual(att_btfc, wp, bp, ap, gp_fc, betp_fc, res_btfc):
    R, F, C = att_btfc.shape
    kernel = functools.partial(_proj_kernel, eps=EPS)

    def full(shape):
        return pl.BlockSpec(shape, lambda i: (0,) * len(shape))

    return pl.pallas_call(
        kernel,
        out_shape=jax.ShapeDtypeStruct((R, F, C), jnp.float32),
        grid=(1,),
        in_specs=[full((R, F, C)), full((C, C)), full((1, C)), full((1, 1)),
                  full((1, F, C)), full((1, F, C)), full((R, F, C))],
        out_specs=full((R, F, C)),
    )(att_btfc, wp, bp.reshape(1, C), ap, gp_fc, betp_fc, res_btfc)


# ------------------------------ full forward --------------------------------

def gridnet_v2_block(x, params, *, emb_ks, emb_hs, n_head, e_dim, hidden):
    # emb_ks == emb_hs == 1 -> nn.Linear branch; olp == 0, so the module's
    # pad / crop are identities and are elided.
    # TODO(synk): general emb_ks/emb_hs (ConvTranspose1d + unfold path) not implemented.
    assert emb_ks == 1 and emb_hs == 1
    B, C, T, F = x.shape
    nH, E = n_head, e_dim
    dv = C // nH
    Dq = nH * E

    # [B,C,T,F] -> time-major sequences over F for the intra branch
    x_btfc = jnp.transpose(x, (0, 2, 3, 1))                       # [B,T,F,C]
    x_intra = jnp.transpose(x_btfc, (2, 0, 1, 3)).reshape(F, B * T, C)

    wih, bih, whh = params['intra_lstm_packed']
    intra = branch_forward(
        x_intra, params['intra_norm_g'], params['intra_norm_b'],
        wih, bih, whh, params['intra_lin_w'], params['intra_lin_b'],
        hidden=hidden)                                            # [F, B*T, C]

    # inter branch: time-major sequences over T grouped by (b, f)
    x_inter = jnp.transpose(intra.reshape(F, B, T, C),
                            (2, 1, 0, 3)).reshape(T, B * F, C)
    wih, bih, whh = params['inter_lstm_packed']
    inter, qkv = branch_forward(
        x_inter, params['inter_norm_g'], params['inter_norm_b'],
        wih, bih, whh, params['inter_lin_w'], params['inter_lin_b'],
        hidden=hidden, wqkv=params['wqkv'], bqkv=params['bqkv'])
    # inter: [T, B*F, C]  (rows (t,b,f));  qkv: [T*B*F, 2*nH*E + C]

    # ---- layout glue (XLA) to per-head attention inputs ----
    qkv = qkv.reshape(T, B, F, 2 * Dq + C)
    q_part = qkv[..., :Dq].reshape(T, B, F, nH, E)
    k_part = qkv[..., Dq:2 * Dq].reshape(T, B, F, nH, E)
    v_part = qkv[..., 2 * Dq:].reshape(T, B, F, nH, dv)

    def to_heads(p, d):            # [T,B,F,nH,d] -> [B, nH, T, d*F]
        return jnp.transpose(p, (1, 3, 0, 4, 2)).reshape(B, nH, T, d * F)

    att = attention_heads(to_heads(q_part, E), to_heads(k_part, E),
                          to_heads(v_part, dv),
                          params['aq'], params['gq'], params['betq'],
                          params['ak'], params['gk'], params['betk'],
                          params['av'], params['gv'], params['betv'])
    # att: [B, nH, T, dv*F]

    att_btfc = jnp.transpose(att.reshape(B, nH, T, dv, F),
                             (0, 2, 4, 1, 3)).reshape(B * T, F, C)
    inter_btfc = jnp.transpose(inter.reshape(T, B, F, C),
                               (1, 0, 2, 3)).reshape(B * T, F, C)

    out = proj_norm_residual(att_btfc, params['wp'], params['bp'],
                             params['ap'], params['gp_fc'], params['betp_fc'],
                             inter_btfc)                          # [B*T, F, C]
    return jnp.transpose(out.reshape(B, T, F, C), (0, 3, 1, 2))   # [B, C, T, F]


# ------------------------- parameter init & packing -------------------------

def init_params(key, C, emb_ks, hidden, n_head, e_dim, n_freqs):
    """PyTorch-convention parameters (weights already stored input-major)."""
    in_ch = C * emb_ks
    keys = jax.random.split(key, 32)
    it = iter(keys)

    def w(shape, scale=0.1):
        return scale * jax.random.normal(next(it), shape, jnp.float32)

    def lstm_params(I, H):
        # [in, 4H] / [H, 4H] with gate column order (i, f, g, o); b = b_ih + b_hh
        return dict(w_ih_f=w((I, 4 * H)), w_hh_f=w((H, 4 * H)), b_f=w((4 * H,)),
                    w_ih_r=w((I, 4 * H)), w_hh_r=w((H, 4 * H)), b_r=w((4 * H,)))

    return dict(
        intra_norm_g=jnp.ones((C,), jnp.float32),
        intra_norm_b=jnp.zeros((C,), jnp.float32),
        inter_norm_g=jnp.ones((C,), jnp.float32),
        inter_norm_b=jnp.zeros((C,), jnp.float32),
        intra_lstm=lstm_params(in_ch, hidden),
        inter_lstm=lstm_params(in_ch, hidden),
        intra_lin_w=w((2 * hidden, in_ch)), intra_lin_b=w((in_ch,)),
        inter_lin_w=w((2 * hidden, in_ch)), inter_lin_b=w((in_ch,)),
        wq=w((C, n_head * e_dim)), bq=w((n_head * e_dim,)),
        wk=w((C, n_head * e_dim)), bk=w((n_head * e_dim,)),
        wv=w((C, C)), bv=w((C,)),
        aq=jnp.full((n_head,), 0.25, jnp.float32),
        ak=jnp.full((n_head,), 0.25, jnp.float32),
        av=jnp.full((n_head,), 0.25, jnp.float32),
        gq=jnp.ones((n_head, e_dim, n_freqs), jnp.float32),
        betq=jnp.zeros((n_head, e_dim, n_freqs), jnp.float32),
        gk=jnp.ones((n_head, e_dim, n_freqs), jnp.float32),
        betk=jnp.zeros((n_head, e_dim, n_freqs), jnp.float32),
        gv=jnp.ones((n_head, C // n_head, n_freqs), jnp.float32),
        betv=jnp.zeros((n_head, C // n_head, n_freqs), jnp.float32),
        wp=w((C, C)), bp=w((C,)),
        ap=jnp.float32(0.25),
        gp=jnp.ones((C, n_freqs), jnp.float32),
        betp=jnp.zeros((C, n_freqs), jnp.float32),
    )


def pack_params(p, *, C, hidden, n_head, e_dim, n_freqs):
    """Repack PyTorch-convention params into the fused-kernel layout."""
    H = hidden
    E, F = e_dim, n_freqs
    dv = C // n_head

    def pack_lstm(lp):
        def interleave(a_f, a_r):        # per-gate interleave: i_f i_r f_f f_r ...
            parts = []
            for g in range(4):
                parts.append(a_f[..., g * H:(g + 1) * H])
                parts.append(a_r[..., g * H:(g + 1) * H])
            return jnp.concatenate(parts, axis=-1)
        wih = interleave(lp['w_ih_f'], lp['w_ih_r'])                     # [I, 8H]
        bih = interleave(lp['b_f'][None, :], lp['b_r'][None, :])         # [1, 8H]
        z = jnp.zeros_like(lp['w_hh_f'])
        whh = jnp.concatenate([interleave(lp['w_hh_f'], z),              # [2H, 8H]
                               interleave(z, lp['w_hh_r'])], axis=0)
        return wih, bih, whh

    return dict(
        intra_norm_g=p['intra_norm_g'], intra_norm_b=p['intra_norm_b'],
        inter_norm_g=p['inter_norm_g'], inter_norm_b=p['inter_norm_b'],
        intra_lstm_packed=pack_lstm(p['intra_lstm']),
        inter_lstm_packed=pack_lstm(p['inter_lstm']),
        intra_lin_w=p['intra_lin_w'], intra_lin_b=p['intra_lin_b'],
        inter_lin_w=p['inter_lin_w'], inter_lin_b=p['inter_lin_b'],
        wqkv=jnp.concatenate([p['wq'], p['wk'], p['wv']], axis=1),
        bqkv=jnp.concatenate([p['bq'], p['bk'], p['bv']]),
        aq=p['aq'].reshape(n_head, 1, 1),
        ak=p['ak'].reshape(n_head, 1, 1),
        av=p['av'].reshape(n_head, 1, 1),
        gq=p['gq'].reshape(n_head, 1, E * F),
        betq=p['betq'].reshape(n_head, 1, E * F),
        gk=p['gk'].reshape(n_head, 1, E * F),
        betk=p['betk'].reshape(n_head, 1, E * F),
        gv=p['gv'].reshape(n_head, 1, dv * F),
        betv=p['betv'].reshape(n_head, 1, dv * F),
        wp=p['wp'], bp=p['bp'],
        ap=jnp.reshape(p['ap'], (1, 1)),
        gp_fc=p['gp'].T[None],           # [1, F, C]
        betp_fc=p['betp'].T[None],
    )


# ----------------------------------- main -----------------------------------

if __name__ == "__main__":
    EMB_DIM = 8
    EMB_KS = 1
    EMB_HS = 1
    N_FREQS = 8
    HIDDEN = 16                                    # 8H = 128 -> lane-dense MXU
    N_HEAD = 4
    APPROX_QK_DIM = 32
    E_DIM = math.ceil(APPROX_QK_DIM / N_FREQS)     # E = 4

    B, OLD_T, OLD_Q = 2, 12, N_FREQS

    key = jax.random.PRNGKey(0)
    kx, kp = jax.random.split(key)
    x = jax.random.normal(kx, (B, EMB_DIM, OLD_T, OLD_Q), jnp.float32)
    raw = init_params(kp, EMB_DIM, EMB_KS, HIDDEN, N_HEAD, E_DIM, N_FREQS)
    params = pack_params(raw, C=EMB_DIM, hidden=HIDDEN, n_head=N_HEAD,
                         e_dim=E_DIM, n_freqs=N_FREQS)

    fwd = functools.partial(gridnet_v2_block, emb_ks=EMB_KS, emb_hs=EMB_HS,
                            n_head=N_HEAD, e_dim=E_DIM, hidden=HIDDEN)
    out = jax.jit(fwd)(x, params)
    out = jax.block_until_ready(out)

    assert out.shape == x.shape, out.shape
    assert bool(jnp.all(jnp.isfinite(out)))
    print("KERNEL_OK")
</pallas_src>

<mosaic_0001>
module attributes {stable_mosaic.version = 11 : i64} {
  func.func @_branch_kernel(%arg0: i32, %arg1: memref<12x16x8xf32, #tpu.memory_space<vmem>>, %arg2: memref<1x8xf32, #tpu.memory_space<vmem>>, %arg3: memref<1x8xf32, #tpu.memory_space<vmem>>, %arg4: memref<8x128xf32, #tpu.memory_space<vmem>>, %arg5: memref<1x128xf32, #tpu.memory_space<vmem>>, %arg6: memref<32x128xf32, #tpu.memory_space<vmem>>, %arg7: memref<32x8xf32, #tpu.memory_space<vmem>>, %arg8: memref<1x8xf32, #tpu.memory_space<vmem>>, %arg9: memref<8x40xf32, #tpu.memory_space<vmem>>, %arg10: memref<1x40xf32, #tpu.memory_space<vmem>>, %arg11: memref<12x16x8xf32, #tpu.memory_space<vmem>>, %arg12: memref<192x40xf32, #tpu.memory_space<vmem>>, %arg13: memref<12x16x128xf32, #tpu.memory_space<vmem>>, %arg14: memref<12x16x16xf32, #tpu.memory_space<vmem>>, %arg15: memref<12x16x16xf32, #tpu.memory_space<vmem>>, %arg16: memref<16x32xf32, #tpu.memory_space<vmem>>, %arg17: memref<16x32xf32, #tpu.memory_space<vmem>>) attributes {dimension_semantics = [#tpu.dimension_semantics<arbitrary>], iteration_bounds = array<i64: 1>, scalar_prefetch = 0 : i64, scratch_operands = 5 : i64, tpu.core_type = #tpu.core_type<tc>, window_params = [{pipeline_mode = #tpu.pipeline_mode<synchronous>, transform_indices = @transform_0, window_bounds = array<i64: 12, 16, 8>}, {pipeline_mode = #tpu.pipeline_mode<synchronous>, transform_indices = @transform_1, window_bounds = array<i64: 1, 8>}, {pipeline_mode = #tpu.pipeline_mode<synchronous>, transform_indices = @transform_2, window_bounds = array<i64: 1, 8>}, {pipeline_mode = #tpu.pipeline_mode<synchronous>, transform_indices = @transform_3, window_bounds = array<i64: 8, 128>}, {pipeline_mode = #tpu.pipeline_mode<synchronous>, transform_indices = @transform_4, window_bounds = array<i64: 1, 128>}, {pipeline_mode = #tpu.pipeline_mode<synchronous>, transform_indices = @transform_5, window_bounds = array<i64: 32, 128>}, {pipeline_mode = #tpu.pipeline_mode<synchronous>, transform_indices = @transform_6, window_bounds = array<i64: 32, 8>}, {pipeline_mode = #tpu.pipeline_mode<synchronous>, transform_indices = @transform_7, window_bounds = array<i64: 1, 8>}, {pipeline_mode = #tpu.pipeline_mode<synchronous>, transform_indices = @transform_8, window_bounds = array<i64: 8, 40>}, {pipeline_mode = #tpu.pipeline_mode<synchronous>, transform_indices = @transform_9, window_bounds = array<i64: 1, 40>}, {pipeline_mode = #tpu.pipeline_mode<synchronous>, transform_indices = @transform_10, window_bounds = array<i64: 12, 16, 8>}, {pipeline_mode = #tpu.pipeline_mode<synchronous>, transform_indices = @transform_11, window_bounds = array<i64: 192, 40>}]} {
    %c0 = arith.constant 0 : index
    %c0_0 = arith.constant 0 : index
    %c0_1 = arith.constant 0 : index
    %0 = vector.load %arg1[%c0, %c0_0, %c0_1] : memref<12x16x8xf32, #tpu.memory_space<vmem>>, vector<12x16x8xf32>
    %cst = arith.constant dense<0.000000e+00> : vector<12x16xf32>
    %1 = vector.multi_reduction <add>, %0, %cst [2] : vector<12x16x8xf32> to vector<12x16xf32>
    %2 = vector.shape_cast %1 : vector<12x16xf32> to vector<12x16x1xf32>
    %cst_2 = arith.constant 8.000000e+00 : f32
    %3 = vector.broadcast %cst_2 : f32 to vector<12x16x1xf32>
    %4 = arith.divf %2, %3 : vector<12x16x1xf32>
    %5 = vector.broadcast %4 : vector<12x16x1xf32> to vector<12x16x8xf32>
    %6 = arith.subf %0, %5 : vector<12x16x8xf32>
    %7 = arith.mulf %6, %6 : vector<12x16x8xf32>
    %cst_3 = arith.constant dense<0.000000e+00> : vector<12x16xf32>
    %8 = vector.multi_reduction <add>, %7, %cst_3 [2] : vector<12x16x8xf32> to vector<12x16xf32>
    %9 = vector.shape_cast %8 : vector<12x16xf32> to vector<12x16x1xf32>
    %cst_4 = arith.constant 8.000000e+00 : f32
    %10 = vector.broadcast %cst_4 : f32 to vector<12x16x1xf32>
    %11 = arith.divf %9, %10 : vector<12x16x1xf32>
    %12 = vector.broadcast %4 : vector<12x16x1xf32> to vector<12x16x8xf32>
    %13 = arith.subf %0, %12 : vector<12x16x8xf32>
    %cst_5 = arith.constant 9.99999974E-6 : f32
    %14 = vector.broadcast %cst_5 : f32 to vector<12x16x1xf32>
    %15 = arith.addf %11, %14 : vector<12x16x1xf32>
    %16 = math.rsqrt %15 : vector<12x16x1xf32>
    %17 = vector.broadcast %16 : vector<12x16x1xf32> to vector<12x16x8xf32>
    %18 = arith.mulf %13, %17 : vector<12x16x8xf32>
    %c0_6 = arith.constant 0 : index
    %c0_7 = arith.constant 0 : index
    %19 = vector.load %arg2[%c0_6, %c0_7] : memref<1x8xf32, #tpu.memory_space<vmem>>, vector<1x8xf32>
    %20 = vector.shape_cast %19 : vector<1x8xf32> to vector<1x1x8xf32>
    %21 = vector.broadcast %20 : vector<1x1x8xf32> to vector<12x16x8xf32>
    %22 = arith.mulf %18, %21 : vector<12x16x8xf32>
    %c0_8 = arith.constant 0 : index
    %c0_9 = arith.constant 0 : index
    %23 = vector.load %arg3[%c0_8, %c0_9] : memref<1x8xf32, #tpu.memory_space<vmem>>, vector<1x8xf32>
    %24 = vector.shape_cast %23 : vector<1x8xf32> to vector<1x1x8xf32>
    %25 = vector.broadcast %24 : vector<1x1x8xf32> to vector<12x16x8xf32>
    %26 = arith.addf %22, %25 : vector<12x16x8xf32>
    %27 = vector.shape_cast %26 : vector<12x16x8xf32> to vector<192x8xf32>
    %c0_10 = arith.constant 0 : index
    %c0_11 = arith.constant 0 : index
    %28 = vector.load %arg4[%c0_10, %c0_11] : memref<8x128xf32, #tpu.memory_space<vmem>>, vector<8x128xf32>
    %cst_12 = arith.constant dense<0.000000e+00> : vector<192x128xf32>
    %29 = tpu.matmul %27, %28, %cst_12 {dimension_numbers = #tpu.dot_dimension_numbers<[1], [0], [0], [1], [0, 0, 1, 1], [], []>} : vector<192x8xf32>, vector<8x128xf32>, vector<192x128xf32> -> vector<192x128xf32>
    %c0_13 = arith.constant 0 : index
    %c0_14 = arith.constant 0 : index
    %30 = vector.load %arg5[%c0_13, %c0_14] : memref<1x128xf32, #tpu.memory_space<vmem>>, vector<1x128xf32>
    %31 = vector.broadcast %30 : vector<1x128xf32> to vector<192x128xf32>
    %32 = arith.addf %29, %31 : vector<192x128xf32>
    %33 = vector.shape_cast %32 : vector<192x128xf32> to vector<12x16x128xf32>
    %c0_15 = arith.constant 0 : index
    %c0_16 = arith.constant 0 : index
    %c0_17 = arith.constant 0 : index
    %34 = vector.load %arg13[%c0_15, %c0_16, %c0_17] : memref<12x16x128xf32, #tpu.memory_space<vmem>>, vector<12x16x128xf32>
    tpu.vector_store %arg13[%c0_15, %c0_16, %c0_17], %33 {strides = array<i32>} : memref<12x16x128xf32, #tpu.memory_space<vmem>>, vector<12x16x128xf32>,
    %cst_18 = arith.constant 0.000000e+00 : f32
    %35 = vector.broadcast %cst_18 : f32 to vector<16x32xf32>
    %c0_19 = arith.constant 0 : index
    %c0_20 = arith.constant 0 : index
    %36 = vector.load %arg16[%c0_19, %c0_20] : memref<16x32xf32, #tpu.memory_space<vmem>>, vector<16x32xf32>
    tpu.vector_store %arg16[%c0_19, %c0_20], %35 {strides = array<i32>} : memref<16x32xf32, #tpu.memory_space<vmem>>, vector<16x32xf32>,
    %cst_21 = arith.constant 0.000000e+00 : f32
    %37 = vector.broadcast %cst_21 : f32 to vector<16x32xf32>
    %c0_22 = arith.constant 0 : index
    %c0_23 = arith.constant 0 : index
    %38 = vector.load %arg17[%c0_22, %c0_23] : memref<16x32xf32, #tpu.memory_space<vmem>>, vector<16x32xf32>
    tpu.vector_store %arg17[%c0_22, %c0_23], %37 {strides = array<i32>} : memref<16x32xf32, #tpu.memory_space<vmem>>, vector<16x32xf32>,
    %39 = tpu.iota {dimensions = array<i32: 1>} : vector<16x128xi32>
    %c32_i32 = arith.constant 32 : i32
    %c0_i32 = arith.constant 0 : i32
    %40 = arith.cmpi eq, %c32_i32, %c0_i32 : i32
    %c1_i32 = arith.constant 1 : i32
    %41 = arith.select %40, %c1_i32, %c32_i32 : i32
    %42 = vector.broadcast %41 : i32 to vector<16x128xi32>
    %43 = arith.remsi %39, %42 : vector<16x128xi32>
    %c0_i32_24 = arith.constant 0 : i32
    %44 = vector.broadcast %c0_i32_24 : i32 to vector<16x128xi32>
    %45 = arith.cmpi ne, %43, %44 : vector<16x128xi32>
    %c0_i32_25 = arith.constant 0 : i32
    %46 = vector.broadcast %c0_i32_25 : i32 to vector<16x128xi32>
    %47 = arith.cmpi slt, %43, %46 : vector<16x128xi32>
    %c0_i32_26 = arith.constant 0 : i32
    %48 = arith.cmpi slt, %41, %c0_i32_26 : i32
    %49 = vector.broadcast %48 : i1 to vector<16x128xi1>
    %50 = vector.broadcast %49 : vector<16x128xi1> to vector<16x128xi1>
    %51 = arith.xori %47, %50 : vector<16x128xi1>
    %52 = arith.andi %51, %45 : vector<16x128xi1>
    %53 = vector.broadcast %41 : i32 to vector<16x128xi32>
    %54 = arith.addi %43, %53 : vector<16x128xi32>
    %55 = arith.select %52, %54, %43 : vector<16x128xi1>, vector<16x128xi32>
    %c16_i32 = arith.constant 16 : i32
    %56 = vector.broadcast %c16_i32 : i32 to vector<16x128xi32>
    %57 = arith.cmpi slt, %55, %56 : vector<16x128xi32>
    %c0_27 = arith.constant 0 : index
    %c0_28 = arith.constant 0 : index
    %58 = vector.load %arg16[%c0_27, %c0_28] : memref<16x32xf32, #tpu.memory_space<vmem>>, vector<16x32xf32>
    %c0_29 = arith.constant 0 : index
    %c0_30 = arith.constant 0 : index
    %59 = vector.load %arg6[%c0_29, %c0_30] : memref<32x128xf32, #tpu.memory_space<vmem>>, vector<32x128xf32>
    %cst_31 = arith.constant dense<0.000000e+00> : vector<16x128xf32>
    %60 = tpu.matmul %58, %59, %cst_31 {dimension_numbers = #tpu.dot_dimension_numbers<[1], [0], [0], [1], [0, 0, 1, 1], [], []>} : vector<16x32xf32>, vector<32x128xf32>, vector<16x128xf32> -> vector<16x128xf32>
    %c0_32 = arith.constant 0 : index
    %c0_33 = arith.constant 0 : index
    %c0_34 = arith.constant 0 : index
    %61 = vector.load %arg13[%c0_32, %c0_33, %c0_34] : memref<12x16x128xf32, #tpu.memory_space<vmem>>, vector<1x16x128xf32>
    %62 = vector.shape_cast %61 : vector<1x16x128xf32> to vector<16x128xf32>
    %c11 = arith.constant 11 : index
    %c0_35 = arith.constant 0 : index
    %c0_36 = arith.constant 0 : index
    %63 = vector.load %arg13[%c11, %c0_35, %c0_36] : memref<12x16x128xf32, #tpu.memory_space<vmem>>, vector<1x16x128xf32>
    %64 = vector.shape_cast %63 : vector<1x16x128xf32> to vector<16x128xf32>
    %65 = arith.select %57, %62, %64 : vector<16x128xi1>, vector<16x128xf32>
    %66 = arith.addf %60, %65 : vector<16x128xf32>
    %67 = vector.extract_strided_slice %66 {offsets = [0, 0], sizes = [16, 32], strides = [1, 1]} : vector<16x128xf32> to vector<16x32xf32>
    %68 = arith.negf %67 : vector<16x32xf32>
    %69 = math.exp %68 : vector<16x32xf32>
    %cst_37 = arith.constant 1.000000e+00 : f32
    %70 = vector.broadcast %cst_37 : f32 to vector<16x32xf32>
    %71 = arith.addf %70, %69 : vector<16x32xf32>
    %72 = arith.divf %70, %71 : vector<16x32xf32>
    %73 = vector.extract_strided_slice %66 {offsets = [0, 32], sizes = [16, 32], strides = [1, 1]} : vector<16x128xf32> to vector<16x32xf32>
    %74 = arith.negf %73 : vector<16x32xf32>
    %75 = math.exp %74 : vector<16x32xf32>
    %cst_38 = arith.constant 1.000000e+00 : f32
    %76 = vector.broadcast %cst_38 : f32 to vector<16x32xf32>
    %77 = arith.addf %76, %75 : vector<16x32xf32>
    %78 = arith.divf %76, %77 : vector<16x32xf32>
    %79 = vector.extract_strided_slice %66 {offsets = [0, 64], sizes = [16, 32], strides = [1, 1]} : vector<16x128xf32> to vector<16x32xf32>
    %80 = math.tanh %79 : vector<16x32xf32>
    %81 = vector.extract_strided_slice %66 {offsets = [0, 96], sizes = [16, 32], strides = [1, 1]} : vector<16x128xf32> to vector<16x32xf32>
    %82 = arith.negf %81 : vector<16x32xf32>
    %83 = math.exp %82 : vector<16x32xf32>
    %cst_39 = arith.constant 1.000000e+00 : f32
    %84 = vector.broadcast %cst_39 : f32 to vector<16x32xf32>
    %85 = arith.addf %84, %83 : vector<16x32xf32>
    %86 = arith.divf %84, %85 : vector<16x32xf32>
    %c0_40 = arith.constant 0 : index
    %c0_41 = arith.constant 0 : index
    %87 = vector.load %arg17[%c0_40, %c0_41] : memref<16x32xf32, #tpu.memory_space<vmem>>, vector<16x32xf32>
    %88 = arith.mulf %78, %87 : vector<16x32xf32>
    %89 = arith.mulf %72, %80 : vector<16x32xf32>
    %90 = arith.addf %88, %89 : vector<16x32xf32>
    %91 = math.tanh %90 : vector<16x32xf32>
    %92 = arith.mulf %86, %91 : vector<16x32xf32>
    %c0_42 = arith.constant 0 : index
    %c0_43 = arith.constant 0 : index
    %93 = vector.load %arg17[%c0_42, %c0_43] : memref<16x32xf32, #tpu.memory_space<vmem>>, vector<16x32xf32>
    tpu.vector_store %arg17[%c0_42, %c0_43], %90 {strides = array<i32>} : memref<16x32xf32, #tpu.memory_space<vmem>>, vector<16x32xf32>,
    %c0_44 = arith.constant 0 : index
    %c0_45 = arith.constant 0 : index
    %94 = vector.load %arg16[%c0_44, %c0_45] : memref<16x32xf32, #tpu.memory_space<vmem>>, vector<16x32xf32>
    tpu.vector_store %arg16[%c0_44, %c0_45], %92 {strides = array<i32>} : memref<16x32xf32, #tpu.memory_space<vmem>>, vector<16x32xf32>,
    %95 = vector.extract_strided_slice %92 {offsets = [0, 0], sizes = [16, 16], strides = [1, 1]} : vector<16x32xf32> to vector<16x16xf32>
    %c0_46 = arith.constant 0 : index
    %c0_47 = arith.constant 0 : index
    %c0_48 = arith.constant 0 : index
    %96 = vector.load %arg14[%c0_46, %c0_47, %c0_48] : memref<12x16x16xf32, #tpu.memory_space<vmem>>, vector<1x16x16xf32>
    %97 = vector.shape_cast %96 : vector<1x16x16xf32> to vector<16x16xf32>
    %98 = vector.shape_cast %95 : vector<16x16xf32> to vector<1x16x16xf32>
    tpu.vector_store %arg14[%c0_46, %c0_47, %c0_48], %98 {strides = array<i32>} : memref<12x16x16xf32, #tpu.memory_space<vmem>>, vector<1x16x16xf32>,
    %99 = vector.extract_strided_slice %92 {offsets = [0, 16], sizes = [16, 16], strides = [1, 1]} : vector<16x32xf32> to vector<16x16xf32>
    %c11_49 = arith.constant 11 : index
    %c0_50 = arith.constant 0 : index
    %c0_51 = arith.constant 0 : index
    %100 = vector.load %arg15[%c11_49, %c0_50, %c0_51] : memref<12x16x16xf32, #tpu.memory_space<vmem>>, vector<1x16x16xf32>
    %101 = vector.shape_cast %100 : vector<1x16x16xf32> to vector<16x16xf32>
    %102 = vector.shape_cast %99 : vector<16x16xf32> to vector<1x16x16xf32>
    tpu.vector_store %arg15[%c11_49, %c0_50, %c0_51], %102 {strides = array<i32>} : memref<12x16x16xf32, #tpu.memory_space<vmem>>, vector<1x16x16xf32>,
    %c0_52 = arith.constant 0 : index
    %c0_53 = arith.constant 0 : index
    %103 = vector.load %arg16[%c0_52, %c0_53] : memref<16x32xf32, #tpu.memory_space<vmem>>, vector<16x32xf32>
    %c0_54 = arith.constant 0 : index
    %c0_55 = arith.constant 0 : index
    %104 = vector.load %arg6[%c0_54, %c0_55] : memref<32x128xf32, #tpu.memory_space<vmem>>, vector<32x128xf32>
    %cst_56 = arith.constant dense<0.000000e+00> : vector<16x128xf32>
    %105 = tpu.matmul %103, %104, %cst_56 {dimension_numbers = #tpu.dot_dimension_numbers<[1], [0], [0], [1], [0, 0, 1, 1], [], []>} : vector<16x32xf32>, vector<32x128xf32>, vector<16x128xf32> -> vector<16x128xf32>
    %c1 = arith.constant 1 : index
    %c0_57 = arith.constant 0 : index
    %c0_58 = arith.constant 0 : index
    %106 = vector.load %arg13[%c1, %c0_57, %c0_58] : memref<12x16x128xf32, #tpu.memory_space<vmem>>, vector<1x16x128xf32>
    %107 = vector.shape_cast %106 : vector<1x16x128xf32> to vector<16x128xf32>
    %c10 = arith.constant 10 : index
    %c0_59 = arith.constant 0 : index
    %c0_60 = arith.constant 0 : index
    %108 = vector.load %arg13[%c10, %c0_59, %c0_60] : memref<12x16x128xf32, #tpu.memory_space<vmem>>, vector<1x16x128xf32>
    %109 = vector.shape_cast %108 : vector<1x16x128xf32> to vector<16x128xf32>
    %110 = arith.select %57, %107, %109 : vector<16x128xi1>, vector<16x128xf32>
    %111 = arith.addf %105, %110 : vector<16x128xf32>
    %112 = vector.extract_strided_slice %111 {offsets = [0, 0], sizes = [16, 32], strides = [1, 1]} : vector<16x128xf32> to vector<16x32xf32>
    %113 = arith.negf %112 : vector<16x32xf32>
    %114 = math.exp %113 : vector<16x32xf32>
    %cst_61 = arith.constant 1.000000e+00 : f32
    %115 = vector.broadcast %cst_61 : f32 to vector<16x32xf32>
    %116 = arith.addf %115, %114 : vector<16x32xf32>
    %117 = arith.divf %115, %116 : vector<16x32xf32>
    %118 = vector.extract_strided_slice %111 {offsets = [0, 32], sizes = [16, 32], strides = [1, 1]} : vector<16x128xf32> to vector<16x32xf32>
    %119 = arith.negf %118 : vector<16x32xf32>
    %120 = math.exp %119 : vector<16x32xf32>
    %cst_62 = arith.constant 1.000000e+00 : f32
    %121 = vector.broadcast %cst_62 : f32 to vector<16x32xf32>
    %122 = arith.addf %121, %120 : vector<16x32xf32>
    %123 = arith.divf %121, %122 : vector<16x32xf32>
    %124 = vector.extract_strided_slice %111 {offsets = [0, 64], sizes = [16, 32], strides = [1, 1]} : vector<16x128xf32> to vector<16x32xf32>
    %125 = math.tanh %124 : vector<16x32xf32>
    %126 = vector.extract_strided_slice %111 {offsets = [0, 96], sizes = [16, 32], strides = [1, 1]} : vector<16x128xf32> to vector<16x32xf32>
    %127 = arith.negf %126 : vector<16x32xf32>
    %128 = math.exp %127 : vector<16x32xf32>
    %cst_63 = arith.constant 1.000000e+00 : f32
    %129 = vector.broadcast %cst_63 : f32 to vector<16x32xf32>
    %130 = arith.addf %129, %128 : vector<16x32xf32>
    %131 = arith.divf %129, %130 : vector<16x32xf32>
    %c0_64 = arith.constant 0 : index
    %c0_65 = arith.constant 0 : index
    %132 = vector.load %arg17[%c0_64, %c0_65] : memref<16x32xf32, #tpu.memory_space<vmem>>, vector<16x32xf32>
    %133 = arith.mulf %123, %132 : vector<16x32xf32>
    %134 = arith.mulf %117, %125 : vector<16x32xf32>
    %135 = arith.addf %133, %134 : vector<16x32xf32>
    %136 = math.tanh %135 : vector<16x32xf32>
    %137 = arith.mulf %131, %136 : vector<16x32xf32>
    %c0_66 = arith.constant 0 : index
    %c0_67 = arith.constant 0 : index
    %138 = vector.load %arg17[%c0_66, %c0_67] : memref<16x32xf32, #tpu.memory_space<vmem>>, vector<16x32xf32>
    tpu.vector_store %arg17[%c0_66, %c0_67], %135 {strides = array<i32>} : memref<16x32xf32, #tpu.memory_space<vmem>>, vector<16x32xf32>,
    %c0_68 = arith.constant 0 : index
    %c0_69 = arith.constant 0 : index
    %139 = vector.load %arg16[%c0_68, %c0_69] : memref<16x32xf32, #tpu.memory_space<vmem>>, vector<16x32xf32>
    tpu.vector_store %arg16[%c0_68, %c0_69], %137 {strides = array<i32>} : memref<16x32xf32, #tpu.memory_space<vmem>>, vector<16x32xf32>,
    %140 = vector.extract_strided_slice %137 {offsets = [0, 0], sizes = [16, 16], strides = [1, 1]} : vector<16x32xf32> to vector<16x16xf32>
    %c1_70 = arith.constant 1 : index
    %c0_71 = arith.constant 0 : index
    %c0_72 = arith.constant 0 : index
    %141 = vector.load %arg14[%c1_70, %c0_71, %c0_72] : memref<12x16x16xf32, #tpu.memory_space<vmem>>, vector<1x16x16xf32>
    %142 = vector.shape_cast %141 : vector<1x16x16xf32> to vector<16x16xf32>
    %143 = vector.shape_cast %140 : vector<16x16xf32> to vector<1x16x16xf32>
    tpu.vector_store %arg14[%c1_70, %c0_71, %c0_72], %143 {strides = array<i32>} : memref<12x16x16xf32, #tpu.memory_space<vmem>>, vector<1x16x16xf32>,
    %144 = vector.extract_strided_slice %137 {offsets = [0, 16], sizes = [16, 16], strides = [1, 1]} : vector<16x32xf32> to vector<16x16xf32>
    %c10_73 = arith.constant 10 : index
    %c0_74 = arith.constant 0 : index
    %c0_75 = arith.constant 0 : index
    %145 = vector.load %arg15[%c10_73, %c0_74, %c0_75] : memref<12x16x16xf32, #tpu.memory_space<vmem>>, vector<1x16x16xf32>
    %146 = vector.shape_cast %145 : vector<1x16x16xf32> to vector<16x16xf32>
    %147 = vector.shape_cast %144 : vector<16x16xf32> to vector<1x16x16xf32>
    tpu.vector_store %arg15[%c10_73, %c0_74, %c0_75], %147 {strides = array<i32>} : memref<12x16x16xf32, #tpu.memory_space<vmem>>, vector<1x16x16xf32>,
    %c0_76 = arith.constant 0 : index
    %c0_77 = arith.constant 0 : index
    %148 = vector.load %arg16[%c0_76, %c0_77] : memref<16x32xf32, #tpu.memory_space<vmem>>, vector<16x32xf32>
    %c0_78 = arith.constant 0 : index
    %c0_79 = arith.constant 0 : index
    %149 = vector.load %arg6[%c0_78, %c0_79] : memref<32x128xf32, #tpu.memory_space<vmem>>, vector<32x128xf32>
    %cst_80 = arith.constant dense<0.000000e+00> : vector<16x128xf32>
    %150 = tpu.matmul %148, %149, %cst_80 {dimension_numbers = #tpu.dot_dimension_numbers<[1], [0], [0], [1], [0, 0, 1, 1], [], []>} : vector<16x32xf32>, vector<32x128xf32>, vector<16x128xf32> -> vector<16x128xf32>
    %c2 = arith.constant 2 : index
    %c0_81 = arith.constant 0 : index
    %c0_82 = arith.constant 0 : index
    %151 = vector.load %arg13[%c2, %c0_81, %c0_82] : memref<12x16x128xf32, #tpu.memory_space<vmem>>, vector<1x16x128xf32>
    %152 = vector.shape_cast %151 : vector<1x16x128xf32> to vector<16x128xf32>
    %c9 = arith.constant 9 : index
    %c0_83 = arith.constant 0 : index
    %c0_84 = arith.constant 0 : index
    %153 = vector.load %arg13[%c9, %c0_83, %c0_84] : memref<12x16x128xf32, #tpu.memory_space<vmem>>, vector<1x16x128xf32>
    %154 = vector.shape_cast %153 : vector<1x16x128xf32> to vector<16x128xf32>
    %155 = arith.select %57, %152, %154 : vector<16x128xi1>, vector<16x128xf32>
    %156 = arith.addf %150, %155 : vector<16x128xf32>
    %157 = vector.extract_strided_slice %156 {offsets = [0, 0], sizes = [16, 32], strides = [1, 1]} : vector<16x128xf32> to vector<16x32xf32>
    %158 = arith.negf %157 : vector<16x32xf32>
    %159 = math.exp %158 : vector<16x32xf32>
    %cst_85 = arith.constant 1.000000e+00 : f32
    %160 = vector.broadcast %cst_85 : f32 to vector<16x32xf32>
    %161 = arith.addf %160, %159 : vector<16x32xf32>
    %162 = arith.divf %160, %161 : vector<16x32xf32>
    %163 = vector.extract_strided_slice %156 {offsets = [0, 32], sizes = [16, 32], strides = [1, 1]} : vector<16x128xf32> to vector<16x32xf32>
    %164 = arith.negf %163 : vector<16x32xf32>
    %165 = math.exp %164 : vector<16x32xf32>
    %cst_86 = arith.constant 1.000000e+00 : f32
    %166 = vector.broadcast %cst_86 : f32 to vector<16x32xf32>
    %167 = arith.addf %166, %165 : vector<16x32xf32>
    %168 = arith.divf %166, %167 : vector<16x32xf32>
    %169 = vector.extract_strided_slice %156 {offsets = [0, 64], sizes = [16, 32], strides = [1, 1]} : vector<16x128xf32> to vector<16x32xf32>
    %170 = math.tanh %169 : vector<16x32xf32>
    %171 = vector.extract_strided_slice %156 {offsets = [0, 96], sizes = [16, 32], strides = [1, 1]} : vector<16x128xf32> to vector<16x32xf32>
    %172 = arith.negf %171 : vector<16x32xf32>
    %173 = math.exp %172 : vector<16x32xf32>
    %cst_87 = arith.constant 1.000000e+00 : f32
    %174 = vector.broadcast %cst_87 : f32 to vector<16x32xf32>
    %175 = arith.addf %174, %173 : vector<16x32xf32>
    %176 = arith.divf %174, %175 : vector<16x32xf32>
    %c0_88 = arith.constant 0 : index
    %c0_89 = arith.constant 0 : index
    %177 = vector.load %arg17[%c0_88, %c0_89] : memref<16x32xf32, #tpu.memory_space<vmem>>, vector<16x32xf32>
    %178 = arith.mulf %168, %177 : vector<16x32xf32>
    %179 = arith.mulf %162, %170 : vector<16x32xf32>
    %180 = arith.addf %178, %179 : vector<16x32xf32>
    %181 = math.tanh %180 : vector<16x32xf32>
    %182 = arith.mulf %176, %181 : vector<16x32xf32>
    %c0_90 = arith.constant 0 : index
    %c0_91 = arith.constant 0 : index
    %183 = vector.load %arg17[%c0_90, %c0_91] : memref<16x32xf32, #tpu.memory_space<vmem>>, vector<16x32xf32>
    tpu.vector_store %arg17[%c0_90, %c0_91], %180 {strides = array<i32>} : memref<16x32xf32, #tpu.memory_space<vmem>>, vector<16x32xf32>,
    %c0_92 = arith.constant 0 : index
    %c0_93 = arith.constant 0 : index
    %184 = vector.load %arg16[%c0_92, %c0_93] : memref<16x32xf32, #tpu.memory_space<vmem>>, vector<16x32xf32>
    tpu.vector_store %arg16[%c0_92, %c0_93], %182 {strides = array<i32>} : memref<16x32xf32, #tpu.memory_space<vmem>>, vector<16x32xf32>,
    %185 = vector.extract_strided_slice %182 {offsets = [0, 0], sizes = [16, 16], strides = [1, 1]} : vector<16x32xf32> to vector<16x16xf32>
    %c2_94 = arith.constant 2 : index
    %c0_95 = arith.constant 0 : index
    %c0_96 = arith.constant 0 : index
    %186 = vector.load %arg14[%c2_94, %c0_95, %c0_96] : memref<12x16x16xf32, #tpu.memory_space<vmem>>, vector<1x16x16xf32>
    %187 = vector.shape_cast %186 : vector<1x16x16xf32> to vector<16x16xf32>
    %188 = vector.shape_cast %185 : vector<16x16xf32> to vector<1x16x16xf32>
    tpu.vector_store %arg14[%c2_94, %c0_95, %c0_96], %188 {strides = array<i32>} : memref<12x16x16xf32, #tpu.memory_space<vmem>>, vector<1x16x16xf32>,
    %189 = vector.extract_strided_slice %182 {offsets = [0, 16], sizes = [16, 16], strides = [1, 1]} : vector<16x32xf32> to vector<16x16xf32>
    %c9_97 = arith.constant 9 : index
    %c0_98 = arith.constant 0 : index
    %c0_99 = arith.constant 0 : index
    %190 = vector.load %arg15[%c9_97, %c0_98, %c0_99] : memref<12x16x16xf32, #tpu.memory_space<vmem>>, vector<1x16x16xf32>
    %191 = vector.shape_cast %190 : vector<1x16x16xf32> to vector<16x16xf32>
    %192 = vector.shape_cast %189 : vector<16x16xf32> to vector<1x16x16xf32>
    tpu.vector_store %arg15[%c9_97, %c0_98, %c0_99], %192 {strides = array<i32>} : memref<12x16x16xf32, #tpu.memory_space<vmem>>, vector<1x16x16xf32>,
    %c0_100 = arith.constant 0 : index
    %c0_101 = arith.constant 0 : index
    %193 = vector.load %arg16[%c0_100, %c0_101] : memref<16x32xf32, #tpu.memory_space<vmem>>, vector<16x32xf32>
    %c0_102 = arith.constant 0 : index
    %c0_103 = arith.constant 0 : index
    %194 = vector.load %arg6[%c0_102, %c0_103] : memref<32x128xf32, #tpu.memory_space<vmem>>, vector<32x128xf32>
    %cst_104 = arith.constant dense<0.000000e+00> : vector<16x128xf32>
    %195 = tpu.matmul %193, %194, %cst_104 {dimension_numbers = #tpu.dot_dimension_numbers<[1], [0], [0], [1], [0, 0, 1, 1], [], []>} : vector<16x32xf32>, vector<32x128xf32>, vector<16x128xf32> -> vector<16x128xf32>
    %c3 = arith.constant 3 : index
    %c0_105 = arith.constant 0 : index
    %c0_106 = arith.constant 0 : index
    %196 = vector.load %arg13[%c3, %c0_105, %c0_106] : memref<12x16x128xf32, #tpu.memory_space<vmem>>, vector<1x16x128xf32>
    %197 = vector.shape_cast %196 : vector<1x16x128xf32> to vector<16x128xf32>
    %c8 = arith.constant 8 : index
    %c0_107 = arith.constant 0 : index
    %c0_108 = arith.constant 0 : index
    %198 = vector.load %arg13[%c8, %c0_107, %c0_108] : memref<12x16x128xf32, #tpu.memory_space<vmem>>, vector<1x16x128xf32>
    %199 = vector.shape_cast %198 : vector<1x16x128xf32> to vector<16x128xf32>
    %200 = arith.select %57, %197, %199 : vector<16x128xi1>, vector<16x128xf32>
    %201 = arith.addf %195, %200 : vector<16x128xf32>
    %202 = vector.extract_strided_slice %201 {offsets = [0, 0], sizes = [16, 32], strides = [1, 1]} : vector<16x128xf32> to vector<16x32xf32>
    %203 = arith.negf %202 : vector<16x32xf32>
    %204 = math.exp %203 : vector<16x32xf32>
    %cst_109 = arith.constant 1.000000e+00 : f32
    %205 = vector.broadcast %cst_109 : f32 to vector<16x32xf32>
    %206 = arith.addf %205, %204 : vector<16x32xf32>
    %207 = arith.divf %205, %206 : vector<16x32xf32>
    %208 = vector.extract_strided_slice %201 {offsets = [0, 32], sizes = [16, 32], strides = [1, 1]} : vector<16x128xf32> to vector<16x32xf32>
    %209 = arith.negf %208 : vector<16x32xf32>
    %210 = math.exp %209 : vector<16x32xf32>
    %cst_110 = arith.constant 1.000000e+00 : f32
    %211 = vector.broadcast %cst_110 : f32 to vector<16x32xf32>
    %212 = arith.addf %211, %210 : vector<16x32xf32>
    %213 = arith.divf %211, %212 : vector<16x32xf32>
    %214 = vector.extract_strided_slice %201 {offsets = [0, 64], sizes = [16, 32], strides = [1, 1]} : vector<16x128xf32> to vector<16x32xf32>
    %215 = math.tanh %214 : vector<16x32xf32>
    %216 = vector.extract_strided_slice %201 {offsets = [0, 96], sizes = [16, 32], strides = [1, 1]} : vector<16x128xf32> to vector<16x32xf32>
    %217 = arith.negf %216 : vector<16x32xf32>
    %218 = math.exp %217 : vector<16x32xf32>
    %cst_111 = arith.constant 1.000000e+00 : f32
    %219 = vector.broadcast %cst_111 : f32 to vector<16x32xf32>
    %220 = arith.addf %219, %218 : vector<16x32xf32>
    %221 = arith.divf %219, %220 : vector<16x32xf32>
    %c0_112 = arith.constant 0 : index
    %c0_113 = arith.constant 0 : index
    %222 = vector.load %arg17[%c0_112, %c0_113] : memref<16x32xf32, #tpu.memory_space<vmem>>, vector<16x32xf32>
    %223 = arith.mulf %213, %222 : vector<16x32xf32>
    %224 = arith.mulf %207, %215 : vector<16x32xf32>
    %225 = arith.addf %223, %224 : vector<16x32xf32>
    %226 = math.tanh %225 : vector<16x32xf32>
    %227 = arith.mulf %221, %226 : vector<16x32xf32>
    %c0_114 = arith.constant 0 : index
    %c0_115 = arith.constant 0 : index
    %228 = vector.load %arg17[%c0_114, %c0_115] : memref<16x32xf32, #tpu.memory_space<vmem>>, vector<16x32xf32>
    tpu.vector_store %arg17[%c0_114, %c0_115], %225 {strides = array<i32>} : memref<16x32xf32, #tpu.memory_space<vmem>>, vector<16x32xf32>,
    %c0_116 = arith.constant 0 : index
    %c0_117 = arith.constant 0 : index
    %229 = vector.load %arg16[%c0_116, %c0_117] : memref<16x32xf32, #tpu.memory_space<vmem>>, vector<16x32xf32>
    tpu.vector_store %arg16[%c0_116, %c0_117], %227 {strides = array<i32>} : memref<16x32xf32, #tpu.memory_space<vmem>>, vector<16x32xf32>,
    %230 = vector.extract_strided_slice %227 {offsets = [0, 0], sizes = [16, 16], strides = [1, 1]} : vector<16x32xf32> to vector<16x16xf32>
    %c3_118 = arith.constant 3 : index
    %c0_119 = arith.constant 0 : index
    %c0_120 = arith.constant 0 : index
    %231 = vector.load %arg14[%c3_118, %c0_119, %c0_120] : memref<12x16x16xf32, #tpu.memory_space<vmem>>, vector<1x16x16xf32>
    %232 = vector.shape_cast %231 : vector<1x16x16xf32> to vector<16x16xf32>
    %233 = vector.shape_cast %230 : vector<16x16xf32> to vector<1x16x16xf32>
    tpu.vector_store %arg14[%c3_118, %c0_119, %c0_120], %233 {strides = array<i32>} : memref<12x16x16xf32, #tpu.memory_space<vmem>>, vector<1x16x16xf32>,
    %234 = vector.extract_strided_slice %227 {offsets = [0, 16], sizes = [16, 16], strides = [1, 1]} : vector<16x32xf32> to vector<16x16xf32>
    %c8_121 = arith.constant 8 : index
    %c0_122 = arith.constant 0 : index
    %c0_123 = arith.constant 0 : index
    %235 = vector.load %arg15[%c8_121, %c0_122, %c0_123] : memref<12x16x16xf32, #tpu.memory_space<vmem>>, vector<1x16x16xf32>
    %236 = vector.shape_cast %235 : vector<1x16x16xf32> to vector<16x16xf32>
    %237 = vector.shape_cast %234 : vector<16x16xf32> to vector<1x16x16xf32>
    tpu.vector_store %arg15[%c8_121, %c0_122, %c0_123], %237 {strides = array<i32>} : memref<12x16x16xf32, #tpu.memory_space<vmem>>, vector<1x16x16xf32>,
    %c0_124 = arith.constant 0 : index
    %c0_125 = arith.constant 0 : index
    %238 = vector.load %arg16[%c0_124, %c0_125] : memref<16x32xf32, #tpu.memory_space<vmem>>, vector<16x32xf32>
    %c0_126 = arith.constant 0 : index
    %c0_127 = arith.constant 0 : index
    %239 = vector.load %arg6[%c0_126, %c0_127] : memref<32x128xf32, #tpu.memory_space<vmem>>, vector<32x128xf32>
    %cst_128 = arith.constant dense<0.000000e+00> : vector<16x128xf32>
    %240 = tpu.matmul %238, %239, %cst_128 {dimension_numbers = #tpu.dot_dimension_numbers<[1], [0], [0], [1], [0, 0, 1, 1], [], []>} : vector<16x32xf32>, vector<32x128xf32>, vector<16x128xf32> -> vector<16x128xf32>
    %c4 = arith.constant 4 : index
    %c0_129 = arith.constant 0 : index
    %c0_130 = arith.constant 0 : index
    %241 = vector.load %arg13[%c4, %c0_129, %c0_130] : memref<12x16x128xf32, #tpu.memory_space<vmem>>, vector<1x16x128xf32>
    %242 = vector.shape_cast %241 : vector<1x16x128xf32> to vector<16x128xf32>
    %c7 = arith.constant 7 : index
    %c0_131 = arith.constant 0 : index
    %c0_132 = arith.constant 0 : index
    %243 = vector.load %arg13[%c7, %c0_131, %c0_132] : memref<12x16x128xf32, #tpu.memory_space<vmem>>, vector<1x16x128xf32>
    %244 = vector.shape_cast %243 : vector<1x16x128xf32> to vector<16x128xf32>
    %245 = arith.select %57, %242, %244 : vector<16x128xi1>, vector<16x128xf32>
    %246 = arith.addf %240, %245 : vector<16x128xf32>
    %247 = vector.extract_strided_slice %246 {offsets = [0, 0], sizes = [16, 32], strides = [1, 1]} : vector<16x128xf32> to vector<16x32xf32>
    %248 = arith.negf %247 : vector<16x32xf32>
    %249 = math.exp %248 : vector<16x32xf32>
    %cst_133 = arith.constant 1.000000e+00 : f32
    %250 = vector.broadcast %cst_133 : f32 to vector<16x32xf32>
    %251 = arith.addf %250, %249 : vector<16x32xf32>
    %252 = arith.divf %250, %251 : vector<16x32xf32>
    %253 = vector.extract_strided_slice %246 {offsets = [0, 32], sizes = [16, 32], strides = [1, 1]} : vector<16x128xf32> to vector<16x32xf32>
    %254 = arith.negf %253 : vector<16x32xf32>
    %255 = math.exp %254 : vector<16x32xf32>
    %cst_134 = arith.constant 1.000000e+00 : f32
    %256 = vector.broadcast %cst_134 : f32 to vector<16x32xf32>
    %257 = arith.addf %256, %255 : vector<16x32xf32>
    %258 = arith.divf %256, %257 : vector<16x32xf32>
    %259 = vector.extract_strided_slice %246 {offsets = [0, 64], sizes = [16, 32], strides = [1, 1]} : vector<16x128xf32> to vector<16x32xf32>
    %260 = math.tanh %259 : vector<16x32xf32>
    %261 = vector.extract_strided_slice %246 {offsets = [0, 96], sizes = [16, 32], strides = [1, 1]} : vector<16x128xf32> to vector<16x32xf32>
    %262 = arith.negf %261 : vector<16x32xf32>
    %263 = math.exp %262 : vector<16x32xf32>
    %cst_135 = arith.constant 1.000000e+00 : f32
    %264 = vector.broadcast %cst_135 : f32 to vector<16x32xf32>
    %265 = arith.addf %264, %263 : vector<16x32xf32>
    %266 = arith.divf %264, %265 : vector<16x32xf32>
    %c0_136 = arith.constant 0 : index
    %c0_137 = arith.constant 0 : index
    %267 = vector.load %arg17[%c0_136, %c0_137] : memref<16x32xf32, #tpu.memory_space<vmem>>, vector<16x32xf32>
    %268 = arith.mulf %258, %267 : vector<16x32xf32>
    %269 = arith.mulf %252, %260 : vector<16x32xf32>
    %270 = arith.addf %268, %269 : vector<16x32xf32>
    %271 = math.tanh %270 : vector<16x32xf32>
    %272 = arith.mulf %266, %271 : vector<16x32xf32>
    %c0_138 = arith.constant 0 : index
    %c0_139 = arith.constant 0 : index
    %273 = vector.load %arg17[%c0_138, %c0_139] : memref<16x32xf32, #tpu.memory_space<vmem>>, vector<16x32xf32>
    tpu.vector_store %arg17[%c0_138, %c0_139], %270 {strides = array<i32>} : memref<16x32xf32, #tpu.memory_space<vmem>>, vector<16x32xf32>,
    %c0_140 = arith.constant 0 : index
    %c0_141 = arith.constant 0 : index
    %274 = vector.load %arg16[%c0_140, %c0_141] : memref<16x32xf32, #tpu.memory_space<vmem>>, vector<16x32xf32>
    tpu.vector_store %arg16[%c0_140, %c0_141], %272 {strides = array<i32>} : memref<16x32xf32, #tpu.memory_space<vmem>>, vector<16x32xf32>,
    %275 = vector.extract_strided_slice %272 {offsets = [0, 0], sizes = [16, 16], strides = [1, 1]} : vector<16x32xf32> to vector<16x16xf32>
    %c4_142 = arith.constant 4 : index
    %c0_143 = arith.constant 0 : index
    %c0_144 = arith.constant 0 : index
    %276 = vector.load %arg14[%c4_142, %c0_143, %c0_144] : memref<12x16x16xf32, #tpu.memory_space<vmem>>, vector<1x16x16xf32>
    %277 = vector.shape_cast %276 : vector<1x16x16xf32> to vector<16x16xf32>
    %278 = vector.shape_cast %275 : vector<16x16xf32> to vector<1x16x16xf32>
    tpu.vector_store %arg14[%c4_142, %c0_143, %c0_144], %278 {strides = array<i32>} : memref<12x16x16xf32, #tpu.memory_space<vmem>>, vector<1x16x16xf32>,
    %279 = vector.extract_strided_slice %272 {offsets = [0, 16], sizes = [16, 16], strides = [1, 1]} : vector<16x32xf32> to vector<16x16xf32>
    %c7_145 = arith.constant 7 : index
    %c0_146 = arith.constant 0 : index
    %c0_147 = arith.constant 0 : index
    %280 = vector.load %arg15[%c7_145, %c0_146, %c0_147] : memref<12x16x16xf32, #tpu.memory_space<vmem>>, vector<1x16x16xf32>
    %281 = vector.shape_cast %280 : vector<1x16x16xf32> to vector<16x16xf32>
    %282 = vector.shape_cast %279 : vector<16x16xf32> to vector<1x16x16xf32>
    tpu.vector_store %arg15[%c7_145, %c0_146, %c0_147], %282 {strides = array<i32>} : memref<12x16x16xf32, #tpu.memory_space<vmem>>, vector<1x16x16xf32>,
    %c0_148 = arith.constant 0 : index
    %c0_149 = arith.constant 0 : index
    %283 = vector.load %arg16[%c0_148, %c0_149] : memref<16x32xf32, #tpu.memory_space<vmem>>, vector<16x32xf32>
    %c0_150 = arith.constant 0 : index
    %c0_151 = arith.constant 0 : index
    %284 = vector.load %arg6[%c0_150, %c0_151] : memref<32x128xf32, #tpu.memory_space<vmem>>, vector<32x128xf32>
    %cst_152 = arith.constant dense<0.000000e+00> : vector<16x128xf32>
    %285 = tpu.matmul %283, %284, %cst_152 {dimension_numbers = #tpu.dot_dimension_numbers<[1], [0], [0], [1], [0, 0, 1, 1], [], []>} : vector<16x32xf32>, vector<32x128xf32>, vector<16x128xf32> -> vector<16x128xf32>
    %c5 = arith.constant 5 : index
    %c0_153 = arith.constant 0 : index
    %c0_154 = arith.constant 0 : index
    %286 = vector.load %arg13[%c5, %c0_153, %c0_154] : memref<12x16x128xf32, #tpu.memory_space<vmem>>, vector<1x16x128xf32>
    %287 = vector.shape_cast %286 : vector<1x16x128xf32> to vector<16x128xf32>
    %c6 = arith.constant 6 : index
    %c0_155 = arith.constant 0 : index
    %c0_156 = arith.constant 0 : index
    %288 = vector.load %arg13[%c6, %c0_155, %c0_156] : memref<12x16x128xf32, #tpu.memory_space<vmem>>, vector<1x16x128xf32>
    %289 = vector.shape_cast %288 : vector<1x16x128xf32> to vector<16x128xf32>
    %290 = arith.select %57, %287, %289 : vector<16x128xi1>, vector<16x128xf32>
    %291 = arith.addf %285, %290 : vector<16x128xf32>
    %292 = vector.extract_strided_slice %291 {offsets = [0, 0], sizes = [16, 32], strides = [1, 1]} : vector<16x128xf32> to vector<16x32xf32>
    %293 = arith.negf %292 : vector<16x32xf32>
    %294 = math.exp %293 : vector<16x32xf32>
    %cst_157 = arith.constant 1.000000e+00 : f32
    %295 = vector.broadcast %cst_157 : f32 to vector<16x32xf32>
    %296 = arith.addf %295, %294 : vector<16x32xf32>
    %297 = arith.divf %295, %296 : vector<16x32xf32>
    %298 = vector.extract_strided_slice %291 {offsets = [0, 32], sizes = [16, 32], strides = [1, 1]} : vector<16x128xf32> to vector<16x32xf32>
    %299 = arith.negf %298 : vector<16x32xf32>
    %300 = math.exp %299 : vector<16x32xf32>
    %cst_158 = arith.constant 1.000000e+00 : f32
    %301 = vector.broadcast %cst_158 : f32 to vector<16x32xf32>
    %302 = arith.addf %301, %300 : vector<16x32xf32>
    %303 = arith.divf %301, %302 : vector<16x32xf32>
    %304 = vector.extract_strided_slice %291 {offsets = [0, 64], sizes = [16, 32], strides = [1, 1]} : vector<16x128xf32> to vector<16x32xf32>
    %305 = math.tanh %304 : vector<16x32xf32>
    %306 = vector.extract_strided_slice %291 {offsets = [0, 96], sizes = [16, 32], strides = [1, 1]} : vector<16x128xf32> to vector<16x32xf32>
    %307 = arith.negf %306 : vector<16x32xf32>
    %308 = math.exp %307 : vector<16x32xf32>
    %cst_159 = arith.constant 1.000000e+00 : f32
    %309 = vector.broadcast %cst_159 : f32 to vector<16x32xf32>
    %310 = arith.addf %309, %308 : vector<16x32xf32>
    %311 = arith.divf %309, %310 : vector<16x32xf32>
    %c0_160 = arith.constant 0 : index
    %c0_161 = arith.constant 0 : index
    %312 = vector.load %arg17[%c0_160, %c0_161] : memref<16x32xf32, #tpu.memory_space<vmem>>, vector<16x32xf32>
    %313 = arith.mulf %303, %312 : vector<16x32xf32>
    %314 = arith.mulf %297, %305 : vector<16x32xf32>
    %315 = arith.addf %313, %314 : vector<16x32xf32>
    %316 = math.tanh %315 : vector<16x32xf32>
    %317 = arith.mulf %311, %316 : vector<16x32xf32>
    %c0_162 = arith.constant 0 : index
    %c0_163 = arith.constant 0 : index
    %318 = vector.load %arg17[%c0_162, %c0_163] : memref<16x32xf32, #tpu.memory_space<vmem>>, vector<16x32xf32>
    tpu.vector_store %arg17[%c0_162, %c0_163], %315 {strides = array<i32>} : memref<16x32xf32, #tpu.memory_space<vmem>>, vector<16x32xf32>,
    %c0_164 = arith.constant 0 : index
    %c0_165 = arith.constant 0 : index
    %319 = vector.load %arg16[%c0_164, %c0_165] : memref<16x32xf32, #tpu.memory_space<vmem>>, vector<16x32xf32>
    tpu.vector_store %arg16[%c0_164, %c0_165], %317 {strides = array<i32>} : memref<16x32xf32, #tpu.memory_space<vmem>>, vector<16x32xf32>,
    %320 = vector.extract_strided_slice %317 {offsets = [0, 0], sizes = [16, 16], strides = [1, 1]} : vector<16x32xf32> to vector<16x16xf32>
    %c5_166 = arith.constant 5 : index
    %c0_167 = arith.constant 0 : index
    %c0_168 = arith.constant 0 : index
    %321 = vector.load %arg14[%c5_166, %c0_167, %c0_168] : memref<12x16x16xf32, #tpu.memory_space<vmem>>, vector<1x16x16xf32>
    %322 = vector.shape_cast %321 : vector<1x16x16xf32> to vector<16x16xf32>
    %323 = vector.shape_cast %320 : vector<16x16xf32> to vector<1x16x16xf32>
    tpu.vector_store %arg14[%c5_166, %c0_167, %c0_168], %323 {strides = array<i32>} : memref<12x16x16xf32, #tpu.memory_space<vmem>>, vector<1x16x16xf32>,
    %324 = vector.extract_strided_slice %317 {offsets = [0, 16], sizes = [16, 16], strides = [1, 1]} : vector<16x32xf32> to vector<16x16xf32>
    %c6_169 = arith.constant 6 : index
    %c0_170 = arith.constant 0 : index
    %c0_171 = arith.constant 0 : index
    %325 = vector.load %arg15[%c6_169, %c0_170, %c0_171] : memref<12x16x16xf32, #tpu.memory_space<vmem>>, vector<1x16x16xf32>
    %326 = vector.shape_cast %325 : vector<1x16x16xf32> to vector<16x16xf32>
    %327 = vector.shape_cast %324 : vector<16x16xf32> to vector<1x16x16xf32>
    tpu.vector_store %arg15[%c6_169, %c0_170, %c0_171], %327 {strides = array<i32>} : memref<12x16x16xf32, #tpu.memory_space<vmem>>, vector<1x16x16xf32>,
    %c0_172 = arith.constant 0 : index
    %c0_173 = arith.constant 0 : index
    %328 = vector.load %arg16[%c0_172, %c0_173] : memref<16x32xf32, #tpu.memory_space<vmem>>, vector<16x32xf32>
    %c0_174 = arith.constant 0 : index
    %c0_175 = arith.constant 0 : index
    %329 = vector.load %arg6[%c0_174, %c0_175] : memref<32x128xf32, #tpu.memory_space<vmem>>, vector<32x128xf32>
    %cst_176 = arith.constant dense<0.000000e+00> : vector<16x128xf32>
    %330 = tpu.matmul %328, %329, %cst_176 {dimension_numbers = #tpu.dot_dimension_numbers<[1], [0], [0], [1], [0, 0, 1, 1], [], []>} : vector<16x32xf32>, vector<32x128xf32>, vector<16x128xf32> -> vector<16x128xf32>
    %c6_177 = arith.constant 6 : index
    %c0_178 = arith.constant 0 : index
    %c0_179 = arith.constant 0 : index
    %331 = vector.load %arg13[%c6_177, %c0_178, %c0_179] : memref<12x16x128xf32, #tpu.memory_space<vmem>>, vector<1x16x128xf32>
    %332 = vector.shape_cast %331 : vector<1x16x128xf32> to vector<16x128xf32>
    %c5_180 = arith.constant 5 : index
    %c0_181 = arith.constant 0 : index
    %c0_182 = arith.constant 0 : index
    %333 = vector.load %arg13[%c5_180, %c0_181, %c0_182] : memref<12x16x128xf32, #tpu.memory_space<vmem>>, vector<1x16x128xf32>
    %334 = vector.shape_cast %333 : vector<1x16x128xf32> to vector<16x128xf32>
    %335 = arith.select %57, %332, %334 : vector<16x128xi1>, vector<16x128xf32>
    %336 = arith.addf %330, %335 : vector<16x128xf32>
    %337 = vector.extract_strided_slice %336 {offsets = [0, 0], sizes = [16, 32], strides = [1, 1]} : vector<16x128xf32> to vector<16x32xf32>
    %338 = arith.negf %337 : vector<16x32xf32>
    %339 = math.exp %338 : vector<16x32xf32>
    %cst_183 = arith.constant 1.000000e+00 : f32
    %340 = vector.broadcast %cst_183 : f32 to vector<16x32xf32>
    %341 = arith.addf %340, %339 : vector<16x32xf32>
    %342 = arith.divf %340, %341 : vector<16x32xf32>
    %343 = vector.extract_strided_slice %336 {offsets = [0, 32], sizes = [16, 32], strides = [1, 1]} : vector<16x128xf32> to vector<16x32xf32>
    %344 = arith.negf %343 : vector<16x32xf32>
    %345 = math.exp %344 : vector<16x32xf32>
    %cst_184 = arith.constant 1.000000e+00 : f32
    %346 = vector.broadcast %cst_184 : f32 to vector<16x32xf32>
    %347 = arith.addf %346, %345 : vector<16x32xf32>
    %348 = arith.divf %346, %347 : vector<16x32xf32>
    %349 = vector.extract_strided_slice %336 {offsets = [0, 64], sizes = [16, 32], strides = [1, 1]} : vector<16x128xf32> to vector<16x32xf32>
    %350 = math.tanh %349 : vector<16x32xf32>
    %351 = vector.extract_strided_slice %336 {offsets = [0, 96], sizes = [16, 32], strides = [1, 1]} : vector<16x128xf32> to vector<16x32xf32>
    %352 = arith.negf %351 : vector<16x32xf32>
    %353 = math.exp %352 : vector<16x32xf32>
    %cst_185 = arith.constant 1.000000e+00 : f32
    %354 = vector.broadcast %cst_185 : f32 to vector<16x32xf32>
    %355 = arith.addf %354, %353 : vector<16x32xf32>
    %356 = arith.divf %354, %355 : vector<16x32xf32>
    %c0_186 = arith.constant 0 : index
    %c0_187 = arith.constant 0 : index
    %357 = vector.load %arg17[%c0_186, %c0_187] : memref<16x32xf32, #tpu.memory_space<vmem>>, vector<16x32xf32>
    %358 = arith.mulf %348, %357 : vector<16x32xf32>
    %359 = arith.mulf %342, %350 : vector<16x32xf32>
    %360 = arith.addf %358, %359 : vector<16x32xf32>
    %361 = math.tanh %360 : vector<16x32xf32>
    %362 = arith.mulf %356, %361 : vector<16x32xf32>
    %c0_188 = arith.constant 0 : index
    %c0_189 = arith.constant 0 : index
    %363 = vector.load %arg17[%c0_188, %c0_189] : memref<16x32xf32, #tpu.memory_space<vmem>>, vector<16x32xf32>
    tpu.vector_store %arg17[%c0_188, %c0_189], %360 {strides = array<i32>} : memref<16x32xf32, #tpu.memory_space<vmem>>, vector<16x32xf32>,
    %c0_190 = arith.constant 0 : index
    %c0_191 = arith.constant 0 : index
    %364 = vector.load %arg16[%c0_190, %c0_191] : memref<16x32xf32, #tpu.memory_space<vmem>>, vector<16x32xf32>
    tpu.vector_store %arg16[%c0_190, %c0_191], %362 {strides = array<i32>} : memref<16x32xf32, #tpu.memory_space<vmem>>, vector<16x32xf32>,
    %365 = vector.extract_strided_slice %362 {offsets = [0, 0], sizes = [16, 16], strides = [1, 1]} : vector<16x32xf32> to vector<16x16xf32>
    %c6_192 = arith.constant 6 : index
    %c0_193 = arith.constant 0 : index
    %c0_194 = arith.constant 0 : index
    %366 = vector.load %arg14[%c6_192, %c0_193, %c0_194] : memref<12x16x16xf32, #tpu.memory_space<vmem>>, vector<1x16x16xf32>
    %367 = vector.shape_cast %366 : vector<1x16x16xf32> to vector<16x16xf32>
    %368 = vector.shape_cast %365 : vector<16x16xf32> to vector<1x16x16xf32>
    tpu.vector_store %arg14[%c6_192, %c0_193, %c0_194], %368 {strides = array<i32>} : memref<12x16x16xf32, #tpu.memory_space<vmem>>, vector<1x16x16xf32>,
    %369 = vector.extract_strided_slice %362 {offsets = [0, 16], sizes = [16, 16], strides = [1, 1]} : vector<16x32xf32> to vector<16x16xf32>
    %c5_195 = arith.constant 5 : index
    %c0_196 = arith.constant 0 : index
    %c0_197 = arith.constant 0 : index
    %370 = vector.load %arg15[%c5_195, %c0_196, %c0_197] : memref<12x16x16xf32, #tpu.memory_space<vmem>>, vector<1x16x16xf32>
    %371 = vector.shape_cast %370 : vector<1x16x16xf32> to vector<16x16xf32>
    %372 = vector.shape_cast %369 : vector<16x16xf32> to vector<1x16x16xf32>
    tpu.vector_store %arg15[%c5_195, %c0_196, %c0_197], %372 {strides = array<i32>} : memref<12x16x16xf32, #tpu.memory_space<vmem>>, vector<1x16x16xf32>,
    %c0_198 = arith.constant 0 : index
    %c0_199 = arith.constant 0 : index
    %373 = vector.load %arg16[%c0_198, %c0_199] : memref<16x32xf32, #tpu.memory_space<vmem>>, vector<16x32xf32>
    %c0_200 = arith.constant 0 : index
    %c0_201 = arith.constant 0 : index
    %374 = vector.load %arg6[%c0_200, %c0_201] : memref<32x128xf32, #tpu.memory_space<vmem>>, vector<32x128xf32>
    %cst_202 = arith.constant dense<0.000000e+00> : vector<16x128xf32>
    %375 = tpu.matmul %373, %374, %cst_202 {dimension_numbers = #tpu.dot_dimension_numbers<[1], [0], [0], [1], [0, 0, 1, 1], [], []>} : vector<16x32xf32>, vector<32x128xf32>, vector<16x128xf32> -> vector<16x128xf32>
    %c7_203 = arith.constant 7 : index
    %c0_204 = arith.constant 0 : index
    %c0_205 = arith.constant 0 : index
    %376 = vector.load %arg13[%c7_203, %c0_204, %c0_205] : memref<12x16x128xf32, #tpu.memory_space<vmem>>, vector<1x16x128xf32>
    %377 = vector.shape_cast %376 : vector<1x16x128xf32> to vector<16x128xf32>
    %c4_206 = arith.constant 4 : index
    %c0_207 = arith.constant 0 : index
    %c0_208 = arith.constant 0 : index
    %378 = vector.load %arg13[%c4_206, %c0_207, %c0_208] : memref<12x16x128xf32, #tpu.memory_space<vmem>>, vector<1x16x128xf32>
    %379 = vector.shape_cast %378 : vector<1x16x128xf32> to vector<16x128xf32>
    %380 = arith.select %57, %377, %379 : vector<16x128xi1>, vector<16x128xf32>
    %381 = arith.addf %375, %380 : vector<16x128xf32>
    %382 = vector.extract_strided_slice %381 {offsets = [0, 0], sizes = [16, 32], strides = [1, 1]} : vector<16x128xf32> to vector<16x32xf32>
    %383 = arith.negf %382 : vector<16x32xf32>
    %384 = math.exp %383 : vector<16x32xf32>
    %cst_209 = arith.constant 1.000000e+00 : f32
    %385 = vector.broadcast %cst_209 : f32 to vector<16x32xf32>
    %386 = arith.addf %385, %384 : vector<16x32xf32>
    %387 = arith.divf %385, %386 : vector<16x32xf32>
    %388 = vector.extract_strided_slice %381 {offsets = [0, 32], sizes = [16, 32], strides = [1, 1]} : vector<16x128xf32> to vector<16x32xf32>
    %389 = arith.negf %388 : vector<16x32xf32>
    %390 = math.exp %389 : vector<16x32xf32>
    %cst_210 = arith.constant 1.000000e+00 : f32
    %391 = vector.broadcast %cst_210 : f32 to vector<16x32xf32>
    %392 = arith.addf %391, %390 : vector<16x32xf32>
    %393 = arith.divf %391, %392 : vector<16x32xf32>
    %394 = vector.extract_strided_slice %381 {offsets = [0, 64], sizes = [16, 32], strides = [1, 1]} : vector<16x128xf32> to vector<16x32xf32>
    %395 = math.tanh %394 : vector<16x32xf32>
    %396 = vector.extract_strided_slice %381 {offsets = [0, 96], sizes = [16, 32], strides = [1, 1]} : vector<16x128xf32> to vector<16x32xf32>
    %397 = arith.negf %396 : vector<16x32xf32>
    %398 = math.exp %397 : vector<16x32xf32>
    %cst_211 = arith.constant 1.000000e+00 : f32
    %399 = vector.broadcast %cst_211 : f32 to vector<16x32xf32>
    %400 = arith.addf %399, %398 : vector<16x32xf32>
    %401 = arith.divf %399, %400 : vector<16x32xf32>
    %c0_212 = arith.constant 0 : index
    %c0_213 = arith.constant 0 : index
    %402 = vector.load %arg17[%c0_212, %c0_213] : memref<16x32xf32, #tpu.memory_space<vmem>>, vector<16x32xf32>
    %403 = arith.mulf %393, %402 : vector<16x32xf32>
    %404 = arith.mulf %387, %395 : vector<16x32xf32>
    %405 = arith.addf %403, %404 : vector<16x32xf32>
    %406 = math.tanh %405 : vector<16x32xf32>
    %407 = arith.mulf %401, %406 : vector<16x32xf32>
    %c0_214 = arith.constant 0 : index
    %c0_215 = arith.constant 0 : index
    %408 = vector.load %arg17[%c0_214, %c0_215] : memref<16x32xf32, #tpu.memory_space<vmem>>, vector<16x32xf32>
    tpu.vector_store %arg17[%c0_214, %c0_215], %405 {strides = array<i32>} : memref<16x32xf32, #tpu.memory_space<vmem>>, vector<16x32xf32>,
    %c0_216 = arith.constant 0 : index
    %c0_217 = arith.constant 0 : index
    %409 = vector.load %arg16[%c0_216, %c0_217] : memref<16x32xf32, #tpu.memory_space<vmem>>, vector<16x32xf32>
    tpu.vector_store %arg16[%c0_216, %c0_217], %407 {strides = array<i32>} : memref<16x32xf32, #tpu.memory_space<vmem>>, vector<16x32xf32>,
    %410 = vector.extract_strided_slice %407 {offsets = [0, 0], sizes = [16, 16], strides = [1, 1]} : vector<16x32xf32> to vector<16x16xf32>
    %c7_218 = arith.constant 7 : index
    %c0_219 = arith.constant 0 : index
    %c0_220 = arith.constant 0 : index
    %411 = vector.load %arg14[%c7_218, %c0_219, %c0_220] : memref<12x16x16xf32, #tpu.memory_space<vmem>>, vector<1x16x16xf32>
    %412 = vector.shape_cast %411 : vector<1x16x16xf32> to vector<16x16xf32>
    %413 = vector.shape_cast %410 : vector<16x16xf32> to vector<1x16x16xf32>
    tpu.vector_store %arg14[%c7_218, %c0_219, %c0_220], %413 {strides = array<i32>} : memref<12x16x16xf32, #tpu.memory_space<vmem>>, vector<1x16x16xf32>,
    %414 = vector.extract_strided_slice %407 {offsets = [0, 16], sizes = [16, 16], strides = [1, 1]} : vector<16x32xf32> to vector<16x16xf32>
    %c4_221 = arith.constant 4 : index
    %c0_222 = arith.constant 0 : index
    %c0_223 = arith.constant 0 : index
    %415 = vector.load %arg15[%c4_221, %c0_222, %c0_223] : memref<12x16x16xf32, #tpu.memory_space<vmem>>, vector<1x16x16xf32>
    %416 = vector.shape_cast %415 : vector<1x16x16xf32> to vector<16x16xf32>
    %417 = vector.shape_cast %414 : vector<16x16xf32> to vector<1x16x16xf32>
    tpu.vector_store %arg15[%c4_221, %c0_222, %c0_223], %417 {strides = array<i32>} : memref<12x16x16xf32, #tpu.memory_space<vmem>>, vector<1x16x16xf32>,
    %c0_224 = arith.constant 0 : index
    %c0_225 = arith.constant 0 : index
    %418 = vector.load %arg16[%c0_224, %c0_225] : memref<16x32xf32, #tpu.memory_space<vmem>>, vector<16x32xf32>
    %c0_226 = arith.constant 0 : index
    %c0_227 = arith.constant 0 : index
    %419 = vector.load %arg6[%c0_226, %c0_227] : memref<32x128xf32, #tpu.memory_space<vmem>>, vector<32x128xf32>
    %cst_228 = arith.constant dense<0.000000e+00> : vector<16x128xf32>
    %420 = tpu.matmul %418, %419, %cst_228 {dimension_numbers = #tpu.dot_dimension_numbers<[1], [0], [0], [1], [0, 0, 1, 1], [], []>} : vector<16x32xf32>, vector<32x128xf32>, vector<16x128xf32> -> vector<16x128xf32>
    %c8_229 = arith.constant 8 : index
    %c0_230 = arith.constant 0 : index
    %c0_231 = arith.constant 0 : index
    %421 = vector.load %arg13[%c8_229, %c0_230, %c0_231] : memref<12x16x128xf32, #tpu.memory_space<vmem>>, vector<1x16x128xf32>
    %422 = vector.shape_cast %421 : vector<1x16x128xf32> to vector<16x128xf32>
    %c3_232 = arith.constant 3 : index
    %c0_233 = arith.constant 0 : index
    %c0_234 = arith.constant 0 : index
    %423 = vector.load %arg13[%c3_232, %c0_233, %c0_234] : memref<12x16x128xf32, #tpu.memory_space<vmem>>, vector<1x16x128xf32>
    %424 = vector.shape_cast %423 : vector<1x16x128xf32> to vector<16x128xf32>
    %425 = arith.select %57, %422, %424 : vector<16x128xi1>, vector<16x128xf32>
    %426 = arith.addf %420, %425 : vector<16x128xf32>
    %427 = vector.extract_strided_slice %426 {offsets = [0, 0], sizes = [16, 32], strides = [1, 1]} : vector<16x128xf32> to vector<16x32xf32>
    %428 = arith.negf %427 : vector<16x32xf32>
    %429 = math.exp %428 : vector<16x32xf32>
    %cst_235 = arith.constant 1.000000e+00 : f32
    %430 = vector.broadcast %cst_235 : f32 to vector<16x32xf32>
    %431 = arith.addf %430, %429 : vector<16x32xf32>
    %432 = arith.divf %430, %431 : vector<16x32xf32>
    %433 = vector.extract_strided_slice %426 {offsets = [0, 32], sizes = [16, 32], strides = [1, 1]} : vector<16x128xf32> to vector<16x32xf32>
    %434 = arith.negf %433 : vector<16x32xf32>
    %435 = math.exp %434 : vector<16x32xf32>
    %cst_236 = arith.constant 1.000000e+00 : f32
    %436 = vector.broadcast %cst_236 : f32 to vector<16x32xf32>
    %437 = arith.addf %436, %435 : vector<16x32xf32>
    %438 = arith.divf %436, %437 : vector<16x32xf32>
    %439 = vector.extract_strided_slice %426 {offsets = [0, 64], sizes = [16, 32], strides = [1, 1]} : vector<16x128xf32> to vector<16x32xf32>
    %440 = math.tanh %439 : vector<16x32xf32>
    %441 = vector.extract_strided_slice %426 {offsets = [0, 96], sizes = [16, 32], strides = [1, 1]} : vector<16x128xf32> to vector<16x32xf32>
    %442 = arith.negf %441 : vector<16x32xf32>
    %443 = math.exp %442 : vector<16x32xf32>
    %cst_237 = arith.constant 1.000000e+00 : f32
    %444 = vector.broadcast %cst_237 : f32 to vector<16x32xf32>
    %445 = arith.addf %444, %443 : vector<16x32xf32>
    %446 = arith.divf %444, %445 : vector<16x32xf32>
    %c0_238 = arith.constant 0 : index
    %c0_239 = arith.constant 0 : index
    %447 = vector.load %arg17[%c0_238, %c0_239] : memref<16x32xf32, #tpu.memory_space<vmem>>, vector<16x32xf32>
    %448 = arith.mulf %438, %447 : vector<16x32xf32>
    %449 = arith.mulf %432, %440 : vector<16x32xf32>
    %450 = arith.addf %448, %449 : vector<16x32xf32>
    %451 = math.tanh %450 : vector<16x32xf32>
    %452 = arith.mulf %446, %451 : vector<16x32xf32>
    %c0_240 = arith.constant 0 : index
    %c0_241 = arith.constant 0 : index
    %453 = vector.load %arg17[%c0_240, %c0_241] : memref<16x32xf32, #tpu.memory_space<vmem>>, vector<16x32xf32>
    tpu.vector_store %arg17[%c0_240, %c0_241], %450 {strides = array<i32>} : memref<16x32xf32, #tpu.memory_space<vmem>>, vector<16x32xf32>,
    %c0_242 = arith.constant 0 : index
    %c0_243 = arith.constant 0 : index
    %454 = vector.load %arg16[%c0_242, %c0_243] : memref<16x32xf32, #tpu.memory_space<vmem>>, vector<16x32xf32>
    tpu.vector_store %arg16[%c0_242, %c0_243], %452 {strides = array<i32>} : memref<16x32xf32, #tpu.memory_space<vmem>>, vector<16x32xf32>,
    %455 = vector.extract_strided_slice %452 {offsets = [0, 0], sizes = [16, 16], strides = [1, 1]} : vector<16x32xf32> to vector<16x16xf32>
    %c8_244 = arith.constant 8 : index
    %c0_245 = arith.constant 0 : index
    %c0_246 = arith.constant 0 : index
    %456 = vector.load %arg14[%c8_244, %c0_245, %c0_246] : memref<12x16x16xf32, #tpu.memory_space<vmem>>, vector<1x16x16xf32>
    %457 = vector.shape_cast %456 : vector<1x16x16xf32> to vector<16x16xf32>
    %458 = vector.shape_cast %455 : vector<16x16xf32> to vector<1x16x16xf32>
    tpu.vector_store %arg14[%c8_244, %c0_245, %c0_246], %458 {strides = array<i32>} : memref<12x16x16xf32, #tpu.memory_space<vmem>>, vector<1x16x16xf32>,
    %459 = vector.extract_strided_slice %452 {offsets = [0, 16], sizes = [16, 16], strides = [1, 1]} : vector<16x32xf32> to vector<16x16xf32>
    %c3_247 = arith.constant 3 : index
    %c0_248 = arith.constant 0 : index
    %c0_249 = arith.constant 0 : index
    %460 = vector.load %arg15[%c3_247, %c0_248, %c0_249] : memref<12x16x16xf32, #tpu.memory_space<vmem>>, vector<1x16x16xf32>
    %461 = vector.shape_cast %460 : vector<1x16x16xf32> to vector<16x16xf32>
    %462 = vector.shape_cast %459 : vector<16x16xf32> to vector<1x16x16xf32>
    tpu.vector_store %arg15[%c3_247, %c0_248, %c0_249], %462 {strides = array<i32>} : memref<12x16x16xf32, #tpu.memory_space<vmem>>, vector<1x16x16xf32>,
    %c0_250 = arith.constant 0 : index
    %c0_251 = arith.constant 0 : index
    %463 = vector.load %arg16[%c0_250, %c0_251] : memref<16x32xf32, #tpu.memory_space<vmem>>, vector<16x32xf32>
    %c0_252 = arith.constant 0 : index
    %c0_253 = arith.constant 0 : index
    %464 = vector.load %arg6[%c0_252, %c0_253] : memref<32x128xf32, #tpu.memory_space<vmem>>, vector<32x128xf32>
    %cst_254 = arith.constant dense<0.000000e+00> : vector<16x128xf32>
    %465 = tpu.matmul %463, %464, %cst_254 {dimension_numbers = #tpu.dot_dimension_numbers<[1], [0], [0], [1], [0, 0, 1, 1], [], []>} : vector<16x32xf32>, vector<32x128xf32>, vector<16x128xf32> -> vector<16x128xf32>
    %c9_255 = arith.constant 9 : index
    %c0_256 = arith.constant 0 : index
    %c0_257 = arith.constant 0 : index
    %466 = vector.load %arg13[%c9_255, %c0_256, %c0_257] : memref<12x16x128xf32, #tpu.memory_space<vmem>>, vector<1x16x128xf32>
    %467 = vector.shape_cast %466 : vector<1x16x128xf32> to vector<16x128xf32>
    %c2_258 = arith.constant 2 : index
    %c0_259 = arith.constant 0 : index
    %c0_260 = arith.constant 0 : index
    %468 = vector.load %arg13[%c2_258, %c0_259, %c0_260] : memref<12x16x128xf32, #tpu.memory_space<vmem>>, vector<1x16x128xf32>
    %469 = vector.shape_cast %468 : vector<1x16x128xf32> to vector<16x128xf32>
    %470 = arith.select %57, %467, %469 : vector<16x128xi1>, vector<16x128xf32>
    %471 = arith.addf %465, %470 : vector<16x128xf32>
    %472 = vector.extract_strided_slice %471 {offsets = [0, 0], sizes = [16, 32], strides = [1, 1]} : vector<16x128xf32> to vector<16x32xf32>
    %473 = arith.negf %472 : vector<16x32xf32>
    %474 = math.exp %473 : vector<16x32xf32>
    %cst_261 = arith.constant 1.000000e+00 : f32
    %475 = vector.broadcast %cst_261 : f32 to vector<16x32xf32>
    %476 = arith.addf %475, %474 : vector<16x32xf32>
    %477 = arith.divf %475, %476 : vector<16x32xf32>
    %478 = vector.extract_strided_slice %471 {offsets = [0, 32], sizes = [16, 32], strides = [1, 1]} : vector<16x128xf32> to vector<16x32xf32>
    %479 = arith.negf %478 : vector<16x32xf32>
    %480 = math.exp %479 : vector<16x32xf32>
    %cst_262 = arith.constant 1.000000e+00 : f32
    %481 = vector.broadcast %cst_262 : f32 to vector<16x32xf32>
    %482 = arith.addf %481, %480 : vector<16x32xf32>
    %483 = arith.divf %481, %482 : vector<16x32xf32>
    %484 = vector.extract_strided_slice %471 {offsets = [0, 64], sizes = [16, 32], strides = [1, 1]} : vector<16x128xf32> to vector<16x32xf32>
    %485 = math.tanh %484 : vector<16x32xf32>
    %486 = vector.extract_strided_slice %471 {offsets = [0, 96], sizes = [16, 32], strides = [1, 1]} : vector<16x128xf32> to vector<16x32xf32>
    %487 = arith.negf %486 : vector<16x32xf32>
    %488 = math.exp %487 : vector<16x32xf32>
    %cst_263 = arith.constant 1.000000e+00 : f32
    %489 = vector.broadcast %cst_263 : f32 to vector<16x32xf32>
    %490 = arith.addf %489, %488 : vector<16x32xf32>
    %491 = arith.divf %489, %490 : vector<16x32xf32>
    %c0_264 = arith.constant 0 : index
    %c0_265 = arith.constant 0 : index
    %492 = vector.load %arg17[%c0_264, %c0_265] : memref<16x32xf32, #tpu.memory_space<vmem>>, vector<16x32xf32>
    %493 = arith.mulf %483, %492 : vector<16x32xf32>
    %494 = arith.mulf %477, %485 : vector<16x32xf32>
    %495 = arith.addf %493, %494 : vector<16x32xf32>
    %496 = math.tanh %495 : vector<16x32xf32>
    %497 = arith.mulf %491, %496 : vector<16x32xf32>
    %c0_266 = arith.constant 0 : index
    %c0_267 = arith.constant 0 : index
    %498 = vector.load %arg17[%c0_266, %c0_267] : memref<16x32xf32, #tpu.memory_space<vmem>>, vector<16x32xf32>
    tpu.vector_store %arg17[%c0_266, %c0_267], %495 {strides = array<i32>} : memref<16x32xf32, #tpu.memory_space<vmem>>, vector<16x32xf32>,
    %c0_268 = arith.constant 0 : index
    %c0_269 = arith.constant 0 : index
    %499 = vector.load %arg16[%c0_268, %c0_269] : memref<16x32xf32, #tpu.memory_space<vmem>>, vector<16x32xf32>
    tpu.vector_store %arg16[%c0_268, %c0_269], %497 {strides = array<i32>} : memref<16x32xf32, #tpu.memory_space<vmem>>, vector<16x32xf32>,
    %500 = vector.extract_strided_slice %497 {offsets = [0, 0], sizes = [16, 16], strides = [1, 1]} : vector<16x32xf32> to vector<16x16xf32>
    %c9_270 = arith.constant 9 : index
    %c0_271 = arith.constant 0 : index
    %c0_272 = arith.constant 0 : index
    %501 = vector.load %arg14[%c9_270, %c0_271, %c0_272] : memref<12x16x16xf32, #tpu.memory_space<vmem>>, vector<1x16x16xf32>
    %502 = vector.shape_cast %501 : vector<1x16x16xf32> to vector<16x16xf32>
    %503 = vector.shape_cast %500 : vector<16x16xf32> to vector<1x16x16xf32>
    tpu.vector_store %arg14[%c9_270, %c0_271, %c0_272], %503 {strides = array<i32>} : memref<12x16x16xf32, #tpu.memory_space<vmem>>, vector<1x16x16xf32>,
    %504 = vector.extract_strided_slice %497 {offsets = [0, 16], sizes = [16, 16], strides = [1, 1]} : vector<16x32xf32> to vector<16x16xf32>
    %c2_273 = arith.constant 2 : index
    %c0_274 = arith.constant 0 : index
    %c0_275 = arith.constant 0 : index
    %505 = vector.load %arg15[%c2_273, %c0_274, %c0_275] : memref<12x16x16xf32, #tpu.memory_space<vmem>>, vector<1x16x16xf32>
    %506 = vector.shape_cast %505 : vector<1x16x16xf32> to vector<16x16xf32>
    %507 = vector.shape_cast %504 : vector<16x16xf32> to vector<1x16x16xf32>
    tpu.vector_store %arg15[%c2_273, %c0_274, %c0_275], %507 {strides = array<i32>} : memref<12x16x16xf32, #tpu.memory_space<vmem>>, vector<1x16x16xf32>,
    %c0_276 = arith.constant 0 : index
    %c0_277 = arith.constant 0 : index
    %508 = vector.load %arg16[%c0_276, %c0_277] : memref<16x32xf32, #tpu.memory_space<vmem>>, vector<16x32xf32>
    %c0_278 = arith.constant 0 : index
    %c0_279 = arith.constant 0 : index
    %509 = vector.load %arg6[%c0_278, %c0_279] : memref<32x128xf32, #tpu.memory_space<vmem>>, vector<32x128xf32>
    %cst_280 = arith.constant dense<0.000000e+00> : vector<16x128xf32>
    %510 = tpu.matmul %508, %509, %cst_280 {dimension_numbers = #tpu.dot_dimension_numbers<[1], [0], [0], [1], [0, 0, 1, 1], [], []>} : vector<16x32xf32>, vector<32x128xf32>, vector<16x128xf32> -> vector<16x128xf32>
    %c10_281 = arith.constant 10 : index
    %c0_282 = arith.constant 0 : index
    %c0_283 = arith.constant 0 : index
    %511 = vector.load %arg13[%c10_281, %c0_282, %c0_283] : memref<12x16x128xf32, #tpu.memory_space<vmem>>, vector<1x16x128xf32>
    %512 = vector.shape_cast %511 : vector<1x16x128xf32> to vector<16x128xf32>
    %c1_284 = arith.constant 1 : index
    %c0_285 = arith.constant 0 : index
    %c0_286 = arith.constant 0 : index
    %513 = vector.load %arg13[%c1_284, %c0_285, %c0_286] : memref<12x16x128xf32, #tpu.memory_space<vmem>>, vector<1x16x128xf32>
    %514 = vector.shape_cast %513 : vector<1x16x128xf32> to vector<16x128xf32>
    %515 = arith.select %57, %512, %514 : vector<16x128xi1>, vector<16x128xf32>
    %516 = arith.addf %510, %515 : vector<16x128xf32>
    %517 = vector.extract_strided_slice %516 {offsets = [0, 0], sizes = [16, 32], strides = [1, 1]} : vector<16x128xf32> to vector<16x32xf32>
    %518 = arith.negf %517 : vector<16x32xf32>
    %519 = math.exp %518 : vector<16x32xf32>
    %cst_287 = arith.constant 1.000000e+00 : f32
    %520 = vector.broadcast %cst_287 : f32 to vector<16x32xf32>
    %521 = arith.addf %520, %519 : vector<16x32xf32>
    %522 = arith.divf %520, %521 : vector<16x32xf32>
    %523 = vector.extract_strided_slice %516 {offsets = [0, 32], sizes = [16, 32], strides = [1, 1]} : vector<16x128xf32> to vector<16x32xf32>
    %524 = arith.negf %523 : vector<16x32xf32>
    %525 = math.exp %524 : vector<16x32xf32>
    %cst_288 = arith.constant 1.000000e+00 : f32
    %526 = vector.broadcast %cst_288 : f32 to vector<16x32xf32>
    %527 = arith.addf %526, %525 : vector<16x32xf32>
    %528 = arith.divf %526, %527 : vector<16x32xf32>
    %529 = vector.extract_strided_slice %516 {offsets = [0, 64], sizes = [16, 32], strides = [1, 1]} : vector<16x128xf32> to vector<16x32xf32>
    %530 = math.tanh %529 : vector<16x32xf32>
    %531 = vector.extract_strided_slice %516 {offsets = [0, 96], sizes = [16, 32], strides = [1, 1]} : vector<16x128xf32> to vector<16x32xf32>
    %532 = arith.negf %531 : vector<16x32xf32>
    %533 = math.exp %532 : vector<16x32xf32>
    %cst_289 = arith.constant 1.000000e+00 : f32
    %534 = vector.broadcast %cst_289 : f32 to vector<16x32xf32>
    %535 = arith.addf %534, %533 : vector<16x32xf32>
    %536 = arith.divf %534, %535 : vector<16x32xf32>
    %c0_290 = arith.constant 0 : index
    %c0_291 = arith.constant 0 : index
    %537 = vector.load %arg17[%c0_290, %c0_291] : memref<16x32xf32, #tpu.memory_space<vmem>>, vector<16x32xf32>
    %538 = arith.mulf %528, %537 : vector<16x32xf32>
    %539 = arith.mulf %522, %530 : vector<16x32xf32>
    %540 = arith.addf %538, %539 : vector<16x32xf32>
    %541 = math.tanh %540 : vector<16x32xf32>
    %542 = arith.mulf %536, %541 : vector<16x32xf32>
    %c0_292 = arith.constant 0 : index
    %c0_293 = arith.constant 0 : index
    %543 = vector.load %arg17[%c0_292, %c0_293] : memref<16x32xf32, #tpu.memory_space<vmem>>, vector<16x32xf32>
    tpu.vector_store %arg17[%c0_292, %c0_293], %540 {strides = array<i32>} : memref<16x32xf32, #tpu.memory_space<vmem>>, vector<16x32xf32>,
    %c0_294 = arith.constant 0 : index
    %c0_295 = arith.constant 0 : index
    %544 = vector.load %arg16[%c0_294, %c0_295] : memref<16x32xf32, #tpu.memory_space<vmem>>, vector<16x32xf32>
    tpu.vector_store %arg16[%c0_294, %c0_295], %542 {strides = array<i32>} : memref<16x32xf32, #tpu.memory_space<vmem>>, vector<16x32xf32>,
    %545 = vector.extract_strided_slice %542 {offsets = [0, 0], sizes = [16, 16], strides = [1, 1]} : vector<16x32xf32> to vector<16x16xf32>
    %c10_296 = arith.constant 10 : index
    %c0_297 = arith.constant 0 : index
    %c0_298 = arith.constant 0 : index
    %546 = vector.load %arg14[%c10_296, %c0_297, %c0_298] : memref<12x16x16xf32, #tpu.memory_space<vmem>>, vector<1x16x16xf32>
    %547 = vector.shape_cast %546 : vector<1x16x16xf32> to vector<16x16xf32>
    %548 = vector.shape_cast %545 : vector<16x16xf32> to vector<1x16x16xf32>
    tpu.vector_store %arg14[%c10_296, %c0_297, %c0_298], %548 {strides = array<i32>} : memref<12x16x16xf32, #tpu.memory_space<vmem>>, vector<1x16x16xf32>,
    %549 = vector.extract_strided_slice %542 {offsets = [0, 16], sizes = [16, 16], strides = [1, 1]} : vector<16x32xf32> to vector<16x16xf32>
    %c1_299 = arith.constant 1 : index
    %c0_300 = arith.constant 0 : index
    %c0_301 = arith.constant 0 : index
    %550 = vector.load %arg15[%c1_299, %c0_300, %c0_301] : memref<12x16x16xf32, #tpu.memory_space<vmem>>, vector<1x16x16xf32>
    %551 = vector.shape_cast %550 : vector<1x16x16xf32> to vector<16x16xf32>
    %552 = vector.shape_cast %549 : vector<16x16xf32> to vector<1x16x16xf32>
    tpu.vector_store %arg15[%c1_299, %c0_300, %c0_301], %552 {strides = array<i32>} : memref<12x16x16xf32, #tpu.memory_space<vmem>>, vector<1x16x16xf32>,
    %c0_302 = arith.constant 0 : index
    %c0_303 = arith.constant 0 : index
    %553 = vector.load %arg16[%c0_302, %c0_303] : memref<16x32xf32, #tpu.memory_space<vmem>>, vector<16x32xf32>
    %c0_304 = arith.constant 0 : index
    %c0_305 = arith.constant 0 : index
    %554 = vector.load %arg6[%c0_304, %c0_305] : memref<32x128xf32, #tpu.memory_space<vmem>>, vector<32x128xf32>
    %cst_306 = arith.constant dense<0.000000e+00> : vector<16x128xf32>
    %555 = tpu.matmul %553, %554, %cst_306 {dimension_numbers = #tpu.dot_dimension_numbers<[1], [0], [0], [1], [0, 0, 1, 1], [], []>} : vector<16x32xf32>, vector<32x128xf32>, vector<16x128xf32> -> vector<16x128xf32>
    %c11_307 = arith.constant 11 : index
    %c0_308 = arith.constant 0 : index
    %c0_309 = arith.constant 0 : index
    %556 = vector.load %arg13[%c11_307, %c0_308, %c0_309] : memref<12x16x128xf32, #tpu.memory_space<vmem>>, vector<1x16x128xf32>
    %557 = vector.shape_cast %556 : vector<1x16x128xf32> to vector<16x128xf32>
    %c0_310 = arith.constant 0 : index
    %c0_311 = arith.constant 0 : index
    %c0_312 = arith.constant 0 : index
    %558 = vector.load %arg13[%c0_310, %c0_311, %c0_312] : memref<12x16x128xf32, #tpu.memory_space<vmem>>, vector<1x16x128xf32>
    %559 = vector.shape_cast %558 : vector<1x16x128xf32> to vector<16x128xf32>
    %560 = arith.select %57, %557, %559 : vector<16x128xi1>, vector<16x128xf32>
    %561 = arith.addf %555, %560 : vector<16x128xf32>
    %562 = vector.extract_strided_slice %561 {offsets = [0, 0], sizes = [16, 32], strides = [1, 1]} : vector<16x128xf32> to vector<16x32xf32>
    %563 = arith.negf %562 : vector<16x32xf32>
    %564 = math.exp %563 : vector<16x32xf32>
    %cst_313 = arith.constant 1.000000e+00 : f32
    %565 = vector.broadcast %cst_313 : f32 to vector<16x32xf32>
    %566 = arith.addf %565, %564 : vector<16x32xf32>
    %567 = arith.divf %565, %566 : vector<16x32xf32>
    %568 = vector.extract_strided_slice %561 {offsets = [0, 32], sizes = [16, 32], strides = [1, 1]} : vector<16x128xf32> to vector<16x32xf32>
    %569 = arith.negf %568 : vector<16x32xf32>
    %570 = math.exp %569 : vector<16x32xf32>
    %cst_314 = arith.constant 1.000000e+00 : f32
    %571 = vector.broadcast %cst_314 : f32 to vector<16x32xf32>
    %572 = arith.addf %571, %570 : vector<16x32xf32>
    %573 = arith.divf %571, %572 : vector<16x32xf32>
    %574 = vector.extract_strided_slice %561 {offsets = [0, 64], sizes = [16, 32], strides = [1, 1]} : vector<16x128xf32> to vector<16x32xf32>
    %575 = math.tanh %574 : vector<16x32xf32>
    %576 = vector.extract_strided_slice %561 {offsets = [0, 96], sizes = [16, 32], strides = [1, 1]} : vector<16x128xf32> to vector<16x32xf32>
    %577 = arith.negf %576 : vector<16x32xf32>
    %578 = math.exp %577 : vector<16x32xf32>
    %cst_315 = arith.constant 1.000000e+00 : f32
    %579 = vector.broadcast %cst_315 : f32 to vector<16x32xf32>
    %580 = arith.addf %579, %578 : vector<16x32xf32>
    %581 = arith.divf %579, %580 : vector<16x32xf32>
    %c0_316 = arith.constant 0 : index
    %c0_317 = arith.constant 0 : index
    %582 = vector.load %arg17[%c0_316, %c0_317] : memref<16x32xf32, #tpu.memory_space<vmem>>, vector<16x32xf32>
    %583 = arith.mulf %573, %582 : vector<16x32xf32>
    %584 = arith.mulf %567, %575 : vector<16x32xf32>
    %585 = arith.addf %583, %584 : vector<16x32xf32>
    %586 = math.tanh %585 : vector<16x32xf32>
    %587 = arith.mulf %581, %586 : vector<16x32xf32>
    %c0_318 = arith.constant 0 : index
    %c0_319 = arith.constant 0 : index
    %588 = vector.load %arg17[%c0_318, %c0_319] : memref<16x32xf32, #tpu.memory_space<vmem>>, vector<16x32xf32>
    tpu.vector_store %arg17[%c0_318, %c0_319], %585 {strides = array<i32>} : memref<16x32xf32, #tpu.memory_space<vmem>>, vector<16x32xf32>,
    %c0_320 = arith.constant 0 : index
    %c0_321 = arith.constant 0 : index
    %589 = vector.load %arg16[%c0_320, %c0_321] : memref<16x32xf32, #tpu.memory_space<vmem>>, vector<16x32xf32>
    tpu.vector_store %arg16[%c0_320, %c0_321], %587 {strides = array<i32>} : memref<16x32xf32, #tpu.memory_space<vmem>>, vector<16x32xf32>,
    %590 = vector.extract_strided_slice %587 {offsets = [0, 0], sizes = [16, 16], strides = [1, 1]} : vector<16x32xf32> to vector<16x16xf32>
    %c11_322 = arith.constant 11 : index
    %c0_323 = arith.constant 0 : index
    %c0_324 = arith.constant 0 : index
    %591 = vector.load %arg14[%c11_322, %c0_323, %c0_324] : memref<12x16x16xf32, #tpu.memory_space<vmem>>, vector<1x16x16xf32>
    %592 = vector.shape_cast %591 : vector<1x16x16xf32> to vector<16x16xf32>
    %593 = vector.shape_cast %590 : vector<16x16xf32> to vector<1x16x16xf32>
    tpu.vector_store %arg14[%c11_322, %c0_323, %c0_324], %593 {strides = array<i32>} : memref<12x16x16xf32, #tpu.memory_space<vmem>>, vector<1x16x16xf32>,
    %594 = vector.extract_strided_slice %587 {offsets = [0, 16], sizes = [16, 16], strides = [1, 1]} : vector<16x32xf32> to vector<16x16xf32>
    %c0_325 = arith.constant 0 : index
    %c0_326 = arith.constant 0 : index
    %c0_327 = arith.constant 0 : index
    %595 = vector.load %arg15[%c0_325, %c0_326, %c0_327] : memref<12x16x16xf32, #tpu.memory_space<vmem>>, vector<1x16x16xf32>
    %596 = vector.shape_cast %595 : vector<1x16x16xf32> to vector<16x16xf32>
    %597 = vector.shape_cast %594 : vector<16x16xf32> to vector<1x16x16xf32>
    tpu.vector_store %arg15[%c0_325, %c0_326, %c0_327], %597 {strides = array<i32>} : memref<12x16x16xf32, #tpu.memory_space<vmem>>, vector<1x16x16xf32>,
    %c0_328 = arith.constant 0 : index
    %c0_329 = arith.constant 0 : index
    %c0_330 = arith.constant 0 : index
    %598 = vector.load %arg14[%c0_328, %c0_329, %c0_330] : memref<12x16x16xf32, #tpu.memory_space<vmem>>, vector<12x16x16xf32>
    %c0_331 = arith.constant 0 : index
    %c0_332 = arith.constant 0 : index
    %c0_333 = arith.constant 0 : index
    %599 = vector.load %arg15[%c0_331, %c0_332, %c0_333] : memref<12x16x16xf32, #tpu.memory_space<vmem>>, vector<12x16x16xf32>
    %600 = tpu.concatenate %598, %599 in 2 : vector<12x16x16xf32>, vector<12x16x16xf32> -> vector<12x16x32xf32>
    %601 = vector.shape_cast %600 : vector<12x16x32xf32> to vector<192x32xf32>
    %c0_334 = arith.constant 0 : index
    %c0_335 = arith.constant 0 : index
    %602 = vector.load %arg7[%c0_334, %c0_335] : memref<32x8xf32, #tpu.memory_space<vmem>>, vector<32x8xf32>
    %cst_336 = arith.constant dense<0.000000e+00> : vector<192x8xf32>
    %603 = tpu.matmul %601, %602, %cst_336 {dimension_numbers = #tpu.dot_dimension_numbers<[1], [0], [0], [1], [0, 0, 1, 1], [], []>} : vector<192x32xf32>, vector<32x8xf32>, vector<192x8xf32> -> vector<192x8xf32>
    %c0_337 = arith.constant 0 : index
    %c0_338 = arith.constant 0 : index
    %604 = vector.load %arg8[%c0_337, %c0_338] : memref<1x8xf32, #tpu.memory_space<vmem>>, vector<1x8xf32>
    %605 = vector.broadcast %604 : vector<1x8xf32> to vector<192x8xf32>
    %606 = arith.addf %603, %605 : vector<192x8xf32>
    %607 = vector.shape_cast %606 : vector<192x8xf32> to vector<12x16x8xf32>
    %c0_339 = arith.constant 0 : index
    %c0_340 = arith.constant 0 : index
    %c0_341 = arith.constant 0 : index
    %608 = vector.load %arg1[%c0_339, %c0_340, %c0_341] : memref<12x16x8xf32, #tpu.memory_space<vmem>>, vector<12x16x8xf32>
    %609 = arith.addf %607, %608 : vector<12x16x8xf32>
    %c0_342 = arith.constant 0 : index
    %c0_343 = arith.constant 0 : index
    %c0_344 = arith.constant 0 : index
    %610 = vector.load %arg11[%c0_342, %c0_343, %c0_344] : memref<12x16x8xf32, #tpu.memory_space<vmem>>, vector<12x16x8xf32>
    tpu.vector_store %arg11[%c0_342, %c0_343, %c0_344], %609 {strides = array<i32>} : memref<12x16x8xf32, #tpu.memory_space<vmem>>, vector<12x16x8xf32>,
    %611 = vector.shape_cast %609 : vector<12x16x8xf32> to vector<192x8xf32>
    %c0_345 = arith.constant 0 : index
    %c0_346 = arith.constant 0 : index
    %612 = vector.load %arg9[%c0_345, %c0_346] : memref<8x40xf32, #tpu.memory_space<vmem>>, vector<8x40xf32>
    %cst_347 = arith.constant dense<0.000000e+00> : vector<192x40xf32>
    %613 = tpu.matmul %611, %612, %cst_347 {dimension_numbers = #tpu.dot_dimension_numbers<[1], [0], [0], [1], [0, 0, 1, 1], [], []>} : vector<192x8xf32>, vector<8x40xf32>, vector<192x40xf32> -> vector<192x40xf32>
    %c0_348 = arith.constant 0 : index
    %c0_349 = arith.constant 0 : index
    %614 = vector.load %arg10[%c0_348, %c0_349] : memref<1x40xf32, #tpu.memory_space<vmem>>, vector<1x40xf32>
    %615 = vector.broadcast %614 : vector<1x40xf32> to vector<192x40xf32>
    %616 = arith.addf %613, %615 : vector<192x40xf32>
    %c0_350 = arith.constant 0 : index
    %c0_351 = arith.constant 0 : index
    %617 = vector.load %arg12[%c0_350, %c0_351] : memref<192x40xf32, #tpu.memory_space<vmem>>, vector<192x40xf32>
    tpu.vector_store %arg12[%c0_350, %c0_351], %616 {strides = array<i32>} : memref<192x40xf32, #tpu.memory_space<vmem>>, vector<192x40xf32>,
    return
  }
  func.func @transform_0(%arg0: i32) -> (i32, i32, i32) {
    %c0_i32 = arith.constant 0 : i32
    %c0_i32_0 = arith.constant 0 : i32
    %c0_i32_1 = arith.constant 0 : i32
    %c0_i32_2 = arith.constant 0 : i32
    return %c0_i32, %c0_i32_0, %c0_i32_1 : i32, i32, i32
  }
  func.func @transform_1(%arg0: i32) -> (i32, i32) {
    %c0_i32 = arith.constant 0 : i32
    %c0_i32_0 = arith.constant 0 : i32
    %c0_i32_1 = arith.constant 0 : i32
    return %c0_i32, %c0_i32_0 : i32, i32
  }
  func.func @transform_2(%arg0: i32) -> (i32, i32) {
    %c0_i32 = arith.constant 0 : i32
    %c0_i32_0 = arith.constant 0 : i32
    %c0_i32_1 = arith.constant 0 : i32
    return %c0_i32, %c0_i32_0 : i32, i32
  }
  func.func @transform_3(%arg0: i32) -> (i32, i32) {
    %c0_i32 = arith.constant 0 : i32
    %c0_i32_0 = arith.constant 0 : i32
    %c0_i32_1 = arith.constant 0 : i32
    return %c0_i32, %c0_i32_0 : i32, i32
  }
  func.func @transform_4(%arg0: i32) -> (i32, i32) {
    %c0_i32 = arith.constant 0 : i32
    %c0_i32_0 = arith.constant 0 : i32
    %c0_i32_1 = arith.constant 0 : i32
    return %c0_i32, %c0_i32_0 : i32, i32
  }
  func.func @transform_5(%arg0: i32) -> (i32, i32) {
    %c0_i32 = arith.constant 0 : i32
    %c0_i32_0 = arith.constant 0 : i32
    %c0_i32_1 = arith.constant 0 : i32
    return %c0_i32, %c0_i32_0 : i32, i32
  }
  func.func @transform_6(%arg0: i32) -> (i32, i32) {
    %c0_i32 = arith.constant 0 : i32
    %c0_i32_0 = arith.constant 0 : i32
    %c0_i32_1 = arith.constant 0 : i32
    return %c0_i32, %c0_i32_0 : i32, i32
  }
  func.func @transform_7(%arg0: i32) -> (i32, i32) {
    %c0_i32 = arith.constant 0 : i32
    %c0_i32_0 = arith.constant 0 : i32
    %c0_i32_1 = arith.constant 0 : i32
    return %c0_i32, %c0_i32_0 : i32, i32
  }
  func.func @transform_8(%arg0: i32) -> (i32, i32) {
    %c0_i32 = arith.constant 0 : i32
    %c0_i32_0 = arith.constant 0 : i32
    %c0_i32_1 = arith.constant 0 : i32
    return %c0_i32, %c0_i32_0 : i32, i32
  }
  func.func @transform_9(%arg0: i32) -> (i32, i32) {
    %c0_i32 = arith.constant 0 : i32
    %c0_i32_0 = arith.constant 0 : i32
    %c0_i32_1 = arith.constant 0 : i32
    return %c0_i32, %c0_i32_0 : i32, i32
  }
  func.func @transform_10(%arg0: i32) -> (i32, i32, i32) {
    %c0_i32 = arith.constant 0 : i32
    %c0_i32_0 = arith.constant 0 : i32
    %c0_i32_1 = arith.constant 0 : i32
    %c0_i32_2 = arith.constant 0 : i32
    return %c0_i32, %c0_i32_0, %c0_i32_1 : i32, i32, i32
  }
  func.func @transform_11(%arg0: i32) -> (i32, i32) {
    %c0_i32 = arith.constant 0 : i32
    %c0_i32_0 = arith.constant 0 : i32
    %c0_i32_1 = arith.constant 0 : i32
    return %c0_i32, %c0_i32_0 : i32, i32
  }
}

module attributes {stable_mosaic.version = 11 : i64} {
  func.func @_branch_kernel(%arg0: i32, %arg1: memref<8x24x8xf32, #tpu.memory_space<vmem>>, %arg2: memref<1x8xf32, #tpu.memory_space<vmem>>, %arg3: memref<1x8xf32, #tpu.memory_space<vmem>>, %arg4: memref<8x128xf32, #tpu.memory_space<vmem>>, %arg5: memref<1x128xf32, #tpu.memory_space<vmem>>, %arg6: memref<32x128xf32, #tpu.memory_space<vmem>>, %arg7: memref<32x8xf32, #tpu.memory_space<vmem>>, %arg8: memref<1x8xf32, #tpu.memory_space<vmem>>, %arg9: memref<8x24x8xf32, #tpu.memory_space<vmem>>, %arg10: memref<8x24x128xf32, #tpu.memory_space<vmem>>, %arg11: memref<8x24x16xf32, #tpu.memory_space<vmem>>, %arg12: memref<8x24x16xf32, #tpu.memory_space<vmem>>, %arg13: memref<24x32xf32, #tpu.memory_space<vmem>>, %arg14: memref<24x32xf32, #tpu.memory_space<vmem>>) attributes {dimension_semantics = [#tpu.dimension_semantics<arbitrary>], iteration_bounds = array<i64: 1>, scalar_prefetch = 0 : i64, scratch_operands = 5 : i64, tpu.core_type = #tpu.core_type<tc>, window_params = [{pipeline_mode = #tpu.pipeline_mode<synchronous>, transform_indices = @transform_0, window_bounds = array<i64: 8, 24, 8>}, {pipeline_mode = #tpu.pipeline_mode<synchronous>, transform_indices = @transform_1, window_bounds = array<i64: 1, 8>}, {pipeline_mode = #tpu.pipeline_mode<synchronous>, transform_indices = @transform_2, window_bounds = array<i64: 1, 8>}, {pipeline_mode = #tpu.pipeline_mode<synchronous>, transform_indices = @transform_3, window_bounds = array<i64: 8, 128>}, {pipeline_mode = #tpu.pipeline_mode<synchronous>, transform_indices = @transform_4, window_bounds = array<i64: 1, 128>}, {pipeline_mode = #tpu.pipeline_mode<synchronous>, transform_indices = @transform_5, window_bounds = array<i64: 32, 128>}, {pipeline_mode = #tpu.pipeline_mode<synchronous>, transform_indices = @transform_6, window_bounds = array<i64: 32, 8>}, {pipeline_mode = #tpu.pipeline_mode<synchronous>, transform_indices = @transform_7, window_bounds = array<i64: 1, 8>}, {pipeline_mode = #tpu.pipeline_mode<synchronous>, transform_indices = @transform_8, window_bounds = array<i64: 8, 24, 8>}]} {
    %c0 = arith.constant 0 : index
    %c0_0 = arith.constant 0 : index
    %c0_1 = arith.constant 0 : index
    %0 = vector.load %arg1[%c0, %c0_0, %c0_1] : memref<8x24x8xf32, #tpu.memory_space<vmem>>, vector<8x24x8xf32>
    %cst = arith.constant dense<0.000000e+00> : vector<8x24xf32>
    %1 = vector.multi_reduction <add>, %0, %cst [2] : vector<8x24x8xf32> to vector<8x24xf32>
    %2 = vector.shape_cast %1 : vector<8x24xf32> to vector<8x24x1xf32>
    %cst_2 = arith.constant 8.000000e+00 : f32
    %3 = vector.broadcast %cst_2 : f32 to vector<8x24x1xf32>
    %4 = arith.divf %2, %3 : vector<8x24x1xf32>
    %5 = vector.broadcast %4 : vector<8x24x1xf32> to vector<8x24x8xf32>
    %6 = arith.subf %0, %5 : vector<8x24x8xf32>
    %7 = arith.mulf %6, %6 : vector<8x24x8xf32>
    %cst_3 = arith.constant dense<0.000000e+00> : vector<8x24xf32>
    %8 = vector.multi_reduction <add>, %7, %cst_3 [2] : vector<8x24x8xf32> to vector<8x24xf32>
    %9 = vector.shape_cast %8 : vector<8x24xf32> to vector<8x24x1xf32>
    %cst_4 = arith.constant 8.000000e+00 : f32
    %10 = vector.broadcast %cst_4 : f32 to vector<8x24x1xf32>
    %11 = arith.divf %9, %10 : vector<8x24x1xf32>
    %12 = vector.broadcast %4 : vector<8x24x1xf32> to vector<8x24x8xf32>
    %13 = arith.subf %0, %12 : vector<8x24x8xf32>
    %cst_5 = arith.constant 9.99999974E-6 : f32
    %14 = vector.broadcast %cst_5 : f32 to vector<8x24x1xf32>
    %15 = arith.addf %11, %14 : vector<8x24x1xf32>
    %16 = math.rsqrt %15 : vector<8x24x1xf32>
    %17 = vector.broadcast %16 : vector<8x24x1xf32> to vector<8x24x8xf32>
    %18 = arith.mulf %13, %17 : vector<8x24x8xf32>
    %c0_6 = arith.constant 0 : index
    %c0_7 = arith.constant 0 : index
    %19 = vector.load %arg2[%c0_6, %c0_7] : memref<1x8xf32, #tpu.memory_space<vmem>>, vector<1x8xf32>
    %20 = vector.shape_cast %19 : vector<1x8xf32> to vector<1x1x8xf32>
    %21 = vector.broadcast %20 : vector<1x1x8xf32> to vector<8x24x8xf32>
    %22 = arith.mulf %18, %21 : vector<8x24x8xf32>
    %c0_8 = arith.constant 0 : index
    %c0_9 = arith.constant 0 : index
    %23 = vector.load %arg3[%c0_8, %c0_9] : memref<1x8xf32, #tpu.memory_space<vmem>>, vector<1x8xf32>
    %24 = vector.shape_cast %23 : vector<1x8xf32> to vector<1x1x8xf32>
    %25 = vector.broadcast %24 : vector<1x1x8xf32> to vector<8x24x8xf32>
    %26 = arith.addf %22, %25 : vector<8x24x8xf32>
    %27 = vector.shape_cast %26 : vector<8x24x8xf32> to vector<192x8xf32>
    %c0_10 = arith.constant 0 : index
    %c0_11 = arith.constant 0 : index
    %28 = vector.load %arg4[%c0_10, %c0_11] : memref<8x128xf32, #tpu.memory_space<vmem>>, vector<8x128xf32>
    %cst_12 = arith.constant dense<0.000000e+00> : vector<192x128xf32>
    %29 = tpu.matmul %27, %28, %cst_12 {dimension_numbers = #tpu.dot_dimension_numbers<[1], [0], [0], [1], [0, 0, 1, 1], [], []>} : vector<192x8xf32>, vector<8x128xf32>, vector<192x128xf32> -> vector<192x128xf32>
    %c0_13 = arith.constant 0 : index
    %c0_14 = arith.constant 0 : index
    %30 = vector.load %arg5[%c0_13, %c0_14] : memref<1x128xf32, #tpu.memory_space<vmem>>, vector<1x128xf32>
    %31 = vector.broadcast %30 : vector<1x128xf32> to vector<192x128xf32>
    %32 = arith.addf %29, %31 : vector<192x128xf32>
    %33 = vector.shape_cast %32 : vector<192x128xf32> to vector<8x24x128xf32>
    %c0_15 = arith.constant 0 : index
    %c0_16 = arith.constant 0 : index
    %c0_17 = arith.constant 0 : index
    %34 = vector.load %arg10[%c0_15, %c0_16, %c0_17] : memref<8x24x128xf32, #tpu.memory_space<vmem>>, vector<8x24x128xf32>
    tpu.vector_store %arg10[%c0_15, %c0_16, %c0_17], %33 {strides = array<i32>} : memref<8x24x128xf32, #tpu.memory_space<vmem>>, vector<8x24x128xf32>,
    %cst_18 = arith.constant 0.000000e+00 : f32
    %35 = vector.broadcast %cst_18 : f32 to vector<24x32xf32>
    %c0_19 = arith.constant 0 : index
    %c0_20 = arith.constant 0 : index
    %36 = vector.load %arg13[%c0_19, %c0_20] : memref<24x32xf32, #tpu.memory_space<vmem>>, vector<24x32xf32>
    tpu.vector_store %arg13[%c0_19, %c0_20], %35 {strides = array<i32>} : memref<24x32xf32, #tpu.memory_space<vmem>>, vector<24x32xf32>,
    %cst_21 = arith.constant 0.000000e+00 : f32
    %37 = vector.broadcast %cst_21 : f32 to vector<24x32xf32>
    %c0_22 = arith.constant 0 : index
    %c0_23 = arith.constant 0 : index
    %38 = vector.load %arg14[%c0_22, %c0_23] : memref<24x32xf32, #tpu.memory_space<vmem>>, vector<24x32xf32>
    tpu.vector_store %arg14[%c0_22, %c0_23], %37 {strides = array<i32>} : memref<24x32xf32, #tpu.memory_space<vmem>>, vector<24x32xf32>,
    %39 = tpu.iota {dimensions = array<i32: 1>} : vector<24x128xi32>
    %c32_i32 = arith.constant 32 : i32
    %c0_i32 = arith.constant 0 : i32
    %40 = arith.cmpi eq, %c32_i32, %c0_i32 : i32
    %c1_i32 = arith.constant 1 : i32
    %41 = arith.select %40, %c1_i32, %c32_i32 : i32
    %42 = vector.broadcast %41 : i32 to vector<24x128xi32>
    %43 = arith.remsi %39, %42 : vector<24x128xi32>
    %c0_i32_24 = arith.constant 0 : i32
    %44 = vector.broadcast %c0_i32_24 : i32 to vector<24x128xi32>
    %45 = arith.cmpi ne, %43, %44 : vector<24x128xi32>
    %c0_i32_25 = arith.constant 0 : i32
    %46 = vector.broadcast %c0_i32_25 : i32 to vector<24x128xi32>
    %47 = arith.cmpi slt, %43, %46 : vector<24x128xi32>
    %c0_i32_26 = arith.constant 0 : i32
    %48 = arith.cmpi slt, %41, %c0_i32_26 : i32
    %49 = vector.broadcast %48 : i1 to vector<24x128xi1>
    %50 = vector.broadcast %49 : vector<24x128xi1> to vector<24x128xi1>
    %51 = arith.xori %47, %50 : vector<24x128xi1>
    %52 = arith.andi %51, %45 : vector<24x128xi1>
    %53 = vector.broadcast %41 : i32 to vector<24x128xi32>
    %54 = arith.addi %43, %53 : vector<24x128xi32>
    %55 = arith.select %52, %54, %43 : vector<24x128xi1>, vector<24x128xi32>
    %c16_i32 = arith.constant 16 : i32
    %56 = vector.broadcast %c16_i32 : i32 to vector<24x128xi32>
    %57 = arith.cmpi slt, %55, %56 : vector<24x128xi32>
    %c0_27 = arith.constant 0 : index
    %c0_28 = arith.constant 0 : index
    %58 = vector.load %arg13[%c0_27, %c0_28] : memref<24x32xf32, #tpu.memory_space<vmem>>, vector<24x32xf32>
    %c0_29 = arith.constant 0 : index
    %c0_30 = arith.constant 0 : index
    %59 = vector.load %arg6[%c0_29, %c0_30] : memref<32x128xf32, #tpu.memory_space<vmem>>, vector<32x128xf32>
    %cst_31 = arith.constant dense<0.000000e+00> : vector<24x128xf32>
    %60 = tpu.matmul %58, %59, %cst_31 {dimension_numbers = #tpu.dot_dimension_numbers<[1], [0], [0], [1], [0, 0, 1, 1], [], []>} : vector<24x32xf32>, vector<32x128xf32>, vector<24x128xf32> -> vector<24x128xf32>
    %c0_32 = arith.constant 0 : index
    %c0_33 = arith.constant 0 : index
    %c0_34 = arith.constant 0 : index
    %61 = vector.load %arg10[%c0_32, %c0_33, %c0_34] : memref<8x24x128xf32, #tpu.memory_space<vmem>>, vector<1x24x128xf32>
    %62 = vector.shape_cast %61 : vector<1x24x128xf32> to vector<24x128xf32>
    %c7 = arith.constant 7 : index
    %c0_35 = arith.constant 0 : index
    %c0_36 = arith.constant 0 : index
    %63 = vector.load %arg10[%c7, %c0_35, %c0_36] : memref<8x24x128xf32, #tpu.memory_space<vmem>>, vector<1x24x128xf32>
    %64 = vector.shape_cast %63 : vector<1x24x128xf32> to vector<24x128xf32>
    %65 = arith.select %57, %62, %64 : vector<24x128xi1>, vector<24x128xf32>
    %66 = arith.addf %60, %65 : vector<24x128xf32>
    %67 = vector.extract_strided_slice %66 {offsets = [0, 0], sizes = [24, 32], strides = [1, 1]} : vector<24x128xf32> to vector<24x32xf32>
    %68 = arith.negf %67 : vector<24x32xf32>
    %69 = math.exp %68 : vector<24x32xf32>
    %cst_37 = arith.constant 1.000000e+00 : f32
    %70 = vector.broadcast %cst_37 : f32 to vector<24x32xf32>
    %71 = arith.addf %70, %69 : vector<24x32xf32>
    %72 = arith.divf %70, %71 : vector<24x32xf32>
    %73 = vector.extract_strided_slice %66 {offsets = [0, 32], sizes = [24, 32], strides = [1, 1]} : vector<24x128xf32> to vector<24x32xf32>
    %74 = arith.negf %73 : vector<24x32xf32>
    %75 = math.exp %74 : vector<24x32xf32>
    %cst_38 = arith.constant 1.000000e+00 : f32
    %76 = vector.broadcast %cst_38 : f32 to vector<24x32xf32>
    %77 = arith.addf %76, %75 : vector<24x32xf32>
    %78 = arith.divf %76, %77 : vector<24x32xf32>
    %79 = vector.extract_strided_slice %66 {offsets = [0, 64], sizes = [24, 32], strides = [1, 1]} : vector<24x128xf32> to vector<24x32xf32>
    %80 = math.tanh %79 : vector<24x32xf32>
    %81 = vector.extract_strided_slice %66 {offsets = [0, 96], sizes = [24, 32], strides = [1, 1]} : vector<24x128xf32> to vector<24x32xf32>
    %82 = arith.negf %81 : vector<24x32xf32>
    %83 = math.exp %82 : vector<24x32xf32>
    %cst_39 = arith.constant 1.000000e+00 : f32
    %84 = vector.broadcast %cst_39 : f32 to vector<24x32xf32>
    %85 = arith.addf %84, %83 : vector<24x32xf32>
    %86 = arith.divf %84, %85 : vector<24x32xf32>
    %c0_40 = arith.constant 0 : index
    %c0_41 = arith.constant 0 : index
    %87 = vector.load %arg14[%c0_40, %c0_41] : memref<24x32xf32, #tpu.memory_space<vmem>>, vector<24x32xf32>
    %88 = arith.mulf %78, %87 : vector<24x32xf32>
    %89 = arith.mulf %72, %80 : vector<24x32xf32>
    %90 = arith.addf %88, %89 : vector<24x32xf32>
    %91 = math.tanh %90 : vector<24x32xf32>
    %92 = arith.mulf %86, %91 : vector<24x32xf32>
    %c0_42 = arith.constant 0 : index
    %c0_43 = arith.constant 0 : index
    %93 = vector.load %arg14[%c0_42, %c0_43] : memref<24x32xf32, #tpu.memory_space<vmem>>, vector<24x32xf32>
    tpu.vector_store %arg14[%c0_42, %c0_43], %90 {strides = array<i32>} : memref<24x32xf32, #tpu.memory_space<vmem>>, vector<24x32xf32>,
    %c0_44 = arith.constant 0 : index
    %c0_45 = arith.constant 0 : index
    %94 = vector.load %arg13[%c0_44, %c0_45] : memref<24x32xf32, #tpu.memory_space<vmem>>, vector<24x32xf32>
    tpu.vector_store %arg13[%c0_44, %c0_45], %92 {strides = array<i32>} : memref<24x32xf32, #tpu.memory_space<vmem>>, vector<24x32xf32>,
    %95 = vector.extract_strided_slice %92 {offsets = [0, 0], sizes = [24, 16], strides = [1, 1]} : vector<24x32xf32> to vector<24x16xf32>
    %c0_46 = arith.constant 0 : index
    %c0_47 = arith.constant 0 : index
    %c0_48 = arith.constant 0 : index
    %96 = vector.load %arg11[%c0_46, %c0_47, %c0_48] : memref<8x24x16xf32, #tpu.memory_space<vmem>>, vector<1x24x16xf32>
    %97 = vector.shape_cast %96 : vector<1x24x16xf32> to vector<24x16xf32>
    %98 = vector.shape_cast %95 : vector<24x16xf32> to vector<1x24x16xf32>
    tpu.vector_store %arg11[%c0_46, %c0_47, %c0_48], %98 {strides = array<i32>} : memref<8x24x16xf32, #tpu.memory_space<vmem>>, vector<1x24x16xf32>,
    %99 = vector.extract_strided_slice %92 {offsets = [0, 16], sizes = [24, 16], strides = [1, 1]} : vector<24x32xf32> to vector<24x16xf32>
    %c7_49 = arith.constant 7 : index
    %c0_50 = arith.constant 0 : index
    %c0_51 = arith.constant 0 : index
    %100 = vector.load %arg12[%c7_49, %c0_50, %c0_51] : memref<8x24x16xf32, #tpu.memory_space<vmem>>, vector<1x24x16xf32>
    %101 = vector.shape_cast %100 : vector<1x24x16xf32> to vector<24x16xf32>
    %102 = vector.shape_cast %99 : vector<24x16xf32> to vector<1x24x16xf32>
    tpu.vector_store %arg12[%c7_49, %c0_50, %c0_51], %102 {strides = array<i32>} : memref<8x24x16xf32, #tpu.memory_space<vmem>>, vector<1x24x16xf32>,
    %c0_52 = arith.constant 0 : index
    %c0_53 = arith.constant 0 : index
    %103 = vector.load %arg13[%c0_52, %c0_53] : memref<24x32xf32, #tpu.memory_space<vmem>>, vector<24x32xf32>
    %c0_54 = arith.constant 0 : index
    %c0_55 = arith.constant 0 : index
    %104 = vector.load %arg6[%c0_54, %c0_55] : memref<32x128xf32, #tpu.memory_space<vmem>>, vector<32x128xf32>
    %cst_56 = arith.constant dense<0.000000e+00> : vector<24x128xf32>
    %105 = tpu.matmul %103, %104, %cst_56 {dimension_numbers = #tpu.dot_dimension_numbers<[1], [0], [0], [1], [0, 0, 1, 1], [], []>} : vector<24x32xf32>, vector<32x128xf32>, vector<24x128xf32> -> vector<24x128xf32>
    %c1 = arith.constant 1 : index
    %c0_57 = arith.constant 0 : index
    %c0_58 = arith.constant 0 : index
    %106 = vector.load %arg10[%c1, %c0_57, %c0_58] : memref<8x24x128xf32, #tpu.memory_space<vmem>>, vector<1x24x128xf32>
    %107 = vector.shape_cast %106 : vector<1x24x128xf32> to vector<24x128xf32>
    %c6 = arith.constant 6 : index
    %c0_59 = arith.constant 0 : index
    %c0_60 = arith.constant 0 : index
    %108 = vector.load %arg10[%c6, %c0_59, %c0_60] : memref<8x24x128xf32, #tpu.memory_space<vmem>>, vector<1x24x128xf32>
    %109 = vector.shape_cast %108 : vector<1x24x128xf32> to vector<24x128xf32>
    %110 = arith.select %57, %107, %109 : vector<24x128xi1>, vector<24x128xf32>
    %111 = arith.addf %105, %110 : vector<24x128xf32>
    %112 = vector.extract_strided_slice %111 {offsets = [0, 0], sizes = [24, 32], strides = [1, 1]} : vector<24x128xf32> to vector<24x32xf32>
    %113 = arith.negf %112 : vector<24x32xf32>
    %114 = math.exp %113 : vector<24x32xf32>
    %cst_61 = arith.constant 1.000000e+00 : f32
    %115 = vector.broadcast %cst_61 : f32 to vector<24x32xf32>
    %116 = arith.addf %115, %114 : vector<24x32xf32>
    %117 = arith.divf %115, %116 : vector<24x32xf32>
    %118 = vector.extract_strided_slice %111 {offsets = [0, 32], sizes = [24, 32], strides = [1, 1]} : vector<24x128xf32> to vector<24x32xf32>
    %119 = arith.negf %118 : vector<24x32xf32>
    %120 = math.exp %119 : vector<24x32xf32>
    %cst_62 = arith.constant 1.000000e+00 : f32
    %121 = vector.broadcast %cst_62 : f32 to vector<24x32xf32>
    %122 = arith.addf %121, %120 : vector<24x32xf32>
    %123 = arith.divf %121, %122 : vector<24x32xf32>
    %124 = vector.extract_strided_slice %111 {offsets = [0, 64], sizes = [24, 32], strides = [1, 1]} : vector<24x128xf32> to vector<24x32xf32>
    %125 = math.tanh %124 : vector<24x32xf32>
    %126 = vector.extract_strided_slice %111 {offsets = [0, 96], sizes = [24, 32], strides = [1, 1]} : vector<24x128xf32> to vector<24x32xf32>
    %127 = arith.negf %126 : vector<24x32xf32>
    %128 = math.exp %127 : vector<24x32xf32>
    %cst_63 = arith.constant 1.000000e+00 : f32
    %129 = vector.broadcast %cst_63 : f32 to vector<24x32xf32>
    %130 = arith.addf %129, %128 : vector<24x32xf32>
    %131 = arith.divf %129, %130 : vector<24x32xf32>
    %c0_64 = arith.constant 0 : index
    %c0_65 = arith.constant 0 : index
    %132 = vector.load %arg14[%c0_64, %c0_65] : memref<24x32xf32, #tpu.memory_space<vmem>>, vector<24x32xf32>
    %133 = arith.mulf %123, %132 : vector<24x32xf32>
    %134 = arith.mulf %117, %125 : vector<24x32xf32>
    %135 = arith.addf %133, %134 : vector<24x32xf32>
    %136 = math.tanh %135 : vector<24x32xf32>
    %137 = arith.mulf %131, %136 : vector<24x32xf32>
    %c0_66 = arith.constant 0 : index
    %c0_67 = arith.constant 0 : index
    %138 = vector.load %arg14[%c0_66, %c0_67] : memref<24x32xf32, #tpu.memory_space<vmem>>, vector<24x32xf32>
    tpu.vector_store %arg14[%c0_66, %c0_67], %135 {strides = array<i32>} : memref<24x32xf32, #tpu.memory_space<vmem>>, vector<24x32xf32>,
    %c0_68 = arith.constant 0 : index
    %c0_69 = arith.constant 0 : index
    %139 = vector.load %arg13[%c0_68, %c0_69] : memref<24x32xf32, #tpu.memory_space<vmem>>, vector<24x32xf32>
    tpu.vector_store %arg13[%c0_68, %c0_69], %137 {strides = array<i32>} : memref<24x32xf32, #tpu.memory_space<vmem>>, vector<24x32xf32>,
    %140 = vector.extract_strided_slice %137 {offsets = [0, 0], sizes = [24, 16], strides = [1, 1]} : vector<24x32xf32> to vector<24x16xf32>
    %c1_70 = arith.constant 1 : index
    %c0_71 = arith.constant 0 : index
    %c0_72 = arith.constant 0 : index
    %141 = vector.load %arg11[%c1_70, %c0_71, %c0_72] : memref<8x24x16xf32, #tpu.memory_space<vmem>>, vector<1x24x16xf32>
    %142 = vector.shape_cast %141 : vector<1x24x16xf32> to vector<24x16xf32>
    %143 = vector.shape_cast %140 : vector<24x16xf32> to vector<1x24x16xf32>
    tpu.vector_store %arg11[%c1_70, %c0_71, %c0_72], %143 {strides = array<i32>} : memref<8x24x16xf32, #tpu.memory_space<vmem>>, vector<1x24x16xf32>,
    %144 = vector.extract_strided_slice %137 {offsets = [0, 16], sizes = [24, 16], strides = [1, 1]} : vector<24x32xf32> to vector<24x16xf32>
    %c6_73 = arith.constant 6 : index
    %c0_74 = arith.constant 0 : index
    %c0_75 = arith.constant 0 : index
    %145 = vector.load %arg12[%c6_73, %c0_74, %c0_75] : memref<8x24x16xf32, #tpu.memory_space<vmem>>, vector<1x24x16xf32>
    %146 = vector.shape_cast %145 : vector<1x24x16xf32> to vector<24x16xf32>
    %147 = vector.shape_cast %144 : vector<24x16xf32> to vector<1x24x16xf32>
    tpu.vector_store %arg12[%c6_73, %c0_74, %c0_75], %147 {strides = array<i32>} : memref<8x24x16xf32, #tpu.memory_space<vmem>>, vector<1x24x16xf32>,
    %c0_76 = arith.constant 0 : index
    %c0_77 = arith.constant 0 : index
    %148 = vector.load %arg13[%c0_76, %c0_77] : memref<24x32xf32, #tpu.memory_space<vmem>>, vector<24x32xf32>
    %c0_78 = arith.constant 0 : index
    %c0_79 = arith.constant 0 : index
    %149 = vector.load %arg6[%c0_78, %c0_79] : memref<32x128xf32, #tpu.memory_space<vmem>>, vector<32x128xf32>
    %cst_80 = arith.constant dense<0.000000e+00> : vector<24x128xf32>
    %150 = tpu.matmul %148, %149, %cst_80 {dimension_numbers = #tpu.dot_dimension_numbers<[1], [0], [0], [1], [0, 0, 1, 1], [], []>} : vector<24x32xf32>, vector<32x128xf32>, vector<24x128xf32> -> vector<24x128xf32>
    %c2 = arith.constant 2 : index
    %c0_81 = arith.constant 0 : index
    %c0_82 = arith.constant 0 : index
    %151 = vector.load %arg10[%c2, %c0_81, %c0_82] : memref<8x24x128xf32, #tpu.memory_space<vmem>>, vector<1x24x128xf32>
    %152 = vector.shape_cast %151 : vector<1x24x128xf32> to vector<24x128xf32>
    %c5 = arith.constant 5 : index
    %c0_83 = arith.constant 0 : index
    %c0_84 = arith.constant 0 : index
    %153 = vector.load %arg10[%c5, %c0_83, %c0_84] : memref<8x24x128xf32, #tpu.memory_space<vmem>>, vector<1x24x128xf32>
    %154 = vector.shape_cast %153 : vector<1x24x128xf32> to vector<24x128xf32>
    %155 = arith.select %57, %152, %154 : vector<24x128xi1>, vector<24x128xf32>
    %156 = arith.addf %150, %155 : vector<24x128xf32>
    %157 = vector.extract_strided_slice %156 {offsets = [0, 0], sizes = [24, 32], strides = [1, 1]} : vector<24x128xf32> to vector<24x32xf32>
    %158 = arith.negf %157 : vector<24x32xf32>
    %159 = math.exp %158 : vector<24x32xf32>
    %cst_85 = arith.constant 1.000000e+00 : f32
    %160 = vector.broadcast %cst_85 : f32 to vector<24x32xf32>
    %161 = arith.addf %160, %159 : vector<24x32xf32>
    %162 = arith.divf %160, %161 : vector<24x32xf32>
    %163 = vector.extract_strided_slice %156 {offsets = [0, 32], sizes = [24, 32], strides = [1, 1]} : vector<24x128xf32> to vector<24x32xf32>
    %164 = arith.negf %163 : vector<24x32xf32>
    %165 = math.exp %164 : vector<24x32xf32>
    %cst_86 = arith.constant 1.000000e+00 : f32
    %166 = vector.broadcast %cst_86 : f32 to vector<24x32xf32>
    %167 = arith.addf %166, %165 : vector<24x32xf32>
    %168 = arith.divf %166, %167 : vector<24x32xf32>
    %169 = vector.extract_strided_slice %156 {offsets = [0, 64], sizes = [24, 32], strides = [1, 1]} : vector<24x128xf32> to vector<24x32xf32>
    %170 = math.tanh %169 : vector<24x32xf32>
    %171 = vector.extract_strided_slice %156 {offsets = [0, 96], sizes = [24, 32], strides = [1, 1]} : vector<24x128xf32> to vector<24x32xf32>
    %172 = arith.negf %171 : vector<24x32xf32>
    %173 = math.exp %172 : vector<24x32xf32>
    %cst_87 = arith.constant 1.000000e+00 : f32
    %174 = vector.broadcast %cst_87 : f32 to vector<24x32xf32>
    %175 = arith.addf %174, %173 : vector<24x32xf32>
    %176 = arith.divf %174, %175 : vector<24x32xf32>
    %c0_88 = arith.constant 0 : index
    %c0_89 = arith.constant 0 : index
    %177 = vector.load %arg14[%c0_88, %c0_89] : memref<24x32xf32, #tpu.memory_space<vmem>>, vector<24x32xf32>
    %178 = arith.mulf %168, %177 : vector<24x32xf32>
    %179 = arith.mulf %162, %170 : vector<24x32xf32>
    %180 = arith.addf %178, %179 : vector<24x32xf32>
    %181 = math.tanh %180 : vector<24x32xf32>
    %182 = arith.mulf %176, %181 : vector<24x32xf32>
    %c0_90 = arith.constant 0 : index
    %c0_91 = arith.constant 0 : index
    %183 = vector.load %arg14[%c0_90, %c0_91] : memref<24x32xf32, #tpu.memory_space<vmem>>, vector<24x32xf32>
    tpu.vector_store %arg14[%c0_90, %c0_91], %180 {strides = array<i32>} : memref<24x32xf32, #tpu.memory_space<vmem>>, vector<24x32xf32>,
    %c0_92 = arith.constant 0 : index
    %c0_93 = arith.constant 0 : index
    %184 = vector.load %arg13[%c0_92, %c0_93] : memref<24x32xf32, #tpu.memory_space<vmem>>, vector<24x32xf32>
    tpu.vector_store %arg13[%c0_92, %c0_93], %182 {strides = array<i32>} : memref<24x32xf32, #tpu.memory_space<vmem>>, vector<24x32xf32>,
    %185 = vector.extract_strided_slice %182 {offsets = [0, 0], sizes = [24, 16], strides = [1, 1]} : vector<24x32xf32> to vector<24x16xf32>
    %c2_94 = arith.constant 2 : index
    %c0_95 = arith.constant 0 : index
    %c0_96 = arith.constant 0 : index
    %186 = vector.load %arg11[%c2_94, %c0_95, %c0_96] : memref<8x24x16xf32, #tpu.memory_space<vmem>>, vector<1x24x16xf32>
    %187 = vector.shape_cast %186 : vector<1x24x16xf32> to vector<24x16xf32>
    %188 = vector.shape_cast %185 : vector<24x16xf32> to vector<1x24x16xf32>
    tpu.vector_store %arg11[%c2_94, %c0_95, %c0_96], %188 {strides = array<i32>} : memref<8x24x16xf32, #tpu.memory_space<vmem>>, vector<1x24x16xf32>,
    %189 = vector.extract_strided_slice %182 {offsets = [0, 16], sizes = [24, 16], strides = [1, 1]} : vector<24x32xf32> to vector<24x16xf32>
    %c5_97 = arith.constant 5 : index
    %c0_98 = arith.constant 0 : index
    %c0_99 = arith.constant 0 : index
    %190 = vector.load %arg12[%c5_97, %c0_98, %c0_99] : memref<8x24x16xf32, #tpu.memory_space<vmem>>, vector<1x24x16xf32>
    %191 = vector.shape_cast %190 : vector<1x24x16xf32> to vector<24x16xf32>
    %192 = vector.shape_cast %189 : vector<24x16xf32> to vector<1x24x16xf32>
    tpu.vector_store %arg12[%c5_97, %c0_98, %c0_99], %192 {strides = array<i32>} : memref<8x24x16xf32, #tpu.memory_space<vmem>>, vector<1x24x16xf32>,
    %c0_100 = arith.constant 0 : index
    %c0_101 = arith.constant 0 : index
    %193 = vector.load %arg13[%c0_100, %c0_101] : memref<24x32xf32, #tpu.memory_space<vmem>>, vector<24x32xf32>
    %c0_102 = arith.constant 0 : index
    %c0_103 = arith.constant 0 : index
    %194 = vector.load %arg6[%c0_102, %c0_103] : memref<32x128xf32, #tpu.memory_space<vmem>>, vector<32x128xf32>
    %cst_104 = arith.constant dense<0.000000e+00> : vector<24x128xf32>
    %195 = tpu.matmul %193, %194, %cst_104 {dimension_numbers = #tpu.dot_dimension_numbers<[1], [0], [0], [1], [0, 0, 1, 1], [], []>} : vector<24x32xf32>, vector<32x128xf32>, vector<24x128xf32> -> vector<24x128xf32>
    %c3 = arith.constant 3 : index
    %c0_105 = arith.constant 0 : index
    %c0_106 = arith.constant 0 : index
    %196 = vector.load %arg10[%c3, %c0_105, %c0_106] : memref<8x24x128xf32, #tpu.memory_space<vmem>>, vector<1x24x128xf32>
    %197 = vector.shape_cast %196 : vector<1x24x128xf32> to vector<24x128xf32>
    %c4 = arith.constant 4 : index
    %c0_107 = arith.constant 0 : index
    %c0_108 = arith.constant 0 : index
    %198 = vector.load %arg10[%c4, %c0_107, %c0_108] : memref<8x24x128xf32, #tpu.memory_space<vmem>>, vector<1x24x128xf32>
    %199 = vector.shape_cast %198 : vector<1x24x128xf32> to vector<24x128xf32>
    %200 = arith.select %57, %197, %199 : vector<24x128xi1>, vector<24x128xf32>
    %201 = arith.addf %195, %200 : vector<24x128xf32>
    %202 = vector.extract_strided_slice %201 {offsets = [0, 0], sizes = [24, 32], strides = [1, 1]} : vector<24x128xf32> to vector<24x32xf32>
    %203 = arith.negf %202 : vector<24x32xf32>
    %204 = math.exp %203 : vector<24x32xf32>
    %cst_109 = arith.constant 1.000000e+00 : f32
    %205 = vector.broadcast %cst_109 : f32 to vector<24x32xf32>
    %206 = arith.addf %205, %204 : vector<24x32xf32>
    %207 = arith.divf %205, %206 : vector<24x32xf32>
    %208 = vector.extract_strided_slice %201 {offsets = [0, 32], sizes = [24, 32], strides = [1, 1]} : vector<24x128xf32> to vector<24x32xf32>
    %209 = arith.negf %208 : vector<24x32xf32>
    %210 = math.exp %209 : vector<24x32xf32>
    %cst_110 = arith.constant 1.000000e+00 : f32
    %211 = vector.broadcast %cst_110 : f32 to vector<24x32xf32>
    %212 = arith.addf %211, %210 : vector<24x32xf32>
    %213 = arith.divf %211, %212 : vector<24x32xf32>
    %214 = vector.extract_strided_slice %201 {offsets = [0, 64], sizes = [24, 32], strides = [1, 1]} : vector<24x128xf32> to vector<24x32xf32>
    %215 = math.tanh %214 : vector<24x32xf32>
    %216 = vector.extract_strided_slice %201 {offsets = [0, 96], sizes = [24, 32], strides = [1, 1]} : vector<24x128xf32> to vector<24x32xf32>
    %217 = arith.negf %216 : vector<24x32xf32>
    %218 = math.exp %217 : vector<24x32xf32>
    %cst_111 = arith.constant 1.000000e+00 : f32
    %219 = vector.broadcast %cst_111 : f32 to vector<24x32xf32>
    %220 = arith.addf %219, %218 : vector<24x32xf32>
    %221 = arith.divf %219, %220 : vector<24x32xf32>
    %c0_112 = arith.constant 0 : index
    %c0_113 = arith.constant 0 : index
    %222 = vector.load %arg14[%c0_112, %c0_113] : memref<24x32xf32, #tpu.memory_space<vmem>>, vector<24x32xf32>
    %223 = arith.mulf %213, %222 : vector<24x32xf32>
    %224 = arith.mulf %207, %215 : vector<24x32xf32>
    %225 = arith.addf %223, %224 : vector<24x32xf32>
    %226 = math.tanh %225 : vector<24x32xf32>
    %227 = arith.mulf %221, %226 : vector<24x32xf32>
    %c0_114 = arith.constant 0 : index
    %c0_115 = arith.constant 0 : index
    %228 = vector.load %arg14[%c0_114, %c0_115] : memref<24x32xf32, #tpu.memory_space<vmem>>, vector<24x32xf32>
    tpu.vector_store %arg14[%c0_114, %c0_115], %225 {strides = array<i32>} : memref<24x32xf32, #tpu.memory_space<vmem>>, vector<24x32xf32>,
    %c0_116 = arith.constant 0 : index
    %c0_117 = arith.constant 0 : index
    %229 = vector.load %arg13[%c0_116, %c0_117] : memref<24x32xf32, #tpu.memory_space<vmem>>, vector<24x32xf32>
    tpu.vector_store %arg13[%c0_116, %c0_117], %227 {strides = array<i32>} : memref<24x32xf32, #tpu.memory_space<vmem>>, vector<24x32xf32>,
    %230 = vector.extract_strided_slice %227 {offsets = [0, 0], sizes = [24, 16], strides = [1, 1]} : vector<24x32xf32> to vector<24x16xf32>
    %c3_118 = arith.constant 3 : index
    %c0_119 = arith.constant 0 : index
    %c0_120 = arith.constant 0 : index
    %231 = vector.load %arg11[%c3_118, %c0_119, %c0_120] : memref<8x24x16xf32, #tpu.memory_space<vmem>>, vector<1x24x16xf32>
    %232 = vector.shape_cast %231 : vector<1x24x16xf32> to vector<24x16xf32>
    %233 = vector.shape_cast %230 : vector<24x16xf32> to vector<1x24x16xf32>
    tpu.vector_store %arg11[%c3_118, %c0_119, %c0_120], %233 {strides = array<i32>} : memref<8x24x16xf32, #tpu.memory_space<vmem>>, vector<1x24x16xf32>,
    %234 = vector.extract_strided_slice %227 {offsets = [0, 16], sizes = [24, 16], strides = [1, 1]} : vector<24x32xf32> to vector<24x16xf32>
    %c4_121 = arith.constant 4 : index
    %c0_122 = arith.constant 0 : index
    %c0_123 = arith.constant 0 : index
    %235 = vector.load %arg12[%c4_121, %c0_122, %c0_123] : memref<8x24x16xf32, #tpu.memory_space<vmem>>, vector<1x24x16xf32>
    %236 = vector.shape_cast %235 : vector<1x24x16xf32> to vector<24x16xf32>
    %237 = vector.shape_cast %234 : vector<24x16xf32> to vector<1x24x16xf32>
    tpu.vector_store %arg12[%c4_121, %c0_122, %c0_123], %237 {strides = array<i32>} : memref<8x24x16xf32, #tpu.memory_space<vmem>>, vector<1x24x16xf32>,
    %c0_124 = arith.constant 0 : index
    %c0_125 = arith.constant 0 : index
    %238 = vector.load %arg13[%c0_124, %c0_125] : memref<24x32xf32, #tpu.memory_space<vmem>>, vector<24x32xf32>
    %c0_126 = arith.constant 0 : index
    %c0_127 = arith.constant 0 : index
    %239 = vector.load %arg6[%c0_126, %c0_127] : memref<32x128xf32, #tpu.memory_space<vmem>>, vector<32x128xf32>
    %cst_128 = arith.constant dense<0.000000e+00> : vector<24x128xf32>
    %240 = tpu.matmul %238, %239, %cst_128 {dimension_numbers = #tpu.dot_dimension_numbers<[1], [0], [0], [1], [0, 0, 1, 1], [], []>} : vector<24x32xf32>, vector<32x128xf32>, vector<24x128xf32> -> vector<24x128xf32>
    %c4_129 = arith.constant 4 : index
    %c0_130 = arith.constant 0 : index
    %c0_131 = arith.constant 0 : index
    %241 = vector.load %arg10[%c4_129, %c0_130, %c0_131] : memref<8x24x128xf32, #tpu.memory_space<vmem>>, vector<1x24x128xf32>
    %242 = vector.shape_cast %241 : vector<1x24x128xf32> to vector<24x128xf32>
    %c3_132 = arith.constant 3 : index
    %c0_133 = arith.constant 0 : index
    %c0_134 = arith.constant 0 : index
    %243 = vector.load %arg10[%c3_132, %c0_133, %c0_134] : memref<8x24x128xf32, #tpu.memory_space<vmem>>, vector<1x24x128xf32>
    %244 = vector.shape_cast %243 : vector<1x24x128xf32> to vector<24x128xf32>
    %245 = arith.select %57, %242, %244 : vector<24x128xi1>, vector<24x128xf32>
    %246 = arith.addf %240, %245 : vector<24x128xf32>
    %247 = vector.extract_strided_slice %246 {offsets = [0, 0], sizes = [24, 32], strides = [1, 1]} : vector<24x128xf32> to vector<24x32xf32>
    %248 = arith.negf %247 : vector<24x32xf32>
    %249 = math.exp %248 : vector<24x32xf32>
    %cst_135 = arith.constant 1.000000e+00 : f32
    %250 = vector.broadcast %cst_135 : f32 to vector<24x32xf32>
    %251 = arith.addf %250, %249 : vector<24x32xf32>
    %252 = arith.divf %250, %251 : vector<24x32xf32>
    %253 = vector.extract_strided_slice %246 {offsets = [0, 32], sizes = [24, 32], strides = [1, 1]} : vector<24x128xf32> to vector<24x32xf32>
    %254 = arith.negf %253 : vector<24x32xf32>
    %255 = math.exp %254 : vector<24x32xf32>
    %cst_136 = arith.constant 1.000000e+00 : f32
    %256 = vector.broadcast %cst_136 : f32 to vector<24x32xf32>
    %257 = arith.addf %256, %255 : vector<24x32xf32>
    %258 = arith.divf %256, %257 : vector<24x32xf32>
    %259 = vector.extract_strided_slice %246 {offsets = [0, 64], sizes = [24, 32], strides = [1, 1]} : vector<24x128xf32> to vector<24x32xf32>
    %260 = math.tanh %259 : vector<24x32xf32>
    %261 = vector.extract_strided_slice %246 {offsets = [0, 96], sizes = [24, 32], strides = [1, 1]} : vector<24x128xf32> to vector<24x32xf32>
    %262 = arith.negf %261 : vector<24x32xf32>
    %263 = math.exp %262 : vector<24x32xf32>
    %cst_137 = arith.constant 1.000000e+00 : f32
    %264 = vector.broadcast %cst_137 : f32 to vector<24x32xf32>
    %265 = arith.addf %264, %263 : vector<24x32xf32>
    %266 = arith.divf %264, %265 : vector<24x32xf32>
    %c0_138 = arith.constant 0 : index
    %c0_139 = arith.constant 0 : index
    %267 = vector.load %arg14[%c0_138, %c0_139] : memref<24x32xf32, #tpu.memory_space<vmem>>, vector<24x32xf32>
    %268 = arith.mulf %258, %267 : vector<24x32xf32>
    %269 = arith.mulf %252, %260 : vector<24x32xf32>
    %270 = arith.addf %268, %269 : vector<24x32xf32>
    %271 = math.tanh %270 : vector<24x32xf32>
    %272 = arith.mulf %266, %271 : vector<24x32xf32>
    %c0_140 = arith.constant 0 : index
    %c0_141 = arith.constant 0 : index
    %273 = vector.load %arg14[%c0_140, %c0_141] : memref<24x32xf32, #tpu.memory_space<vmem>>, vector<24x32xf32>
    tpu.vector_store %arg14[%c0_140, %c0_141], %270 {strides = array<i32>} : memref<24x32xf32, #tpu.memory_space<vmem>>, vector<24x32xf32>,
    %c0_142 = arith.constant 0 : index
    %c0_143 = arith.constant 0 : index
    %274 = vector.load %arg13[%c0_142, %c0_143] : memref<24x32xf32, #tpu.memory_space<vmem>>, vector<24x32xf32>
    tpu.vector_store %arg13[%c0_142, %c0_143], %272 {strides = array<i32>} : memref<24x32xf32, #tpu.memory_space<vmem>>, vector<24x32xf32>,
    %275 = vector.extract_strided_slice %272 {offsets = [0, 0], sizes = [24, 16], strides = [1, 1]} : vector<24x32xf32> to vector<24x16xf32>
    %c4_144 = arith.constant 4 : index
    %c0_145 = arith.constant 0 : index
    %c0_146 = arith.constant 0 : index
    %276 = vector.load %arg11[%c4_144, %c0_145, %c0_146] : memref<8x24x16xf32, #tpu.memory_space<vmem>>, vector<1x24x16xf32>
    %277 = vector.shape_cast %276 : vector<1x24x16xf32> to vector<24x16xf32>
    %278 = vector.shape_cast %275 : vector<24x16xf32> to vector<1x24x16xf32>
    tpu.vector_store %arg11[%c4_144, %c0_145, %c0_146], %278 {strides = array<i32>} : memref<8x24x16xf32, #tpu.memory_space<vmem>>, vector<1x24x16xf32>,
    %279 = vector.extract_strided_slice %272 {offsets = [0, 16], sizes = [24, 16], strides = [1, 1]} : vector<24x32xf32> to vector<24x16xf32>
    %c3_147 = arith.constant 3 : index
    %c0_148 = arith.constant 0 : index
    %c0_149 = arith.constant 0 : index
    %280 = vector.load %arg12[%c3_147, %c0_148, %c0_149] : memref<8x24x16xf32, #tpu.memory_space<vmem>>, vector<1x24x16xf32>
    %281 = vector.shape_cast %280 : vector<1x24x16xf32> to vector<24x16xf32>
    %282 = vector.shape_cast %279 : vector<24x16xf32> to vector<1x24x16xf32>
    tpu.vector_store %arg12[%c3_147, %c0_148, %c0_149], %282 {strides = array<i32>} : memref<8x24x16xf32, #tpu.memory_space<vmem>>, vector<1x24x16xf32>,
    %c0_150 = arith.constant 0 : index
    %c0_151 = arith.constant 0 : index
    %283 = vector.load %arg13[%c0_150, %c0_151] : memref<24x32xf32, #tpu.memory_space<vmem>>, vector<24x32xf32>
    %c0_152 = arith.constant 0 : index
    %c0_153 = arith.constant 0 : index
    %284 = vector.load %arg6[%c0_152, %c0_153] : memref<32x128xf32, #tpu.memory_space<vmem>>, vector<32x128xf32>
    %cst_154 = arith.constant dense<0.000000e+00> : vector<24x128xf32>
    %285 = tpu.matmul %283, %284, %cst_154 {dimension_numbers = #tpu.dot_dimension_numbers<[1], [0], [0], [1], [0, 0, 1, 1], [], []>} : vector<24x32xf32>, vector<32x128xf32>, vector<24x128xf32> -> vector<24x128xf32>
    %c5_155 = arith.constant 5 : index
    %c0_156 = arith.constant 0 : index
    %c0_157 = arith.constant 0 : index
    %286 = vector.load %arg10[%c5_155, %c0_156, %c0_157] : memref<8x24x128xf32, #tpu.memory_space<vmem>>, vector<1x24x128xf32>
    %287 = vector.shape_cast %286 : vector<1x24x128xf32> to vector<24x128xf32>
    %c2_158 = arith.constant 2 : index
    %c0_159 = arith.constant 0 : index
    %c0_160 = arith.constant 0 : index
    %288 = vector.load %arg10[%c2_158, %c0_159, %c0_160] : memref<8x24x128xf32, #tpu.memory_space<vmem>>, vector<1x24x128xf32>
    %289 = vector.shape_cast %288 : vector<1x24x128xf32> to vector<24x128xf32>
    %290 = arith.select %57, %287, %289 : vector<24x128xi1>, vector<24x128xf32>
    %291 = arith.addf %285, %290 : vector<24x128xf32>
    %292 = vector.extract_strided_slice %291 {offsets = [0, 0], sizes = [24, 32], strides = [1, 1]} : vector<24x128xf32> to vector<24x32xf32>
    %293 = arith.negf %292 : vector<24x32xf32>
    %294 = math.exp %293 : vector<24x32xf32>
    %cst_161 = arith.constant 1.000000e+00 : f32
    %295 = vector.broadcast %cst_161 : f32 to vector<24x32xf32>
    %296 = arith.addf %295, %294 : vector<24x32xf32>
    %297 = arith.divf %295, %296 : vector<24x32xf32>
    %298 = vector.extract_strided_slice %291 {offsets = [0, 32], sizes = [24, 32], strides = [1, 1]} : vector<24x128xf32> to vector<24x32xf32>
    %299 = arith.negf %298 : vector<24x32xf32>
    %300 = math.exp %299 : vector<24x32xf32>
    %cst_162 = arith.constant 1.000000e+00 : f32
    %301 = vector.broadcast %cst_162 : f32 to vector<24x32xf32>
    %302 = arith.addf %301, %300 : vector<24x32xf32>
    %303 = arith.divf %301, %302 : vector<24x32xf32>
    %304 = vector.extract_strided_slice %291 {offsets = [0, 64], sizes = [24, 32], strides = [1, 1]} : vector<24x128xf32> to vector<24x32xf32>
    %305 = math.tanh %304 : vector<24x32xf32>
    %306 = vector.extract_strided_slice %291 {offsets = [0, 96], sizes = [24, 32], strides = [1, 1]} : vector<24x128xf32> to vector<24x32xf32>
    %307 = arith.negf %306 : vector<24x32xf32>
    %308 = math.exp %307 : vector<24x32xf32>
    %cst_163 = arith.constant 1.000000e+00 : f32
    %309 = vector.broadcast %cst_163 : f32 to vector<24x32xf32>
    %310 = arith.addf %309, %308 : vector<24x32xf32>
    %311 = arith.divf %309, %310 : vector<24x32xf32>
    %c0_164 = arith.constant 0 : index
    %c0_165 = arith.constant 0 : index
    %312 = vector.load %arg14[%c0_164, %c0_165] : memref<24x32xf32, #tpu.memory_space<vmem>>, vector<24x32xf32>
    %313 = arith.mulf %303, %312 : vector<24x32xf32>
    %314 = arith.mulf %297, %305 : vector<24x32xf32>
    %315 = arith.addf %313, %314 : vector<24x32xf32>
    %316 = math.tanh %315 : vector<24x32xf32>
    %317 = arith.mulf %311, %316 : vector<24x32xf32>
    %c0_166 = arith.constant 0 : index
    %c0_167 = arith.constant 0 : index
    %318 = vector.load %arg14[%c0_166, %c0_167] : memref<24x32xf32, #tpu.memory_space<vmem>>, vector<24x32xf32>
    tpu.vector_store %arg14[%c0_166, %c0_167], %315 {strides = array<i32>} : memref<24x32xf32, #tpu.memory_space<vmem>>, vector<24x32xf32>,
    %c0_168 = arith.constant 0 : index
    %c0_169 = arith.constant 0 : index
    %319 = vector.load %arg13[%c0_168, %c0_169] : memref<24x32xf32, #tpu.memory_space<vmem>>, vector<24x32xf32>
    tpu.vector_store %arg13[%c0_168, %c0_169], %317 {strides = array<i32>} : memref<24x32xf32, #tpu.memory_space<vmem>>, vector<24x32xf32>,
    %320 = vector.extract_strided_slice %317 {offsets = [0, 0], sizes = [24, 16], strides = [1, 1]} : vector<24x32xf32> to vector<24x16xf32>
    %c5_170 = arith.constant 5 : index
    %c0_171 = arith.constant 0 : index
    %c0_172 = arith.constant 0 : index
    %321 = vector.load %arg11[%c5_170, %c0_171, %c0_172] : memref<8x24x16xf32, #tpu.memory_space<vmem>>, vector<1x24x16xf32>
    %322 = vector.shape_cast %321 : vector<1x24x16xf32> to vector<24x16xf32>
    %323 = vector.shape_cast %320 : vector<24x16xf32> to vector<1x24x16xf32>
    tpu.vector_store %arg11[%c5_170, %c0_171, %c0_172], %323 {strides = array<i32>} : memref<8x24x16xf32, #tpu.memory_space<vmem>>, vector<1x24x16xf32>,
    %324 = vector.extract_strided_slice %317 {offsets = [0, 16], sizes = [24, 16], strides = [1, 1]} : vector<24x32xf32> to vector<24x16xf32>
    %c2_173 = arith.constant 2 : index
    %c0_174 = arith.constant 0 : index
    %c0_175 = arith.constant 0 : index
    %325 = vector.load %arg12[%c2_173, %c0_174, %c0_175] : memref<8x24x16xf32, #tpu.memory_space<vmem>>, vector<1x24x16xf32>
    %326 = vector.shape_cast %325 : vector<1x24x16xf32> to vector<24x16xf32>
    %327 = vector.shape_cast %324 : vector<24x16xf32> to vector<1x24x16xf32>
    tpu.vector_store %arg12[%c2_173, %c0_174, %c0_175], %327 {strides = array<i32>} : memref<8x24x16xf32, #tpu.memory_space<vmem>>, vector<1x24x16xf32>,
    %c0_176 = arith.constant 0 : index
    %c0_177 = arith.constant 0 : index
    %328 = vector.load %arg13[%c0_176, %c0_177] : memref<24x32xf32, #tpu.memory_space<vmem>>, vector<24x32xf32>
    %c0_178 = arith.constant 0 : index
    %c0_179 = arith.constant 0 : index
    %329 = vector.load %arg6[%c0_178, %c0_179] : memref<32x128xf32, #tpu.memory_space<vmem>>, vector<32x128xf32>
    %cst_180 = arith.constant dense<0.000000e+00> : vector<24x128xf32>
    %330 = tpu.matmul %328, %329, %cst_180 {dimension_numbers = #tpu.dot_dimension_numbers<[1], [0], [0], [1], [0, 0, 1, 1], [], []>} : vector<24x32xf32>, vector<32x128xf32>, vector<24x128xf32> -> vector<24x128xf32>
    %c6_181 = arith.constant 6 : index
    %c0_182 = arith.constant 0 : index
    %c0_183 = arith.constant 0 : index
    %331 = vector.load %arg10[%c6_181, %c0_182, %c0_183] : memref<8x24x128xf32, #tpu.memory_space<vmem>>, vector<1x24x128xf32>
    %332 = vector.shape_cast %331 : vector<1x24x128xf32> to vector<24x128xf32>
    %c1_184 = arith.constant 1 : index
    %c0_185 = arith.constant 0 : index
    %c0_186 = arith.constant 0 : index
    %333 = vector.load %arg10[%c1_184, %c0_185, %c0_186] : memref<8x24x128xf32, #tpu.memory_space<vmem>>, vector<1x24x128xf32>
    %334 = vector.shape_cast %333 : vector<1x24x128xf32> to vector<24x128xf32>
    %335 = arith.select %57, %332, %334 : vector<24x128xi1>, vector<24x128xf32>
    %336 = arith.addf %330, %335 : vector<24x128xf32>
    %337 = vector.extract_strided_slice %336 {offsets = [0, 0], sizes = [24, 32], strides = [1, 1]} : vector<24x128xf32> to vector<24x32xf32>
    %338 = arith.negf %337 : vector<24x32xf32>
    %339 = math.exp %338 : vector<24x32xf32>
    %cst_187 = arith.constant 1.000000e+00 : f32
    %340 = vector.broadcast %cst_187 : f32 to vector<24x32xf32>
    %341 = arith.addf %340, %339 : vector<24x32xf32>
    %342 = arith.divf %340, %341 : vector<24x32xf32>
    %343 = vector.extract_strided_slice %336 {offsets = [0, 32], sizes = [24, 32], strides = [1, 1]} : vector<24x128xf32> to vector<24x32xf32>
    %344 = arith.negf %343 : vector<24x32xf32>
    %345 = math.exp %344 : vector<24x32xf32>
    %cst_188 = arith.constant 1.000000e+00 : f32
    %346 = vector.broadcast %cst_188 : f32 to vector<24x32xf32>
    %347 = arith.addf %346, %345 : vector<24x32xf32>
    %348 = arith.divf %346, %347 : vector<24x32xf32>
    %349 = vector.extract_strided_slice %336 {offsets = [0, 64], sizes = [24, 32], strides = [1, 1]} : vector<24x128xf32> to vector<24x32xf32>
    %350 = math.tanh %349 : vector<24x32xf32>
    %351 = vector.extract_strided_slice %336 {offsets = [0, 96], sizes = [24, 32], strides = [1, 1]} : vector<24x128xf32> to vector<24x32xf32>
    %352 = arith.negf %351 : vector<24x32xf32>
    %353 = math.exp %352 : vector<24x32xf32>
    %cst_189 = arith.constant 1.000000e+00 : f32
    %354 = vector.broadcast %cst_189 : f32 to vector<24x32xf32>
    %355 = arith.addf %354, %353 : vector<24x32xf32>
    %356 = arith.divf %354, %355 : vector<24x32xf32>
    %c0_190 = arith.constant 0 : index
    %c0_191 = arith.constant 0 : index
    %357 = vector.load %arg14[%c0_190, %c0_191] : memref<24x32xf32, #tpu.memory_space<vmem>>, vector<24x32xf32>
    %358 = arith.mulf %348, %357 : vector<24x32xf32>
    %359 = arith.mulf %342, %350 : vector<24x32xf32>
    %360 = arith.addf %358, %359 : vector<24x32xf32>
    %361 = math.tanh %360 : vector<24x32xf32>
    %362 = arith.mulf %356, %361 : vector<24x32xf32>
    %c0_192 = arith.constant 0 : index
    %c0_193 = arith.constant 0 : index
    %363 = vector.load %arg14[%c0_192, %c0_193] : memref<24x32xf32, #tpu.memory_space<vmem>>, vector<24x32xf32>
    tpu.vector_store %arg14[%c0_192, %c0_193], %360 {strides = array<i32>} : memref<24x32xf32, #tpu.memory_space<vmem>>, vector<24x32xf32>,
    %c0_194 = arith.constant 0 : index
    %c0_195 = arith.constant 0 : index
    %364 = vector.load %arg13[%c0_194, %c0_195] : memref<24x32xf32, #tpu.memory_space<vmem>>, vector<24x32xf32>
    tpu.vector_store %arg13[%c0_194, %c0_195], %362 {strides = array<i32>} : memref<24x32xf32, #tpu.memory_space<vmem>>, vector<24x32xf32>,
    %365 = vector.extract_strided_slice %362 {offsets = [0, 0], sizes = [24, 16], strides = [1, 1]} : vector<24x32xf32> to vector<24x16xf32>
    %c6_196 = arith.constant 6 : index
    %c0_197 = arith.constant 0 : index
    %c0_198 = arith.constant 0 : index
    %366 = vector.load %arg11[%c6_196, %c0_197, %c0_198] : memref<8x24x16xf32, #tpu.memory_space<vmem>>, vector<1x24x16xf32>
    %367 = vector.shape_cast %366 : vector<1x24x16xf32> to vector<24x16xf32>
    %368 = vector.shape_cast %365 : vector<24x16xf32> to vector<1x24x16xf32>
    tpu.vector_store %arg11[%c6_196, %c0_197, %c0_198], %368 {strides = array<i32>} : memref<8x24x16xf32, #tpu.memory_space<vmem>>, vector<1x24x16xf32>,
    %369 = vector.extract_strided_slice %362 {offsets = [0, 16], sizes = [24, 16], strides = [1, 1]} : vector<24x32xf32> to vector<24x16xf32>
    %c1_199 = arith.constant 1 : index
    %c0_200 = arith.constant 0 : index
    %c0_201 = arith.constant 0 : index
    %370 = vector.load %arg12[%c1_199, %c0_200, %c0_201] : memref<8x24x16xf32, #tpu.memory_space<vmem>>, vector<1x24x16xf32>
    %371 = vector.shape_cast %370 : vector<1x24x16xf32> to vector<24x16xf32>
    %372 = vector.shape_cast %369 : vector<24x16xf32> to vector<1x24x16xf32>
    tpu.vector_store %arg12[%c1_199, %c0_200, %c0_201], %372 {strides = array<i32>} : memref<8x24x16xf32, #tpu.memory_space<vmem>>, vector<1x24x16xf32>,
    %c0_202 = arith.constant 0 : index
    %c0_203 = arith.constant 0 : index
    %373 = vector.load %arg13[%c0_202, %c0_203] : memref<24x32xf32, #tpu.memory_space<vmem>>, vector<24x32xf32>
    %c0_204 = arith.constant 0 : index
    %c0_205 = arith.constant 0 : index
    %374 = vector.load %arg6[%c0_204, %c0_205] : memref<32x128xf32, #tpu.memory_space<vmem>>, vector<32x128xf32>
    %cst_206 = arith.constant dense<0.000000e+00> : vector<24x128xf32>
    %375 = tpu.matmul %373, %374, %cst_206 {dimension_numbers = #tpu.dot_dimension_numbers<[1], [0], [0], [1], [0, 0, 1, 1], [], []>} : vector<24x32xf32>, vector<32x128xf32>, vector<24x128xf32> -> vector<24x128xf32>
    %c7_207 = arith.constant 7 : index
    %c0_208 = arith.constant 0 : index
    %c0_209 = arith.constant 0 : index
    %376 = vector.load %arg10[%c7_207, %c0_208, %c0_209] : memref<8x24x128xf32, #tpu.memory_space<vmem>>, vector<1x24x128xf32>
    %377 = vector.shape_cast %376 : vector<1x24x128xf32> to vector<24x128xf32>
    %c0_210 = arith.constant 0 : index
    %c0_211 = arith.constant 0 : index
    %c0_212 = arith.constant 0 : index
    %378 = vector.load %arg10[%c0_210, %c0_211, %c0_212] : memref<8x24x128xf32, #tpu.memory_space<vmem>>, vector<1x24x128xf32>
    %379 = vector.shape_cast %378 : vector<1x24x128xf32> to vector<24x128xf32>
    %380 = arith.select %57, %377, %379 : vector<24x128xi1>, vector<24x128xf32>
    %381 = arith.addf %375, %380 : vector<24x128xf32>
    %382 = vector.extract_strided_slice %381 {offsets = [0, 0], sizes = [24, 32], strides = [1, 1]} : vector<24x128xf32> to vector<24x32xf32>
    %383 = arith.negf %382 : vector<24x32xf32>
    %384 = math.exp %383 : vector<24x32xf32>
    %cst_213 = arith.constant 1.000000e+00 : f32
    %385 = vector.broadcast %cst_213 : f32 to vector<24x32xf32>
    %386 = arith.addf %385, %384 : vector<24x32xf32>
    %387 = arith.divf %385, %386 : vector<24x32xf32>
    %388 = vector.extract_strided_slice %381 {offsets = [0, 32], sizes = [24, 32], strides = [1, 1]} : vector<24x128xf32> to vector<24x32xf32>
    %389 = arith.negf %388 : vector<24x32xf32>
    %390 = math.exp %389 : vector<24x32xf32>
    %cst_214 = arith.constant 1.000000e+00 : f32
    %391 = vector.broadcast %cst_214 : f32 to vector<24x32xf32>
    %392 = arith.addf %391, %390 : vector<24x32xf32>
    %393 = arith.divf %391, %392 : vector<24x32xf32>
    %394 = vector.extract_strided_slice %381 {offsets = [0, 64], sizes = [24, 32], strides = [1, 1]} : vector<24x128xf32> to vector<24x32xf32>
    %395 = math.tanh %394 : vector<24x32xf32>
    %396 = vector.extract_strided_slice %381 {offsets = [0, 96], sizes = [24, 32], strides = [1, 1]} : vector<24x128xf32> to vector<24x32xf32>
    %397 = arith.negf %396 : vector<24x32xf32>
    %398 = math.exp %397 : vector<24x32xf32>
    %cst_215 = arith.constant 1.000000e+00 : f32
    %399 = vector.broadcast %cst_215 : f32 to vector<24x32xf32>
    %400 = arith.addf %399, %398 : vector<24x32xf32>
    %401 = arith.divf %399, %400 : vector<24x32xf32>
    %c0_216 = arith.constant 0 : index
    %c0_217 = arith.constant 0 : index
    %402 = vector.load %arg14[%c0_216, %c0_217] : memref<24x32xf32, #tpu.memory_space<vmem>>, vector<24x32xf32>
    %403 = arith.mulf %393, %402 : vector<24x32xf32>
    %404 = arith.mulf %387, %395 : vector<24x32xf32>
    %405 = arith.addf %403, %404 : vector<24x32xf32>
    %406 = math.tanh %405 : vector<24x32xf32>
    %407 = arith.mulf %401, %406 : vector<24x32xf32>
    %c0_218 = arith.constant 0 : index
    %c0_219 = arith.constant 0 : index
    %408 = vector.load %arg14[%c0_218, %c0_219] : memref<24x32xf32, #tpu.memory_space<vmem>>, vector<24x32xf32>
    tpu.vector_store %arg14[%c0_218, %c0_219], %405 {strides = array<i32>} : memref<24x32xf32, #tpu.memory_space<vmem>>, vector<24x32xf32>,
    %c0_220 = arith.constant 0 : index
    %c0_221 = arith.constant 0 : index
    %409 = vector.load %arg13[%c0_220, %c0_221] : memref<24x32xf32, #tpu.memory_space<vmem>>, vector<24x32xf32>
    tpu.vector_store %arg13[%c0_220, %c0_221], %407 {strides = array<i32>} : memref<24x32xf32, #tpu.memory_space<vmem>>, vector<24x32xf32>,
    %410 = vector.extract_strided_slice %407 {offsets = [0, 0], sizes = [24, 16], strides = [1, 1]} : vector<24x32xf32> to vector<24x16xf32>
    %c7_222 = arith.constant 7 : index
    %c0_223 = arith.constant 0 : index
    %c0_224 = arith.constant 0 : index
    %411 = vector.load %arg11[%c7_222, %c0_223, %c0_224] : memref<8x24x16xf32, #tpu.memory_space<vmem>>, vector<1x24x16xf32>
    %412 = vector.shape_cast %411 : vector<1x24x16xf32> to vector<24x16xf32>
    %413 = vector.shape_cast %410 : vector<24x16xf32> to vector<1x24x16xf32>
    tpu.vector_store %arg11[%c7_222, %c0_223, %c0_224], %413 {strides = array<i32>} : memref<8x24x16xf32, #tpu.memory_space<vmem>>, vector<1x24x16xf32>,
    %414 = vector.extract_strided_slice %407 {offsets = [0, 16], sizes = [24, 16], strides = [1, 1]} : vector<24x32xf32> to vector<24x16xf32>
    %c0_225 = arith.constant 0 : index
    %c0_226 = arith.constant 0 : index
    %c0_227 = arith.constant 0 : index
    %415 = vector.load %arg12[%c0_225, %c0_226, %c0_227] : memref<8x24x16xf32, #tpu.memory_space<vmem>>, vector<1x24x16xf32>
    %416 = vector.shape_cast %415 : vector<1x24x16xf32> to vector<24x16xf32>
    %417 = vector.shape_cast %414 : vector<24x16xf32> to vector<1x24x16xf32>
    tpu.vector_store %arg12[%c0_225, %c0_226, %c0_227], %417 {strides = array<i32>} : memref<8x24x16xf32, #tpu.memory_space<vmem>>, vector<1x24x16xf32>,
    %c0_228 = arith.constant 0 : index
    %c0_229 = arith.constant 0 : index
    %c0_230 = arith.constant 0 : index
    %418 = vector.load %arg11[%c0_228, %c0_229, %c0_230] : memref<8x24x16xf32, #tpu.memory_space<vmem>>, vector<8x24x16xf32>
    %c0_231 = arith.constant 0 : index
    %c0_232 = arith.constant 0 : index
    %c0_233 = arith.constant 0 : index
    %419 = vector.load %arg12[%c0_231, %c0_232, %c0_233] : memref<8x24x16xf32, #tpu.memory_space<vmem>>, vector<8x24x16xf32>
    %420 = tpu.concatenate %418, %419 in 2 : vector<8x24x16xf32>, vector<8x24x16xf32> -> vector<8x24x32xf32>
    %421 = vector.shape_cast %420 : vector<8x24x32xf32> to vector<192x32xf32>
    %c0_234 = arith.constant 0 : index
    %c0_235 = arith.constant 0 : index
    %422 = vector.load %arg7[%c0_234, %c0_235] : memref<32x8xf32, #tpu.memory_space<vmem>>, vector<32x8xf32>
    %cst_236 = arith.constant dense<0.000000e+00> : vector<192x8xf32>
    %423 = tpu.matmul %421, %422, %cst_236 {dimension_numbers = #tpu.dot_dimension_numbers<[1], [0], [0], [1], [0, 0, 1, 1], [], []>} : vector<192x32xf32>, vector<32x8xf32>, vector<192x8xf32> -> vector<192x8xf32>
    %c0_237 = arith.constant 0 : index
    %c0_238 = arith.constant 0 : index
    %424 = vector.load %arg8[%c0_237, %c0_238] : memref<1x8xf32, #tpu.memory_space<vmem>>, vector<1x8xf32>
    %425 = vector.broadcast %424 : vector<1x8xf32> to vector<192x8xf32>
    %426 = arith.addf %423, %425 : vector<192x8xf32>
    %427 = vector.shape_cast %426 : vector<192x8xf32> to vector<8x24x8xf32>
    %c0_239 = arith.constant 0 : index
    %c0_240 = arith.constant 0 : index
    %c0_241 = arith.constant 0 : index
    %428 = vector.load %arg1[%c0_239, %c0_240, %c0_241] : memref<8x24x8xf32, #tpu.memory_space<vmem>>, vector<8x24x8xf32>
    %429 = arith.addf %427, %428 : vector<8x24x8xf32>
    %c0_242 = arith.constant 0 : index
    %c0_243 = arith.constant 0 : index
    %c0_244 = arith.constant 0 : index
    %430 = vector.load %arg9[%c0_242, %c0_243, %c0_244] : memref<8x24x8xf32, #tpu.memory_space<vmem>>, vector<8x24x8xf32>
    tpu.vector_store %arg9[%c0_242, %c0_243, %c0_244], %429 {strides = array<i32>} : memref<8x24x8xf32, #tpu.memory_space<vmem>>, vector<8x24x8xf32>,
    return
  }
  func.func @transform_0(%arg0: i32) -> (i32, i32, i32) {
    %c0_i32 = arith.constant 0 : i32
    %c0_i32_0 = arith.constant 0 : i32
    %c0_i32_1 = arith.constant 0 : i32
    %c0_i32_2 = arith.constant 0 : i32
    return %c0_i32, %c0_i32_0, %c0_i32_1 : i32, i32, i32
  }
  func.func @transform_1(%arg0: i32) -> (i32, i32) {
    %c0_i32 = arith.constant 0 : i32
    %c0_i32_0 = arith.constant 0 : i32
    %c0_i32_1 = arith.constant 0 : i32
    return %c0_i32, %c0_i32_0 : i32, i32
  }
  func.func @transform_2(%arg0: i32) -> (i32, i32) {
    %c0_i32 = arith.constant 0 : i32
    %c0_i32_0 = arith.constant 0 : i32
    %c0_i32_1 = arith.constant 0 : i32
    return %c0_i32, %c0_i32_0 : i32, i32
  }
  func.func @transform_3(%arg0: i32) -> (i32, i32) {
    %c0_i32 = arith.constant 0 : i32
    %c0_i32_0 = arith.constant 0 : i32
    %c0_i32_1 = arith.constant 0 : i32
    return %c0_i32, %c0_i32_0 : i32, i32
  }
  func.func @transform_4(%arg0: i32) -> (i32, i32) {
    %c0_i32 = arith.constant 0 : i32
    %c0_i32_0 = arith.constant 0 : i32
    %c0_i32_1 = arith.constant 0 : i32
    return %c0_i32, %c0_i32_0 : i32, i32
  }
  func.func @transform_5(%arg0: i32) -> (i32, i32) {
    %c0_i32 = arith.constant 0 : i32
    %c0_i32_0 = arith.constant 0 : i32
    %c0_i32_1 = arith.constant 0 : i32
    return %c0_i32, %c0_i32_0 : i32, i32
  }
  func.func @transform_6(%arg0: i32) -> (i32, i32) {
    %c0_i32 = arith.constant 0 : i32
    %c0_i32_0 = arith.constant 0 : i32
    %c0_i32_1 = arith.constant 0 : i32
    return %c0_i32, %c0_i32_0 : i32, i32
  }
  func.func @transform_7(%arg0: i32) -> (i32, i32) {
    %c0_i32 = arith.constant 0 : i32
    %c0_i32_0 = arith.constant 0 : i32
    %c0_i32_1 = arith.constant 0 : i32
    return %c0_i32, %c0_i32_0 : i32, i32
  }
  func.func @transform_8(%arg0: i32) -> (i32, i32, i32) {
    %c0_i32 = arith.constant 0 : i32
    %c0_i32_0 = arith.constant 0 : i32
    %c0_i32_1 = arith.constant 0 : i32
    %c0_i32_2 = arith.constant 0 : i32
    return %c0_i32, %c0_i32_0, %c0_i32_1 : i32, i32, i32
  }
}

module attributes {stable_mosaic.version = 11 : i64} {
  func.func @_attn_head_kernel(%arg0: i32, %arg1: i32, %arg2: memref<1x1x12x32xf32, #tpu.memory_space<vmem>>, %arg3: memref<1x1x12x32xf32, #tpu.memory_space<vmem>>, %arg4: memref<1x1x12x16xf32, #tpu.memory_space<vmem>>, %arg5: memref<1x1x1xf32, #tpu.memory_space<vmem>>, %arg6: memref<1x1x32xf32, #tpu.memory_space<vmem>>, %arg7: memref<1x1x32xf32, #tpu.memory_space<vmem>>, %arg8: memref<1x1x1xf32, #tpu.memory_space<vmem>>, %arg9: memref<1x1x32xf32, #tpu.memory_space<vmem>>, %arg10: memref<1x1x32xf32, #tpu.memory_space<vmem>>, %arg11: memref<1x1x1xf32, #tpu.memory_space<vmem>>, %arg12: memref<1x1x16xf32, #tpu.memory_space<vmem>>, %arg13: memref<1x1x16xf32, #tpu.memory_space<vmem>>, %arg14: memref<1x1x12x16xf32, #tpu.memory_space<vmem>>) attributes {dimension_semantics = [#tpu.dimension_semantics<parallel>, #tpu.dimension_semantics<parallel>], iteration_bounds = array<i64: 2, 4>, scalar_prefetch = 0 : i64, scratch_operands = 0 : i64, tpu.core_type = #tpu.core_type<tc>, window_params = [{transform_indices = @transform_0, window_bounds = array<i64: 1, 1, 12, 32>}, {transform_indices = @transform_1, window_bounds = array<i64: 1, 1, 12, 32>}, {transform_indices = @transform_2, window_bounds = array<i64: 1, 1, 12, 16>}, {transform_indices = @transform_3, window_bounds = array<i64: 1, 1, 1>}, {transform_indices = @transform_4, window_bounds = array<i64: 1, 1, 32>}, {transform_indices = @transform_5, window_bounds = array<i64: 1, 1, 32>}, {transform_indices = @transform_6, window_bounds = array<i64: 1, 1, 1>}, {transform_indices = @transform_7, window_bounds = array<i64: 1, 1, 32>}, {transform_indices = @transform_8, window_bounds = array<i64: 1, 1, 32>}, {transform_indices = @transform_9, window_bounds = array<i64: 1, 1, 1>}, {transform_indices = @transform_10, window_bounds = array<i64: 1, 1, 16>}, {transform_indices = @transform_11, window_bounds = array<i64: 1, 1, 16>}, {transform_indices = @transform_12, window_bounds = array<i64: 1, 1, 12, 16>}]} {
    %c0 = arith.constant 0 : index
    %c0_0 = arith.constant 0 : index
    %c0_1 = arith.constant 0 : index
    %c0_2 = arith.constant 0 : index
    %0 = vector.load %arg2[%c0, %c0_0, %c0_1, %c0_2] : memref<1x1x12x32xf32, #tpu.memory_space<vmem>>, vector<1x1x12x32xf32>
    %1 = vector.shape_cast %0 : vector<1x1x12x32xf32> to vector<12x32xf32>
    %cst = arith.constant 0.000000e+00 : f32
    %2 = vector.broadcast %cst : f32 to vector<12x32xf32>
    %3 = arith.cmpf oge, %1, %2 : vector<12x32xf32>
    %c0_3 = arith.constant 0 : index
    %c0_4 = arith.constant 0 : index
    %c0_5 = arith.constant 0 : index
    %4 = vector.load %arg5[%c0_3, %c0_4, %c0_5] : memref<1x1x1xf32, #tpu.memory_space<vmem>>, vector<1x1x1xf32>
    %5 = vector.shape_cast %4 : vector<1x1x1xf32> to vector<1x1xf32>
    %6 = vector.broadcast %5 : vector<1x1xf32> to vector<12x32xf32>
    %7 = arith.mulf %6, %1 : vector<12x32xf32>
    %8 = arith.select %3, %1, %7 : vector<12x32xi1>, vector<12x32xf32>
    %cst_6 = arith.constant dense<0.000000e+00> : vector<12xf32>
    %9 = vector.multi_reduction <add>, %8, %cst_6 [1] : vector<12x32xf32> to vector<12xf32>
    %10 = vector.shape_cast %9 : vector<12xf32> to vector<12x1xf32>
    %cst_7 = arith.constant 3.200000e+01 : f32
    %11 = vector.broadcast %cst_7 : f32 to vector<12x1xf32>
    %12 = arith.divf %10, %11 : vector<12x1xf32>
    %13 = vector.broadcast %12 : vector<12x1xf32> to vector<12x32xf32>
    %14 = arith.subf %8, %13 : vector<12x32xf32>
    %15 = arith.mulf %14, %14 : vector<12x32xf32>
    %cst_8 = arith.constant dense<0.000000e+00> : vector<12xf32>
    %16 = vector.multi_reduction <add>, %15, %cst_8 [1] : vector<12x32xf32> to vector<12xf32>
    %17 = vector.shape_cast %16 : vector<12xf32> to vector<12x1xf32>
    %cst_9 = arith.constant 3.200000e+01 : f32
    %18 = vector.broadcast %cst_9 : f32 to vector<12x1xf32>
    %19 = arith.divf %17, %18 : vector<12x1xf32>
    %20 = vector.broadcast %12 : vector<12x1xf32> to vector<12x32xf32>
    %21 = arith.subf %8, %20 : vector<12x32xf32>
    %cst_10 = arith.constant 9.99999974E-6 : f32
    %22 = vector.broadcast %cst_10 : f32 to vector<12x1xf32>
    %23 = arith.addf %19, %22 : vector<12x1xf32>
    %24 = math.rsqrt %23 : vector<12x1xf32>
    %25 = vector.broadcast %24 : vector<12x1xf32> to vector<12x32xf32>
    %26 = arith.mulf %21, %25 : vector<12x32xf32>
    %c0_11 = arith.constant 0 : index
    %c0_12 = arith.constant 0 : index
    %c0_13 = arith.constant 0 : index
    %27 = vector.load %arg6[%c0_11, %c0_12, %c0_13] : memref<1x1x32xf32, #tpu.memory_space<vmem>>, vector<1x1x32xf32>
    %28 = vector.shape_cast %27 : vector<1x1x32xf32> to vector<1x32xf32>
    %29 = vector.broadcast %28 : vector<1x32xf32> to vector<12x32xf32>
    %30 = arith.mulf %26, %29 : vector<12x32xf32>
    %c0_14 = arith.constant 0 : index
    %c0_15 = arith.constant 0 : index
    %c0_16 = arith.constant 0 : index
    %31 = vector.load %arg7[%c0_14, %c0_15, %c0_16] : memref<1x1x32xf32, #tpu.memory_space<vmem>>, vector<1x1x32xf32>
    %32 = vector.shape_cast %31 : vector<1x1x32xf32> to vector<1x32xf32>
    %33 = vector.broadcast %32 : vector<1x32xf32> to vector<12x32xf32>
    %34 = arith.addf %30, %33 : vector<12x32xf32>
    %c0_17 = arith.constant 0 : index
    %c0_18 = arith.constant 0 : index
    %c0_19 = arith.constant 0 : index
    %c0_20 = arith.constant 0 : index
    %35 = vector.load %arg3[%c0_17, %c0_18, %c0_19, %c0_20] : memref<1x1x12x32xf32, #tpu.memory_space<vmem>>, vector<1x1x12x32xf32>
    %36 = vector.shape_cast %35 : vector<1x1x12x32xf32> to vector<12x32xf32>
    %cst_21 = arith.constant 0.000000e+00 : f32
    %37 = vector.broadcast %cst_21 : f32 to vector<12x32xf32>
    %38 = arith.cmpf oge, %36, %37 : vector<12x32xf32>
    %c0_22 = arith.constant 0 : index
    %c0_23 = arith.constant 0 : index
    %c0_24 = arith.constant 0 : index
    %39 = vector.load %arg8[%c0_22, %c0_23, %c0_24] : memref<1x1x1xf32, #tpu.memory_space<vmem>>, vector<1x1x1xf32>
    %40 = vector.shape_cast %39 : vector<1x1x1xf32> to vector<1x1xf32>
    %41 = vector.broadcast %40 : vector<1x1xf32> to vector<12x32xf32>
    %42 = arith.mulf %41, %36 : vector<12x32xf32>
    %43 = arith.select %38, %36, %42 : vector<12x32xi1>, vector<12x32xf32>
    %cst_25 = arith.constant dense<0.000000e+00> : vector<12xf32>
    %44 = vector.multi_reduction <add>, %43, %cst_25 [1] : vector<12x32xf32> to vector<12xf32>
    %45 = vector.shape_cast %44 : vector<12xf32> to vector<12x1xf32>
    %cst_26 = arith.constant 3.200000e+01 : f32
    %46 = vector.broadcast %cst_26 : f32 to vector<12x1xf32>
    %47 = arith.divf %45, %46 : vector<12x1xf32>
    %48 = vector.broadcast %47 : vector<12x1xf32> to vector<12x32xf32>
    %49 = arith.subf %43, %48 : vector<12x32xf32>
    %50 = arith.mulf %49, %49 : vector<12x32xf32>
    %cst_27 = arith.constant dense<0.000000e+00> : vector<12xf32>
    %51 = vector.multi_reduction <add>, %50, %cst_27 [1] : vector<12x32xf32> to vector<12xf32>
    %52 = vector.shape_cast %51 : vector<12xf32> to vector<12x1xf32>
    %cst_28 = arith.constant 3.200000e+01 : f32
    %53 = vector.broadcast %cst_28 : f32 to vector<12x1xf32>
    %54 = arith.divf %52, %53 : vector<12x1xf32>
    %55 = vector.broadcast %47 : vector<12x1xf32> to vector<12x32xf32>
    %56 = arith.subf %43, %55 : vector<12x32xf32>
    %cst_29 = arith.constant 9.99999974E-6 : f32
    %57 = vector.broadcast %cst_29 : f32 to vector<12x1xf32>
    %58 = arith.addf %54, %57 : vector<12x1xf32>
    %59 = math.rsqrt %58 : vector<12x1xf32>
    %60 = vector.broadcast %59 : vector<12x1xf32> to vector<12x32xf32>
    %61 = arith.mulf %56, %60 : vector<12x32xf32>
    %c0_30 = arith.constant 0 : index
    %c0_31 = arith.constant 0 : index
    %c0_32 = arith.constant 0 : index
    %62 = vector.load %arg9[%c0_30, %c0_31, %c0_32] : memref<1x1x32xf32, #tpu.memory_space<vmem>>, vector<1x1x32xf32>
    %63 = vector.shape_cast %62 : vector<1x1x32xf32> to vector<1x32xf32>
    %64 = vector.broadcast %63 : vector<1x32xf32> to vector<12x32xf32>
    %65 = arith.mulf %61, %64 : vector<12x32xf32>
    %c0_33 = arith.constant 0 : index
    %c0_34 = arith.constant 0 : index
    %c0_35 = arith.constant 0 : index
    %66 = vector.load %arg10[%c0_33, %c0_34, %c0_35] : memref<1x1x32xf32, #tpu.memory_space<vmem>>, vector<1x1x32xf32>
    %67 = vector.shape_cast %66 : vector<1x1x32xf32> to vector<1x32xf32>
    %68 = vector.broadcast %67 : vector<1x32xf32> to vector<12x32xf32>
    %69 = arith.addf %65, %68 : vector<12x32xf32>
    %c0_36 = arith.constant 0 : index
    %c0_37 = arith.constant 0 : index
    %c0_38 = arith.constant 0 : index
    %c0_39 = arith.constant 0 : index
    %70 = vector.load %arg4[%c0_36, %c0_37, %c0_38, %c0_39] : memref<1x1x12x16xf32, #tpu.memory_space<vmem>>, vector<1x1x12x16xf32>
    %71 = vector.shape_cast %70 : vector<1x1x12x16xf32> to vector<12x16xf32>
    %cst_40 = arith.constant 0.000000e+00 : f32
    %72 = vector.broadcast %cst_40 : f32 to vector<12x16xf32>
    %73 = arith.cmpf oge, %71, %72 : vector<12x16xf32>
    %c0_41 = arith.constant 0 : index
    %c0_42 = arith.constant 0 : index
    %c0_43 = arith.constant 0 : index
    %74 = vector.load %arg11[%c0_41, %c0_42, %c0_43] : memref<1x1x1xf32, #tpu.memory_space<vmem>>, vector<1x1x1xf32>
    %75 = vector.shape_cast %74 : vector<1x1x1xf32> to vector<1x1xf32>
    %76 = vector.broadcast %75 : vector<1x1xf32> to vector<12x16xf32>
    %77 = arith.mulf %76, %71 : vector<12x16xf32>
    %78 = arith.select %73, %71, %77 : vector<12x16xi1>, vector<12x16xf32>
    %cst_44 = arith.constant dense<0.000000e+00> : vector<12xf32>
    %79 = vector.multi_reduction <add>, %78, %cst_44 [1] : vector<12x16xf32> to vector<12xf32>
    %80 = vector.shape_cast %79 : vector<12xf32> to vector<12x1xf32>
    %cst_45 = arith.constant 1.600000e+01 : f32
    %81 = vector.broadcast %cst_45 : f32 to vector<12x1xf32>
    %82 = arith.divf %80, %81 : vector<12x1xf32>
    %83 = vector.broadcast %82 : vector<12x1xf32> to vector<12x16xf32>
    %84 = arith.subf %78, %83 : vector<12x16xf32>
    %85 = arith.mulf %84, %84 : vector<12x16xf32>
    %cst_46 = arith.constant dense<0.000000e+00> : vector<12xf32>
    %86 = vector.multi_reduction <add>, %85, %cst_46 [1] : vector<12x16xf32> to vector<12xf32>
    %87 = vector.shape_cast %86 : vector<12xf32> to vector<12x1xf32>
    %cst_47 = arith.constant 1.600000e+01 : f32
    %88 = vector.broadcast %cst_47 : f32 to vector<12x1xf32>
    %89 = arith.divf %87, %88 : vector<12x1xf32>
    %90 = vector.broadcast %82 : vector<12x1xf32> to vector<12x16xf32>
    %91 = arith.subf %78, %90 : vector<12x16xf32>
    %cst_48 = arith.constant 9.99999974E-6 : f32
    %92 = vector.broadcast %cst_48 : f32 to vector<12x1xf32>
    %93 = arith.addf %89, %92 : vector<12x1xf32>
    %94 = math.rsqrt %93 : vector<12x1xf32>
    %95 = vector.broadcast %94 : vector<12x1xf32> to vector<12x16xf32>
    %96 = arith.mulf %91, %95 : vector<12x16xf32>
    %c0_49 = arith.constant 0 : index
    %c0_50 = arith.constant 0 : index
    %c0_51 = arith.constant 0 : index
    %97 = vector.load %arg12[%c0_49, %c0_50, %c0_51] : memref<1x1x16xf32, #tpu.memory_space<vmem>>, vector<1x1x16xf32>
    %98 = vector.shape_cast %97 : vector<1x1x16xf32> to vector<1x16xf32>
    %99 = vector.broadcast %98 : vector<1x16xf32> to vector<12x16xf32>
    %100 = arith.mulf %96, %99 : vector<12x16xf32>
    %c0_52 = arith.constant 0 : index
    %c0_53 = arith.constant 0 : index
    %c0_54 = arith.constant 0 : index
    %101 = vector.load %arg13[%c0_52, %c0_53, %c0_54] : memref<1x1x16xf32, #tpu.memory_space<vmem>>, vector<1x1x16xf32>
    %102 = vector.shape_cast %101 : vector<1x1x16xf32> to vector<1x16xf32>
    %103 = vector.broadcast %102 : vector<1x16xf32> to vector<12x16xf32>
    %104 = arith.addf %100, %103 : vector<12x16xf32>
    %cst_55 = arith.constant dense<0.000000e+00> : vector<12x12xf32>
    %105 = tpu.matmul %34, %69, %cst_55 {dimension_numbers = #tpu.dot_dimension_numbers<[1], [1], [0], [0], [0, 0, 1, 0], [], []>} : vector<12x32xf32>, vector<12x32xf32>, vector<12x12xf32> -> vector<12x12xf32>
    %cst_56 = arith.constant 0.176776692 : f32
    %106 = vector.broadcast %cst_56 : f32 to vector<12x12xf32>
    %107 = arith.mulf %105, %106 : vector<12x12xf32>
    %cst_57 = arith.constant dense<0xFF800000> : vector<12xf32>
    %108 = vector.multi_reduction <maximumf>, %107, %cst_57 [1] : vector<12x12xf32> to vector<12xf32>
    %109 = vector.shape_cast %108 : vector<12xf32> to vector<12x1xf32>
    %110 = vector.broadcast %109 : vector<12x1xf32> to vector<12x12xf32>
    %111 = arith.subf %107, %110 : vector<12x12xf32>
    %112 = math.exp %111 : vector<12x12xf32>
    %cst_58 = arith.constant dense<0.000000e+00> : vector<12xf32>
    %113 = vector.multi_reduction <add>, %112, %cst_58 [1] : vector<12x12xf32> to vector<12xf32>
    %114 = vector.shape_cast %113 : vector<12xf32> to vector<12x1xf32>
    %115 = tpu.reciprocal %114 {approx = true} : vector<12x1xf32> -> vector<12x1xf32>
    %116 = vector.broadcast %115 : vector<12x1xf32> to vector<12x12xf32>
    %117 = arith.mulf %112, %116 : vector<12x12xf32>
    %cst_59 = arith.constant dense<0.000000e+00> : vector<12x16xf32>
    %118 = tpu.matmul %117, %104, %cst_59 {dimension_numbers = #tpu.dot_dimension_numbers<[1], [0], [0], [1], [0, 0, 1, 1], [], []>} : vector<12x12xf32>, vector<12x16xf32>, vector<12x16xf32> -> vector<12x16xf32>
    %c0_60 = arith.constant 0 : index
    %c0_61 = arith.constant 0 : index
    %c0_62 = arith.constant 0 : index
    %c0_63 = arith.constant 0 : index
    %119 = vector.load %arg14[%c0_60, %c0_61, %c0_62, %c0_63] : memref<1x1x12x16xf32, #tpu.memory_space<vmem>>, vector<1x1x12x16xf32>
    %120 = vector.shape_cast %119 : vector<1x1x12x16xf32> to vector<12x16xf32>
    %121 = vector.shape_cast %118 : vector<12x16xf32> to vector<1x1x12x16xf32>
    tpu.vector_store %arg14[%c0_60, %c0_61, %c0_62, %c0_63], %121 {strides = array<i32>} : memref<1x1x12x16xf32, #tpu.memory_space<vmem>>, vector<1x1x12x16xf32>,
    return
  }
  func.func @transform_0(%arg0: i32, %arg1: i32) -> (i32, i32, i32, i32) {
    %c0_i32 = arith.constant 0 : i32
    %c0_i32_0 = arith.constant 0 : i32
    %c0_i32_1 = arith.constant 0 : i32
    return %arg0, %arg1, %c0_i32, %c0_i32_0 : i32, i32, i32, i32
  }
  func.func @transform_1(%arg0: i32, %arg1: i32) -> (i32, i32, i32, i32) {
    %c0_i32 = arith.constant 0 : i32
    %c0_i32_0 = arith.constant 0 : i32
    %c0_i32_1 = arith.constant 0 : i32
    return %arg0, %arg1, %c0_i32, %c0_i32_0 : i32, i32, i32, i32
  }
  func.func @transform_2(%arg0: i32, %arg1: i32) -> (i32, i32, i32, i32) {
    %c0_i32 = arith.constant 0 : i32
    %c0_i32_0 = arith.constant 0 : i32
    %c0_i32_1 = arith.constant 0 : i32
    return %arg0, %arg1, %c0_i32, %c0_i32_0 : i32, i32, i32, i32
  }
  func.func @transform_3(%arg0: i32, %arg1: i32) -> (i32, i32, i32) {
    %c0_i32 = arith.constant 0 : i32
    %c0_i32_0 = arith.constant 0 : i32
    %c0_i32_1 = arith.constant 0 : i32
    return %arg1, %c0_i32, %c0_i32_0 : i32, i32, i32
  }
  func.func @transform_4(%arg0: i32, %arg1: i32) -> (i32, i32, i32) {
    %c0_i32 = arith.constant 0 : i32
    %c0_i32_0 = arith.constant 0 : i32
    %c0_i32_1 = arith.constant 0 : i32
    return %arg1, %c0_i32, %c0_i32_0 : i32, i32, i32
  }
  func.func @transform_5(%arg0: i32, %arg1: i32) -> (i32, i32, i32) {
    %c0_i32 = arith.constant 0 : i32
    %c0_i32_0 = arith.constant 0 : i32
    %c0_i32_1 = arith.constant 0 : i32
    return %arg1, %c0_i32, %c0_i32_0 : i32, i32, i32
  }
  func.func @transform_6(%arg0: i32, %arg1: i32) -> (i32, i32, i32) {
    %c0_i32 = arith.constant 0 : i32
    %c0_i32_0 = arith.constant 0 : i32
    %c0_i32_1 = arith.constant 0 : i32
    return %arg1, %c0_i32, %c0_i32_0 : i32, i32, i32
  }
  func.func @transform_7(%arg0: i32, %arg1: i32) -> (i32, i32, i32) {
    %c0_i32 = arith.constant 0 : i32
    %c0_i32_0 = arith.constant 0 : i32
    %c0_i32_1 = arith.constant 0 : i32
    return %arg1, %c0_i32, %c0_i32_0 : i32, i32, i32
  }
  func.func @transform_8(%arg0: i32, %arg1: i32) -> (i32, i32, i32) {
    %c0_i32 = arith.constant 0 : i32
    %c0_i32_0 = arith.constant 0 : i32
    %c0_i32_1 = arith.constant 0 : i32
    return %arg1, %c0_i32, %c0_i32_0 : i32, i32, i32
  }
  func.func @transform_9(%arg0: i32, %arg1: i32) -> (i32, i32, i32) {
    %c0_i32 = arith.constant 0 : i32
    %c0_i32_0 = arith.constant 0 : i32
    %c0_i32_1 = arith.constant 0 : i32
    return %arg1, %c0_i32, %c0_i32_0 : i32, i32, i32
  }
  func.func @transform_10(%arg0: i32, %arg1: i32) -> (i32, i32, i32) {
    %c0_i32 = arith.constant 0 : i32
    %c0_i32_0 = arith.constant 0 : i32
    %c0_i32_1 = arith.constant 0 : i32
    return %arg1, %c0_i32, %c0_i32_0 : i32, i32, i32
  }
  func.func @transform_11(%arg0: i32, %arg1: i32) -> (i32, i32, i32) {
    %c0_i32 = arith.constant 0 : i32
    %c0_i32_0 = arith.constant 0 : i32
    %c0_i32_1 = arith.constant 0 : i32
    return %arg1, %c0_i32, %c0_i32_0 : i32, i32, i32
  }
  func.func @transform_12(%arg0: i32, %arg1: i32) -> (i32, i32, i32, i32) {
    %c0_i32 = arith.constant 0 : i32
    %c0_i32_0 = arith.constant 0 : i32
    %c0_i32_1 = arith.constant 0 : i32
    return %arg0, %arg1, %c0_i32, %c0_i32_0 : i32, i32, i32, i32
  }
}

module attributes {stable_mosaic.version = 11 : i64} {
  func.func @_proj_kernel(%arg0: i32, %arg1: memref<24x8x8xf32, #tpu.memory_space<vmem>>, %arg2: memref<8x8xf32, #tpu.memory_space<vmem>>, %arg3: memref<1x8xf32, #tpu.memory_space<vmem>>, %arg4: memref<1x1xf32, #tpu.memory_space<vmem>>, %arg5: memref<1x8x8xf32, #tpu.memory_space<vmem>>, %arg6: memref<1x8x8xf32, #tpu.memory_space<vmem>>, %arg7: memref<24x8x8xf32, #tpu.memory_space<vmem>>, %arg8: memref<24x8x8xf32, #tpu.memory_space<vmem>>) attributes {dimension_semantics = [#tpu.dimension_semantics<arbitrary>], iteration_bounds = array<i64: 1>, scalar_prefetch = 0 : i64, scratch_operands = 0 : i64, tpu.core_type = #tpu.core_type<tc>, window_params = [{pipeline_mode = #tpu.pipeline_mode<synchronous>, transform_indices = @transform_0, window_bounds = array<i64: 24, 8, 8>}, {pipeline_mode = #tpu.pipeline_mode<synchronous>, transform_indices = @transform_1, window_bounds = array<i64: 8, 8>}, {pipeline_mode = #tpu.pipeline_mode<synchronous>, transform_indices = @transform_2, window_bounds = array<i64: 1, 8>}, {pipeline_mode = #tpu.pipeline_mode<synchronous>, transform_indices = @transform_3, window_bounds = array<i64: 1, 1>}, {pipeline_mode = #tpu.pipeline_mode<synchronous>, transform_indices = @transform_4, window_bounds = array<i64: 1, 8, 8>}, {pipeline_mode = #tpu.pipeline_mode<synchronous>, transform_indices = @transform_5, window_bounds = array<i64: 1, 8, 8>}, {pipeline_mode = #tpu.pipeline_mode<synchronous>, transform_indices = @transform_6, window_bounds = array<i64: 24, 8, 8>}, {pipeline_mode = #tpu.pipeline_mode<synchronous>, transform_indices = @transform_7, window_bounds = array<i64: 24, 8, 8>}]} {
    %c0 = arith.constant 0 : index
    %c0_0 = arith.constant 0 : index
    %c0_1 = arith.constant 0 : index
    %0 = vector.load %arg1[%c0, %c0_0, %c0_1] : memref<24x8x8xf32, #tpu.memory_space<vmem>>, vector<24x8x8xf32>
    %1 = vector.shape_cast %0 : vector<24x8x8xf32> to vector<192x8xf32>
    %c0_2 = arith.constant 0 : index
    %c0_3 = arith.constant 0 : index
    %2 = vector.load %arg2[%c0_2, %c0_3] : memref<8x8xf32, #tpu.memory_space<vmem>>, vector<8x8xf32>
    %cst = arith.constant dense<0.000000e+00> : vector<192x8xf32>
    %3 = tpu.matmul %1, %2, %cst {dimension_numbers = #tpu.dot_dimension_numbers<[1], [0], [0], [1], [0, 0, 1, 1], [], []>} : vector<192x8xf32>, vector<8x8xf32>, vector<192x8xf32> -> vector<192x8xf32>
    %c0_4 = arith.constant 0 : index
    %c0_5 = arith.constant 0 : index
    %4 = vector.load %arg3[%c0_4, %c0_5] : memref<1x8xf32, #tpu.memory_space<vmem>>, vector<1x8xf32>
    %5 = vector.broadcast %4 : vector<1x8xf32> to vector<192x8xf32>
    %6 = arith.addf %3, %5 : vector<192x8xf32>
    %7 = vector.shape_cast %6 : vector<192x8xf32> to vector<24x8x8xf32>
    %cst_6 = arith.constant 0.000000e+00 : f32
    %8 = vector.broadcast %cst_6 : f32 to vector<24x8x8xf32>
    %9 = arith.cmpf oge, %7, %8 : vector<24x8x8xf32>
    %c0_7 = arith.constant 0 : index
    %c0_8 = arith.constant 0 : index
    %10 = vector.load %arg4[%c0_7, %c0_8] : memref<1x1xf32, #tpu.memory_space<vmem>>, vector<1x1xf32>
    %11 = vector.shape_cast %10 : vector<1x1xf32> to vector<1x1x1xf32>
    %12 = vector.broadcast %11 : vector<1x1x1xf32> to vector<24x8x8xf32>
    %13 = arith.mulf %12, %7 : vector<24x8x8xf32>
    %14 = arith.select %9, %7, %13 : vector<24x8x8xi1>, vector<24x8x8xf32>
    %cst_9 = arith.constant dense<0.000000e+00> : vector<24x8xf32>
    %15 = vector.multi_reduction <add>, %14, %cst_9 [2] : vector<24x8x8xf32> to vector<24x8xf32>
    %16 = vector.shape_cast %15 : vector<24x8xf32> to vector<24x8x1xf32>
    %cst_10 = arith.constant dense<0.000000e+00> : vector<24x1xf32>
    %17 = vector.multi_reduction <add>, %16, %cst_10 [1] : vector<24x8x1xf32> to vector<24x1xf32>
    %18 = vector.shape_cast %17 : vector<24x1xf32> to vector<24x1x1xf32>
    %cst_11 = arith.constant 1.562500e-02 : f32
    %19 = vector.broadcast %cst_11 : f32 to vector<24x1x1xf32>
    %20 = arith.mulf %18, %19 : vector<24x1x1xf32>
    %21 = vector.broadcast %20 : vector<24x1x1xf32> to vector<24x8x8xf32>
    %22 = arith.subf %14, %21 : vector<24x8x8xf32>
    %23 = arith.mulf %22, %22 : vector<24x8x8xf32>
    %cst_12 = arith.constant dense<0.000000e+00> : vector<24x8xf32>
    %24 = vector.multi_reduction <add>, %23, %cst_12 [2] : vector<24x8x8xf32> to vector<24x8xf32>
    %25 = vector.shape_cast %24 : vector<24x8xf32> to vector<24x8x1xf32>
    %cst_13 = arith.constant dense<0.000000e+00> : vector<24x1xf32>
    %26 = vector.multi_reduction <add>, %25, %cst_13 [1] : vector<24x8x1xf32> to vector<24x1xf32>
    %27 = vector.shape_cast %26 : vector<24x1xf32> to vector<24x1x1xf32>
    %cst_14 = arith.constant 1.562500e-02 : f32
    %28 = vector.broadcast %cst_14 : f32 to vector<24x1x1xf32>
    %29 = arith.mulf %27, %28 : vector<24x1x1xf32>
    %cst_15 = arith.constant 9.99999974E-6 : f32
    %30 = vector.broadcast %cst_15 : f32 to vector<24x1x1xf32>
    %31 = arith.addf %29, %30 : vector<24x1x1xf32>
    %32 = math.rsqrt %31 : vector<24x1x1xf32>
    %33 = vector.broadcast %32 : vector<24x1x1xf32> to vector<24x8x8xf32>
    %34 = arith.mulf %22, %33 : vector<24x8x8xf32>
    %c0_16 = arith.constant 0 : index
    %c0_17 = arith.constant 0 : index
    %c0_18 = arith.constant 0 : index
    %35 = vector.load %arg5[%c0_16, %c0_17, %c0_18] : memref<1x8x8xf32, #tpu.memory_space<vmem>>, vector<1x8x8xf32>
    %36 = vector.broadcast %35 : vector<1x8x8xf32> to vector<24x8x8xf32>
    %37 = arith.mulf %34, %36 : vector<24x8x8xf32>
    %c0_19 = arith.constant 0 : index
    %c0_20 = arith.constant 0 : index
    %c0_21 = arith.constant 0 : index
    %38 = vector.load %arg6[%c0_19, %c0_20, %c0_21] : memref<1x8x8xf32, #tpu.memory_space<vmem>>, vector<1x8x8xf32>
    %39 = vector.broadcast %38 : vector<1x8x8xf32> to vector<24x8x8xf32>
    %40 = arith.addf %37, %39 : vector<24x8x8xf32>
    %c0_22 = arith.constant 0 : index
    %c0_23 = arith.constant 0 : index
    %c0_24 = arith.constant 0 : index
    %41 = vector.load %arg7[%c0_22, %c0_23, %c0_24] : memref<24x8x8xf32, #tpu.memory_space<vmem>>, vector<24x8x8xf32>
    %42 = arith.addf %40, %41 : vector<24x8x8xf32>
    %c0_25 = arith.constant 0 : index
    %c0_26 = arith.constant 0 : index
    %c0_27 = arith.constant 0 : index
    %43 = vector.load %arg8[%c0_25, %c0_26, %c0_27] : memref<24x8x8xf32, #tpu.memory_space<vmem>>, vector<24x8x8xf32>
    tpu.vector_store %arg8[%c0_25, %c0_26, %c0_27], %42 {strides = array<i32>} : memref<24x8x8xf32, #tpu.memory_space<vmem>>, vector<24x8x8xf32>,
    return
  }
  func.func @transform_0(%arg0: i32) -> (i32, i32, i32) {
    %c0_i32 = arith.constant 0 : i32
    %c0_i32_0 = arith.constant 0 : i32
    %c0_i32_1 = arith.constant 0 : i32
    %c0_i32_2 = arith.constant 0 : i32
    return %c0_i32, %c0_i32_0, %c0_i32_1 : i32, i32, i32
  }
  func.func @transform_1(%arg0: i32) -> (i32, i32) {
    %c0_i32 = arith.constant 0 : i32
    %c0_i32_0 = arith.constant 0 : i32
    %c0_i32_1 = arith.constant 0 : i32
    return %c0_i32, %c0_i32_0 : i32, i32
  }
  func.func @transform_2(%arg0: i32) -> (i32, i32) {
    %c0_i32 = arith.constant 0 : i32
    %c0_i32_0 = arith.constant 0 : i32
    %c0_i32_1 = arith.constant 0 : i32
    return %c0_i32, %c0_i32_0 : i32, i32
  }
  func.func @transform_3(%arg0: i32) -> (i32, i32) {
    %c0_i32 = arith.constant 0 : i32
    %c0_i32_0 = arith.constant 0 : i32
    %c0_i32_1 = arith.constant 0 : i32
    return %c0_i32, %c0_i32_0 : i32, i32
  }
  func.func @transform_4(%arg0: i32) -> (i32, i32, i32) {
    %c0_i32 = arith.constant 0 : i32
    %c0_i32_0 = arith.constant 0 : i32
    %c0_i32_1 = arith.constant 0 : i32
    %c0_i32_2 = arith.constant 0 : i32
    return %c0_i32, %c0_i32_0, %c0_i32_1 : i32, i32, i32
  }
  func.func @transform_5(%arg0: i32) -> (i32, i32, i32) {
    %c0_i32 = arith.constant 0 : i32
    %c0_i32_0 = arith.constant 0 : i32
    %c0_i32_1 = arith.constant 0 : i32
    %c0_i32_2 = arith.constant 0 : i32
    return %c0_i32, %c0_i32_0, %c0_i32_1 : i32, i32, i32
  }
  func.func @transform_6(%arg0: i32) -> (i32, i32, i32) {
    %c0_i32 = arith.constant 0 : i32
    %c0_i32_0 = arith.constant 0 : i32
    %c0_i32_1 = arith.constant 0 : i32
    %c0_i32_2 = arith.constant 0 : i32
    return %c0_i32, %c0_i32_0, %c0_i32_1 : i32, i32, i32
  }
  func.func @transform_7(%arg0: i32) -> (i32, i32, i32) {
    %c0_i32 = arith.constant 0 : i32
    %c0_i32_0 = arith.constant 0 : i32
    %c0_i32_1 = arith.constant 0 : i32
    %c0_i32_2 = arith.constant 0 : i32
    return %c0_i32, %c0_i32_0, %c0_i32_1 : i32, i32, i32
  }
}

</mosaic_0001>

<bundles_post_ra>
// kernel: gridnet_v2_block.6
= control target key start
LH: loop header
LB: loop body
LE: loop exit
PB: predicated region body
PF: predicated region fallthrough
CT: control target
= control target key end

     0   :  { %s1494_s21 = smov 0   ;;  %s1496_s22 = smov 0   ;;  %s1630_s0 = inlined_call_operand.vmem [shape: f32[2,4,12,32], index: 0, kind: input, shape index: {}]   ;;  %s1631_s1 = inlined_call_operand.vmem [shape: f32[2,4,12,32], index: 1, kind: input, shape index: {}]   ;;  %s1632_s2 = inlined_call_operand.vmem [shape: f32[2,4,12,16], index: 2, kind: input, shape index: {}]   ;;  %s1633_s3 = inlined_call_operand.vmem [shape: f32[4,1,1], index: 3, kind: input, shape index: {}]   ;;  %s1634_s4 = inlined_call_operand.vmem [shape: f32[4,1,32], index: 4, kind: input, shape index: {}]   ;;  %s1635_s5 = inlined_call_operand.vmem [shape: f32[4,1,32], index: 5, kind: input, shape index: {}]   ;;  %s1636_s6 = inlined_call_operand.vmem [shape: f32[4,1,1], index: 6, kind: input, shape index: {}]   ;;  %s1637_s7 = inlined_call_operand.vmem [shape: f32[4,1,32], index: 7, kind: input, shape index: {}]   ;;  %s1638_s8 = inlined_call_operand.vmem [shape: f32[4,1,32], index: 8, kind: input, shape index: {}]   ;;  %s1639_s9 = inlined_call_operand.vmem [shape: f32[4,1,1], index: 9, kind: input, shape index: {}]   ;;  %s1640_s10 = inlined_call_operand.vmem [shape: f32[4,1,16], index: 10, kind: input, shape index: {}]   ;;  %s1641_s11 = inlined_call_operand.vmem [shape: f32[4,1,16], index: 11, kind: input, shape index: {}]   ;;  %s1642_s12 = inlined_call_operand.vmem [shape: f32[2,4,12,16], index: 12, kind: output, shape index: {}]  }
   0x1   :  { %s1498_s23 = smov 0   ;;  %s1500_s24 = smov 0  }
   0x2   :  { %s1502_s25 = smov 0  }
   0x3 LB: > { %s31_s26 = sadd.s32 1, %s1417_s23  ;;  %s34_s27 = sadd.s32 1, %s1421_s24  ;;  %s1425_s25 = sphi %s1502_s25, %s22_s25   ;;  %s1421_s24 = sphi %s1500_s24, %s1646_s24   ;;  %s1417_s23 = sphi %s1498_s23, %s1645_s23   ;;  %s1413_s22 = sphi %s1496_s22, %s1644_s22   ;;  %s1409_s21 = sphi %s1494_s21, %s1643_s21  }
   0x4   : > { %p32_p0 = scmp.ge.s32.totalorder %s31_s26, 4  ;;  %p1258_p1 = scmp.ge.s32.totalorder %s1425_s25, 1 }
   0x5   : > { %p486_p2 = scmp.lt.s32.totalorder %s1425_s25, 9 }
   0x6   : > { %s1648_s26 = smov (%p32_p0, %s31_s26), 0  ;;  %s1650_s27 = smov (!%p32_p0, %s34_s27), %s1421_s24 }
   0x7   : > { %p487_p3 = pnand %p1258_p1, %p486_p2  ;;  %p36_p4 = scmp.ge.s32.totalorder %s1650_s27, 2 }
   0x8   : > { %p583_p5 = scmp.lt.s32.totalorder (!%p487_p3), %s1409_s21, 3  ;;  %v1427_v0 = vmov (!%p487_p3), 0   ;;  %p581_p6 = scmp.lt.s32.totalorder (!%p487_p3), %s1413_s22, 1  ;;  %vm662_vm1 = vcmask (!%p487_p3), 261120   ;;  %vm666_vm4 = vcmask (!%p487_p3), 257024   ;;  %vm789_vm8 = vcmask (!%p487_p3), 130048  }
   0x9   : > { %s1652_s27 = smov (%p36_p4, %s1650_s27), 0  ;;  %490 = sbr.rel (%p487_p3) target bundleno = 1224 (0x4c8), region = 68 }
   0xa   : > { %1365 = vset.pattern.permute.xlu0 (!%p487_p3), %v1427_v0  ;;  %1366 = vset.pattern.permute.xlu1 (!%p487_p3), %v1427_v0  ;;  %vm793_vm9 = vcmask (!%p487_p3), 125952   ;;  %vm1312_vm10 = vmpackc.low (!%p487_p3), %vm662_vm1, %vm662_vm1  ;;  %vm929_vm11 = vcmask (!%p487_p3), 93184   ;;  %vm925_vm12 = vcmask (!%p487_p3), 97280   ;;  %vm955_vm13 = vcmask (!%p487_p3), 1043456  }
   0xb   : > { %vm1428_vm14 = vmmov (!%p487_p3), 1  }
   0xc   : > { %vm1318_vm15 = vmpackc.low (!%p487_p3), %vm955_vm13, %vm1428_vm14 }
  0x10   : > { %s1654_s21 = smov (!%p583_p5, %s1409_s21), 3  ;;  %s1656_s22 = smov (!%p581_p6, %s1413_s22), 1 }
  0x11   : > { %s619_s30 = scalar_lea.vmem %s1636_s6, %s1654_s21  ;;  %s610_s15 = scalar_lea.vmem %s1633_s3, %s1654_s21 }
  0x12   : > { %v1274_v1 = vld [vmem:[%s619_s30] ss:$0 sm:$0xff]  ;;  %s1259_s16 = sshll.u32 %s1654_s21, 1  ;;  %s1260_s17 = sshll.u32 %s1656_s22, 3 }
  0x13   : > { %720 = vperm.xlu0 %1365, %v1274_v1   ;;  %v1271_v2 = vld [vmem:[%s610_s15] ss:$0 sm:$0xff]  ;;  %s587_s18 = sadd.s32 %s1260_s17, %s1259_s16  ;;  %s628_s16 = scalar_lea.vmem %s1639_s9, %s1654_s21 }
  0x14   : > { %s1535_s19 = sshll.u32 %s587_s18, 3  ;;  %v1277_v41 = vld [vmem:[%s628_s16] ss:$0 sm:$0xff]  ;;  %s622_s13 = scalar_lea.vmem %s1637_s7, %s1654_s21 }
  0x15   : > { %s598_s29 = scalar_lea.vmem %s1631_s1, %s1535_s19  ;;  %s589_s14 = scalar_lea.vmem %s1630_s0, %s1535_s19  ;;  %v1275_v59 = vld [vmem:[%s622_s13] ss:$0 sm:$0xff] }
  0x16   : > { %v709_v3 = vld [vmem:[%s598_s29] sm:$0xff]  ;;  %v710_v4 = vld [vmem:[%s598_s29 + $0x8] sm:$0xf]  ;;  %s607_s20 = scalar_lea.vmem %s1632_s2, %s1535_s19  ;;  %s625_s22 = scalar_lea.vmem %s1638_s8, %s1654_s21 }
  0x17   : > { %655 = vperm.xlu0 %1365, %v1271_v2   ;;  %vm711_vm0 = vcmp.ge.f32.partialorder %v709_v3, 0.0  ;;  %v644_v8 = vld [vmem:[%s589_s14] sm:$0xff]  ;;  %v645_v9 = vld [vmem:[%s589_s14 + $0x8] sm:$0xf]  ;;  %vm712_vm2 = vcmp.ge.f32.partialorder %v710_v4, 0.0  ;;  %s613_s17 = scalar_lea.vmem %s1634_s4, %s1654_s21  ;;  %s616_s28 = scalar_lea.vmem %s1635_s5, %s1654_s21 }
  0x18   : > { %vm646_vm3 = vcmp.ge.f32.partialorder %v644_v8, 0.0  ;;  %vm647_vm5 = vcmp.ge.f32.partialorder %v645_v9, 0.0  ;;  %v771_v53 = vld [vmem:[%s607_s20] sm:$0xff]  ;;  %v772_v54 = vld [vmem:[%s607_s20 + $0x8] sm:$0xf]  ;;  %s631_s30 = scalar_lea.vmem %s1640_s10, %s1654_s21  ;;  %s634_s15 = scalar_lea.vmem %s1641_s11, %s1654_s21 }
  0x19   : > { %vm773_vm6 = vcmp.ge.f32.partialorder %v771_v53, 0.0  ;;  %vm774_vm7 = vcmp.ge.f32.partialorder %v772_v54, 0.0 }
  0x92   : > { %v721_v5 = vpop.permute.xlu0 %720 }
  0x93   : > { %v723_v6 = vmul.f32 %v721_v5, %v709_v3  ;;  %v724_v7 = vmul.f32 %v721_v5, %v710_v4 }
  0x95   : > { %v725_v10 = vsel %vm711_vm0, %v709_v3, %v723_v6  ;;  %v726_v15 = vsel %vm712_vm2, %v710_v4, %v724_v7  ;;  %v1276_v4 = vld [vmem:[%s625_s22] ss:$0 sm:$0xff] }
  0x96   : > { %v656_v11 = vpop.permute.xlu0 %655  ;;  %v727_v12 = vsel %vm662_vm1, %v725_v10, 0.0  ;;  %v730_v17 = vsel %vm666_vm4, %v726_v15, 0.0 }
  0x97   : > { %v658_v13 = vmul.f32 %v656_v11, %v644_v8  ;;  %v659_v14 = vmul.f32 %v656_v11, %v645_v9  ;;  %728 = vadd.xlane.f32.xlu1 %v727_v12  ;;  %v1273_v12 = vld [vmem:[%s616_s28] ss:$0 sm:$0xff] }
  0x99   : > { %v660_v16 = vsel %vm646_vm3, %v644_v8, %v658_v13  ;;  %v661_v19 = vsel %vm647_vm5, %v645_v9, %v659_v14  ;;  %v1272_v8 = vld [vmem:[%s613_s17] ss:$0 sm:$0xff]  ;;  %s643_s17 = scalar_lea.vmem %s1642_s12, %s1535_s19 }
  0x9a   : > { %v663_v18 = vsel %vm662_vm1, %v660_v16, 0.0  ;;  %v667_v20 = vsel %vm666_vm4, %v661_v19, 0.0 }
  0x9b   : > { %731 = vadd.xlane.f32.xlu1 %v730_v17  ;;  %664 = vadd.xlane.f32.xlu0 %v663_v18 }
  0x9f   : > { %668 = vadd.xlane.f32.xlu1 %v667_v20 }
 0x124   : > { %v729_v21 = vpop.xlane.xlu1 %728 }
 0x125   : > { %v733_v22 = vmul.f32 0.03125, %v729_v21 }
 0x127   : > { %v735_v23 = vsub.f32 %v725_v10, %v733_v22 }
 0x128   : > { %v732_v24 = vpop.xlane.xlu1 %731  ;;  %v665_v25 = vpop.xlane.xlu0 %664 }
 0x129   : > { %v734_v26 = vmul.f32 0.03125, %v732_v24  ;;  %v671_v27 = vmul.f32 0.03125, %v665_v25  ;;  %v737_v28 = vmul.f32 %v735_v23, %v735_v23 }
 0x12b   : > { %v736_v29 = vsub.f32 %v726_v15, %v734_v26  ;;  %v1549_v30 = vsub.f32 %v660_v16, %v671_v27  ;;  %v739_v31 = vsel %vm662_vm1, %v737_v28, 0.0 }
 0x12c   : > { %740 = vadd.xlane.f32.xlu1 %v739_v31  ;;  %v669_v32 = vpop.xlane.xlu1 %668 }
 0x12d   : > { %v672_v33 = vmul.f32 0.03125, %v669_v32  ;;  %v738_v34 = vmul.f32 %v736_v29, %v736_v29  ;;  %v675_v37 = vmul.f32 %v1549_v30, %v1549_v30 }
 0x12f   : > { %v1552_v35 = vsub.f32 %v661_v19, %v672_v33  ;;  %v742_v36 = vsel %vm666_vm4, %v738_v34, 0.0  ;;  %v677_v38 = vsel %vm662_vm1, %v675_v37, 0.0 }
 0x130   : > { %743 = vadd.xlane.f32.xlu1 %v742_v36 }
 0x131   : > { %v676_v39 = vmul.f32 %v1552_v35, %v1552_v35 }
 0x133   : > { %v680_v40 = vsel %vm666_vm4, %v676_v39, 0.0 }
 0x134   : > { %678 = vadd.xlane.f32.xlu1 %v677_v38 }
 0x138   : > { %681 = vadd.xlane.f32.xlu1 %v680_v40 }
 0x149   : > { %782 = vperm.xlu1 %1366, %v1277_v41  }
 0x1b9   : > { %v741_v42 = vpop.xlane.xlu1 %740 }
 0x1ba   : > { %v745_v43 = vmul.f32 0.03125, %v741_v42 }
 0x1bc   : > { %v747_v44 = vadd.f32 1e-05, %v745_v43 }
 0x1bd   : > { %v744_v45 = vpop.xlane.xlu1 %743 }
 0x1be   : > { %1367 = vrsqrt.f32 %v747_v44  ;;  %v746_v46 = vmul.f32 0.03125, %v744_v45 }
 0x1c0   : > { %v748_v47 = vadd.f32 1e-05, %v746_v46 }
 0x1c1   : > { %v679_v48 = vpop.xlane.xlu1 %678 }
 0x1c2   : > { %1369 = vrsqrt.f32 %v748_v47  ;;  %v683_v49 = vmul.f32 0.03125, %v679_v48 }
 0x1c4   : > { %v685_v50 = vadd.f32 1e-05, %v683_v49 }
 0x1c5   : > { %v682_v51 = vpop.xlane.xlu1 %681 }
 0x1c6   : > { %1371 = vrsqrt.f32 %v685_v50  ;;  %v684_v52 = vmul.f32 0.03125, %v682_v51 }
 0x1c8   : > { %v1368_v55 = vpop.eup %1367  ;;  %v686_v56 = vadd.f32 1e-05, %v684_v52 }
 0x1c9   : > { %v751_v57 = vmul.f32 %v1368_v55, %v735_v23  ;;  %v783_v58 = vpop.permute.xlu1 %782 }
 0x1ca   : > { %1373 = vrsqrt.f32 %v686_v56  ;;  %v785_v60 = vmul.f32 %v783_v58, %v771_v53  ;;  %v786_v61 = vmul.f32 %v783_v58, %v772_v54  ;;  %v1279_v58 = vld [vmem:[%s634_s15] ss:$0 sm:$0xff] }
 0x1cb   : > { %v760_v2 = vmul.f32 %v1275_v59, %v751_v57 }
 0x1cc   : > { %v1370_v62 = vpop.eup %1369  ;;  %v787_v63 = vsel %vm773_vm6, %v771_v53, %v785_v60  ;;  %v788_v0 = vsel %vm774_vm7, %v772_v54, %v786_v61  ;;  %v1278_v54 = vld [vmem:[%s631_s30] ss:$0 sm:$0xff] }
 0x1cd   : > { %v752_v1 = vmul.f32 %v1370_v62, %v736_v29  ;;  %v790_v3 = vsel %vm789_vm8, %v787_v63, 0.0  ;;  %v794_v6 = vsel %vm793_vm9, %v788_v0, 0.0  ;;  %v769_v9 = vadd.f32 %v1276_v4, %v760_v2 }
 0x1ce   : > { %791 = vadd.xlane.f32.xlu0 %v790_v3 }
 0x1cf   : > { %v761_v5 = vmul.f32 %v1275_v59, %v752_v1 }
 0x1d0   : > { %v1372_v7 = vpop.eup %1371 }
 0x1d1   : > { %v770_v10 = vadd.f32 %v1276_v4, %v761_v5  ;;  %v689_v11 = vmul.f32 %v1372_v7, %v1549_v30 }
 0x1d2   : > { %795 = vadd.xlane.f32.xlu0 %v794_v6 }
 0x1d3   : > { %v1311_v13 = vpack.c.bf16 %v770_v10, %v769_v9  ;;  %v698_v14 = vmul.f32 %v1272_v8, %v689_v11 }
 0x1d4   : > { %v1374_v15 = vpop.eup %1373 }
 0x1d5   : > { %1313 = vmatprep.subr.msk.bf16.mxu0 %vm1312_vm10, %v1311_v13  ;;  %v690_v16 = vmul.f32 %v1374_v15, %v1552_v35  ;;  %v707_v17 = vadd.f32 %v1273_v12, %v698_v14 }
 0x1d6   : > { %1316 = vmatpush3.bf16.xpose.msk.msra.mxu0 %vm1312_vm10, %v1311_v13 }
 0x1d7   : > { %v699_v18 = vmul.f32 %v1272_v8, %v690_v16  ;;  %1301 = vmatprep.mubr.msk.f32.mxu0 %vm662_vm1, %v707_v17 }
 0x1d9   : > { %v708_v19 = vadd.f32 %v1273_v12, %v699_v18 }
 0x1dd   : > { %1302 = vmatmul.mubr.msk.f32.vlgmr.msra.gmra.mrb[0].mxu0 %vm662_vm1, %v708_v19 }
 0x25b   : > { %v792_v20 = vpop.xlane.xlu0 %791 }
 0x25c   : > { %v798_v21 = vmul.f32 0.0625, %v792_v20 }
 0x25e   : > { %v800_v23 = vsub.f32 %v787_v63, %v798_v21 }
 0x25f   : > { %v796_v22 = vpop.xlane.xlu0 %795 }
 0x260   : > { %v799_v24 = vmul.f32 0.0625, %v796_v22  ;;  %v802_v31 = vmul.f32 %v800_v23, %v800_v23 }
 0x262   : > { %v801_v29 = vsub.f32 %v788_v0, %v799_v24  ;;  %v804_v33 = vsel %vm789_vm8, %v802_v31, 0.0 }
 0x264   : > { %v803_v34 = vmul.f32 %v801_v29, %v801_v29 }
 0x266   : > { %v807_v35 = vsel %vm793_vm9, %v803_v34, 0.0 }
 0x2b0   : > { %v1303_v25 = vpop.f32.mrb[0].mxu0 }
 0x2b1   : > { %v924_v26 = vmul.f32 0.17677669, %v1303_v25  ;;  %v914_v27 = vpop.f32.mrb[1].mxu0 }
 0x2b2   : > { %v923_v28 = vmul.f32 0.17677669, %v914_v27 }
 0x2b3   : > { %v930_v30 = vsel %vm929_vm11, %v924_v26, -inf }
 0x2b4   : > { %931 = vmax.xlane.f32.xlu0 %v930_v30  ;;  %v926_v32 = vsel %vm925_vm12, %v923_v28, -inf }
 0x2b5   : > { %927 = vmax.xlane.f32.xlu1 %v926_v32 }
 0x2b8   : > { %805 = vadd.xlane.f32.xlu0 %v804_v33 }
 0x2bc   : > { %808 = vadd.xlane.f32.xlu0 %v807_v35 }
 0x341   : > { %v932_v36 = vpop.xlane.xlu0 %931 }
 0x342   : > { %v934_v37 = vsub.f32 %v924_v26, %v932_v36  ;;  %v928_v38 = vpop.xlane.xlu1 %927 }
 0x343   : > { %v933_v39 = vsub.f32 %v923_v28, %v928_v38 }
 0x344   : > { %v937_v40 = vmul.f32 1.442695, %v934_v37 }
 0x345   : > { %v935_v41 = vmul.f32 1.442695, %v933_v39  ;;  %v806_v42 = vpop.xlane.xlu0 %805 }
 0x346   : > { %v810_v43 = vmul.f32 0.0625, %v806_v42 }
 0x347   : > { %1375 = vpow2.f32 %v935_v41 }
 0x348   : > { %v812_v44 = vadd.f32 1e-05, %v810_v43  ;;  %1377 = vpow2.f32 %v937_v40 }
 0x349   : > { %v809_v45 = vpop.xlane.xlu0 %808 }
 0x34a   : > { %1379 = vrsqrt.f32 %v812_v44  ;;  %v811_v46 = vmul.f32 0.0625, %v809_v45 }
 0x34c   : > { %v813_v47 = vadd.f32 1e-05, %v811_v46 }
 0x34e   : > { %1381 = vrsqrt.f32 %v813_v47 }
 0x351   : > { %v1376_v48 = vpop.eup %1375 }
 0x352   : > { %v939_v49 = vsel %vm925_vm12, %v1376_v48, 0.0  ;;  %v1378_v50 = vpop.eup %1377 }
 0x353   : > { %940 = vadd.xlane.f32.xlu0 %v939_v49  ;;  %v942_v53 = vsel %vm929_vm11, %v1378_v50, 0.0 }
 0x354   : > { %v1380_v51 = vpop.eup %1379 }
 0x355   : > { %v816_v52 = vmul.f32 %v1380_v51, %v800_v23 }
 0x357   : > { %943 = vadd.xlane.f32.xlu0 %v942_v53  ;;  %v825_v57 = vmul.f32 %v1278_v54, %v816_v52 }
 0x358   : > { %v1382_v55 = vpop.eup %1381 }
 0x359   : > { %v817_v56 = vmul.f32 %v1382_v55, %v801_v29  ;;  %v834_v60 = vadd.f32 %v1279_v58, %v825_v57 }
 0x35b   : > { %v826_v59 = vmul.f32 %v1278_v54, %v817_v56 }
 0x35d   : > { %v835_v61 = vadd.f32 %v1279_v58, %v826_v59 }
 0x35f   : > { %v1317_v62 = vpack.c.bf16 %v835_v61, %v834_v60 }
 0x361   : > { %1319 = vmatprep.subr.msk.bf16.mxu1 %vm1318_vm15, %v1317_v62 }
 0x362   : > { %1322 = vmatpush3.bf16.msk.msra.mxu1 %vm1318_vm15, %v1317_v62 }
 0x3e0   : > { %v941_v63 = vpop.xlane.xlu0 %940 }
 0x3e1   : > { %1383 = vrcp.f32 %v941_v63 }
 0x3e4   : > { %v944_v0 = vpop.xlane.xlu0 %943 }
 0x3e5   : > { %1385 = vrcp.f32 %v944_v0 }
 0x3eb   : > { %v1384_v1 = vpop.eup %1383 }
 0x3ec   : > { %v947_v2 = vmul.f32 %v1384_v1, %v1376_v48 }
 0x3ee   : > { %1308 = vmatprep.mubr.msk.f32.mxu1 %vm925_vm12, %v947_v2 }
 0x3ef   : > { %v1386_v3 = vpop.eup %1385 }
 0x3f0   : > { %v948_v4 = vmul.f32 %v1386_v3, %v1378_v50 }
 0x3f2   : > { %1309 = vmatmul.mubr.msk.f32.vlgmr.msra.gmra.mrb[0].mxu1 %vm925_vm12, %v948_v4 }
 0x4c5   : > { %v1310_v5 = vpop.f32.mrb[0].mxu1 }
 0x4c6   : > { %1035 = vst.msk [vmem:[%s643_s17 + $0x8] sm:$0xf] %vm793_vm9, %v1310_v5  ;;  %v1025_v6 = vpop.f32.mrb[1].mxu1 }
 0x4c7   : > { %1034 = vst.msk [vmem:[%s643_s17] sm:$0xff] %vm789_vm8, %v1025_v6 }
 0x4c8 PF: > { %s22_s25 = sadd.s32 1, %s1425_s25   ;;  %s1643_s21 = smov %s1417_s23 }
 0x4c9   : > { %p19_p7 = scmp.ge.s32.totalorder %s22_s25, 10   ;;  %s1644_s22 = smov %s1421_s24 }
 0x4ca   : > { %s1645_s23 = smov %s1648_s26  ;;  %s1646_s24 = smov %s1652_s27 }
 0x4cb   :  { %21 = sbr.rel (!%p19_p7) target bundleno = 3 (0x3), region = 131 }

// kernel: gridnet_v2_block.7
= control target key start
LH: loop header
LB: loop body
LE: loop exit
PB: predicated region body
PF: predicated region fallthrough
CT: control target
= control target key end

     0   :  { %vm60_vm0 = vcmask 64512   ;;  %v1267_v3 = vmov 0   ;;  %s1976_s1 = inlined_call_operand.vmem [shape: f32[8,8], index: 1, kind: input, shape index: {}]   ;;  %s1977_s0 = inlined_call_operand.vmem [shape: f32[24,8,8], index: 0, kind: input, shape index: {}]   ;;  %s1978_s3 = inlined_call_operand.<no memory space> [shape: f32[1,1], index: 3, kind: input, shape index: {}]   ;;  %s1979_s2 = inlined_call_operand.vmem [shape: f32[1,8], index: 2, kind: input, shape index: {}]   ;;  %s1980_s4 = inlined_call_operand.vmem [shape: f32[1,8,8], index: 4, kind: input, shape index: {}]   ;;  %s1981_s5 = inlined_call_operand.vmem [shape: f32[1,8,8], index: 5, kind: input, shape index: {}]   ;;  %s1982_s6 = inlined_call_operand.vmem [shape: f32[24,8,8], index: 6, kind: input, shape index: {}]   ;;  %s1983_s7 = inlined_call_operand.vmem [shape: f32[24,8,8], index: 7, kind: output, shape index: {}]  }
   0x1   :  { %v52_v0 = vld [vmem:[%s1976_s1] sm:$0xff]  ;;  %1218 = vset.pattern.permute.xlu0 %v1267_v3  ;;  %v12_v4 = vstv %s1978_s3  ;;  %v29_v5 = vld [vmem:[%s1977_s0 + $0x8] sm:$0xff]  ;;  %v30_v7 = vld [vmem:[%s1977_s0 + $0x10] sm:$0xff] }
   0x2   :  { %v28_v1 = vld [vmem:[%s1977_s0] sm:$0xff]  ;;  %1177 = vmatprep.subr.mxu0 %v52_v0  ;;  %1215 = vmatprep.subr.mxu1 %v52_v0  ;;  %v41_v6 = vld [vmem:[%s1977_s0 + $0x68] sm:$0xff]  ;;  %13 = vst [vmem:[#allocation2] sm:$0x1] %v12_v4  ;;  %v42_v8 = vld [vmem:[%s1977_s0 + $0x70] sm:$0xff] }
   0x3   :  { %v40_v2 = vld [vmem:[%s1977_s0 + $0x60] sm:$0xff]  ;;  %1178 = vmatpush3.msra.mxu0 %v52_v0  ;;  %1216 = vmatpush3.msra.mxu1 %v52_v0  ;;  %v31_v9 = vld [vmem:[%s1977_s0 + $0x18] sm:$0xff]  ;;  %v33_v14 = vld [vmem:[%s1977_s0 + $0x28] sm:$0xff] }
   0x4   :  { %1179 = vmatprep.mubr.msk.f32.mxu0 %vm60_vm0, %v28_v1  ;;  %1197 = vmatprep.mubr.msk.f32.mxu1 %vm60_vm0, %v40_v2  ;;  %v43_v10 = vld [vmem:[%s1977_s0 + $0x78] sm:$0xff]  ;;  %v32_v11 = vld [vmem:[%s1977_s0 + $0x20] sm:$0xff]  ;;  %v45_v15 = vld [vmem:[%s1977_s0 + $0x88] sm:$0xff] }
   0x5   :  { %1180 = vmatmul.mubr.msk.f32.vlgmr.msra.gmra.mrb[0].mxu0 %vm60_vm0, %v29_v5  ;;  %1198 = vmatmul.mubr.msk.f32.vlgmr.msra.gmra.mrb[0].mxu1 %vm60_vm0, %v41_v6  ;;  %v44_v12 = vld [vmem:[%s1977_s0 + $0x80] sm:$0xff]  ;;  %v34_v16 = vld [vmem:[%s1977_s0 + $0x30] sm:$0xff]  ;;  %v35_v18 = vld [vmem:[%s1977_s0 + $0x38] sm:$0xff] }
   0x6   :  { %1182 = vmatprep.mubr.msk.f32.mxu0 %vm60_vm0, %v30_v7  ;;  %1200 = vmatprep.mubr.msk.f32.mxu1 %vm60_vm0, %v42_v8  ;;  %v46_v17 = vld [vmem:[%s1977_s0 + $0x90] sm:$0xff]  ;;  %v47_v19 = vld [vmem:[%s1977_s0 + $0x98] sm:$0xff]  ;;  %v36_v20 = vld [vmem:[%s1977_s0 + $0x40] sm:$0xff] }
   0x7   :  { %v48_v21 = vld [vmem:[%s1977_s0 + $0xa0] sm:$0xff]  ;;  %v37_v22 = vld [vmem:[%s1977_s0 + $0x48] sm:$0xff]  ;;  %v38_v24 = vld [vmem:[%s1977_s0 + $0x50] sm:$0xff] }
   0x8   :  { %v49_v23 = vld [vmem:[%s1977_s0 + $0xa8] sm:$0xff]  ;;  %v50_v25 = vld [vmem:[%s1977_s0 + $0xb0] sm:$0xff]  ;;  %v39_v26 = vld [vmem:[%s1977_s0 + $0x58] sm:$0xff] }
   0x9   :  { %1183 = vmatmul.mubr.msk.f32.gmra.mrb[2].mxu0 %vm60_vm0, %v31_v9  ;;  %1201 = vmatmul.mubr.msk.f32.gmra.mrb[2].mxu1 %vm60_vm0, %v43_v10  ;;  %v1151_v13 = vld [vmem:[#allocation2] ss:$0 sm:$0xff]  ;;  %v51_v27 = vld [vmem:[%s1977_s0 + $0xb8] sm:$0xff] }
   0xa   :  { %1185 = vmatprep.mubr.msk.f32.mxu0 %vm60_vm0, %v32_v11  ;;  %1203 = vmatprep.mubr.msk.f32.mxu1 %vm60_vm0, %v44_v12  ;;  %v1413_v28 = vld [vmem:[%s1979_s2] ss:$0 sm:$0xff] }
   0xb   :  { %349 = vperm.xlu0 %1218, %v1151_v13  }
   0xd   :  { %1186 = vmatmul.mubr.msk.f32.gmra.mrb[4].mxu0 %vm60_vm0, %v33_v14  ;;  %1204 = vmatmul.mubr.msk.f32.gmra.mrb[4].mxu1 %vm60_vm0, %v45_v15 }
   0xe   :  { %1188 = vmatprep.mubr.msk.f32.mxu0 %vm60_vm0, %v34_v16  ;;  %1206 = vmatprep.mubr.msk.f32.mxu1 %vm60_vm0, %v46_v17 }
  0x11   :  { %1189 = vmatmul.mubr.msk.f32.gmra.mrb[6].mxu0 %vm60_vm0, %v35_v18  ;;  %1207 = vmatmul.mubr.msk.f32.gmra.mrb[6].mxu1 %vm60_vm0, %v47_v19 }
  0x12   :  { %1191 = vmatprep.mubr.msk.f32.mxu0 %vm60_vm0, %v36_v20  ;;  %1209 = vmatprep.mubr.msk.f32.mxu1 %vm60_vm0, %v48_v21 }
  0x15   :  { %1192 = vmatmul.mubr.msk.f32.gmra.mrb[8].mxu0 %vm60_vm0, %v37_v22  ;;  %1210 = vmatmul.mubr.msk.f32.gmra.mrb[8].mxu1 %vm60_vm0, %v49_v23 }
  0x16   :  { %1194 = vmatprep.mubr.msk.f32.mxu0 %vm60_vm0, %v38_v24  ;;  %1212 = vmatprep.mubr.msk.f32.mxu1 %vm60_vm0, %v50_v25 }
  0x19   :  { %1195 = vmatmul.mubr.msk.f32.gmra.mrb[10].mxu0 %vm60_vm0, %v39_v26  ;;  %1213 = vmatmul.mubr.msk.f32.gmra.mrb[10].mxu1 %vm60_vm0, %v51_v27 }
  0x8a   :  { %v1415_v29 = vpop.permute.xlu0 %349 }
  0xd8   :  { %v1181_v30 = vpop.f32.mrb[0].mxu0  ;;  %v1199_v31 = vpop.f32.mrb[0].mxu1 }
  0xd9   :  { %v205_v32 = vadd.f32 %v1181_v30, %v1413_v28  ;;  %v265_v33 = vadd.f32 %v1199_v31, %v1413_v28  ;;  %v199_v34 = vpop.f32.mrb[1].mxu0  ;;  %v259_v35 = vpop.f32.mrb[1].mxu1 }
  0xda   :  { %v200_v36 = vadd.f32 %v1413_v28, %v199_v34  ;;  %v260_v37 = vadd.f32 %v1413_v28, %v259_v35 }
  0xdb   :  { %vm319_vm1 = vcmp.ge.f32.partialorder %v205_v32, 0.0  ;;  %v353_v38 = vmul.f32 %v1415_v29, %v205_v32  ;;  %v365_v39 = vmul.f32 %v1415_v29, %v265_v33  ;;  %vm331_vm3 = vcmp.ge.f32.partialorder %v265_v33, 0.0 }
  0xdc   :  { %v1184_v40 = vpop.f32.mrb[2].mxu0  ;;  %v1202_v41 = vpop.f32.mrb[2].mxu1  ;;  %vm318_vm2 = vcmp.ge.f32.partialorder %v200_v36, 0.0  ;;  %v352_v42 = vmul.f32 %v1415_v29, %v200_v36  ;;  %v364_v43 = vmul.f32 %v1415_v29, %v260_v37  ;;  %vm330_vm4 = vcmp.ge.f32.partialorder %v260_v37, 0.0 }
  0xdd   :  { %v215_v44 = vadd.f32 %v1184_v40, %v1413_v28  ;;  %v209_v45 = vpop.f32.mrb[3].mxu0  ;;  %v269_v46 = vpop.f32.mrb[3].mxu1  ;;  %v1426_v47 = vsel %vm319_vm1, %v205_v32, %v353_v38  ;;  %v275_v52 = vadd.f32 %v1202_v41, %v1413_v28  ;;  %v1437_v54 = vsel %vm331_vm3, %v265_v33, %v365_v39 }
  0xde   :  { %v270_v48 = vadd.f32 %v1413_v28, %v269_v46  ;;  %v403_v49 = vsel %vm60_vm0, %v1426_v47, 0.0  ;;  %v1431_v50 = vsel %vm318_vm2, %v200_v36, %v352_v42  ;;  %v1440_v58 = vsel %vm330_vm4, %v260_v37, %v364_v43 }
  0xdf   :  { %v355_v51 = vmul.f32 %v1415_v29, %v215_v44  ;;  %404 = vadd.xlane.f32.xlu1 %v403_v49  ;;  %v400_v53 = vsel %vm60_vm0, %v1431_v50, 0.0  ;;  %vm321_vm5 = vcmp.ge.f32.partialorder %v215_v44, 0.0  ;;  %v439_v62 = vsel %vm60_vm0, %v1437_v54, 0.0 }
  0xe0   :  { %v366_v55 = vmul.f32 %v1415_v29, %v270_v48  ;;  %v1187_v56 = vpop.f32.mrb[4].mxu0  ;;  %v1205_v57 = vpop.f32.mrb[4].mxu1  ;;  %401 = vadd.xlane.f32.xlu0 %v400_v53  ;;  %vm332_vm6 = vcmp.ge.f32.partialorder %v270_v48, 0.0  ;;  %v367_v63 = vmul.f32 %v1415_v29, %v275_v52  ;;  %v210_v0 = vadd.f32 %v1413_v28, %v209_v45 }
  0xe1   :  { %v219_v59 = vpop.f32.mrb[5].mxu0  ;;  %v279_v60 = vpop.f32.mrb[5].mxu1  ;;  %v436_v1 = vsel %vm60_vm0, %v1440_v58, 0.0  ;;  %v1449_v2 = vsel %vm321_vm5, %v215_v44, %v355_v51  ;;  %vm333_vm7 = vcmp.ge.f32.partialorder %v275_v52, 0.0  ;;  %v225_v12 = vadd.f32 %v1187_v56, %v1413_v28 }
  0xe2   :  { %v280_v61 = vadd.f32 %v1413_v28, %v279_v60  ;;  %v1454_v6 = vsel %vm332_vm6, %v270_v48, %v366_v55  ;;  %v409_v10 = vsel %vm60_vm0, %v1449_v2, 0.0  ;;  %v354_v11 = vmul.f32 %v1415_v29, %v210_v0 }
  0xe3   :  { %440 = vadd.xlane.f32.xlu1 %v439_v62  ;;  %v442_v13 = vsel %vm60_vm0, %v1454_v6, 0.0  ;;  %v1465_v14 = vsel %vm333_vm7, %v275_v52, %v367_v63  ;;  %vm320_vm9 = vcmp.ge.f32.partialorder %v210_v0, 0.0  ;;  %v357_v23 = vmul.f32 %v1415_v29, %v225_v12 }
  0xe4   :  { %v368_v3 = vmul.f32 %v1415_v29, %v280_v61  ;;  %v1190_v4 = vpop.f32.mrb[6].mxu0  ;;  %v1452_v5 = vpop.f32.mrb[6].mxu1  ;;  %437 = vadd.xlane.f32.xlu0 %v436_v1  ;;  %vm334_vm8 = vcmp.ge.f32.partialorder %v280_v61, 0.0  ;;  %v445_v22 = vsel %vm60_vm0, %v1465_v14, 0.0  ;;  %v285_v24 = vadd.f32 %v1205_v57, %v1413_v28 }
  0xe5   :  { %v1456_v7 = vpop.f32.mrb[7].mxu0  ;;  %v289_v8 = vpop.f32.mrb[7].mxu1  ;;  %v1483_v26 = vsel %vm320_vm9, %v210_v0, %v354_v11  ;;  %vm323_vm11 = vcmp.ge.f32.partialorder %v225_v12, 0.0  ;;  %v220_v38 = vadd.f32 %v1413_v28, %v219_v59  ;;  %v235_v46 = vadd.f32 %v1190_v4, %v1413_v28 }
  0xe6   :  { %v290_v9 = vadd.f32 %v1413_v28, %v289_v8  ;;  %v1472_v18 = vsel %vm334_vm8, %v280_v61, %v368_v3  ;;  %v406_v36 = vsel %vm60_vm0, %v1483_v26, 0.0  ;;  %v369_v37 = vmul.f32 %v1415_v29, %v285_v24 }
  0xe7   :  { %410 = vadd.xlane.f32.xlu1 %v409_v10  ;;  %v448_v25 = vsel %vm60_vm0, %v1472_v18, 0.0  ;;  %v1499_v40 = vsel %vm323_vm11, %v225_v12, %v357_v23  ;;  %vm335_vm13 = vcmp.ge.f32.partialorder %v285_v24, 0.0  ;;  %v356_v45 = vmul.f32 %v1415_v29, %v220_v38 }
  0xe8   :  { %v370_v15 = vmul.f32 %v1415_v29, %v290_v9  ;;  %v1468_v16 = vpop.f32.mrb[8].mxu0  ;;  %v1470_v17 = vpop.f32.mrb[8].mxu1  ;;  %443 = vadd.xlane.f32.xlu0 %v442_v13  ;;  %vm336_vm10 = vcmp.ge.f32.partialorder %v290_v9, 0.0  ;;  %v415_v44 = vsel %vm60_vm0, %v1499_v40, 0.0  ;;  %v1511_v49 = vsel %vm335_vm13, %v285_v24, %v369_v37 }
  0xe9   :  { %v1474_v19 = vpop.f32.mrb[9].mxu0  ;;  %v299_v20 = vpop.f32.mrb[9].mxu1  ;;  %vm322_vm15 = vcmp.ge.f32.partialorder %v220_v38, 0.0  ;;  %v451_v53 = vsel %vm60_vm0, %v1511_v49, 0.0  ;;  %v359_v55 = vmul.f32 %v1415_v29, %v235_v46  ;;  %v295_v56 = vadd.f32 %v1452_v5, %v1413_v28 }
  0xea   :  { %v300_v21 = vadd.f32 %v1413_v28, %v299_v20  ;;  %v1490_v32 = vsel %vm336_vm10, %v290_v9, %v370_v15  ;;  %v1523_v59 = vsel %vm322_vm15, %v220_v38, %v356_v45  ;;  %vm325_vm2 = vcmp.ge.f32.partialorder %v235_v46, 0.0 }
  0xeb   :  { %446 = vadd.xlane.f32.xlu1 %v445_v22  ;;  %v454_v39 = vsel %vm60_vm0, %v1490_v32, 0.0  ;;  %v412_v61 = vsel %vm60_vm0, %v1523_v59, 0.0  ;;  %v371_v62 = vmul.f32 %v1415_v29, %v295_v56  ;;  %v230_v63 = vadd.f32 %v1413_v28, %v1456_v7 }
  0xec   :  { %v372_v27 = vmul.f32 %v1415_v29, %v300_v21  ;;  %v1486_v30 = vpop.f32.mrb[10].mxu0  ;;  %v1488_v31 = vpop.f32.mrb[10].mxu1  ;;  %449 = vadd.xlane.f32.xlu0 %v448_v25  ;;  %vm338_vm12 = vcmp.ge.f32.partialorder %v300_v21, 0.0  ;;  %v1534_v1 = vsel %vm325_vm2, %v235_v46, %v359_v55  ;;  %vm337_vm3 = vcmp.ge.f32.partialorder %v295_v56, 0.0 }
  0xed   :  { %v249_v33 = vpop.f32.mrb[11].mxu0  ;;  %v309_v34 = vpop.f32.mrb[11].mxu1  ;;  %v421_v3 = vsel %vm60_vm0, %v1534_v1, 0.0  ;;  %v358_v4 = vmul.f32 %v1415_v29, %v230_v63  ;;  %v245_v5 = vadd.f32 %v1468_v16, %v1413_v28  ;;  %v1541_v8 = vsel %vm337_vm3, %v295_v56, %v371_v62 }
  0xee   :  { %v250_v35 = vadd.f32 %v1413_v28, %v249_v33  ;;  %v310_v42 = vadd.f32 %v1413_v28, %v309_v34  ;;  %v1503_v43 = vsel %vm338_vm12, %v300_v21, %v372_v27  ;;  %vm324_vm4 = vcmp.ge.f32.partialorder %v230_v63, 0.0 }
  0xef   :  { %407 = vadd.xlane.f32.xlu1 %v406_v36  ;;  %v460_v48 = vsel %vm60_vm0, %v1503_v43, 0.0  ;;  %v457_v7 = vsel %vm60_vm0, %v1541_v8, 0.0  ;;  %v361_v9 = vmul.f32 %v1415_v29, %v245_v5  ;;  %v305_v10 = vadd.f32 %v1470_v17, %v1413_v28 }
  0xf0   :  { %v362_v41 = vmul.f32 %v1415_v29, %v250_v35  ;;  %455 = vadd.xlane.f32.xlu0 %v454_v39  ;;  %vm328_vm14 = vcmp.ge.f32.partialorder %v250_v35, 0.0  ;;  %v374_v51 = vmul.f32 %v1415_v29, %v310_v42  ;;  %vm340_vm1 = vcmp.ge.f32.partialorder %v310_v42, 0.0 }
  0xf1   :  { %v1548_v11 = vsel %vm324_vm4, %v230_v63, %v358_v4  ;;  %vm327_vm5 = vcmp.ge.f32.partialorder %v245_v5, 0.0  ;;  %v373_v13 = vmul.f32 %v1415_v29, %v305_v10  ;;  %v240_v15 = vadd.f32 %v1413_v28, %v1474_v19 }
  0xf2   :  { %v1514_v52 = vsel %vm328_vm14, %v250_v35, %v362_v41  ;;  %v1525_v60 = vsel %vm340_vm1, %v310_v42, %v374_v51  ;;  %v418_v12 = vsel %vm60_vm0, %v1548_v11, 0.0  ;;  %v1555_v16 = vsel %vm327_vm5, %v245_v5, %v361_v9 }
  0xf3   :  { %416 = vadd.xlane.f32.xlu1 %v415_v44  ;;  %v430_v57 = vsel %vm60_vm0, %v1514_v52, 0.0  ;;  %v466_v0 = vsel %vm60_vm0, %v1525_v60, 0.0  ;;  %vm339_vm6 = vcmp.ge.f32.partialorder %v305_v10, 0.0  ;;  %v427_v20 = vsel %vm60_vm0, %v1555_v16, 0.0 }
  0xf4   :  { %461 = vadd.xlane.f32.xlu0 %v460_v48  ;;  %v360_v17 = vmul.f32 %v1415_v29, %v240_v15  ;;  %v255_v21 = vadd.f32 %v1486_v30, %v1413_v28  ;;  %v1562_v22 = vsel %vm339_vm6, %v305_v10, %v373_v13  ;;  %vm326_vm7 = vcmp.ge.f32.partialorder %v240_v15, 0.0 }
  0xf5   :  { %v463_v23 = vsel %vm60_vm0, %v1562_v22, 0.0  ;;  %v315_v24 = vadd.f32 %v1488_v31, %v1413_v28 }
  0xf6   :  { %v363_v19 = vmul.f32 %v1415_v29, %v255_v21  ;;  %v1569_v25 = vsel %vm326_vm7, %v240_v15, %v360_v17  ;;  %vm329_vm8 = vcmp.ge.f32.partialorder %v255_v21, 0.0 }
  0xf7   :  { %452 = vadd.xlane.f32.xlu1 %v451_v53  ;;  %v424_v27 = vsel %vm60_vm0, %v1569_v25, 0.0  ;;  %v375_v30 = vmul.f32 %v1415_v29, %v315_v24  ;;  %vm341_vm9 = vcmp.ge.f32.partialorder %v315_v24, 0.0 }
  0xf8   :  { %431 = vadd.xlane.f32.xlu0 %v430_v57  ;;  %v1574_v33 = vsel %vm329_vm8, %v255_v21, %v363_v19 }
  0xf9   :  { %v433_v34 = vsel %vm60_vm0, %v1574_v33, 0.0  ;;  %v1578_v35 = vsel %vm341_vm9, %v315_v24, %v375_v30 }
  0xfa   :  { %v469_v28 = vsel %vm60_vm0, %v1578_v35, 0.0 }
  0xfb   :  { %413 = vadd.xlane.f32.xlu1 %v412_v61 }
  0xfc   :  { %467 = vadd.xlane.f32.xlu0 %v466_v0 }
  0xff   :  { %422 = vadd.xlane.f32.xlu1 %v421_v3 }
 0x103   :  { %458 = vadd.xlane.f32.xlu1 %v457_v7 }
 0x107   :  { %419 = vadd.xlane.f32.xlu1 %v418_v12 }
 0x10b   :  { %428 = vadd.xlane.f32.xlu1 %v427_v20 }
 0x10f   :  { %464 = vadd.xlane.f32.xlu1 %v463_v23 }
 0x113   :  { %425 = vadd.xlane.f32.xlu1 %v424_v27 }
 0x117   :  { %434 = vadd.xlane.f32.xlu1 %v433_v34 }
 0x11b   :  { %470 = vadd.xlane.f32.xlu1 %v469_v28 }
 0x16c   :  { %v405_v31 = vpop.xlane.xlu1 %404 }
 0x16d   :  { %v478_v36 = vrot.slane %v405_v31, 4  ;;  %v402_v37 = vpop.xlane.xlu0 %401 }
 0x16e   :  { %v472_v38 = vrot.slane %v402_v37, 4 }
 0x16f   :  { %v479_v39 = vadd.f32 %v478_v36, %v405_v31 }
 0x170   :  { %v473_v29 = vadd.f32 %v472_v38, %v402_v37  ;;  %v441_v41 = vpop.xlane.xlu1 %440 }
 0x171   :  { %v480_v42 = vrot.slane %v479_v39, 2  ;;  %v550_v44 = vrot.slane %v441_v41, 4  ;;  %v438_v45 = vpop.xlane.xlu0 %437 }
 0x172   :  { %v474_v46 = vrot.slane %v473_v29, 2  ;;  %v544_v48 = vrot.slane %v438_v45, 4 }
 0x173   :  { %v481_v51 = vadd.f32 %v480_v42, %v479_v39  ;;  %v551_v53 = vadd.f32 %v550_v44, %v441_v41 }
 0x174   :  { %v475_v55 = vadd.f32 %v474_v46, %v473_v29  ;;  %v545_v56 = vadd.f32 %v544_v48, %v438_v45  ;;  %v411_v57 = vpop.xlane.xlu1 %410 }
 0x175   :  { %v482_v61 = vrot.slane %v481_v51, 1  ;;  %v552_v62 = vrot.slane %v551_v53, 2  ;;  %v490_v63 = vrot.slane %v411_v57, 4  ;;  %v444_v0 = vpop.xlane.xlu0 %443 }
 0x176   :  { %v476_v3 = vrot.slane %v475_v55, 1  ;;  %v546_v4 = vrot.slane %v545_v56, 2  ;;  %v556_v5 = vrot.slane %v444_v0, 4 }
 0x177   :  { %v483_v7 = vadd.f32 %v482_v61, %v481_v51  ;;  %v553_v9 = vadd.f32 %v552_v62, %v551_v53  ;;  %v491_v10 = vadd.f32 %v490_v63, %v411_v57 }
 0x178   :  { %v477_v12 = vadd.f32 %v476_v3, %v475_v55  ;;  %v547_v13 = vadd.f32 %v546_v4, %v545_v56  ;;  %v557_v15 = vadd.f32 %v556_v5, %v444_v0  ;;  %v447_v20 = vpop.xlane.xlu1 %446 }
 0x179   :  { %v617_v17 = vmul.f32 0.015625, %v483_v7  ;;  %v554_v21 = vrot.slane %v553_v9, 1  ;;  %v492_v23 = vrot.slane %v491_v10, 2  ;;  %v562_v19 = vrot.slane %v447_v20, 4  ;;  %v450_v24 = vpop.xlane.xlu0 %449 }
 0x17a   :  { %v616_v27 = vmul.f32 0.015625, %v477_v12  ;;  %v568_v30 = vrot.slane %v450_v24, 4  ;;  %v548_v34 = vrot.slane %v547_v13, 1  ;;  %v558_v29 = vrot.slane %v557_v15, 2 }
 0x17b   :  { %v493_v28 = vadd.f32 %v492_v23, %v491_v10  ;;  %v563_v31 = vadd.f32 %v562_v19, %v447_v20  ;;  %v1583_v36 = vsub.f32 %v1426_v47, %v617_v17  ;;  %v555_v37 = vadd.f32 %v554_v21, %v553_v9 }
 0x17c   :  { %v408_v38 = vpop.xlane.xlu1 %407  ;;  %v1586_v39 = vsub.f32 %v1431_v50, %v616_v27  ;;  %v569_v45 = vadd.f32 %v568_v30, %v450_v24  ;;  %v549_v46 = vadd.f32 %v548_v34, %v547_v13  ;;  %v559_v57 = vadd.f32 %v558_v29, %v557_v15 }
 0x17d   :  { %v564_v41 = vrot.slane %v563_v31, 2  ;;  %v484_v42 = vrot.slane %v408_v38, 4  ;;  %v494_v44 = vrot.slane %v493_v28, 1  ;;  %v665_v53 = vmul.f32 %v1583_v36, %v1583_v36  ;;  %v456_v62 = vpop.xlane.xlu0 %455 }
 0x17e   :  { %v629_v55 = vmul.f32 0.015625, %v555_v37  ;;  %v664_v47 = vmul.f32 %v1586_v39, %v1586_v39  ;;  %v570_v3 = vrot.slane %v569_v45, 2  ;;  %v628_v5 = vmul.f32 0.015625, %v549_v46 }
 0x17f   :  { %v565_v48 = vadd.f32 %v564_v41, %v563_v31  ;;  %v485_v51 = vadd.f32 %v484_v42, %v408_v38  ;;  %v691_v63 = vsel %vm60_vm0, %v665_v53, 0.0  ;;  %v495_v0 = vadd.f32 %v494_v44, %v493_v28 }
 0x180   :  { %v417_v56 = vpop.xlane.xlu1 %416  ;;  %692 = vadd.xlane.f32.xlu1 %v691_v63  ;;  %v688_v9 = vsel %vm60_vm0, %v664_v47, 0.0  ;;  %v580_v10 = vrot.slane %v456_v62, 4  ;;  %v1595_v13 = vsub.f32 %v1437_v54, %v629_v55  ;;  %v560_v20 = vrot.slane %v559_v57, 1 }
 0x181   :  { %v566_v61 = vrot.slane %v565_v48, 1  ;;  %v486_v50 = vrot.slane %v485_v51, 2  ;;  %v502_v4 = vrot.slane %v417_v56, 4  ;;  %689 = vadd.xlane.f32.xlu0 %v688_v9  ;;  %v619_v19 = vmul.f32 0.015625, %v495_v0 }
 0x182   :  { %v571_v24 = vadd.f32 %v570_v3, %v569_v45  ;;  %v677_v30 = vmul.f32 %v1595_v13, %v1595_v13  ;;  %v1600_v28 = vsub.f32 %v1440_v58, %v628_v5  ;;  %v581_v37 = vadd.f32 %v580_v10, %v456_v62 }
 0x183   :  { %v487_v7 = vadd.f32 %v486_v50, %v485_v51  ;;  %v503_v12 = vadd.f32 %v502_v4, %v417_v56  ;;  %v567_v17 = vadd.f32 %v566_v61, %v565_v48  ;;  %v561_v45 = vadd.f32 %v560_v20, %v559_v57  ;;  %v462_v51 = vpop.xlane.xlu0 %461 }
 0x184   :  { %v453_v15 = vpop.xlane.xlu1 %452  ;;  %v727_v54 = vsel %vm60_vm0, %v677_v30, 0.0  ;;  %v676_v44 = vmul.f32 %v1600_v28, %v1600_v28  ;;  %v572_v46 = vrot.slane %v571_v24, 1  ;;  %v1606_v53 = vsub.f32 %v1449_v2, %v619_v19 }
 0x185   :  { %v488_v21 = vrot.slane %v487_v7, 1  ;;  %v574_v23 = vrot.slane %v453_v15, 4  ;;  %v504_v27 = vrot.slane %v503_v12, 2  ;;  %v631_v41 = vmul.f32 0.015625, %v567_v17  ;;  %728 = vadd.xlane.f32.xlu1 %v727_v54 }
 0x186   :  { %v724_v55 = vsel %vm60_vm0, %v676_v44, 0.0  ;;  %v582_v61 = vrot.slane %v581_v37, 2  ;;  %v667_v62 = vmul.f32 %v1606_v53, %v1606_v53  ;;  %v592_v0 = vrot.slane %v462_v51, 4 }
 0x187   :  { %v575_v34 = vadd.f32 %v574_v23, %v453_v15  ;;  %v489_v31 = vadd.f32 %v488_v21, %v487_v7  ;;  %v505_v38 = vadd.f32 %v504_v27, %v503_v12  ;;  %725 = vadd.xlane.f32.xlu0 %v724_v55  ;;  %v1612_v4 = vsub.f32 %v1465_v14, %v631_v41  ;;  %v432_v14 = vpop.xlane.xlu0 %431 }
 0x188   :  { %v414_v29 = vpop.xlane.xlu1 %413  ;;  %v630_v2 = vmul.f32 0.015625, %v561_v45  ;;  %v573_v5 = vadd.f32 %v572_v46, %v571_v24  ;;  %v697_v7 = vsel %vm60_vm0, %v667_v62, 0.0  ;;  %v583_v20 = vadd.f32 %v582_v61, %v581_v37 }
 0x189   :  { %v576_v42 = vrot.slane %v575_v34, 2  ;;  %v506_v48 = vrot.slane %v505_v38, 1  ;;  %v496_v56 = vrot.slane %v414_v29, 4  ;;  %v618_v47 = vmul.f32 0.015625, %v489_v31  ;;  %698 = vadd.xlane.f32.xlu1 %v697_v7 }
 0x18a   :  { %v679_v15 = vmul.f32 %v1612_v4, %v1612_v4  ;;  %v593_v19 = vadd.f32 %v592_v0, %v462_v51  ;;  %v532_v44 = vrot.slane %v432_v14, 4 }
 0x18b   :  { %v577_v58 = vadd.f32 %v576_v42, %v575_v34  ;;  %v507_v50 = vadd.f32 %v506_v48, %v505_v38  ;;  %v497_v3 = vadd.f32 %v496_v56, %v414_v29  ;;  %v1618_v23 = vsub.f32 %v1483_v26, %v618_v47  ;;  %v468_v62 = vpop.xlane.xlu0 %467 }
 0x18c   :  { %v423_v63 = vpop.xlane.xlu1 %422  ;;  %v733_v24 = vsel %vm60_vm0, %v679_v15, 0.0  ;;  %v632_v34 = vmul.f32 0.015625, %v573_v5  ;;  %v1627_v26 = vsub.f32 %v1454_v6, %v630_v2  ;;  %v584_v42 = vrot.slane %v583_v20, 1 }
 0x18d   :  { %v578_v57 = vrot.slane %v577_v58, 1  ;;  %v621_v9 = vmul.f32 0.015625, %v507_v50  ;;  %v498_v12 = vrot.slane %v497_v3, 2  ;;  %v514_v17 = vrot.slane %v423_v63, 4  ;;  %734 = vadd.xlane.f32.xlu1 %v733_v24 }
 0x18e   :  { %v666_v54 = vmul.f32 %v1618_v23, %v1618_v23  ;;  %v594_v47 = vrot.slane %v593_v19, 2 }
 0x18f   :  { %v579_v10 = vadd.f32 %v578_v57, %v577_v58  ;;  %v499_v27 = vadd.f32 %v498_v12, %v497_v3  ;;  %v515_v38 = vadd.f32 %v514_v17, %v423_v63  ;;  %v1624_v41 = vsub.f32 %v1499_v40, %v621_v9 }
 0x190   :  { %v459_v21 = vpop.xlane.xlu1 %458  ;;  %v694_v46 = vsel %vm60_vm0, %v666_v54, 0.0  ;;  %v678_v40 = vmul.f32 %v1627_v26, %v1627_v26  ;;  %v533_v3 = vadd.f32 %v532_v44, %v432_v14  ;;  %v604_v17 = vrot.slane %v468_v62, 4 }
 0x191   :  { %v586_v30 = vrot.slane %v459_v21, 4  ;;  %v633_v31 = vmul.f32 0.015625, %v579_v10  ;;  %v500_v29 = vrot.slane %v499_v27, 1  ;;  %v516_v45 = vrot.slane %v515_v38, 2  ;;  %695 = vadd.xlane.f32.xlu0 %v694_v46 }
 0x192   :  { %v669_v55 = vmul.f32 %v1624_v41, %v1624_v41  ;;  %v730_v5 = vsel %vm60_vm0, %v678_v40, 0.0  ;;  %v1646_v14 = vsub.f32 %v1472_v18, %v632_v34  ;;  %v585_v54 = vadd.f32 %v584_v42, %v583_v20 }
 0x193   :  { %v587_v37 = vadd.f32 %v586_v30, %v459_v21  ;;  %v501_v51 = vadd.f32 %v500_v29, %v499_v27  ;;  %v517_v61 = vadd.f32 %v516_v45, %v515_v38  ;;  %v1635_v6 = vsub.f32 %v1511_v49, %v633_v31 }
 0x194   :  { %v420_v48 = vpop.xlane.xlu1 %419  ;;  %v703_v0 = vsel %vm60_vm0, %v669_v55, 0.0  ;;  %v595_v29 = vadd.f32 %v594_v47, %v593_v19  ;;  %v680_v55 = vmul.f32 %v1646_v14, %v1646_v14  ;;  %v634_v47 = vmul.f32 0.015625, %v585_v54 }
 0x195   :  { %v588_v58 = vrot.slane %v587_v37, 2  ;;  %v508_v56 = vrot.slane %v420_v48, 4  ;;  %v620_v50 = vmul.f32 0.015625, %v501_v51  ;;  %v518_v2 = vrot.slane %v517_v61, 1  ;;  %704 = vadd.xlane.f32.xlu1 %v703_v0  ;;  %731 = vadd.xlane.f32.xlu0 %v730_v5 }
 0x196   :  { %v681_v7 = vmul.f32 %v1635_v6, %v1635_v6 }
 0x197   :  { %v589_v63 = vadd.f32 %v588_v58, %v587_v37  ;;  %v509_v57 = vadd.f32 %v508_v56, %v420_v48  ;;  %v1642_v15 = vsub.f32 %v1523_v59, %v620_v50  ;;  %v519_v21 = vadd.f32 %v518_v2, %v517_v61 }
 0x198   :  { %v429_v9 = vpop.xlane.xlu1 %428  ;;  %v739_v27 = vsel %vm60_vm0, %v681_v7, 0.0  ;;  %v534_v37 = vrot.slane %v533_v3, 2  ;;  %v605_v58 = vadd.f32 %v604_v17, %v468_v62  ;;  %v596_v61 = vrot.slane %v595_v29, 1 }
 0x199   :  { %v590_v10 = vrot.slane %v589_v63, 1  ;;  %v510_v12 = vrot.slane %v509_v57, 2  ;;  %v526_v49 = vrot.slane %v429_v9, 4  ;;  %v668_v38 = vmul.f32 %v1642_v15, %v1642_v15  ;;  %740 = vadd.xlane.f32.xlu1 %v739_v27 }
 0x19a   :  { %v623_v44 = vmul.f32 0.015625, %v519_v21  ;;  %v535_v40 = vadd.f32 %v534_v37, %v533_v3  ;;  %v606_v2 = vrot.slane %v605_v58, 2  ;;  %v736_v7 = vsel %vm60_vm0, %v680_v55, 0.0 }
 0x19b   :  { %v591_v24 = vadd.f32 %v590_v10, %v589_v63  ;;  %v511_v30 = vadd.f32 %v510_v12, %v509_v57  ;;  %v527_v31 = vadd.f32 %v526_v49, %v429_v9  ;;  %v700_v18 = vsel %vm60_vm0, %v668_v38, 0.0 }
 0x19c   :  { %v465_v59 = vpop.xlane.xlu1 %464  ;;  %v1652_v34 = vsub.f32 %v1534_v1, %v623_v44  ;;  %701 = vadd.xlane.f32.xlu0 %v700_v18  ;;  %v1670_v21 = vsub.f32 %v1490_v32, %v634_v47  ;;  %v597_v38 = vadd.f32 %v596_v61, %v595_v29  ;;  %v536_v54 = vrot.slane %v535_v40, 1 }
 0x19d   :  { %v635_v45 = vmul.f32 0.015625, %v591_v24  ;;  %v512_v46 = vrot.slane %v511_v30, 1  ;;  %v528_v48 = vrot.slane %v527_v31, 2  ;;  %v598_v51 = vrot.slane %v465_v59, 4 }
 0x19e   :  { %v671_v50 = vmul.f32 %v1652_v34, %v1652_v34  ;;  %v607_v37 = vadd.f32 %v606_v2, %v605_v58 }
 0x19f   :  { %v513_v56 = vadd.f32 %v512_v46, %v511_v30  ;;  %v529_v20 = vadd.f32 %v528_v48, %v527_v31  ;;  %v599_v19 = vadd.f32 %v598_v51, %v465_v59  ;;  %v1657_v42 = vsub.f32 %v1541_v8, %v635_v45 }
 0x1a0   :  { %v426_v62 = vpop.xlane.xlu1 %425  ;;  %v709_v5 = vsel %vm60_vm0, %v671_v50, 0.0  ;;  %737 = vadd.xlane.f32.xlu0 %v736_v7  ;;  %v682_v51 = vmul.f32 %v1670_v21, %v1670_v21 }
 0x1a1   :  { %v622_v63 = vmul.f32 0.015625, %v513_v56  ;;  %v530_v1 = vrot.slane %v529_v20, 1  ;;  %v600_v0 = vrot.slane %v599_v19, 2  ;;  %v520_v57 = vrot.slane %v426_v62, 4  ;;  %710 = vadd.xlane.f32.xlu1 %v709_v5 }
 0x1a2   :  { %v683_v8 = vmul.f32 %v1657_v42, %v1657_v42  ;;  %v636_v56 = vmul.f32 0.015625, %v597_v38 }
 0x1a3   :  { %v531_v9 = vadd.f32 %v530_v1, %v529_v20  ;;  %v601_v10 = vadd.f32 %v600_v0, %v599_v19  ;;  %v521_v3 = vadd.f32 %v520_v57, %v426_v62  ;;  %v1667_v17 = vsub.f32 %v1548_v11, %v622_v63 }
 0x1a4   :  { %v745_v12 = vsel %vm60_vm0, %v683_v8, 0.0  ;;  %v435_v49 = vpop.xlane.xlu1 %434  ;;  %v537_v20 = vadd.f32 %v536_v54, %v535_v40  ;;  %v608_v19 = vrot.slane %v607_v37, 1  ;;  %v742_v1 = vsel %vm60_vm0, %v682_v51, 0.0 }
 0x1a5   :  { %v625_v27 = vmul.f32 0.015625, %v531_v9  ;;  %v602_v24 = vrot.slane %v601_v10, 1  ;;  %v522_v30 = vrot.slane %v521_v3, 2  ;;  %v538_v31 = vrot.slane %v435_v49, 4  ;;  %746 = vadd.xlane.f32.xlu1 %v745_v12 }
 0x1a6   :  { %v670_v44 = vmul.f32 %v1667_v17, %v1667_v17  ;;  %v626_v5 = vmul.f32 0.015625, %v537_v20  ;;  %v609_v7 = vadd.f32 %v608_v19, %v607_v37  ;;  %v1690_v8 = vsub.f32 %v1503_v43, %v636_v56 }
 0x1a7   :  { %v603_v59 = vadd.f32 %v602_v24, %v601_v10  ;;  %v523_v45 = vadd.f32 %v522_v30, %v521_v3  ;;  %v539_v46 = vadd.f32 %v538_v31, %v435_v49  ;;  %v1675_v11 = vsub.f32 %v1555_v16, %v625_v27 }
 0x1a8   :  { %v471_v48 = vpop.xlane.xlu1 %470  ;;  %v706_v32 = vsel %vm60_vm0, %v670_v44, 0.0  ;;  %v638_v24 = vmul.f32 0.015625, %v609_v7  ;;  %v684_v30 = vmul.f32 %v1690_v8, %v1690_v8  ;;  %v1705_v54 = vsub.f32 %v1514_v52, %v626_v5 }
 0x1a9   :  { %v637_v18 = vmul.f32 0.015625, %v603_v59  ;;  %v524_v29 = vrot.slane %v523_v45, 1  ;;  %v540_v55 = vrot.slane %v539_v46, 2  ;;  %v610_v58 = vrot.slane %v471_v48, 4  ;;  %707 = vadd.xlane.f32.xlu0 %v706_v32 }
 0x1aa   :  { %v673_v47 = vmul.f32 %v1675_v11, %v1675_v11  ;;  %v1710_v44 = vsub.f32 %v1525_v60, %v638_v24 }
 0x1ab   :  { %v525_v61 = vadd.f32 %v524_v29, %v523_v45  ;;  %v541_v16 = vadd.f32 %v540_v55, %v539_v46  ;;  %v611_v50 = vadd.f32 %v610_v58, %v471_v48  ;;  %v1683_v62 = vsub.f32 %v1562_v22, %v637_v18 }
 0x1ac   :  { %v715_v63 = vsel %vm60_vm0, %v673_v47, 0.0  ;;  %v748_v45 = vsel %vm60_vm0, %v684_v30, 0.0  ;;  %v686_v32 = vmul.f32 %v1710_v44, %v1710_v44 }
 0x1ad   :  { %v624_v0 = vmul.f32 0.015625, %v525_v61  ;;  %v542_v57 = vrot.slane %v541_v16, 1  ;;  %v612_v2 = vrot.slane %v611_v50, 2  ;;  %716 = vadd.xlane.f32.xlu1 %v715_v63  ;;  %743 = vadd.xlane.f32.xlu0 %v742_v1  ;;  %v685_v40 = vmul.f32 %v1683_v62, %v1683_v62 }
 0x1af   :  { %v543_v9 = vadd.f32 %v542_v57, %v541_v16  ;;  %v613_v22 = vadd.f32 %v612_v2, %v611_v50  ;;  %v751_v10 = vsel %vm60_vm0, %v685_v40, 0.0  ;;  %v1694_v3 = vsub.f32 %v1569_v25, %v624_v0 }
 0x1b1   :  { %v627_v12 = vmul.f32 0.015625, %v543_v9  ;;  %v614_v49 = vrot.slane %v613_v22, 1  ;;  %752 = vadd.xlane.f32.xlu1 %v751_v10  ;;  %v672_v27 = vmul.f32 %v1694_v3, %v1694_v3 }
 0x1b3   :  { %v615_v31 = vadd.f32 %v614_v49, %v613_v22  ;;  %v712_v43 = vsel %vm60_vm0, %v672_v27, 0.0  ;;  %v1702_v38 = vsub.f32 %v1574_v33, %v627_v12  ;;  %v674_v33 = vmul.f32 %v1705_v54, %v1705_v54 }
 0x1b4   :  { %713 = vadd.xlane.f32.xlu0 %v712_v43 }
 0x1b5   :  { %v639_v25 = vmul.f32 0.015625, %v615_v31  ;;  %v675_v37 = vmul.f32 %v1702_v38, %v1702_v38  ;;  %v718_v60 = vsel %vm60_vm0, %v674_v33, 0.0 }
 0x1b7   :  { %v721_v59 = vsel %vm60_vm0, %v675_v37, 0.0  ;;  %v1715_v46 = vsub.f32 %v1578_v35, %v639_v25  ;;  %v754_v35 = vsel %vm60_vm0, %v686_v32, 0.0 }
 0x1b8   :  { %722 = vadd.xlane.f32.xlu1 %v721_v59  ;;  %749 = vadd.xlane.f32.xlu0 %v748_v45 }
 0x1b9   :  { %v687_v52 = vmul.f32 %v1715_v46, %v1715_v46 }
 0x1bb   :  { %v757_v48 = vsel %vm60_vm0, %v687_v52, 0.0 }
 0x1bc   :  { %758 = vadd.xlane.f32.xlu1 %v757_v48  ;;  %719 = vadd.xlane.f32.xlu0 %v718_v60 }
 0x1c0   :  { %755 = vadd.xlane.f32.xlu0 %v754_v35 }
 0x20d   :  { %v693_v51 = vpop.xlane.xlu1 %692 }
 0x20e   :  { %v766_v18 = vrot.slane %v693_v51, 4  ;;  %v690_v29 = vpop.xlane.xlu0 %689 }
 0x20f   :  { %v760_v58 = vrot.slane %v690_v29, 4 }
 0x210   :  { %v767_v55 = vadd.f32 %v766_v18, %v693_v51 }
 0x211   :  { %v761_v20 = vadd.f32 %v760_v58, %v690_v29 }
 0x212   :  { %v768_v56 = vrot.slane %v767_v55, 2  ;;  %v729_v61 = vpop.xlane.xlu1 %728 }
 0x213   :  { %v762_v47 = vrot.slane %v761_v20, 2  ;;  %v838_v16 = vrot.slane %v729_v61, 4 }
 0x214   :  { %v769_v19 = vadd.f32 %v768_v56, %v767_v55  ;;  %v726_v0 = vpop.xlane.xlu0 %725 }
 0x215   :  { %v763_v63 = vadd.f32 %v762_v47, %v761_v20  ;;  %v839_v1 = vadd.f32 %v838_v16, %v729_v61  ;;  %v832_v40 = vrot.slane %v726_v0, 4 }
 0x216   :  { %v770_v50 = vrot.slane %v769_v19, 1  ;;  %v699_v10 = vpop.xlane.xlu1 %698 }
 0x217   :  { %v764_v2 = vrot.slane %v763_v63, 1  ;;  %v840_v5 = vrot.slane %v839_v1, 2  ;;  %v833_v22 = vadd.f32 %v832_v40, %v726_v0  ;;  %v778_v49 = vrot.slane %v699_v10, 4 }
 0x218   :  { %v771_v57 = vadd.f32 %v770_v50, %v769_v19 }
 0x219   :  { %v765_v9 = vadd.f32 %v764_v2, %v763_v63  ;;  %v841_v12 = vadd.f32 %v840_v5, %v839_v1  ;;  %v834_v30 = vrot.slane %v833_v22, 2  ;;  %v779_v43 = vadd.f32 %v778_v49, %v699_v10  ;;  %v1729_v10 = vld [vmem:[%s1980_s4] sm:$0xff] }
 0x21a   :  { %v905_v7 = vmul.f32 0.015625, %v771_v57  ;;  %v735_v59 = vpop.xlane.xlu1 %734 }
 0x21b   :  { %v904_v24 = vmul.f32 0.015625, %v765_v9  ;;  %v842_v31 = vrot.slane %v841_v12, 1  ;;  %v835_v37 = vadd.f32 %v834_v30, %v833_v22  ;;  %v780_v33 = vrot.slane %v779_v43, 2 }
 0x21c   :  { %v929_v27 = vadd.f32 1e-05, %v905_v7  ;;  %v850_v52 = vrot.slane %v735_v59, 4 }
 0x21d   :  { %v928_v25 = vadd.f32 1e-05, %v904_v24  ;;  %v843_v45 = vadd.f32 %v842_v31, %v841_v12  ;;  %v836_v48 = vrot.slane %v835_v37, 1  ;;  %v781_v35 = vadd.f32 %v780_v33, %v779_v43 }
 0x21e   :  { %1219 = vrsqrt.f32 %v929_v27  ;;  %v696_v60 = vpop.xlane.xlu0 %695  ;;  %v851_v51 = vadd.f32 %v850_v52, %v735_v59 }
 0x21f   :  { %1221 = vrsqrt.f32 %v928_v25  ;;  %v917_v32 = vmul.f32 0.015625, %v843_v45  ;;  %v772_v18 = vrot.slane %v696_v60, 4  ;;  %v837_v29 = vadd.f32 %v836_v48, %v835_v37  ;;  %v1735_v37 = vld [vmem:[%s1981_s5] sm:$0xff] }
 0x220   :  { %v782_v58 = vrot.slane %v781_v35, 1  ;;  %v852_v56 = vrot.slane %v851_v51, 2 }
 0x221   :  { %v941_v55 = vadd.f32 1e-05, %v917_v32  ;;  %v773_v20 = vadd.f32 %v772_v18, %v696_v60  ;;  %v916_v47 = vmul.f32 0.015625, %v837_v29 }
 0x222   :  { %v705_v19 = vpop.xlane.xlu1 %704  ;;  %v732_v16 = vpop.xlane.xlu0 %731  ;;  %v783_v50 = vadd.f32 %v782_v58, %v781_v35  ;;  %v853_v63 = vadd.f32 %v852_v56, %v851_v51 }
 0x223   :  { %v790_v61 = vrot.slane %v705_v19, 4  ;;  %1223 = vrsqrt.f32 %v941_v55  ;;  %v774_v1 = vrot.slane %v773_v20, 2  ;;  %v940_v0 = vadd.f32 1e-05, %v916_v47 }
 0x224   :  { %v844_v2 = vrot.slane %v732_v16, 4  ;;  %v907_v40 = vmul.f32 0.015625, %v783_v50  ;;  %v854_v5 = vrot.slane %v853_v63, 1 }
 0x225   :  { %v791_v57 = vadd.f32 %v790_v61, %v705_v19  ;;  %v775_v7 = vadd.f32 %v774_v1, %v773_v20  ;;  %1225 = vrsqrt.f32 %v940_v0 }
 0x226   :  { %v741_v9 = vpop.xlane.xlu1 %740  ;;  %v845_v49 = vadd.f32 %v844_v2, %v732_v16  ;;  %v931_v30 = vadd.f32 1e-05, %v907_v40  ;;  %v855_v31 = vadd.f32 %v854_v5, %v853_v63 }
 0x227   :  { %v792_v12 = vrot.slane %v791_v57, 2  ;;  %v862_v27 = vrot.slane %v741_v9, 4  ;;  %v776_v43 = vrot.slane %v775_v7, 1 }
 0x228   :  { %v1220_v22 = vpop.eup %1219  ;;  %v846_v45 = vrot.slane %v845_v49, 2  ;;  %1227 = vrsqrt.f32 %v931_v30  ;;  %v919_v32 = vmul.f32 0.015625, %v855_v31 }
 0x229   :  { %v977_v24 = vmul.f32 %v1220_v22, %v1583_v36  ;;  %v1222_v25 = vpop.eup %1221  ;;  %v793_v59 = vadd.f32 %v792_v12, %v791_v57  ;;  %v863_v33 = vadd.f32 %v862_v27, %v741_v9  ;;  %v702_v52 = vpop.xlane.xlu0 %701  ;;  %v1051_v36 = vld [vmem:[%s1982_s6 + $0x8] sm:$0xff]  ;;  %v777_v35 = vadd.f32 %v776_v43, %v775_v7 }
 0x22a   :  { %v976_v60 = vmul.f32 %v1222_v25, %v1586_v39  ;;  %v847_v18 = vadd.f32 %v846_v45, %v845_v49  ;;  %v943_v56 = vadd.f32 1e-05, %v919_v32  ;;  %v784_v20 = vrot.slane %v702_v52, 4  ;;  %v1050_v39 = vld [vmem:[%s1982_s6] sm:$0xff] }
 0x22b   :  { %v1002_v48 = vmul.f32 %v1729_v10, %v977_v24  ;;  %v794_v51 = vrot.slane %v793_v59, 1  ;;  %v864_v29 = vrot.slane %v863_v33, 2  ;;  %v906_v19 = vmul.f32 0.015625, %v777_v35 }
 0x22c   :  { %v1001_v58 = vmul.f32 %v1729_v10, %v976_v60  ;;  %v848_v61 = vrot.slane %v847_v18, 1  ;;  %1229 = vrsqrt.f32 %v943_v56  ;;  %v785_v57 = vadd.f32 %v784_v20, %v702_v52 }
 0x22d   :  { %v1027_v55 = vadd.f32 %v1735_v37, %v1002_v48  ;;  %v795_v47 = vadd.f32 %v794_v51, %v793_v59  ;;  %v865_v16 = vadd.f32 %v864_v29, %v863_v33  ;;  %v1224_v63 = vpop.eup %1223  ;;  %v930_v40 = vadd.f32 1e-05, %v906_v19  ;;  %v738_v27 = vpop.xlane.xlu0 %737 }
 0x22e   :  { %v711_v50 = vpop.xlane.xlu1 %710  ;;  %v1026_v0 = vadd.f32 %v1735_v37, %v1001_v58  ;;  %v989_v2 = vmul.f32 %v1224_v63, %v1595_v13  ;;  %v849_v7 = vadd.f32 %v848_v61, %v847_v18  ;;  %v786_v12 = vrot.slane %v785_v57, 2  ;;  %v1063_v13 = vld [vmem:[%s1982_s6 + $0x68] sm:$0xff] }
 0x22f   :  { %v1075_v1 = vadd.f32 %v1051_v36, %v1027_v55  ;;  %v909_v5 = vmul.f32 0.015625, %v795_v47  ;;  %v866_v22 = vrot.slane %v865_v16, 1  ;;  %v802_v49 = vrot.slane %v711_v50, 4  ;;  %v1226_v24 = vpop.eup %1225 }
 0x230   :  { %v1074_v9 = vadd.f32 %v1050_v39, %v1026_v0  ;;  %v1014_v30 = vmul.f32 %v1729_v10, %v989_v2  ;;  %1231 = vrsqrt.f32 %v930_v40  ;;  %v918_v43 = vmul.f32 0.015625, %v849_v7  ;;  %v1053_v2 = vld [vmem:[%s1982_s6 + $0x18] sm:$0xff] }
 0x231   :  { %1099 = vst.msk [vmem:[%s1983_s7 + $0x8] sm:$0xff] %vm60_vm0, %v1075_v1  ;;  %v933_v31 = vadd.f32 1e-05, %v909_v5  ;;  %v988_v25 = vmul.f32 %v1226_v24, %v1600_v28  ;;  %v867_v59 = vadd.f32 %v866_v22, %v865_v16  ;;  %v787_v45 = vadd.f32 %v786_v12, %v785_v57  ;;  %v1062_v28 = vld [vmem:[%s1982_s6 + $0x60] sm:$0xff] }
 0x232   :  { %1098 = vst.msk [vmem:[%s1983_s7] sm:$0xff] %vm60_vm0, %v1074_v9  ;;  %v803_v33 = vadd.f32 %v802_v49, %v711_v50  ;;  %v1039_v52 = vadd.f32 %v1735_v37, %v1014_v30  ;;  %v942_v48 = vadd.f32 1e-05, %v918_v43  ;;  %v856_v60 = vrot.slane %v738_v27, 4  ;;  %v747_v32 = vpop.xlane.xlu1 %746  ;;  %v1228_v36 = vpop.eup %1227 }
 0x233   :  { %1233 = vrsqrt.f32 %v933_v31  ;;  %v1013_v35 = vmul.f32 %v1729_v10, %v988_v25  ;;  %v921_v51 = vmul.f32 0.015625, %v867_v59  ;;  %v788_v18 = vrot.slane %v787_v45, 1 }
 0x234   :  { %v804_v29 = vrot.slane %v803_v33, 2  ;;  %v1087_v58 = vadd.f32 %v1063_v13, %v1039_v52  ;;  %v979_v56 = vmul.f32 %v1228_v36, %v1606_v53  ;;  %1235 = vrsqrt.f32 %v942_v48 }
 0x235   :  { %v857_v20 = vadd.f32 %v856_v60, %v738_v27  ;;  %v1038_v39 = vadd.f32 %v1735_v37, %v1013_v35  ;;  %v945_v19 = vadd.f32 1e-05, %v921_v51  ;;  %v789_v47 = vadd.f32 %v788_v18, %v787_v45 }
 0x236   :  { %v708_v55 = vpop.xlane.xlu0 %707  ;;  %v805_v61 = vadd.f32 %v804_v29, %v803_v33  ;;  %1111 = vst.msk [vmem:[%s1983_s7 + $0x68] sm:$0xff] %vm60_vm0, %v1087_v58  ;;  %v1004_v16 = vmul.f32 %v1729_v10, %v979_v56  ;;  %v874_v63 = vrot.slane %v747_v32, 4  ;;  %v1230_v57 = vpop.eup %1229  ;;  %v1052_v56 = vld [vmem:[%s1982_s6 + $0x10] sm:$0xff] }
 0x237   :  { %v858_v50 = vrot.slane %v857_v20, 2  ;;  %v796_v1 = vrot.slane %v708_v55, 4  ;;  %v1086_v53 = vadd.f32 %v1062_v28, %v1038_v39  ;;  %1237 = vrsqrt.f32 %v945_v19 }
 0x238   :  { %v908_v40 = vmul.f32 0.015625, %v789_v47  ;;  %v806_v5 = vrot.slane %v805_v61, 1  ;;  %v1029_v7 = vadd.f32 %v1735_v37, %v1004_v16  ;;  %v991_v9 = vmul.f32 %v1230_v57, %v1612_v4  ;;  %v1065_v4 = vld [vmem:[%s1982_s6 + $0x78] sm:$0xff] }
 0x239   :  { %v859_v22 = vadd.f32 %v858_v50, %v857_v20  ;;  %v875_v12 = vadd.f32 %v874_v63, %v747_v32  ;;  %1110 = vst.msk [vmem:[%s1983_s7 + $0x60] sm:$0xff] %vm60_vm0, %v1086_v53  ;;  %v797_v24 = vadd.f32 %v796_v1, %v708_v55 }
 0x23a   :  { %v717_v0 = vpop.xlane.xlu1 %716  ;;  %v932_v49 = vadd.f32 1e-05, %v908_v40  ;;  %v807_v27 = vadd.f32 %v806_v5, %v805_v61  ;;  %v1232_v31 = vpop.eup %1231  ;;  %v1077_v43 = vadd.f32 %v1053_v2, %v1029_v7  ;;  %v1016_v13 = vmul.f32 %v1729_v10, %v991_v9  ;;  %v1064_v9 = vld [vmem:[%s1982_s6 + $0x70] sm:$0xff] }
 0x23b   :  { %v814_v30 = vrot.slane %v717_v0, 4  ;;  %v860_v25 = vrot.slane %v859_v22, 1  ;;  %v876_v59 = vrot.slane %v875_v12, 2  ;;  %v978_v45 = vmul.f32 %v1232_v31, %v1618_v23  ;;  %v744_v55 = vpop.xlane.xlu0 %743 }
 0x23c   :  { %1239 = vrsqrt.f32 %v932_v49  ;;  %v911_v33 = vmul.f32 0.015625, %v807_v27  ;;  %v798_v52 = vrot.slane %v797_v24, 2  ;;  %1101 = vst.msk [vmem:[%s1983_s7 + $0x18] sm:$0xff] %vm60_vm0, %v1077_v43  ;;  %v1041_v60 = vadd.f32 %v1735_v37, %v1016_v13 }
 0x23d   :  { %v1234_v48 = vpop.eup %1233  ;;  %v861_v32 = vadd.f32 %v860_v25, %v859_v22  ;;  %v877_v36 = vadd.f32 %v876_v59, %v875_v12  ;;  %v815_v35 = vadd.f32 %v814_v30, %v717_v0  ;;  %v1003_v51 = vmul.f32 %v1729_v10, %v978_v45  ;;  %v1067_v45 = vld [vmem:[%s1982_s6 + $0x88] sm:$0xff] }
 0x23e   :  { %v981_v18 = vmul.f32 %v1234_v48, %v1624_v41  ;;  %v935_v29 = vadd.f32 1e-05, %v911_v33  ;;  %v799_v23 = vadd.f32 %v798_v52, %v797_v24  ;;  %v1236_v58 = vpop.eup %1235  ;;  %v1089_v28 = vadd.f32 %v1065_v4, %v1041_v60  ;;  %v1055_v41 = vld [vmem:[%s1982_s6 + $0x28] sm:$0xff]  ;;  %v753_v5 = vpop.xlane.xlu1 %752 }
 0x23f   :  { %v920_v20 = vmul.f32 0.015625, %v861_v32  ;;  %v878_v39 = vrot.slane %v877_v36, 1  ;;  %v816_v19 = vrot.slane %v815_v35, 2  ;;  %v1028_v47 = vadd.f32 %v1735_v37, %v1003_v51 }
 0x240   :  { %v1006_v61 = vmul.f32 %v1729_v10, %v981_v18  ;;  %v990_v16 = vmul.f32 %v1236_v58, %v1627_v26  ;;  %1241 = vrsqrt.f32 %v935_v29  ;;  %1113 = vst.msk [vmem:[%s1983_s7 + $0x78] sm:$0xff] %vm60_vm0, %v1089_v28  ;;  %v800_v1 = vrot.slane %v799_v23, 1 }
 0x241   :  { %v944_v50 = vadd.f32 1e-05, %v920_v20  ;;  %v879_v63 = vadd.f32 %v878_v39, %v877_v36  ;;  %v817_v0 = vadd.f32 %v816_v19, %v815_v35  ;;  %v1238_v57 = vpop.eup %1237  ;;  %v1076_v53 = vadd.f32 %v1052_v56, %v1028_v47  ;;  %v714_v7 = vpop.xlane.xlu0 %713 }
 0x242   :  { %v1031_v2 = vadd.f32 %v1735_v37, %v1006_v61  ;;  %v1015_v26 = vmul.f32 %v1729_v10, %v990_v16  ;;  %v868_v40 = vrot.slane %v744_v55, 4  ;;  %v993_v22 = vmul.f32 %v1238_v57, %v1635_v6 }
 0x243   :  { %1243 = vrsqrt.f32 %v944_v50  ;;  %v923_v12 = vmul.f32 0.015625, %v879_v63  ;;  %v801_v49 = vadd.f32 %v800_v1, %v799_v23  ;;  %1100 = vst.msk [vmem:[%s1983_s7 + $0x10] sm:$0xff] %vm60_vm0, %v1076_v53  ;;  %v818_v30 = vrot.slane %v817_v0, 1 }
 0x244   :  { %v1079_v27 = vadd.f32 %v1055_v41, %v1031_v2  ;;  %v1040_v24 = vadd.f32 %v1735_v37, %v1015_v26  ;;  %v869_v31 = vadd.f32 %v868_v40, %v744_v55  ;;  %v1018_v43 = vmul.f32 %v1729_v10, %v993_v22 }
 0x245   :  { %v947_v13 = vadd.f32 1e-05, %v923_v12  ;;  %v910_v25 = vmul.f32 0.015625, %v801_v49  ;;  %v886_v59 = vrot.slane %v753_v5, 4  ;;  %v819_v33 = vadd.f32 %v818_v30, %v817_v0  ;;  %v723_v60 = vpop.xlane.xlu1 %722  ;;  %v750_v55 = vpop.xlane.xlu0 %749 }
 0x246   :  { %v1240_v4 = vpop.eup %1239  ;;  %1103 = vst.msk [vmem:[%s1983_s7 + $0x28] sm:$0xff] %vm60_vm0, %v1079_v27  ;;  %v1088_v6 = vadd.f32 %v1064_v9, %v1040_v24  ;;  %v870_v52 = vrot.slane %v869_v31, 2  ;;  %v808_v48 = vrot.slane %v714_v7, 4  ;;  %v1043_v32 = vadd.f32 %v1735_v37, %v1018_v43  ;;  %v1057_v9 = vld [vmem:[%s1982_s6 + $0x38] sm:$0xff] }
 0x247   :  { %v980_v36 = vmul.f32 %v1240_v4, %v1642_v15  ;;  %1245 = vrsqrt.f32 %v947_v13  ;;  %v934_v35 = vadd.f32 1e-05, %v910_v25  ;;  %v913_v51 = vmul.f32 0.015625, %v819_v33  ;;  %v1054_v15 = vld [vmem:[%s1982_s6 + $0x20] sm:$0xff] }
 0x248   :  { %1112 = vst.msk [vmem:[%s1983_s7 + $0x70] sm:$0xff] %vm60_vm0, %v1088_v6  ;;  %v871_v18 = vadd.f32 %v870_v52, %v869_v31  ;;  %v887_v29 = vadd.f32 %v886_v59, %v753_v5  ;;  %v809_v23 = vadd.f32 %v808_v48, %v714_v7  ;;  %v1091_v58 = vadd.f32 %v1067_v45, %v1043_v32  ;;  %v1066_v45 = vld [vmem:[%s1982_s6 + $0x80] sm:$0xff] }
 0x249   :  { %v1005_v28 = vmul.f32 %v1729_v10, %v980_v36  ;;  %1247 = vrsqrt.f32 %v934_v35  ;;  %v826_v56 = vrot.slane %v723_v60, 4  ;;  %v937_v39 = vadd.f32 1e-05, %v913_v51  ;;  %v759_v53 = vpop.xlane.xlu1 %758  ;;  %v720_v4 = vpop.xlane.xlu0 %719 }
 0x24a   :  { %v1242_v20 = vpop.eup %1241  ;;  %v872_v19 = vrot.slane %v871_v18, 1  ;;  %v888_v47 = vrot.slane %v887_v29, 2  ;;  %v810_v61 = vrot.slane %v809_v23, 2  ;;  %1115 = vst.msk [vmem:[%s1983_s7 + $0x88] sm:$0xff] %vm60_vm0, %v1091_v58  ;;  %v880_v63 = vrot.slane %v750_v55, 4 }
 0x24b   :  { %v1030_v16 = vadd.f32 %v1735_v37, %v1005_v28  ;;  %v983_v41 = vmul.f32 %v1242_v20, %v1652_v34  ;;  %v827_v50 = vadd.f32 %v826_v56, %v723_v60  ;;  %1249 = vrsqrt.f32 %v937_v39 }
 0x24c   :  { %v873_v1 = vadd.f32 %v872_v19, %v871_v18  ;;  %v889_v0 = vadd.f32 %v888_v47, %v887_v29  ;;  %v811_v57 = vadd.f32 %v810_v61, %v809_v23  ;;  %v881_v7 = vadd.f32 %v880_v63, %v750_v55 }
 0x24d   :  { %v1244_v2 = vpop.eup %1243  ;;  %v1078_v26 = vadd.f32 %v1054_v15, %v1030_v16  ;;  %v1008_v40 = vmul.f32 %v1729_v10, %v983_v41  ;;  %v828_v5 = vrot.slane %v827_v50, 2  ;;  %v898_v31 = vrot.slane %v759_v53, 4  ;;  %v756_v41 = vpop.xlane.xlu0 %755 }
 0x24e   :  { %v992_v22 = vmul.f32 %v1244_v2, %v1646_v14  ;;  %v922_v34 = vmul.f32 0.015625, %v873_v1  ;;  %v890_v12 = vrot.slane %v889_v0, 1  ;;  %v812_v49 = vrot.slane %v811_v57, 1 }
 0x24f   :  { %1102 = vst.msk [vmem:[%s1983_s7 + $0x20] sm:$0xff] %vm60_vm0, %v1078_v26  ;;  %v1033_v27 = vadd.f32 %v1735_v37, %v1008_v40  ;;  %v829_v24 = vadd.f32 %v828_v5, %v827_v50  ;;  %v882_v30 = vrot.slane %v881_v7, 2  ;;  %v899_v48 = vadd.f32 %v898_v31, %v759_v53  ;;  %v1056_v50 = vld [vmem:[%s1982_s6 + $0x30] sm:$0xff] }
 0x250   :  { %v1017_v43 = vmul.f32 %v1729_v10, %v992_v22  ;;  %v946_v13 = vadd.f32 1e-05, %v922_v34  ;;  %v891_v25 = vadd.f32 %v890_v12, %v889_v0  ;;  %v813_v59 = vadd.f32 %v812_v49, %v811_v57 }
 0x251   :  { %v1246_v14 = vpop.eup %1245  ;;  %v1081_v6 = vadd.f32 %v1057_v9, %v1033_v27  ;;  %v830_v33 = vrot.slane %v829_v24, 1  ;;  %v883_v52 = vadd.f32 %v882_v30, %v881_v7  ;;  %v900_v23 = vrot.slane %v899_v48, 2 }
 0x252   :  { %v1042_v60 = vadd.f32 %v1735_v37, %v1017_v43  ;;  %v995_v32 = vmul.f32 %v1246_v14, %v1657_v42  ;;  %1251 = vrsqrt.f32 %v946_v13  ;;  %v925_v36 = vmul.f32 0.015625, %v891_v25  ;;  %v1069_v42 = vld [vmem:[%s1982_s6 + $0x98] sm:$0xff] }
 0x253   :  { %v1248_v35 = vpop.eup %1247  ;;  %1105 = vst.msk [vmem:[%s1983_s7 + $0x38] sm:$0xff] %vm60_vm0, %v1081_v6  ;;  %v912_v51 = vmul.f32 0.015625, %v813_v59  ;;  %v831_v18 = vadd.f32 %v830_v33, %v829_v24  ;;  %v884_v29 = vrot.slane %v883_v52, 1  ;;  %v901_v19 = vadd.f32 %v900_v23, %v899_v48  ;;  %v1071_v23 = vld [vmem:[%s1982_s6 + $0xa8] sm:$0xff] }
 0x254   :  { %v1090_v55 = vadd.f32 %v1066_v45, %v1042_v60  ;;  %v1020_v58 = vmul.f32 %v1729_v10, %v995_v32  ;;  %v982_v28 = vmul.f32 %v1248_v35, %v1667_v17  ;;  %v949_v56 = vadd.f32 1e-05, %v925_v36  ;;  %v1068_v45 = vld [vmem:[%s1982_s6 + $0x90] sm:$0xff] }
 0x255   :  { %v936_v20 = vadd.f32 1e-05, %v912_v51  ;;  %v915_v15 = vmul.f32 0.015625, %v831_v18  ;;  %v885_v39 = vadd.f32 %v884_v29, %v883_v52  ;;  %v1250_v47 = vpop.eup %1249  ;;  %v820_v17 = vrot.slane %v720_v4, 4 }
 0x256   :  { %1114 = vst.msk [vmem:[%s1983_s7 + $0x80] sm:$0xff] %vm60_vm0, %v1090_v55  ;;  %v1045_v61 = vadd.f32 %v1735_v37, %v1020_v58  ;;  %v1007_v16 = vmul.f32 %v1729_v10, %v982_v28  ;;  %1253 = vrsqrt.f32 %v949_v56  ;;  %v985_v63 = vmul.f32 %v1250_v47, %v1675_v11  ;;  %v1059_v11 = vld [vmem:[%s1982_s6 + $0x48] sm:$0xff] }
 0x257   :  { %1255 = vrsqrt.f32 %v936_v20  ;;  %v939_v1 = vadd.f32 1e-05, %v915_v15  ;;  %v924_v0 = vmul.f32 0.015625, %v885_v39  ;;  %v902_v2 = vrot.slane %v901_v19, 1 }
 0x258   :  { %v1093_v57 = vadd.f32 %v1069_v42, %v1045_v61  ;;  %v1032_v53 = vadd.f32 %v1735_v37, %v1007_v16  ;;  %v821_v26 = vadd.f32 %v820_v17, %v720_v4  ;;  %v1010_v40 = vmul.f32 %v1729_v10, %v985_v63 }
 0x259   :  { %1257 = vrsqrt.f32 %v939_v1  ;;  %v948_v5 = vadd.f32 1e-05, %v924_v0  ;;  %v892_v7 = vrot.slane %v756_v41, 4  ;;  %v903_v22 = vadd.f32 %v902_v2, %v901_v19  ;;  %v1061_v19 = vld [vmem:[%s1982_s6 + $0x58] sm:$0xff] }
 0x25a   :  { %1117 = vst.msk [vmem:[%s1983_s7 + $0x98] sm:$0xff] %vm60_vm0, %v1093_v57  ;;  %v1080_v9 = vadd.f32 %v1056_v50, %v1032_v53  ;;  %v822_v34 = vrot.slane %v821_v26, 2  ;;  %v1035_v12 = vadd.f32 %v1735_v37, %v1010_v40  ;;  %v1073_v53 = vld [vmem:[%s1982_s6 + $0xb8] sm:$0xff] }
 0x25b   :  { %1259 = vrsqrt.f32 %v948_v5  ;;  %v893_v49 = vadd.f32 %v892_v7, %v756_v41  ;;  %v927_v24 = vmul.f32 0.015625, %v903_v22 }
 0x25c   :  { %v1252_v27 = vpop.eup %1251  ;;  %1104 = vst.msk [vmem:[%s1983_s7 + $0x30] sm:$0xff] %vm60_vm0, %v1080_v9  ;;  %v823_v30 = vadd.f32 %v822_v34, %v821_v26  ;;  %v1083_v31 = vadd.f32 %v1059_v11, %v1035_v12  ;;  %v1060_v9 = vld [vmem:[%s1982_s6 + $0x50] sm:$0xff] }
 0x25d   :  { %v994_v43 = vmul.f32 %v1252_v27, %v1670_v21  ;;  %v894_v13 = vrot.slane %v893_v49, 2  ;;  %v951_v25 = vadd.f32 1e-05, %v927_v24 }
 0x25e   :  { %v824_v59 = vrot.slane %v823_v30, 1  ;;  %1107 = vst.msk [vmem:[%s1983_s7 + $0x48] sm:$0xff] %vm60_vm0, %v1083_v31 }
 0x25f   :  { %v1019_v4 = vmul.f32 %v1729_v10, %v994_v43  ;;  %v895_v14 = vadd.f32 %v894_v13, %v893_v49  ;;  %1261 = vrsqrt.f32 %v951_v25 }
 0x260   :  { %v1254_v6 = vpop.eup %1253  ;;  %v825_v33 = vadd.f32 %v824_v59, %v823_v30 }
 0x261   :  { %v1256_v52 = vpop.eup %1255  ;;  %v1044_v21 = vadd.f32 %v1735_v37, %v1019_v4  ;;  %v997_v48 = vmul.f32 %v1254_v6, %v1683_v62  ;;  %v896_v60 = vrot.slane %v895_v14, 1 }
 0x262   :  { %v984_v32 = vmul.f32 %v1256_v52, %v1694_v3  ;;  %v914_v36 = vmul.f32 0.015625, %v825_v33  ;;  %v1058_v3 = vld [vmem:[%s1982_s6 + $0x40] sm:$0xff] }
 0x263   :  { %v1258_v35 = vpop.eup %1257  ;;  %v1092_v51 = vadd.f32 %v1068_v45, %v1044_v21  ;;  %v1022_v18 = vmul.f32 %v1729_v10, %v997_v48  ;;  %v897_v29 = vadd.f32 %v896_v60, %v895_v14 }
 0x264   :  { %v1009_v55 = vmul.f32 %v1729_v10, %v984_v32  ;;  %v987_v58 = vmul.f32 %v1258_v35, %v1702_v38  ;;  %v938_v28 = vadd.f32 1e-05, %v914_v36 }
 0x265   :  { %v1260_v56 = vpop.eup %1259  ;;  %1116 = vst.msk [vmem:[%s1983_s7 + $0x90] sm:$0xff] %vm60_vm0, %v1092_v51  ;;  %v1047_v62 = vadd.f32 %v1735_v37, %v1022_v18  ;;  %v926_v42 = vmul.f32 0.015625, %v897_v29 }
 0x266   :  { %v1034_v20 = vadd.f32 %v1735_v37, %v1009_v55  ;;  %v1012_v15 = vmul.f32 %v1729_v10, %v987_v58  ;;  %v996_v38 = vmul.f32 %v1260_v56, %v1690_v8  ;;  %1263 = vrsqrt.f32 %v938_v28  ;;  %v1070_v8 = vld [vmem:[%s1982_s6 + $0xa0] sm:$0xff] }
 0x267   :  { %v1095_v39 = vadd.f32 %v1071_v23, %v1047_v62  ;;  %v950_v47 = vadd.f32 1e-05, %v926_v42 }
 0x268   :  { %v1082_v61 = vadd.f32 %v1058_v3, %v1034_v20  ;;  %v1037_v16 = vadd.f32 %v1735_v37, %v1012_v15  ;;  %v1021_v17 = vmul.f32 %v1729_v10, %v996_v38 }
 0x269   :  { %1119 = vst.msk [vmem:[%s1983_s7 + $0xa8] sm:$0xff] %vm60_vm0, %v1095_v39  ;;  %1265 = vrsqrt.f32 %v950_v47  ;;  %v1262_v41 = vpop.eup %1261 }
 0x26a   :  { %1106 = vst.msk [vmem:[%s1983_s7 + $0x40] sm:$0xff] %vm60_vm0, %v1082_v61  ;;  %v1085_v50 = vadd.f32 %v1061_v19, %v1037_v16  ;;  %v1046_v63 = vadd.f32 %v1735_v37, %v1021_v17  ;;  %v999_v1 = vmul.f32 %v1262_v41, %v1715_v46 }
 0x26c   :  { %1109 = vst.msk [vmem:[%s1983_s7 + $0x58] sm:$0xff] %vm60_vm0, %v1085_v50  ;;  %v1094_v0 = vadd.f32 %v1070_v8, %v1046_v63  ;;  %v1024_v57 = vmul.f32 %v1729_v10, %v999_v1 }
 0x26e   :  { %1118 = vst.msk [vmem:[%s1983_s7 + $0xa0] sm:$0xff] %vm60_vm0, %v1094_v0  ;;  %v1049_v2 = vadd.f32 %v1735_v37, %v1024_v57 }
 0x270   :  { %v1264_v46 = vpop.eup %1263  ;;  %v1097_v26 = vadd.f32 %v1073_v53, %v1049_v2 }
 0x271   :  { %v986_v40 = vmul.f32 %v1264_v46, %v1705_v54  ;;  %v1072_v54 = vld [vmem:[%s1982_s6 + $0xb0] sm:$0xff] }
 0x272   :  { %1121 = vst.msk [vmem:[%s1983_s7 + $0xb8] sm:$0xff] %vm60_vm0, %v1097_v26 }
 0x273   :  { %v1266_v5 = vpop.eup %1265  ;;  %v1011_v7 = vmul.f32 %v1729_v10, %v986_v40 }
 0x274   :  { %v998_v11 = vmul.f32 %v1266_v5, %v1710_v44 }
 0x275   :  { %v1036_v22 = vadd.f32 %v1735_v37, %v1011_v7 }
 0x276   :  { %v1023_v34 = vmul.f32 %v1729_v10, %v998_v11 }
 0x277   :  { %v1084_v12 = vadd.f32 %v1060_v9, %v1036_v22 }
 0x278   :  { %v1048_v49 = vadd.f32 %v1735_v37, %v1023_v34 }
 0x279   :  { %1108 = vst.msk [vmem:[%s1983_s7 + $0x50] sm:$0xff] %vm60_vm0, %v1084_v12 }
 0x27a   :  { %v1096_v27 = vadd.f32 %v1072_v54, %v1048_v49 }
 0x27c   :  { %1120 = vst.msk [vmem:[%s1983_s7 + $0xb0] sm:$0xff] %vm60_vm0, %v1096_v27 }

// kernel: gridnet_v2_block.5
= control target key start
LH: loop header
LB: loop body
LE: loop exit
PB: predicated region body
PF: predicated region fallthrough
CT: control target
= control target key end

     0   :  { %vm61_vm0 = vcmask 64512   ;;  %vm726_vm1 = vcmask 261120   ;;  %s4636_s21 = smov 32   ;;  %s4637_s22 = smov 96   ;;  %vm918_vm3 = vcmask 130048   ;;  %vm3725_vm4 = vcmask 326656   ;;  %s6328_s0 = inlined_call_operand.vmem [shape: f32[12,16,8], index: 0, kind: input, shape index: {}]   ;;  %s6329_s3 = inlined_call_operand.vmem [shape: f32[8,128], index: 3, kind: input, shape index: {}]   ;;  %s6330_s5 = inlined_call_operand.vmem [shape: f32[32,128], index: 5, kind: input, shape index: {}]   ;;  %s6331_s1 = inlined_call_operand.vmem [shape: f32[1,8], index: 1, kind: input, shape index: {}]   ;;  %s6332_s2 = inlined_call_operand.vmem [shape: f32[1,8], index: 2, kind: input, shape index: {}]   ;;  %s6333_s4 = inlined_call_operand.vmem [shape: f32[1,128], index: 4, kind: input, shape index: {}]   ;;  %s6334_s6 = inlined_call_operand.vmem [shape: f32[32,8], index: 6, kind: input, shape index: {}]   ;;  %s6335_s8 = inlined_call_operand.vmem [shape: f32[8,40], index: 8, kind: input, shape index: {}]   ;;  %s6336_s7 = inlined_call_operand.vmem [shape: f32[1,8], index: 7, kind: input, shape index: {}]   ;;  %s6337_s10 = inlined_call_operand.vmem [shape: f32[12,16,8], index: 10, kind: output, shape index: {0}]   ;;  %s6338_s9 = inlined_call_operand.vmem [shape: f32[1,40], index: 9, kind: input, shape index: {}]   ;;  %s6339_s11 = inlined_call_operand.vmem [shape: f32[192,40], index: 11, kind: output, shape index: {1}]  }
   0x1   :  { %v4702_v0 = vld [vmem:[%s6328_s0] sm:$0xff]  ;;  %v4707_v1 = vld [vmem:[%s6328_s0 + $0x10] sm:$0xff]  ;;  %v4712_v2 = vld [vmem:[%s6328_s0 + $0x8] sm:$0xff] }
   0x2   :  { %v62_v3 = vsel %vm61_vm0, %v4702_v0, 0.0  ;;  %v68_v4 = vsel %vm61_vm0, %v4707_v1, 0.0  ;;  %v4721_v5 = vld [vmem:[%s6328_s0 + $0x18] sm:$0xff]  ;;  %v65_v6 = vsel %vm61_vm0, %v4712_v2, 0.0  ;;  %v4730_v8 = vld [vmem:[%s6328_s0 + $0x20] sm:$0xff]  ;;  %v4735_v9 = vld [vmem:[%s6328_s0 + $0x28] sm:$0xff] }
   0x3   :  { %63 = vadd.xlane.f32.xlu0 %v62_v3  ;;  %69 = vadd.xlane.f32.xlu1 %v68_v4  ;;  %v71_v7 = vsel %vm61_vm0, %v4721_v5, 0.0  ;;  %v74_v10 = vsel %vm61_vm0, %v4730_v8, 0.0  ;;  %v77_v11 = vsel %vm61_vm0, %v4735_v9, 0.0  ;;  %v4744_v12 = vld [vmem:[%s6328_s0 + $0x30] sm:$0xff]  ;;  %v4749_v13 = vld [vmem:[%s6328_s0 + $0x38] sm:$0xff]  ;;  %v4758_v16 = vld [vmem:[%s6328_s0 + $0x40] sm:$0xff] }
   0x4   :  { %v80_v14 = vsel %vm61_vm0, %v4744_v12, 0.0  ;;  %v83_v15 = vsel %vm61_vm0, %v4749_v13, 0.0  ;;  %v4763_v17 = vld [vmem:[%s6328_s0 + $0x48] sm:$0xff]  ;;  %v86_v18 = vsel %vm61_vm0, %v4758_v16, 0.0  ;;  %v4772_v20 = vld [vmem:[%s6328_s0 + $0x50] sm:$0xff]  ;;  %v4777_v21 = vld [vmem:[%s6328_s0 + $0x58] sm:$0xff] }
   0x5   :  { %v89_v19 = vsel %vm61_vm0, %v4763_v17, 0.0  ;;  %v92_v22 = vsel %vm61_vm0, %v4772_v20, 0.0  ;;  %v95_v23 = vsel %vm61_vm0, %v4777_v21, 0.0  ;;  %v4786_v24 = vld [vmem:[%s6328_s0 + $0x60] sm:$0xff]  ;;  %v4791_v25 = vld [vmem:[%s6328_s0 + $0x68] sm:$0xff]  ;;  %v4800_v28 = vld [vmem:[%s6328_s0 + $0x70] sm:$0xff] }
   0x6   :  { %v98_v26 = vsel %vm61_vm0, %v4786_v24, 0.0  ;;  %v101_v27 = vsel %vm61_vm0, %v4791_v25, 0.0  ;;  %v4805_v29 = vld [vmem:[%s6328_s0 + $0x78] sm:$0xff]  ;;  %v104_v30 = vsel %vm61_vm0, %v4800_v28, 0.0  ;;  %v4814_v32 = vld [vmem:[%s6328_s0 + $0x80] sm:$0xff]  ;;  %v4819_v33 = vld [vmem:[%s6328_s0 + $0x88] sm:$0xff] }
   0x7   :  { %66 = vadd.xlane.f32.xlu0 %v65_v6  ;;  %72 = vadd.xlane.f32.xlu1 %v71_v7  ;;  %v107_v31 = vsel %vm61_vm0, %v4805_v29, 0.0  ;;  %v110_v34 = vsel %vm61_vm0, %v4814_v32, 0.0  ;;  %v113_v35 = vsel %vm61_vm0, %v4819_v33, 0.0  ;;  %v4828_v36 = vld [vmem:[%s6328_s0 + $0x90] sm:$0xff]  ;;  %v4833_v37 = vld [vmem:[%s6328_s0 + $0x98] sm:$0xff]  ;;  %v4842_v40 = vld [vmem:[%s6328_s0 + $0xa0] sm:$0xff] }
   0x8   :  { %v116_v38 = vsel %vm61_vm0, %v4828_v36, 0.0  ;;  %v119_v39 = vsel %vm61_vm0, %v4833_v37, 0.0  ;;  %v4847_v41 = vld [vmem:[%s6328_s0 + $0xa8] sm:$0xff]  ;;  %v122_v42 = vsel %vm61_vm0, %v4842_v40, 0.0  ;;  %v4856_v44 = vld [vmem:[%s6328_s0 + $0xb0] sm:$0xff]  ;;  %v4861_v45 = vld [vmem:[%s6328_s0 + $0xb8] sm:$0xff] }
   0x9   :  { %v125_v43 = vsel %vm61_vm0, %v4847_v41, 0.0  ;;  %v128_v46 = vsel %vm61_vm0, %v4856_v44, 0.0  ;;  %v131_v47 = vsel %vm61_vm0, %v4861_v45, 0.0 }
   0xb   :  { %75 = vadd.xlane.f32.xlu0 %v74_v10  ;;  %78 = vadd.xlane.f32.xlu1 %v77_v11 }
   0xf   :  { %81 = vadd.xlane.f32.xlu0 %v80_v14  ;;  %84 = vadd.xlane.f32.xlu1 %v83_v15 }
  0x13   :  { %87 = vadd.xlane.f32.xlu0 %v86_v18  ;;  %90 = vadd.xlane.f32.xlu1 %v89_v19 }
  0x17   :  { %93 = vadd.xlane.f32.xlu0 %v92_v22  ;;  %96 = vadd.xlane.f32.xlu1 %v95_v23 }
  0x1b   :  { %99 = vadd.xlane.f32.xlu0 %v98_v26  ;;  %102 = vadd.xlane.f32.xlu1 %v101_v27 }
  0x1f   :  { %105 = vadd.xlane.f32.xlu0 %v104_v30  ;;  %108 = vadd.xlane.f32.xlu1 %v107_v31 }
  0x23   :  { %111 = vadd.xlane.f32.xlu0 %v110_v34  ;;  %114 = vadd.xlane.f32.xlu1 %v113_v35 }
  0x27   :  { %117 = vadd.xlane.f32.xlu0 %v116_v38  ;;  %120 = vadd.xlane.f32.xlu1 %v119_v39 }
  0x2b   :  { %123 = vadd.xlane.f32.xlu0 %v122_v42  ;;  %126 = vadd.xlane.f32.xlu1 %v125_v43 }
  0x2f   :  { %129 = vadd.xlane.f32.xlu0 %v128_v46  ;;  %132 = vadd.xlane.f32.xlu1 %v131_v47 }
  0x90   :  { %v64_v48 = vpop.xlane.xlu0 %63  ;;  %v70_v49 = vpop.xlane.xlu1 %69 }
  0x91   :  { %v135_v50 = vmul.f32 0.125, %v64_v48  ;;  %v137_v51 = vmul.f32 0.125, %v70_v49 }
  0x93   :  { %v4868_v52 = vsub.f32 %v4702_v0, %v135_v50  ;;  %v4871_v53 = vsub.f32 %v4707_v1, %v137_v51 }
  0x94   :  { %v67_v54 = vpop.xlane.xlu0 %66  ;;  %v73_v55 = vpop.xlane.xlu1 %72 }
  0x95   :  { %v136_v56 = vmul.f32 0.125, %v67_v54  ;;  %v138_v57 = vmul.f32 0.125, %v73_v55  ;;  %v183_v58 = vmul.f32 %v4868_v52, %v4868_v52  ;;  %v185_v59 = vmul.f32 %v4871_v53, %v4871_v53 }
  0x97   :  { %v4878_v60 = vsub.f32 %v4712_v2, %v136_v56  ;;  %v4881_v61 = vsub.f32 %v4721_v5, %v138_v57  ;;  %v207_v62 = vsel %vm61_vm0, %v183_v58, 0.0  ;;  %v213_v1 = vsel %vm61_vm0, %v185_v59, 0.0 }
  0x98   :  { %208 = vadd.xlane.f32.xlu0 %v207_v62  ;;  %v76_v63 = vpop.xlane.xlu0 %75  ;;  %v79_v0 = vpop.xlane.xlu1 %78 }
  0x99   :  { %v139_v3 = vmul.f32 0.125, %v76_v63  ;;  %v140_v4 = vmul.f32 0.125, %v79_v0  ;;  %v184_v6 = vmul.f32 %v4878_v60, %v4878_v60  ;;  %v186_v7 = vmul.f32 %v4881_v61, %v4881_v61 }
  0x9b   :  { %v4890_v2 = vsub.f32 %v4730_v8, %v139_v3  ;;  %v4893_v5 = vsub.f32 %v4735_v9, %v140_v4  ;;  %v210_v10 = vsel %vm61_vm0, %v184_v6, 0.0  ;;  %v216_v15 = vsel %vm61_vm0, %v186_v7, 0.0 }
  0x9c   :  { %214 = vadd.xlane.f32.xlu0 %v213_v1  ;;  %211 = vadd.xlane.f32.xlu1 %v210_v10  ;;  %v82_v11 = vpop.xlane.xlu0 %81  ;;  %v85_v14 = vpop.xlane.xlu1 %84 }
  0x9d   :  { %v141_v18 = vmul.f32 0.125, %v82_v11  ;;  %v142_v19 = vmul.f32 0.125, %v85_v14  ;;  %v187_v22 = vmul.f32 %v4890_v2, %v4890_v2  ;;  %v188_v8 = vmul.f32 %v4893_v5, %v4893_v5 }
  0x9f   :  { %v4902_v23 = vsub.f32 %v4744_v12, %v141_v18  ;;  %v4905_v9 = vsub.f32 %v4749_v13, %v142_v19  ;;  %v219_v26 = vsel %vm61_vm0, %v187_v22, 0.0  ;;  %v222_v31 = vsel %vm61_vm0, %v188_v8, 0.0 }
  0xa0   :  { %217 = vadd.xlane.f32.xlu1 %v216_v15  ;;  %220 = vadd.xlane.f32.xlu0 %v219_v26  ;;  %v88_v27 = vpop.xlane.xlu0 %87  ;;  %v91_v30 = vpop.xlane.xlu1 %90 }
  0xa1   :  { %v143_v34 = vmul.f32 0.125, %v88_v27  ;;  %v144_v35 = vmul.f32 0.125, %v91_v30  ;;  %v189_v38 = vmul.f32 %v4902_v23, %v4902_v23  ;;  %v190_v12 = vmul.f32 %v4905_v9, %v4905_v9 }
  0xa3   :  { %v4914_v39 = vsub.f32 %v4758_v16, %v143_v34  ;;  %v4917_v13 = vsub.f32 %v4763_v17, %v144_v35  ;;  %v225_v42 = vsel %vm61_vm0, %v189_v38, 0.0  ;;  %v228_v47 = vsel %vm61_vm0, %v190_v12, 0.0 }
  0xa4   :  { %223 = vadd.xlane.f32.xlu1 %v222_v31  ;;  %226 = vadd.xlane.f32.xlu0 %v225_v42  ;;  %v94_v43 = vpop.xlane.xlu0 %93  ;;  %v97_v46 = vpop.xlane.xlu1 %96 }
  0xa5   :  { %v145_v48 = vmul.f32 0.125, %v94_v43  ;;  %v146_v49 = vmul.f32 0.125, %v97_v46  ;;  %v191_v50 = vmul.f32 %v4914_v39, %v4914_v39  ;;  %v192_v16 = vmul.f32 %v4917_v13, %v4917_v13 }
  0xa7   :  { %v4926_v51 = vsub.f32 %v4772_v20, %v145_v48  ;;  %v4929_v17 = vsub.f32 %v4777_v21, %v146_v49  ;;  %v231_v54 = vsel %vm61_vm0, %v191_v50, 0.0  ;;  %v234_v57 = vsel %vm61_vm0, %v192_v16, 0.0 }
  0xa8   :  { %229 = vadd.xlane.f32.xlu1 %v228_v47  ;;  %232 = vadd.xlane.f32.xlu0 %v231_v54  ;;  %v100_v55 = vpop.xlane.xlu0 %99  ;;  %v103_v56 = vpop.xlane.xlu1 %102 }
  0xa9   :  { %v147_v58 = vmul.f32 0.125, %v100_v55  ;;  %v148_v59 = vmul.f32 0.125, %v103_v56  ;;  %v193_v62 = vmul.f32 %v4926_v51, %v4926_v51  ;;  %v194_v20 = vmul.f32 %v4929_v17, %v4929_v17 }
  0xab   :  { %v4938_v63 = vsub.f32 %v4786_v24, %v147_v58  ;;  %v4941_v21 = vsub.f32 %v4791_v25, %v148_v59  ;;  %v237_v0 = vsel %vm61_vm0, %v193_v62, 0.0  ;;  %v240_v4 = vsel %vm61_vm0, %v194_v20, 0.0 }
  0xac   :  { %235 = vadd.xlane.f32.xlu1 %v234_v57  ;;  %238 = vadd.xlane.f32.xlu0 %v237_v0  ;;  %v106_v1 = vpop.xlane.xlu0 %105  ;;  %v109_v3 = vpop.xlane.xlu1 %108 }
  0xad   :  { %v149_v6 = vmul.f32 0.125, %v106_v1  ;;  %v150_v7 = vmul.f32 0.125, %v109_v3  ;;  %v195_v10 = vmul.f32 %v4938_v63, %v4938_v63  ;;  %v196_v24 = vmul.f32 %v4941_v21, %v4941_v21 }
  0xaf   :  { %v4950_v11 = vsub.f32 %v4800_v28, %v149_v6  ;;  %v4953_v25 = vsub.f32 %v4805_v29, %v150_v7  ;;  %v243_v14 = vsel %vm61_vm0, %v195_v10, 0.0  ;;  %v246_v19 = vsel %vm61_vm0, %v196_v24, 0.0 }
  0xb0   :  { %241 = vadd.xlane.f32.xlu1 %v240_v4  ;;  %244 = vadd.xlane.f32.xlu0 %v243_v14  ;;  %v112_v15 = vpop.xlane.xlu0 %111  ;;  %v115_v18 = vpop.xlane.xlu1 %114  ;;  %v749_v14 = vld [vmem:[%s6330_s5 + $0x8] sm:$0xff] }
  0xb1   :  { %v151_v22 = vmul.f32 0.125, %v112_v15  ;;  %v152_v8 = vmul.f32 0.125, %v115_v18  ;;  %v197_v26 = vmul.f32 %v4950_v11, %v4950_v11  ;;  %v198_v28 = vmul.f32 %v4953_v25, %v4953_v25 }
  0xb2   :  { %v4634_v18 = vmov 0.0  }
  0xb3   :  { %v4962_v27 = vsub.f32 %v4814_v32, %v151_v22  ;;  %v4965_v29 = vsub.f32 %v4819_v33, %v152_v8  ;;  %v249_v30 = vsel %vm61_vm0, %v197_v26, 0.0  ;;  %v252_v35 = vsel %vm61_vm0, %v198_v28, 0.0  ;;  %727 = vst.msk [vmem:[#allocation5] sm:$0xff] %vm726_vm1, %v4634_v18  ;;  %728 = vst.msk [vmem:[#allocation5 + $0x8] sm:$0xff] %vm726_vm1, %v4634_v18  ;;  %v751_v22 = vld [vmem:[%s6330_s5 + $0x18] sm:$0xff] }
  0xb4   :  { %247 = vadd.xlane.f32.xlu1 %v246_v19  ;;  %250 = vadd.xlane.f32.xlu0 %v249_v30  ;;  %v118_v31 = vpop.xlane.xlu0 %117  ;;  %v121_v34 = vpop.xlane.xlu1 %120  ;;  %729 = vst.msk [vmem:[#allocation6] sm:$0xff] %vm726_vm1, %v4634_v18  ;;  %730 = vst.msk [vmem:[#allocation6 + $0x8] sm:$0xff] %vm726_vm1, %v4634_v18  ;;  %v750_v19 = vld [vmem:[%s6330_s5 + $0x10] sm:$0xff] }
  0xb5   :  { %v153_v38 = vmul.f32 0.125, %v118_v31  ;;  %v154_v12 = vmul.f32 0.125, %v121_v34  ;;  %v199_v42 = vmul.f32 %v4962_v27, %v4962_v27  ;;  %v200_v32 = vmul.f32 %v4965_v29, %v4965_v29 }
  0xb6   :  { %v5035_v8 = vpack.c.bf16 %v751_v22, %v750_v19 }
  0xb7   :  { %v4974_v43 = vsub.f32 %v4828_v36, %v153_v38  ;;  %v4977_v33 = vsub.f32 %v4833_v37, %v154_v12  ;;  %v255_v46 = vsel %vm61_vm0, %v199_v42, 0.0  ;;  %v258_v49 = vsel %vm61_vm0, %v200_v32, 0.0 }
  0xb8   :  { %253 = vadd.xlane.f32.xlu1 %v252_v35  ;;  %256 = vadd.xlane.f32.xlu0 %v255_v46  ;;  %v124_v47 = vpop.xlane.xlu0 %123  ;;  %v127_v48 = vpop.xlane.xlu1 %126 }
  0xb9   :  { %v155_v50 = vmul.f32 0.125, %v124_v47  ;;  %v156_v16 = vmul.f32 0.125, %v127_v48  ;;  %v201_v54 = vmul.f32 %v4974_v43, %v4974_v43  ;;  %v202_v36 = vmul.f32 %v4977_v33, %v4977_v33 }
  0xba   :  { %v746_v26 = vld [vmem:[#allocation5] sm:$0xff]  ;;  %v747_v28 = vld [vmem:[#allocation5 + $0x8] sm:$0xff] }
  0xbb   :  { %v4986_v55 = vsub.f32 %v4842_v40, %v155_v50  ;;  %v4989_v37 = vsub.f32 %v4847_v41, %v156_v16  ;;  %v261_v56 = vsel %vm61_vm0, %v201_v54, 0.0  ;;  %v264_v59 = vsel %vm61_vm0, %v202_v36, 0.0  ;;  %v437_v41 = vld [vmem:[%s6329_s3] sm:$0xff]  ;;  %4079 = vmatprep.mubr.msk.f32.mxu1 %vm726_vm1, %v746_v26 }
  0xbc   :  { %259 = vadd.xlane.f32.xlu1 %v258_v49  ;;  %262 = vadd.xlane.f32.xlu0 %v261_v56  ;;  %v130_v57 = vpop.xlane.xlu0 %129  ;;  %v133_v58 = vpop.xlane.xlu1 %132 }
  0xbd   :  { %v157_v62 = vmul.f32 0.125, %v130_v57  ;;  %v158_v20 = vmul.f32 0.125, %v133_v58  ;;  %v203_v0 = vmul.f32 %v4986_v55, %v4986_v55  ;;  %v204_v40 = vmul.f32 %v4989_v37, %v4989_v37  ;;  %4033 = vmatprep.subr.mxu0 %v437_v41 }
  0xbe   :  { %4034 = vmatpush3.msra.mxu0 %v437_v41 }
  0xbf   :  { %v5001_v1 = vsub.f32 %v4856_v44, %v157_v62  ;;  %v5004_v3 = vsub.f32 %v4861_v45, %v158_v20  ;;  %v267_v4 = vsel %vm61_vm0, %v203_v0, 0.0  ;;  %v270_v6 = vsel %vm61_vm0, %v204_v40, 0.0  ;;  %v748_v45 = vld [vmem:[%s6330_s5] sm:$0xff] }
  0xc0   :  { %265 = vadd.xlane.f32.xlu1 %v264_v59  ;;  %268 = vadd.xlane.f32.xlu0 %v267_v4  ;;  %v5020_v15 = vpack.c.bf16 %v749_v14, %v748_v45  ;;  %v5049_v0 = vld [vmem:[%s6331_s1] ss:$0 sm:$0xff] }
  0xc1   :  { %v205_v7 = vmul.f32 %v5001_v1, %v5001_v1  ;;  %v206_v10 = vmul.f32 %v5004_v3, %v5004_v3 }
  0xc2   :  { %4286 = vmatprep.subr.bf16.mxu1 %v5020_v15  ;;  %4334 = vmatprep.subr.bf16.mxu0 %v5020_v15 }
  0xc3   :  { %v273_v24 = vsel %vm61_vm0, %v205_v7, 0.0  ;;  %v276_v44 = vsel %vm61_vm0, %v206_v10, 0.0  ;;  %4288 = vmatpush3.bf16.msra.mxu1 %v5020_v15  ;;  %v5055_v10 = vld [vmem:[%s6332_s2] ss:$0 sm:$0xff] }
  0xc4   :  { %271 = vadd.xlane.f32.xlu1 %v270_v6  ;;  %274 = vadd.xlane.f32.xlu0 %v273_v24 }
  0xc5   :  { %4290 = vmatprep.subr.bf16.mxu1 %v5035_v8 }
  0xc7   :  { %4292 = vmatpush3.bf16.msra.mxu1 %v5035_v8 }
  0xc8   :  { %277 = vadd.xlane.f32.xlu1 %v276_v44  ;;  %4294 = vmatprep.subr.bf16.mxu1 %v5020_v15 }
  0xca   :  { %4080 = vmatmul.mubr.msk.f32.vlgmr.msra.gmra.mrb[0].mxu1 %vm726_vm1, %v747_v28 }
  0xcb   :  { %4296 = vmatpush3.bf16.msra.mxu1 %v5020_v15 }
  0xcc   :  { %4298 = vmatprep.subr.bf16.mxu1 %v5035_v8 }
  0xcf   :  { %4300 = vmatpush3.bf16.msra.mxu1 %v5035_v8 }
  0xd0   :  { %4302 = vmatprep.subr.bf16.mxu1 %v5020_v15 }
 0x125   :  { %v209_v30 = vpop.xlane.xlu0 %208 }
 0x126   :  { %v279_v31 = vmul.f32 0.125, %v209_v30 }
 0x128   :  { %v303_v34 = vadd.f32 1e-05, %v279_v31 }
 0x129   :  { %v212_v35 = vpop.xlane.xlu1 %211  ;;  %v215_v38 = vpop.xlane.xlu0 %214 }
 0x12a   :  { %4394 = vrsqrt.f32 %v303_v34  ;;  %v280_v12 = vmul.f32 0.125, %v212_v35  ;;  %v281_v42 = vmul.f32 0.125, %v215_v38 }
 0x12c   :  { %v304_v32 = vadd.f32 1e-05, %v280_v12  ;;  %v305_v46 = vadd.f32 1e-05, %v281_v42 }
 0x12d   :  { %v218_v47 = vpop.xlane.xlu1 %217  ;;  %v221_v48 = vpop.xlane.xlu0 %220 }
 0x12e   :  { %4396 = vrsqrt.f32 %v304_v32  ;;  %v282_v49 = vmul.f32 0.125, %v218_v47  ;;  %v283_v50 = vmul.f32 0.125, %v221_v48 }
 0x12f   :  { %4398 = vrsqrt.f32 %v305_v46 }
 0x130   :  { %v306_v16 = vadd.f32 1e-05, %v282_v49  ;;  %v307_v54 = vadd.f32 1e-05, %v283_v50 }
 0x131   :  { %v224_v36 = vpop.xlane.xlu1 %223  ;;  %v227_v56 = vpop.xlane.xlu0 %226 }
 0x132   :  { %4400 = vrsqrt.f32 %v306_v16  ;;  %v284_v57 = vmul.f32 0.125, %v224_v36  ;;  %v285_v58 = vmul.f32 0.125, %v227_v56 }
 0x133   :  { %4402 = vrsqrt.f32 %v307_v54 }
 0x134   :  { %v4395_v59 = vpop.eup %4394  ;;  %v308_v62 = vadd.f32 1e-05, %v284_v57  ;;  %v309_v20 = vadd.f32 1e-05, %v285_v58 }
 0x135   :  { %v230_v40 = vpop.xlane.xlu1 %229  ;;  %v233_v41 = vpop.xlane.xlu0 %232  ;;  %v351_v4 = vmul.f32 %v4395_v59, %v4868_v52 }
 0x136   :  { %4404 = vrsqrt.f32 %v308_v62  ;;  %v286_v6 = vmul.f32 0.125, %v230_v40  ;;  %v287_v7 = vmul.f32 0.125, %v233_v41 }
 0x137   :  { %4406 = vrsqrt.f32 %v309_v20  ;;  %v382_v24 = vmul.f32 %v5049_v0, %v351_v4 }
 0x138   :  { %v4397_v44 = vpop.eup %4396  ;;  %v310_v45 = vadd.f32 1e-05, %v286_v6  ;;  %v311_v14 = vadd.f32 1e-05, %v287_v7 }
 0x139   :  { %v4399_v18 = vpop.eup %4398  ;;  %v236_v19 = vpop.xlane.xlu1 %235  ;;  %v413_v26 = vadd.f32 %v5055_v10, %v382_v24  ;;  %v352_v52 = vmul.f32 %v4397_v44, %v4878_v60 }
 0x13a   :  { %v239_v22 = vpop.xlane.xlu0 %238  ;;  %4408 = vrsqrt.f32 %v310_v45  ;;  %v288_v28 = vmul.f32 0.125, %v236_v19  ;;  %v353_v31 = vmul.f32 %v4399_v18, %v4871_v53 }
 0x13b   :  { %v289_v30 = vmul.f32 0.125, %v239_v22  ;;  %4410 = vrsqrt.f32 %v311_v14  ;;  %4035 = vmatprep.mubr.msk.f32.mxu0 %vm61_vm0, %v413_v26  ;;  %v383_v34 = vmul.f32 %v5049_v0, %v352_v52 }
 0x13c   :  { %v4401_v35 = vpop.eup %4400  ;;  %v312_v38 = vadd.f32 1e-05, %v288_v28  ;;  %v384_v42 = vmul.f32 %v5049_v0, %v353_v31 }
 0x13d   :  { %v313_v12 = vadd.f32 1e-05, %v289_v30  ;;  %v4403_v32 = vpop.eup %4402  ;;  %v242_v46 = vpop.xlane.xlu1 %241  ;;  %v414_v60 = vadd.f32 %v5055_v10, %v383_v34  ;;  %v354_v48 = vmul.f32 %v4401_v35, %v4881_v61 }
 0x13e   :  { %v245_v47 = vpop.xlane.xlu0 %244  ;;  %4412 = vrsqrt.f32 %v312_v38  ;;  %v290_v49 = vmul.f32 0.125, %v242_v46  ;;  %v415_v50 = vadd.f32 %v5055_v10, %v384_v42  ;;  %v355_v54 = vmul.f32 %v4403_v32, %v4890_v2 }
 0x13f   :  { %v291_v53 = vmul.f32 0.125, %v245_v47  ;;  %4414 = vrsqrt.f32 %v313_v12  ;;  %4036 = vmatmul.mubr.msk.f32.vlgmr.msra.gmra.mrb[0].mxu0 %vm61_vm0, %v414_v60  ;;  %v385_v16 = vmul.f32 %v5049_v0, %v354_v48 }
 0x140   :  { %v4405_v36 = vpop.eup %4404  ;;  %v314_v56 = vadd.f32 1e-05, %v290_v49  ;;  %4038 = vmatprep.mubr.msk.f32.mxu0 %vm61_vm0, %v415_v50  ;;  %4336 = vmatpush3.bf16.msra.mxu0 %v5020_v15  ;;  %v386_v20 = vmul.f32 %v5049_v0, %v355_v54 }
 0x141   :  { %v315_v57 = vadd.f32 1e-05, %v291_v53  ;;  %v4407_v61 = vpop.eup %4406  ;;  %v248_v58 = vpop.xlane.xlu1 %247  ;;  %v416_v62 = vadd.f32 %v5055_v10, %v385_v16  ;;  %v356_v40 = vmul.f32 %v4405_v36, %v4893_v5  ;;  %4338 = vmatprep.subr.bf16.mxu0 %v5035_v8 }
 0x142   :  { %v251_v59 = vpop.xlane.xlu0 %250  ;;  %4416 = vrsqrt.f32 %v314_v56  ;;  %v292_v2 = vmul.f32 0.125, %v248_v58  ;;  %v357_v4 = vmul.f32 %v4407_v61, %v4902_v23  ;;  %v417_v6 = vadd.f32 %v5055_v10, %v386_v20 }
 0x143   :  { %v293_v41 = vmul.f32 0.125, %v251_v59  ;;  %4418 = vrsqrt.f32 %v315_v57  ;;  %4039 = vmatmul.mubr.msk.f32.gmra.mrb[2].mxu0 %vm61_vm0, %v416_v62  ;;  %v387_v7 = vmul.f32 %v5049_v0, %v356_v40 }
 0x144   :  { %v4409_v24 = vpop.eup %4408  ;;  %v316_v44 = vadd.f32 1e-05, %v292_v2  ;;  %v388_v14 = vmul.f32 %v5049_v0, %v357_v4  ;;  %4340 = vmatpush3.bf16.msra.mxu0 %v5035_v8  ;;  %4041 = vmatprep.mubr.msk.f32.mxu0 %vm61_vm0, %v417_v6 }
 0x145   :  { %v317_v45 = vadd.f32 1e-05, %v293_v41  ;;  %v4411_v5 = vpop.eup %4410  ;;  %v254_v18 = vpop.xlane.xlu1 %253  ;;  %v418_v23 = vadd.f32 %v5055_v10, %v387_v7  ;;  %v358_v22 = vmul.f32 %v4409_v24, %v4905_v9 }
 0x146   :  { %v257_v19 = vpop.xlane.xlu0 %256  ;;  %4420 = vrsqrt.f32 %v316_v44  ;;  %v294_v26 = vmul.f32 0.125, %v254_v18  ;;  %v419_v28 = vadd.f32 %v5055_v10, %v388_v14  ;;  %v359_v31 = vmul.f32 %v4411_v5, %v4914_v39 }
 0x147   :  { %v295_v52 = vmul.f32 0.125, %v257_v19  ;;  %4422 = vrsqrt.f32 %v317_v45  ;;  %4042 = vmatmul.mubr.msk.f32.gmra.mrb[4].mxu0 %vm61_vm0, %v418_v23  ;;  %v389_v30 = vmul.f32 %v5049_v0, %v358_v22 }
 0x148   :  { %v4413_v34 = vpop.eup %4412  ;;  %v318_v35 = vadd.f32 1e-05, %v294_v26  ;;  %4044 = vmatprep.mubr.msk.f32.mxu0 %vm61_vm0, %v419_v28  ;;  %v390_v46 = vmul.f32 %v5049_v0, %v359_v31 }
 0x149   :  { %v319_v38 = vadd.f32 1e-05, %v295_v52  ;;  %v4415_v12 = vpop.eup %4414  ;;  %v260_v42 = vpop.xlane.xlu1 %259  ;;  %v420_v32 = vadd.f32 %v5055_v10, %v389_v30  ;;  %v360_v47 = vmul.f32 %v4413_v34, %v4917_v13 }
 0x14a   :  { %v263_v9 = vpop.xlane.xlu0 %262  ;;  %4424 = vrsqrt.f32 %v318_v35  ;;  %v296_v60 = vmul.f32 0.125, %v260_v42  ;;  %v361_v49 = vmul.f32 %v4415_v12, %v4926_v51  ;;  %v421_v39 = vadd.f32 %v5055_v10, %v390_v46 }
 0x14b   :  { %v297_v48 = vmul.f32 0.125, %v263_v9  ;;  %4426 = vrsqrt.f32 %v319_v38  ;;  %4045 = vmatmul.mubr.msk.f32.gmra.mrb[6].mxu0 %vm61_vm0, %v420_v32  ;;  %v391_v53 = vmul.f32 %v5049_v0, %v360_v47 }
 0x14c   :  { %v4417_v50 = vpop.eup %4416  ;;  %v320_v16 = vadd.f32 1e-05, %v296_v60  ;;  %v392_v36 = vmul.f32 %v5049_v0, %v361_v49  ;;  %4047 = vmatprep.mubr.msk.f32.mxu0 %vm61_vm0, %v421_v39 }
 0x14d   :  { %v321_v54 = vadd.f32 1e-05, %v297_v48  ;;  %v4419_v56 = vpop.eup %4418  ;;  %v266_v13 = vpop.xlane.xlu1 %265  ;;  %v422_v61 = vadd.f32 %v5055_v10, %v391_v53  ;;  %v362_v51 = vmul.f32 %v4417_v50, %v4929_v17 }
 0x14e   :  { %v269_v57 = vpop.xlane.xlu0 %268  ;;  %4428 = vrsqrt.f32 %v320_v16  ;;  %v298_v58 = vmul.f32 0.125, %v266_v13  ;;  %v423_v62 = vadd.f32 %v5055_v10, %v392_v36  ;;  %v363_v40 = vmul.f32 %v4419_v56, %v4938_v63 }
 0x14f   :  { %v299_v59 = vmul.f32 0.125, %v269_v57  ;;  %4430 = vrsqrt.f32 %v321_v54  ;;  %4048 = vmatmul.mubr.msk.f32.gmra.mrb[8].mxu0 %vm61_vm0, %v422_v61  ;;  %v393_v20 = vmul.f32 %v5049_v0, %v362_v51 }
 0x150   :  { %v4421_v2 = vpop.eup %4420  ;;  %v322_v41 = vadd.f32 1e-05, %v298_v58  ;;  %4050 = vmatprep.mubr.msk.f32.mxu0 %vm61_vm0, %v423_v62  ;;  %v394_v44 = vmul.f32 %v5049_v0, %v363_v40 }
 0x151   :  { %v323_v4 = vadd.f32 1e-05, %v299_v59  ;;  %v4423_v6 = vpop.eup %4422  ;;  %v272_v7 = vpop.xlane.xlu1 %271  ;;  %v424_v24 = vadd.f32 %v5055_v10, %v393_v20  ;;  %v364_v45 = vmul.f32 %v4421_v2, %v4941_v21 }
 0x152   :  { %v275_v17 = vpop.xlane.xlu0 %274  ;;  %4432 = vrsqrt.f32 %v322_v41  ;;  %v300_v14 = vmul.f32 0.125, %v272_v7  ;;  %v365_v18 = vmul.f32 %v4423_v6, %v4950_v11  ;;  %v425_v63 = vadd.f32 %v5055_v10, %v394_v44 }
 0x153   :  { %v301_v5 = vmul.f32 0.125, %v275_v17  ;;  %4434 = vrsqrt.f32 %v323_v4  ;;  %4051 = vmatmul.mubr.msk.f32.gmra.mrb[10].mxu0 %vm61_vm0, %v424_v24  ;;  %v395_v19 = vmul.f32 %v5049_v0, %v364_v45 }
 0x154   :  { %v4425_v23 = vpop.eup %4424  ;;  %v324_v22 = vadd.f32 1e-05, %v300_v14  ;;  %v396_v52 = vmul.f32 %v5049_v0, %v365_v18  ;;  %4053 = vmatprep.mubr.msk.f32.mxu0 %vm61_vm0, %v425_v63 }
 0x155   :  { %v325_v26 = vadd.f32 1e-05, %v301_v5  ;;  %v4427_v28 = vpop.eup %4426  ;;  %v278_v21 = vpop.xlane.xlu1 %277  ;;  %v426_v30 = vadd.f32 %v5055_v10, %v395_v19  ;;  %v366_v11 = vmul.f32 %v4425_v23, %v4953_v25  ;;  %v731_v5 = vlaneseq }
 0x156   :  { %4436 = vrsqrt.f32 %v324_v22  ;;  %v302_v31 = vmul.f32 0.125, %v278_v21  ;;  %v427_v34 = vadd.f32 %v5055_v10, %v396_v52  ;;  %v367_v35 = vmul.f32 %v4427_v28, %v4962_v27 }
 0x157   :  { %4438 = vrsqrt.f32 %v325_v26  ;;  %4054 = vmatmul.mubr.msk.f32.gmra.mrb[12].mxu0 %vm61_vm0, %v426_v30  ;;  %v397_v38 = vmul.f32 %v5049_v0, %v366_v11  ;;  %v732_v22 = vand.u32 127, %v731_v5 }
 0x158   :  { %v4429_v12 = vpop.eup %4428  ;;  %v326_v42 = vadd.f32 1e-05, %v302_v31  ;;  %4056 = vmatprep.mubr.msk.f32.mxu0 %vm61_vm0, %v427_v34  ;;  %v398_v9 = vmul.f32 %v5049_v0, %v367_v35 }
 0x159   :  { %v4431_v32 = vpop.eup %4430  ;;  %v428_v25 = vadd.f32 %v5055_v10, %v397_v38  ;;  %v368_v46 = vmul.f32 %v4429_v12, %v4965_v29  ;;  %v737_v30 = vand.u32 31, %v732_v22 }
 0x15a   :  { %4440 = vrsqrt.f32 %v326_v42  ;;  %v429_v47 = vadd.f32 %v5055_v10, %v398_v9  ;;  %v369_v27 = vmul.f32 %v4431_v32, %v4974_v43 }
 0x15b   :  { %4057 = vmatmul.mubr.msk.f32.gmra.mrb[14].mxu0 %vm61_vm0, %v428_v25  ;;  %v399_v60 = vmul.f32 %v5049_v0, %v368_v46  ;;  %vm5198_vm2 = vcmp.lt.s32.totalorder %v737_v30, 16 }
 0x15c   :  { %v4433_v48 = vpop.eup %4432  ;;  %4059 = vmatprep.mubr.msk.f32.mxu0 %vm61_vm0, %v429_v47  ;;  %v400_v49 = vmul.f32 %v5049_v0, %v369_v27 }
 0x15d   :  { %v4435_v39 = vpop.eup %4434  ;;  %v430_v53 = vadd.f32 %v5055_v10, %v399_v60  ;;  %v370_v50 = vmul.f32 %v4433_v48, %v4977_v33 }
 0x15e   :  { %v431_v29 = vadd.f32 %v5055_v10, %v400_v49  ;;  %v371_v16 = vmul.f32 %v4435_v39, %v4986_v55 }
 0x15f   :  { %4060 = vmatmul.mubr.msk.f32.gmra.mrb[16].mxu0 %vm61_vm0, %v430_v53  ;;  %v401_v43 = vmul.f32 %v5049_v0, %v370_v50 }
 0x160   :  { %v4437_v54 = vpop.eup %4436  ;;  %4062 = vmatprep.mubr.msk.f32.mxu0 %vm61_vm0, %v431_v29  ;;  %v402_v36 = vmul.f32 %v5049_v0, %v371_v16 }
 0x161   :  { %v4439_v56 = vpop.eup %4438  ;;  %v432_v13 = vadd.f32 %v5055_v10, %v401_v43  ;;  %v372_v57 = vmul.f32 %v4437_v54, %v4989_v37 }
 0x162   :  { %v433_v33 = vadd.f32 %v5055_v10, %v402_v36  ;;  %v373_v61 = vmul.f32 %v4439_v56, %v5001_v1 }
 0x163   :  { %4063 = vmatmul.mubr.msk.f32.gmra.mrb[18].mxu0 %vm61_vm0, %v432_v13  ;;  %v403_v55 = vmul.f32 %v5049_v0, %v372_v57 }
 0x164   :  { %v4441_v51 = vpop.eup %4440  ;;  %4065 = vmatprep.mubr.msk.f32.mxu0 %vm61_vm0, %v433_v33  ;;  %v404_v58 = vmul.f32 %v5049_v0, %v373_v61 }
 0x165   :  { %v434_v59 = vadd.f32 %v5055_v10, %v403_v55  ;;  %v374_v62 = vmul.f32 %v4441_v51, %v5004_v3  ;;  %v5166_v3 = vld [vmem:[%s6333_s4] ss:$0 sm:$0xff]  ;;  %s4635_s4 = smov 64  }
 0x166   :  { %v435_v20 = vadd.f32 %v5055_v10, %v404_v58 }
 0x167   :  { %4066 = vmatmul.mubr.msk.f32.gmra.mrb[20].mxu0 %vm61_vm0, %v434_v59  ;;  %v405_v37 = vmul.f32 %v5049_v0, %v374_v62 }
 0x168   :  { %4068 = vmatprep.mubr.msk.f32.mxu0 %vm61_vm0, %v435_v20 }
 0x169   :  { %v436_v1 = vadd.f32 %v5055_v10, %v405_v37 }
 0x16b   :  { %4069 = vmatmul.mubr.msk.f32.gmra.mrb[22].mxu0 %vm61_vm0, %v436_v1 }
 0x19d   :  { %v5155_v40 = vpop.f32.mrb[0].mxu1 }
 0x19e   :  { %v5157_v2 = vpop.f32.mrb[1].mxu1 }
 0x212   :  { %v5159_v41 = vpop.f32.mrb[0].mxu0 }
 0x213   :  { %v5161_v4 = vpop.f32.mrb[1].mxu0  ;;  %v5314_v22 = vadd.f32 %v5159_v41, %v5166_v3 }
 0x214   :  { %v5321_v30 = vadd.f32 %v5166_v3, %v5161_v4 }
 0x216   :  { %v4040_v0 = vpop.f32.mrb[2].mxu0 }
 0x217   :  { %v5169_v6 = vadd.f32 %v4040_v0, %v5166_v3  ;;  %v593_v10 = vpop.f32.mrb[3].mxu0 }
 0x218   :  { %v5172_v7 = vadd.f32 %v5166_v3, %v593_v10 }
 0x21a   :  { %v4043_v17 = vpop.f32.mrb[4].mxu0 }
 0x21b   :  { %v5175_v24 = vadd.f32 %v4043_v17, %v5166_v3  ;;  %v603_v44 = vpop.f32.mrb[5].mxu0 }
 0x21c   :  { %v5178_v45 = vadd.f32 %v5166_v3, %v603_v44 }
 0x21e   :  { %v4046_v14 = vpop.f32.mrb[6].mxu0 }
 0x21f   :  { %v5181_v18 = vadd.f32 %v4046_v14, %v5166_v3  ;;  %v613_v63 = vpop.f32.mrb[7].mxu0 }
 0x220   :  { %v5184_v19 = vadd.f32 %v5166_v3, %v613_v63 }
 0x222   :  { %v4049_v23 = vpop.f32.mrb[8].mxu0 }
 0x223   :  { %v5187_v26 = vadd.f32 %v4049_v23, %v5166_v3  ;;  %v623_v52 = vpop.f32.mrb[9].mxu0 }
 0x224   :  { %v5190_v28 = vadd.f32 %v5166_v3, %v623_v52 }
 0x226   :  { %v4052_v21 = vpop.f32.mrb[10].mxu0 }
 0x227   :  { %v5193_v11 = vadd.f32 %v4052_v21, %v5166_v3  ;;  %v633_v31 = vpop.f32.mrb[11].mxu0 }
 0x228   :  { %v5196_v34 = vadd.f32 %v5166_v3, %v633_v31 }
 0x22a   :  { %v4055_v35 = vpop.f32.mrb[12].mxu0 }
 0x22b   :  { %v5203_v12 = vadd.f32 %v4055_v35, %v5166_v3  ;;  %v643_v42 = vpop.f32.mrb[13].mxu0 }
 0x22c   :  { %v5206_v9 = vadd.f32 %v5166_v3, %v643_v42 }
 0x22d   :  { %v1683_v32 = vsel %vm5198_vm2, %v5193_v11, %v5203_v12  ;;  %v1866_v25 = vsel %vm5198_vm2, %v5203_v12, %v5193_v11 }
 0x22e   :  { %v4058_v46 = vpop.f32.mrb[14].mxu0  ;;  %v1682_v47 = vsel %vm5198_vm2, %v5196_v34, %v5206_v9  ;;  %v1865_v27 = vsel %vm5198_vm2, %v5206_v9, %v5196_v34 }
 0x22f   :  { %v5225_v60 = vadd.f32 %v4058_v46, %v5166_v3  ;;  %v653_v48 = vpop.f32.mrb[15].mxu0 }
 0x230   :  { %v5228_v49 = vadd.f32 %v5166_v3, %v653_v48 }
 0x231   :  { %v1498_v39 = vsel %vm5198_vm2, %v5187_v26, %v5225_v60  ;;  %v2049_v53 = vsel %vm5198_vm2, %v5225_v60, %v5187_v26 }
 0x232   :  { %v4061_v50 = vpop.f32.mrb[16].mxu0  ;;  %v1497_v29 = vsel %vm5198_vm2, %v5190_v28, %v5228_v49  ;;  %v2048_v16 = vsel %vm5198_vm2, %v5228_v49, %v5190_v28 }
 0x233   :  { %v5247_v43 = vadd.f32 %v4061_v50, %v5166_v3  ;;  %v663_v54 = vpop.f32.mrb[17].mxu0 }
 0x234   :  { %v5250_v36 = vadd.f32 %v5166_v3, %v663_v54  ;;  %v855_v54 = vld [vmem:[#allocation6 + $0x8] sm:$0xff] }
 0x235   :  { %v1313_v56 = vsel %vm5198_vm2, %v5181_v18, %v5247_v43  ;;  %v2232_v13 = vsel %vm5198_vm2, %v5247_v43, %v5181_v18 }
 0x236   :  { %v4064_v57 = vpop.f32.mrb[18].mxu0  ;;  %v1312_v33 = vsel %vm5198_vm2, %v5184_v19, %v5250_v36  ;;  %v2231_v61 = vsel %vm5198_vm2, %v5250_v36, %v5184_v19 }
 0x237   :  { %v5269_v55 = vadd.f32 %v4064_v57, %v5166_v3  ;;  %v673_v51 = vpop.f32.mrb[19].mxu0 }
 0x238   :  { %v5272_v58 = vadd.f32 %v5166_v3, %v673_v51 }
 0x239   :  { %v1128_v59 = vsel %vm5198_vm2, %v5175_v24, %v5269_v55  ;;  %v2415_v62 = vsel %vm5198_vm2, %v5269_v55, %v5175_v24 }
 0x23a   :  { %v4067_v20 = vpop.f32.mrb[20].mxu0  ;;  %v1127_v37 = vsel %vm5198_vm2, %v5178_v45, %v5272_v58  ;;  %v2414_v1 = vsel %vm5198_vm2, %v5272_v58, %v5178_v45 }
 0x23b   :  { %v5291_v0 = vadd.f32 %v4067_v20, %v5166_v3  ;;  %v683_v10 = vpop.f32.mrb[21].mxu0 }
 0x23c   :  { %v5294_v17 = vadd.f32 %v5166_v3, %v683_v10 }
 0x23d   :  { %v943_v44 = vsel %vm5198_vm2, %v5169_v6, %v5291_v0  ;;  %v2598_v14 = vsel %vm5198_vm2, %v5291_v0, %v5169_v6 }
 0x23e   :  { %v4070_v5 = vpop.f32.mrb[22].mxu0  ;;  %v942_v63 = vsel %vm5198_vm2, %v5172_v7, %v5294_v17  ;;  %v2597_v23 = vsel %vm5198_vm2, %v5294_v17, %v5172_v7 }
 0x23f   :  { %v5317_v52 = vadd.f32 %v4070_v5, %v5166_v3  ;;  %v693_v21 = vpop.f32.mrb[23].mxu0 }
 0x240   :  { %v5324_v31 = vadd.f32 %v5166_v3, %v693_v21 }
 0x241   :  { %v758_v35 = vsel %vm5198_vm2, %v5314_v22, %v5317_v52  ;;  %v2781_v41 = vsel %vm5198_vm2, %v5317_v52, %v5314_v22 }
 0x242   :  { %v837_v42 = vadd.f32 %v5155_v40, %v758_v35  ;;  %v757_v4 = vsel %vm5198_vm2, %v5321_v30, %v5324_v31  ;;  %v854_v40 = vld [vmem:[#allocation6] sm:$0xff] }
 0x243   :  { %v832_v46 = vadd.f32 %v5157_v2, %v757_v4 }
 0x244   :  { %4442 = vtanh.f32 %v837_v42  ;;  %v3788_v57 = vmul.f32 -1.442695, %v837_v42 }
 0x245   :  { %4444 = vtanh.f32 %v832_v46  ;;  %v3787_v51 = vmul.f32 -1.442695, %v832_v46 }
 0x246   :  { %4446 = vpow2.f32 %v3788_v57 }
 0x247   :  { %4448 = vpow2.f32 %v3787_v51 }
 0x24e   :  { %v4443_v48 = vpop.eup %4442 }
 0x24f   :  { %v4445_v50 = vpop.eup %4444  ;;  %870 = vrot.lane.b32.xlu1 %v4443_v48, %s4635_s4 }
 0x250   :  { %868 = vrot.lane.b32.xlu0 %v4445_v50, %s4635_s4  ;;  %v4447_v2 = vpop.eup %4446 }
 0x251   :  { %v4449_v20 = vpop.eup %4448  ;;  %v847_v10 = vadd.f32 1.0, %v4447_v2 }
 0x252   :  { %v846_v5 = vadd.f32 1.0, %v4449_v20 }
 0x253   :  { %858 = vrot.lane.b32.xlu1 %v854_v40, %s4636_s21  ;;  %4450 = vrcp.f32 %v847_v10 }
 0x254   :  { %4452 = vrcp.f32 %v846_v5 }
 0x257   :  { %860 = vrot.lane.b32.xlu1 %v855_v54, %s4636_s21 }
 0x25d   :  { %v4451_v21 = vpop.eup %4450 }
 0x25e   :  { %v4453_v4 = vpop.eup %4452 }
 0x2c1   :  { %v871_v35 = vpop.permute.xlu1 %870 }
 0x2c2   :  { %v875_v48 = vmul.f32 %v4451_v21, %v871_v35  ;;  %v869_v50 = vpop.permute.xlu0 %868 }
 0x2c3   :  { %v874_v3 = vmul.f32 %v4453_v4, %v869_v50 }
 0x2c4   :  { %880 = vrot.lane.b32.xlu1 %v875_v48, %s4636_s21 }
 0x2c5   :  { %878 = vrot.lane.b32.xlu0 %v874_v3, %s4636_s21  ;;  %v859_v42 = vpop.permute.xlu1 %858 }
 0x2c6   :  { %v864_v54 = vmul.f32 %v4453_v4, %v859_v42 }
 0x2c9   :  { %v861_v46 = vpop.permute.xlu1 %860 }
 0x2ca   :  { %v865_v40 = vmul.f32 %v4451_v21, %v861_v46 }
 0x336   :  { %v881_v57 = vpop.permute.xlu1 %880 }
 0x337   :  { %v885_v51 = vadd.f32 %v881_v57, %v865_v40  ;;  %v879_v2 = vpop.permute.xlu0 %878 }
 0x338   :  { %v884_v20 = vadd.f32 %v879_v2, %v864_v54 }
 0x339   :  { %4454 = vtanh.f32 %v885_v51 }
 0x33a   :  { %4456 = vtanh.f32 %v884_v20 }
 0x343   :  { %v4455_v10 = vpop.eup %4454 }
 0x344   :  { %v4457_v5 = vpop.eup %4456  ;;  %892 = vrot.lane.b32.xlu1 %v4455_v10, %s4635_s4 }
 0x345   :  { %890 = vrot.lane.b32.xlu0 %v4457_v5, %s4635_s4 }
 0x3b6   :  { %v893_v35 = vpop.permute.xlu1 %892 }
 0x3b7   :  { %v5352_v48 = vmul.f32 %v4451_v21, %v893_v35  ;;  %v891_v3 = vpop.permute.xlu0 %890 }
 0x3b8   :  { %v5354_v50 = vmul.f32 %v4453_v4, %v891_v3 }
 0x3b9   :  { %912 = vrot.lane.b32.xlu1 %v5352_v48, %s4636_s21 }
 0x3ba   :  { %910 = vrot.lane.b32.xlu0 %v5354_v50, %s4636_s21 }
 0x3bd   :  { %902 = vrot.lane.b32.xlu1 %v885_v51, %s4637_s22 }
 0x3be   :  { %900 = vrot.lane.b32.xlu0 %v884_v20, %s4637_s22 }
 0x42b   :  { %v913_v42 = vpop.permute.xlu1 %912 }
 0x42c   :  { %917 = vst.msk [vmem:[#allocation5 + $0x8] sm:$0xff] %vm726_vm1, %v913_v42  ;;  %v911_v21 = vpop.permute.xlu0 %910 }
 0x42d   :  { %920 = vst.msk [vmem:[#allocation3 + $0x8] sm:$0xff] %vm918_vm3, %v913_v42  ;;  %919 = vst.msk [vmem:[#allocation3] sm:$0xff] %vm918_vm3, %v911_v21 }
 0x42e   :  { %916 = vst.msk [vmem:[#allocation5] sm:$0xff] %vm726_vm1, %v911_v21 }
 0x42f   :  { %v903_v4 = vpop.permute.xlu1 %902 }
 0x430   :  { %907 = vst.msk [vmem:[#allocation6 + $0x8] sm:$0xff] %vm726_vm1, %v903_v4  ;;  %v901_v46 = vpop.permute.xlu0 %900 }
 0x431   :  { %906 = vst.msk [vmem:[#allocation6] sm:$0xff] %vm726_vm1, %v901_v46 }
 0x433   :  { %v931_v54 = vld [vmem:[#allocation5 + $0x8] sm:$0xff] }
 0x435   :  { %v930_v40 = vld [vmem:[#allocation5] sm:$0xff] }
 0x436   :  { %4090 = vmatprep.mubr.msk.f32.mxu1 %vm726_vm1, %v930_v40 }
 0x437   :  { %4091 = vmatmul.mubr.msk.f32.vlgmr.msra.gmra.mrb[2].mxu1 %vm726_vm1, %v931_v54  ;;  %v1040_v35 = vld [vmem:[#allocation6 + $0x8] sm:$0xff] }
 0x438   :  { %4304 = vmatpush3.bf16.msra.mxu1 %v5020_v15  ;;  %v1039_v3 = vld [vmem:[#allocation6] sm:$0xff] }
 0x439   :  { %4306 = vmatprep.subr.bf16.mxu1 %v5035_v8 }
 0x43c   :  { %4308 = vmatpush3.bf16.msra.mxu1 %v5035_v8 }
 0x43d   :  { %4310 = vmatprep.subr.bf16.mxu1 %v5020_v15 }
 0x50a   :  { %v4092_v57 = vpop.f32.mrb[2].mxu1 }
 0x50b   :  { %v1022_v51 = vadd.f32 %v4092_v57, %v943_v44  ;;  %v1016_v2 = vpop.f32.mrb[3].mxu1 }
 0x50c   :  { %v1017_v20 = vadd.f32 %v1016_v2, %v942_v63 }
 0x50d   :  { %4458 = vtanh.f32 %v1022_v51  ;;  %v3792_v44 = vmul.f32 -1.442695, %v1022_v51 }
 0x50e   :  { %4460 = vtanh.f32 %v1017_v20  ;;  %v3791_v42 = vmul.f32 -1.442695, %v1017_v20 }
 0x50f   :  { %4462 = vpow2.f32 %v3792_v44 }
 0x510   :  { %4464 = vpow2.f32 %v3791_v42 }
 0x517   :  { %v4459_v10 = vpop.eup %4458 }
 0x518   :  { %v4461_v5 = vpop.eup %4460  ;;  %1055 = vrot.lane.b32.xlu1 %v4459_v10, %s4635_s4 }
 0x519   :  { %1053 = vrot.lane.b32.xlu0 %v4461_v5, %s4635_s4  ;;  %v4463_v21 = vpop.eup %4462 }
 0x51a   :  { %v4465_v63 = vpop.eup %4464  ;;  %v1032_v4 = vadd.f32 1.0, %v4463_v21 }
 0x51b   :  { %v1031_v46 = vadd.f32 1.0, %v4465_v63 }
 0x51c   :  { %1045 = vrot.lane.b32.xlu1 %v1040_v35, %s4636_s21  ;;  %4466 = vrcp.f32 %v1032_v4 }
 0x51d   :  { %1043 = vrot.lane.b32.xlu0 %v1039_v3, %s4636_s21  ;;  %4468 = vrcp.f32 %v1031_v46 }
 0x526   :  { %v4467_v40 = vpop.eup %4466 }
 0x527   :  { %v4469_v57 = vpop.eup %4468 }
 0x58a   :  { %v1056_v54 = vpop.permute.xlu1 %1055 }
 0x58b   :  { %v1060_v2 = vmul.f32 %v4467_v40, %v1056_v54  ;;  %v1054_v10 = vpop.permute.xlu0 %1053 }
 0x58c   :  { %v1059_v5 = vmul.f32 %v4469_v57, %v1054_v10 }
 0x58d   :  { %1065 = vrot.lane.b32.xlu1 %v1060_v2, %s4636_s21 }
 0x58e   :  { %1063 = vrot.lane.b32.xlu0 %v1059_v5, %s4636_s21  ;;  %v1046_v51 = vpop.permute.xlu1 %1045 }
 0x58f   :  { %v1044_v20 = vpop.permute.xlu0 %1043  ;;  %v1050_v35 = vmul.f32 %v4467_v40, %v1046_v51 }
 0x590   :  { %v1049_v3 = vmul.f32 %v4469_v57, %v1044_v20 }
 0x5ff   :  { %v1066_v44 = vpop.permute.xlu1 %1065 }
 0x600   :  { %v1070_v42 = vadd.f32 %v1066_v44, %v1050_v35  ;;  %v1064_v21 = vpop.permute.xlu0 %1063 }
 0x601   :  { %v1069_v63 = vadd.f32 %v1064_v21, %v1049_v3 }
 0x602   :  { %4470 = vtanh.f32 %v1070_v42 }
 0x603   :  { %4472 = vtanh.f32 %v1069_v63 }
 0x60c   :  { %v4471_v4 = vpop.eup %4470 }
 0x60d   :  { %v4473_v46 = vpop.eup %4472  ;;  %1077 = vrot.lane.b32.xlu1 %v4471_v4, %s4635_s4 }
 0x60e   :  { %1075 = vrot.lane.b32.xlu0 %v4473_v46, %s4635_s4 }
 0x67f   :  { %v1078_v54 = vpop.permute.xlu1 %1077 }
 0x680   :  { %v5392_v2 = vmul.f32 %v4467_v40, %v1078_v54  ;;  %v1076_v10 = vpop.permute.xlu0 %1075 }
 0x681   :  { %v5394_v5 = vmul.f32 %v4469_v57, %v1076_v10 }
 0x682   :  { %1097 = vrot.lane.b32.xlu1 %v5392_v2, %s4636_s21 }
 0x683   :  { %1095 = vrot.lane.b32.xlu0 %v5394_v5, %s4636_s21 }
 0x686   :  { %1087 = vrot.lane.b32.xlu1 %v1070_v42, %s4637_s22 }
 0x687   :  { %1085 = vrot.lane.b32.xlu0 %v1069_v63, %s4637_s22 }
 0x6f4   :  { %v1098_v51 = vpop.permute.xlu1 %1097 }
 0x6f5   :  { %1102 = vst.msk [vmem:[#allocation5 + $0x8] sm:$0xff] %vm726_vm1, %v1098_v51  ;;  %v1096_v40 = vpop.permute.xlu0 %1095 }
 0x6f6   :  { %1105 = vst.msk [vmem:[#allocation3 + $0x18] sm:$0xff] %vm918_vm3, %v1098_v51  ;;  %1104 = vst.msk [vmem:[#allocation3 + $0x10] sm:$0xff] %vm918_vm3, %v1096_v40 }
 0x6f7   :  { %1101 = vst.msk [vmem:[#allocation5] sm:$0xff] %vm726_vm1, %v1096_v40 }
 0x6f8   :  { %v1088_v57 = vpop.permute.xlu1 %1087 }
 0x6f9   :  { %1092 = vst.msk [vmem:[#allocation6 + $0x8] sm:$0xff] %vm726_vm1, %v1088_v57  ;;  %v1086_v20 = vpop.permute.xlu0 %1085 }
 0x6fa   :  { %1091 = vst.msk [vmem:[#allocation6] sm:$0xff] %vm726_vm1, %v1086_v20 }
 0x6fc   :  { %v1116_v3 = vld [vmem:[#allocation5 + $0x8] sm:$0xff] }
 0x6fe   :  { %v1115_v35 = vld [vmem:[#allocation5] sm:$0xff] }
 0x6ff   :  { %4101 = vmatprep.mubr.msk.f32.mxu1 %vm726_vm1, %v1115_v35 }
 0x700   :  { %4102 = vmatmul.mubr.msk.f32.vlgmr.msra.gmra.mrb[4].mxu1 %vm726_vm1, %v1116_v3  ;;  %v1225_v54 = vld [vmem:[#allocation6 + $0x8] sm:$0xff] }
 0x701   :  { %4312 = vmatpush3.bf16.msra.mxu1 %v5020_v15  ;;  %v1224_v10 = vld [vmem:[#allocation6] sm:$0xff] }
 0x702   :  { %4314 = vmatprep.subr.bf16.mxu1 %v5035_v8 }
 0x705   :  { %4316 = vmatpush3.bf16.msra.mxu1 %v5035_v8 }
 0x706   :  { %4318 = vmatprep.subr.bf16.mxu1 %v5020_v15 }
 0x7d3   :  { %v4103_v44 = vpop.f32.mrb[4].mxu1 }
 0x7d4   :  { %v1207_v42 = vadd.f32 %v4103_v44, %v1128_v59  ;;  %v1201_v21 = vpop.f32.mrb[5].mxu1 }
 0x7d5   :  { %v1202_v63 = vadd.f32 %v1201_v21, %v1127_v37 }
 0x7d6   :  { %4474 = vtanh.f32 %v1207_v42  ;;  %v3796_v59 = vmul.f32 -1.442695, %v1207_v42 }
 0x7d7   :  { %4476 = vtanh.f32 %v1202_v63  ;;  %v3795_v51 = vmul.f32 -1.442695, %v1202_v63 }
 0x7d8   :  { %4478 = vpow2.f32 %v3796_v59 }
 0x7d9   :  { %4480 = vpow2.f32 %v3795_v51 }
 0x7e0   :  { %v4475_v4 = vpop.eup %4474 }
 0x7e1   :  { %v4477_v46 = vpop.eup %4476  ;;  %1240 = vrot.lane.b32.xlu1 %v4475_v4, %s4635_s4 }
 0x7e2   :  { %1238 = vrot.lane.b32.xlu0 %v4477_v46, %s4635_s4  ;;  %v4479_v40 = vpop.eup %4478 }
 0x7e3   :  { %v4481_v37 = vpop.eup %4480  ;;  %v1217_v57 = vadd.f32 1.0, %v4479_v40 }
 0x7e4   :  { %v1216_v20 = vadd.f32 1.0, %v4481_v37 }
 0x7e5   :  { %1230 = vrot.lane.b32.xlu1 %v1225_v54, %s4636_s21  ;;  %4482 = vrcp.f32 %v1217_v57 }
 0x7e6   :  { %1228 = vrot.lane.b32.xlu0 %v1224_v10, %s4636_s21  ;;  %4484 = vrcp.f32 %v1216_v20 }
 0x7ef   :  { %v4483_v35 = vpop.eup %4482 }
 0x7f0   :  { %v4485_v44 = vpop.eup %4484 }
 0x853   :  { %v1241_v3 = vpop.permute.xlu1 %1240 }
 0x854   :  { %v1245_v21 = vmul.f32 %v4483_v35, %v1241_v3  ;;  %v1239_v4 = vpop.permute.xlu0 %1238 }
 0x855   :  { %v1244_v46 = vmul.f32 %v4485_v44, %v1239_v4 }
 0x856   :  { %1250 = vrot.lane.b32.xlu1 %v1245_v21, %s4636_s21 }
 0x857   :  { %1248 = vrot.lane.b32.xlu0 %v1244_v46, %s4636_s21  ;;  %v1231_v42 = vpop.permute.xlu1 %1230 }
 0x858   :  { %v1229_v63 = vpop.permute.xlu0 %1228  ;;  %v1235_v54 = vmul.f32 %v4483_v35, %v1231_v42 }
 0x859   :  { %v1234_v10 = vmul.f32 %v4485_v44, %v1229_v63 }
 0x8c8   :  { %v1251_v59 = vpop.permute.xlu1 %1250 }
 0x8c9   :  { %v1255_v51 = vadd.f32 %v1251_v59, %v1235_v54  ;;  %v1249_v40 = vpop.permute.xlu0 %1248 }
 0x8ca   :  { %v1254_v37 = vadd.f32 %v1249_v40, %v1234_v10 }
 0x8cb   :  { %4486 = vtanh.f32 %v1255_v51 }
 0x8cc   :  { %4488 = vtanh.f32 %v1254_v37 }
 0x8d5   :  { %v4487_v57 = vpop.eup %4486 }
 0x8d6   :  { %v4489_v20 = vpop.eup %4488  ;;  %1262 = vrot.lane.b32.xlu1 %v4487_v57, %s4635_s4 }
 0x8d7   :  { %1260 = vrot.lane.b32.xlu0 %v4489_v20, %s4635_s4 }
 0x948   :  { %v1263_v3 = vpop.permute.xlu1 %1262 }
 0x949   :  { %v5432_v21 = vmul.f32 %v4483_v35, %v1263_v3  ;;  %v1261_v4 = vpop.permute.xlu0 %1260 }
 0x94a   :  { %v5434_v46 = vmul.f32 %v4485_v44, %v1261_v4 }
 0x94b   :  { %1282 = vrot.lane.b32.xlu1 %v5432_v21, %s4636_s21 }
 0x94c   :  { %1280 = vrot.lane.b32.xlu0 %v5434_v46, %s4636_s21 }
 0x94f   :  { %1272 = vrot.lane.b32.xlu1 %v1255_v51, %s4637_s22 }
 0x950   :  { %1270 = vrot.lane.b32.xlu0 %v1254_v37, %s4637_s22 }
 0x9bd   :  { %v1283_v42 = vpop.permute.xlu1 %1282 }
 0x9be   :  { %1287 = vst.msk [vmem:[#allocation5 + $0x8] sm:$0xff] %vm726_vm1, %v1283_v42  ;;  %v1281_v35 = vpop.permute.xlu0 %1280 }
 0x9bf   :  { %1290 = vst.msk [vmem:[#allocation3 + $0x28] sm:$0xff] %vm918_vm3, %v1283_v42  ;;  %1289 = vst.msk [vmem:[#allocation3 + $0x20] sm:$0xff] %vm918_vm3, %v1281_v35 }
 0x9c0   :  { %1286 = vst.msk [vmem:[#allocation5] sm:$0xff] %vm726_vm1, %v1281_v35 }
 0x9c1   :  { %v1273_v44 = vpop.permute.xlu1 %1272 }
 0x9c2   :  { %1277 = vst.msk [vmem:[#allocation6 + $0x8] sm:$0xff] %vm726_vm1, %v1273_v44  ;;  %v1271_v63 = vpop.permute.xlu0 %1270 }
 0x9c3   :  { %1276 = vst.msk [vmem:[#allocation6] sm:$0xff] %vm726_vm1, %v1271_v63 }
 0x9c5   :  { %v1301_v10 = vld [vmem:[#allocation5 + $0x8] sm:$0xff] }
 0x9c7   :  { %v1300_v54 = vld [vmem:[#allocation5] sm:$0xff] }
 0x9c8   :  { %4112 = vmatprep.mubr.msk.f32.mxu1 %vm726_vm1, %v1300_v54 }
 0x9c9   :  { %4113 = vmatmul.mubr.msk.f32.vlgmr.msra.gmra.mrb[6].mxu1 %vm726_vm1, %v1301_v10  ;;  %v1410_v3 = vld [vmem:[#allocation6 + $0x8] sm:$0xff] }
 0x9ca   :  { %4320 = vmatpush3.bf16.msra.mxu1 %v5020_v15  ;;  %v1409_v4 = vld [vmem:[#allocation6] sm:$0xff] }
 0x9cb   :  { %4322 = vmatprep.subr.bf16.mxu1 %v5035_v8 }
 0x9ce   :  { %4324 = vmatpush3.bf16.msra.mxu1 %v5035_v8 }
 0x9cf   :  { %4326 = vmatprep.subr.bf16.mxu1 %v5020_v15 }
 0xa9c   :  { %v4114_v59 = vpop.f32.mrb[6].mxu1 }
 0xa9d   :  { %v1392_v51 = vadd.f32 %v4114_v59, %v1313_v56  ;;  %v1386_v40 = vpop.f32.mrb[7].mxu1 }
 0xa9e   :  { %v1387_v37 = vadd.f32 %v1386_v40, %v1312_v33 }
 0xa9f   :  { %4490 = vtanh.f32 %v1392_v51  ;;  %v3800_v56 = vmul.f32 -1.442695, %v1392_v51 }
 0xaa0   :  { %4492 = vtanh.f32 %v1387_v37  ;;  %v3799_v42 = vmul.f32 -1.442695, %v1387_v37 }
 0xaa1   :  { %4494 = vpow2.f32 %v3800_v56 }
 0xaa2   :  { %4496 = vpow2.f32 %v3799_v42 }
 0xaa9   :  { %v4491_v57 = vpop.eup %4490 }
 0xaaa   :  { %v4493_v20 = vpop.eup %4492  ;;  %1425 = vrot.lane.b32.xlu1 %v4491_v57, %s4635_s4 }
 0xaab   :  { %1423 = vrot.lane.b32.xlu0 %v4493_v20, %s4635_s4  ;;  %v4495_v35 = vpop.eup %4494 }
 0xaac   :  { %v4497_v33 = vpop.eup %4496  ;;  %v1402_v44 = vadd.f32 1.0, %v4495_v35 }
 0xaad   :  { %v1401_v63 = vadd.f32 1.0, %v4497_v33 }
 0xaae   :  { %1415 = vrot.lane.b32.xlu1 %v1410_v3, %s4636_s21  ;;  %4498 = vrcp.f32 %v1402_v44 }
 0xaaf   :  { %1413 = vrot.lane.b32.xlu0 %v1409_v4, %s4636_s21  ;;  %4500 = vrcp.f32 %v1401_v63 }
 0xab8   :  { %v4499_v54 = vpop.eup %4498 }
 0xab9   :  { %v4501_v59 = vpop.eup %4500 }
 0xb1c   :  { %v1426_v10 = vpop.permute.xlu1 %1425 }
 0xb1d   :  { %v1430_v40 = vmul.f32 %v4499_v54, %v1426_v10  ;;  %v1424_v57 = vpop.permute.xlu0 %1423 }
 0xb1e   :  { %v1429_v20 = vmul.f32 %v4501_v59, %v1424_v57 }
 0xb1f   :  { %1435 = vrot.lane.b32.xlu1 %v1430_v40, %s4636_s21 }
 0xb20   :  { %1433 = vrot.lane.b32.xlu0 %v1429_v20, %s4636_s21  ;;  %v1416_v51 = vpop.permute.xlu1 %1415 }
 0xb21   :  { %v1414_v37 = vpop.permute.xlu0 %1413  ;;  %v1420_v3 = vmul.f32 %v4499_v54, %v1416_v51 }
 0xb22   :  { %v1419_v4 = vmul.f32 %v4501_v59, %v1414_v37 }
 0xb91   :  { %v1436_v56 = vpop.permute.xlu1 %1435 }
 0xb92   :  { %v1440_v42 = vadd.f32 %v1436_v56, %v1420_v3  ;;  %v1434_v35 = vpop.permute.xlu0 %1433 }
 0xb93   :  { %v1439_v33 = vadd.f32 %v1434_v35, %v1419_v4 }
 0xb94   :  { %4502 = vtanh.f32 %v1440_v42 }
 0xb95   :  { %4504 = vtanh.f32 %v1439_v33 }
 0xb9e   :  { %v4503_v44 = vpop.eup %4502 }
 0xb9f   :  { %v4505_v63 = vpop.eup %4504  ;;  %1447 = vrot.lane.b32.xlu1 %v4503_v44, %s4635_s4 }
 0xba0   :  { %1445 = vrot.lane.b32.xlu0 %v4505_v63, %s4635_s4 }
 0xc11   :  { %v1448_v10 = vpop.permute.xlu1 %1447 }
 0xc12   :  { %v5472_v40 = vmul.f32 %v4499_v54, %v1448_v10  ;;  %v1446_v57 = vpop.permute.xlu0 %1445 }
 0xc13   :  { %v5474_v20 = vmul.f32 %v4501_v59, %v1446_v57 }
 0xc14   :  { %1467 = vrot.lane.b32.xlu1 %v5472_v40, %s4636_s21 }
 0xc15   :  { %1465 = vrot.lane.b32.xlu0 %v5474_v20, %s4636_s21 }
 0xc18   :  { %1457 = vrot.lane.b32.xlu1 %v1440_v42, %s4637_s22 }
 0xc19   :  { %1455 = vrot.lane.b32.xlu0 %v1439_v33, %s4637_s22 }
 0xc86   :  { %v1468_v51 = vpop.permute.xlu1 %1467 }
 0xc87   :  { %1472 = vst.msk [vmem:[#allocation5 + $0x8] sm:$0xff] %vm726_vm1, %v1468_v51  ;;  %v1466_v54 = vpop.permute.xlu0 %1465 }
 0xc88   :  { %1475 = vst.msk [vmem:[#allocation3 + $0x38] sm:$0xff] %vm918_vm3, %v1468_v51  ;;  %1474 = vst.msk [vmem:[#allocation3 + $0x30] sm:$0xff] %vm918_vm3, %v1466_v54 }
 0xc89   :  { %1471 = vst.msk [vmem:[#allocation5] sm:$0xff] %vm726_vm1, %v1466_v54 }
 0xc8a   :  { %v1458_v59 = vpop.permute.xlu1 %1457 }
 0xc8b   :  { %1462 = vst.msk [vmem:[#allocation6 + $0x8] sm:$0xff] %vm726_vm1, %v1458_v59  ;;  %v1456_v37 = vpop.permute.xlu0 %1455 }
 0xc8c   :  { %1461 = vst.msk [vmem:[#allocation6] sm:$0xff] %vm726_vm1, %v1456_v37 }
 0xc8e   :  { %v1486_v4 = vld [vmem:[#allocation5 + $0x8] sm:$0xff] }
 0xc90   :  { %v1485_v3 = vld [vmem:[#allocation5] sm:$0xff] }
 0xc91   :  { %4123 = vmatprep.mubr.msk.f32.mxu1 %vm726_vm1, %v1485_v3 }
 0xc92   :  { %4124 = vmatmul.mubr.msk.f32.vlgmr.msra.gmra.mrb[8].mxu1 %vm726_vm1, %v1486_v4 }
 0xc93   :  { %4328 = vmatpush3.bf16.msra.mxu1 %v5020_v15  ;;  %v1594_v63 = vld [vmem:[#allocation6] sm:$0xff] }
 0xc94   :  { %4330 = vmatprep.subr.bf16.mxu1 %v5035_v8 }
 0xc97   :  { %4332 = vmatpush3.bf16.msra.mxu1 %v5035_v8  ;;  %v1595_v8 = vld [vmem:[#allocation6 + $0x8] sm:$0xff] }
 0xd65   :  { %v4125_v56 = vpop.f32.mrb[8].mxu1 }
 0xd66   :  { %v1577_v42 = vadd.f32 %v4125_v56, %v1498_v39  ;;  %v1571_v35 = vpop.f32.mrb[9].mxu1 }
 0xd67   :  { %v1572_v33 = vadd.f32 %v1571_v35, %v1497_v29 }
 0xd68   :  { %4506 = vtanh.f32 %v1577_v42  ;;  %v3804_v39 = vmul.f32 -1.442695, %v1577_v42 }
 0xd69   :  { %4508 = vtanh.f32 %v1572_v33  ;;  %v3803_v10 = vmul.f32 -1.442695, %v1572_v33 }
 0xd6a   :  { %4510 = vpow2.f32 %v3804_v39 }
 0xd6b   :  { %4512 = vpow2.f32 %v3803_v10 }
 0xd72   :  { %v4507_v15 = vpop.eup %4506 }
 0xd73   :  { %v4509_v44 = vpop.eup %4508  ;;  %1610 = vrot.lane.b32.xlu1 %v4507_v15, %s4635_s4 }
 0xd74   :  { %1608 = vrot.lane.b32.xlu0 %v4509_v44, %s4635_s4  ;;  %v4511_v57 = vpop.eup %4510 }
 0xd75   :  { %v4513_v29 = vpop.eup %4512  ;;  %v1587_v51 = vadd.f32 1.0, %v4511_v57 }
 0xd76   :  { %v1586_v54 = vadd.f32 1.0, %v4513_v29 }
 0xd77   :  { %1600 = vrot.lane.b32.xlu1 %v1595_v8, %s4636_s21  ;;  %4514 = vrcp.f32 %v1587_v51 }
 0xd78   :  { %1598 = vrot.lane.b32.xlu0 %v1594_v63, %s4636_s21  ;;  %4516 = vrcp.f32 %v1586_v54 }
 0xd81   :  { %v4515_v59 = vpop.eup %4514 }
 0xd82   :  { %v4517_v3 = vpop.eup %4516 }
 0xde5   :  { %v1611_v37 = vpop.permute.xlu1 %1610 }
 0xde6   :  { %v1615_v4 = vmul.f32 %v4515_v59, %v1611_v37  ;;  %v1609_v56 = vpop.permute.xlu0 %1608 }
 0xde7   :  { %v1614_v35 = vmul.f32 %v4517_v3, %v1609_v56 }
 0xde8   :  { %1620 = vrot.lane.b32.xlu1 %v1615_v4, %s4636_s21 }
 0xde9   :  { %1618 = vrot.lane.b32.xlu0 %v1614_v35, %s4636_s21  ;;  %v1601_v42 = vpop.permute.xlu1 %1600 }
 0xdea   :  { %v1599_v33 = vpop.permute.xlu0 %1598  ;;  %v1605_v15 = vmul.f32 %v4515_v59, %v1601_v42 }
 0xdeb   :  { %v1604_v44 = vmul.f32 %v4517_v3, %v1599_v33 }
 0xe5a   :  { %v1621_v8 = vpop.permute.xlu1 %1620 }
 0xe5b   :  { %v1625_v63 = vadd.f32 %v1621_v8, %v1605_v15  ;;  %v1619_v39 = vpop.permute.xlu0 %1618 }
 0xe5c   :  { %v1624_v10 = vadd.f32 %v1619_v39, %v1604_v44 }
 0xe5d   :  { %4518 = vtanh.f32 %v1625_v63 }
 0xe5e   :  { %4520 = vtanh.f32 %v1624_v10 }
 0xe67   :  { %v4519_v57 = vpop.eup %4518 }
 0xe68   :  { %v4521_v29 = vpop.eup %4520  ;;  %1632 = vrot.lane.b32.xlu1 %v4519_v57, %s4635_s4 }
 0xe69   :  { %1630 = vrot.lane.b32.xlu0 %v4521_v29, %s4635_s4 }
 0xeda   :  { %v1633_v51 = vpop.permute.xlu1 %1632 }
 0xedb   :  { %v5511_v54 = vmul.f32 %v4515_v59, %v1633_v51  ;;  %v1631_v37 = vpop.permute.xlu0 %1630 }
 0xedc   :  { %v5513_v4 = vmul.f32 %v4517_v3, %v1631_v37 }
 0xedd   :  { %1652 = vrot.lane.b32.xlu1 %v5511_v54, %s4636_s21 }
 0xede   :  { %1650 = vrot.lane.b32.xlu0 %v5513_v4, %s4636_s21 }
 0xee1   :  { %1642 = vrot.lane.b32.xlu1 %v1625_v63, %s4637_s22 }
 0xee2   :  { %1640 = vrot.lane.b32.xlu0 %v1624_v10, %s4637_s22 }
 0xf4f   :  { %v1653_v56 = vpop.permute.xlu1 %1652 }
 0xf50   :  { %1657 = vst.msk [vmem:[#allocation5 + $0x8] sm:$0xff] %vm726_vm1, %v1653_v56  ;;  %v1651_v59 = vpop.permute.xlu0 %1650 }
 0xf51   :  { %1660 = vst.msk [vmem:[#allocation3 + $0x48] sm:$0xff] %vm918_vm3, %v1653_v56  ;;  %1659 = vst.msk [vmem:[#allocation3 + $0x40] sm:$0xff] %vm918_vm3, %v1651_v59 }
 0xf52   :  { %1656 = vst.msk [vmem:[#allocation5] sm:$0xff] %vm726_vm1, %v1651_v59 }
 0xf53   :  { %v1643_v3 = vpop.permute.xlu1 %1642 }
 0xf54   :  { %1647 = vst.msk [vmem:[#allocation6 + $0x8] sm:$0xff] %vm726_vm1, %v1643_v3  ;;  %v1641_v35 = vpop.permute.xlu0 %1640 }
 0xf55   :  { %1646 = vst.msk [vmem:[#allocation6] sm:$0xff] %vm726_vm1, %v1641_v35 }
 0xf57   :  { %v1671_v33 = vld [vmem:[#allocation5 + $0x8] sm:$0xff] }
 0xf59   :  { %v1670_v42 = vld [vmem:[#allocation5] sm:$0xff] }
 0xf5a   :  { %4134 = vmatprep.mubr.msk.f32.mxu1 %vm726_vm1, %v1670_v42 }
 0xf5b   :  { %4135 = vmatmul.mubr.msk.f32.vlgmr.msra.gmra.mrb[10].mxu1 %vm726_vm1, %v1671_v33  ;;  %v1780_v57 = vld [vmem:[#allocation6 + $0x8] sm:$0xff] }
 0xf5c   :  { %v1779_v29 = vld [vmem:[#allocation6] sm:$0xff] }
0x102e   :  { %v4136_v15 = vpop.f32.mrb[10].mxu1 }
0x102f   :  { %v1762_v44 = vadd.f32 %v4136_v15, %v1683_v32  ;;  %v1756_v8 = vpop.f32.mrb[11].mxu1 }
0x1030   :  { %v1757_v63 = vadd.f32 %v1756_v8, %v1682_v47 }
0x1031   :  { %4522 = vtanh.f32 %v1762_v44  ;;  %v3808_v32 = vmul.f32 -1.442695, %v1762_v44 }
0x1032   :  { %4524 = vtanh.f32 %v1757_v63  ;;  %v3807_v51 = vmul.f32 -1.442695, %v1757_v63 }
0x1033   :  { %4526 = vpow2.f32 %v3808_v32 }
0x1034   :  { %4528 = vpow2.f32 %v3807_v51 }
0x103b   :  { %v4523_v39 = vpop.eup %4522 }
0x103c   :  { %v4525_v10 = vpop.eup %4524  ;;  %1795 = vrot.lane.b32.xlu1 %v4523_v39, %s4635_s4 }
0x103d   :  { %1793 = vrot.lane.b32.xlu0 %v4525_v10, %s4635_s4  ;;  %v4527_v37 = vpop.eup %4526 }
0x103e   :  { %v4529_v47 = vpop.eup %4528  ;;  %v1772_v56 = vadd.f32 1.0, %v4527_v37 }
0x103f   :  { %v1771_v59 = vadd.f32 1.0, %v4529_v47 }
0x1040   :  { %1785 = vrot.lane.b32.xlu1 %v1780_v57, %s4636_s21  ;;  %4530 = vrcp.f32 %v1772_v56 }
0x1041   :  { %1783 = vrot.lane.b32.xlu0 %v1779_v29, %s4636_s21  ;;  %4532 = vrcp.f32 %v1771_v59 }
0x104a   :  { %v4531_v3 = vpop.eup %4530 }
0x104b   :  { %v4533_v42 = vpop.eup %4532 }
0x10ae   :  { %v1796_v35 = vpop.permute.xlu1 %1795 }
0x10af   :  { %v1800_v33 = vmul.f32 %v4531_v3, %v1796_v35  ;;  %v1794_v15 = vpop.permute.xlu0 %1793 }
0x10b0   :  { %v1799_v8 = vmul.f32 %v4533_v42, %v1794_v15 }
0x10b1   :  { %1805 = vrot.lane.b32.xlu1 %v1800_v33, %s4636_s21 }
0x10b2   :  { %1803 = vrot.lane.b32.xlu0 %v1799_v8, %s4636_s21  ;;  %v1786_v44 = vpop.permute.xlu1 %1785 }
0x10b3   :  { %v1784_v63 = vpop.permute.xlu0 %1783  ;;  %v1790_v39 = vmul.f32 %v4531_v3, %v1786_v44 }
0x10b4   :  { %v1789_v10 = vmul.f32 %v4533_v42, %v1784_v63 }
0x1123   :  { %v1806_v57 = vpop.permute.xlu1 %1805 }
0x1124   :  { %v1810_v29 = vadd.f32 %v1806_v57, %v1790_v39  ;;  %v1804_v32 = vpop.permute.xlu0 %1803 }
0x1125   :  { %v1809_v51 = vadd.f32 %v1804_v32, %v1789_v10 }
0x1126   :  { %4534 = vtanh.f32 %v1810_v29 }
0x1127   :  { %4536 = vtanh.f32 %v1809_v51 }
0x1130   :  { %v4535_v37 = vpop.eup %4534 }
0x1131   :  { %v4537_v47 = vpop.eup %4536  ;;  %1817 = vrot.lane.b32.xlu1 %v4535_v37, %s4635_s4 }
0x1132   :  { %1815 = vrot.lane.b32.xlu0 %v4537_v47, %s4635_s4 }
0x11a3   :  { %v1818_v56 = vpop.permute.xlu1 %1817 }
0x11a4   :  { %v5547_v59 = vmul.f32 %v4531_v3, %v1818_v56  ;;  %v1816_v35 = vpop.permute.xlu0 %1815 }
0x11a5   :  { %v5549_v33 = vmul.f32 %v4533_v42, %v1816_v35 }
0x11a6   :  { %1837 = vrot.lane.b32.xlu1 %v5547_v59, %s4636_s21 }
0x11a7   :  { %1835 = vrot.lane.b32.xlu0 %v5549_v33, %s4636_s21 }
0x11aa   :  { %1827 = vrot.lane.b32.xlu1 %v1810_v29, %s4637_s22 }
0x11ab   :  { %1825 = vrot.lane.b32.xlu0 %v1809_v51, %s4637_s22 }
0x1218   :  { %v1838_v15 = vpop.permute.xlu1 %1837 }
0x1219   :  { %1842 = vst.msk [vmem:[#allocation5 + $0x8] sm:$0xff] %vm726_vm1, %v1838_v15  ;;  %v1836_v3 = vpop.permute.xlu0 %1835 }
0x121a   :  { %1845 = vst.msk [vmem:[#allocation3 + $0x58] sm:$0xff] %vm918_vm3, %v1838_v15  ;;  %1844 = vst.msk [vmem:[#allocation3 + $0x50] sm:$0xff] %vm918_vm3, %v1836_v3 }
0x121b   :  { %1841 = vst.msk [vmem:[#allocation5] sm:$0xff] %vm726_vm1, %v1836_v3 }
0x121c   :  { %v1828_v42 = vpop.permute.xlu1 %1827 }
0x121d   :  { %1832 = vst.msk [vmem:[#allocation6 + $0x8] sm:$0xff] %vm726_vm1, %v1828_v42  ;;  %v1826_v8 = vpop.permute.xlu0 %1825 }
0x121e   :  { %1831 = vst.msk [vmem:[#allocation6] sm:$0xff] %vm726_vm1, %v1826_v8 }
0x1220   :  { %v1856_v63 = vld [vmem:[#allocation5 + $0x8] sm:$0xff] }
0x1222   :  { %v1855_v44 = vld [vmem:[#allocation5] sm:$0xff] }
0x1223   :  { %4145 = vmatprep.mubr.msk.f32.mxu0 %vm726_vm1, %v1855_v44 }
0x1224   :  { %4146 = vmatmul.mubr.msk.f32.vlgmr.msra.gmra.mrb[24].mxu0 %vm726_vm1, %v1856_v63  ;;  %v1963_v37 = vld [vmem:[#allocation6 + $0x8] sm:$0xff] }
0x1225   :  { %v1962_v11 = vld [vmem:[#allocation6] sm:$0xff] }
0x12f7   :  { %v4147_v39 = vpop.f32.mrb[24].mxu0 }
0x12f8   :  { %v1945_v10 = vadd.f32 %v4147_v39, %v1866_v25  ;;  %v1939_v57 = vpop.f32.mrb[25].mxu0 }
0x12f9   :  { %v1940_v29 = vadd.f32 %v1939_v57, %v1865_v27 }
0x12fa   :  { %4538 = vtanh.f32 %v1945_v10  ;;  %v3812_v12 = vmul.f32 -1.442695, %v1945_v10 }
0x12fb   :  { %4540 = vtanh.f32 %v1940_v29  ;;  %v3811_v25 = vmul.f32 -1.442695, %v1940_v29 }
0x12fc   :  { %4542 = vpow2.f32 %v3812_v12  ;;  %v2040_v12 = vld [vmem:[%s6330_s5] sm:$0xff] }
0x12fd   :  { %4544 = vpow2.f32 %v3811_v25  ;;  %v2041_v25 = vld [vmem:[%s6330_s5 + $0x8] sm:$0xff] }
0x1304   :  { %v4539_v32 = vpop.eup %4538 }
0x1305   :  { %v4541_v51 = vpop.eup %4540  ;;  %1978 = vrot.lane.b32.xlu1 %v4539_v32, %s4635_s4 }
0x1306   :  { %1976 = vrot.lane.b32.xlu0 %v4541_v51, %s4635_s4  ;;  %v4543_v34 = vpop.eup %4542 }
0x1307   :  { %v4545_v9 = vpop.eup %4544  ;;  %v1955_v27 = vadd.f32 1.0, %v4543_v34  ;;  %v5589_v34 = vpack.c.bf16 %v2041_v25, %v2040_v12 }
0x1308   :  { %v1954_v47 = vadd.f32 1.0, %v4545_v9  ;;  %v2042_v9 = vld [vmem:[%s6330_s5 + $0x10] sm:$0xff] }
0x1309   :  { %1968 = vrot.lane.b32.xlu1 %v1963_v37, %s4636_s21  ;;  %4546 = vrcp.f32 %v1955_v27  ;;  %4342 = vmatprep.subr.bf16.mxu1 %v5589_v34  ;;  %v2043_v27 = vld [vmem:[%s6330_s5 + $0x18] sm:$0xff]  ;;  %s4638_s5 = smov 16  }
0x130a   :  { %1966 = vrot.lane.b32.xlu0 %v1962_v11, %s4636_s21  ;;  %4548 = vrcp.f32 %v1954_v47  ;;  %4350 = vmatprep.subr.bf16.mxu0 %v5589_v34  ;;  %v5601_v47 = vpack.c.bf16 %v2043_v27, %v2042_v9 }
0x130b   :  { %4344 = vmatpush3.bf16.msra.mxu1 %v5589_v34  ;;  %4352 = vmatpush3.bf16.msra.mxu0 %v5589_v34 }
0x130c   :  { %4346 = vmatprep.subr.bf16.mxu1 %v5601_v47  ;;  %4354 = vmatprep.subr.bf16.mxu0 %v5601_v47 }
0x130f   :  { %4348 = vmatpush3.bf16.msra.mxu1 %v5601_v47  ;;  %4356 = vmatpush3.bf16.msra.mxu0 %v5601_v47 }
0x1310   :  { %4358 = vmatprep.subr.bf16.mxu1 %v5589_v34  ;;  %4366 = vmatprep.subr.bf16.mxu0 %v5589_v34 }
0x1313   :  { %v4547_v56 = vpop.eup %4546 }
0x1314   :  { %v4549_v15 = vpop.eup %4548 }
0x1377   :  { %v1979_v35 = vpop.permute.xlu1 %1978 }
0x1378   :  { %v1983_v3 = vmul.f32 %v4547_v56, %v1979_v35  ;;  %v1977_v42 = vpop.permute.xlu0 %1976 }
0x1379   :  { %v1982_v8 = vmul.f32 %v4549_v15, %v1977_v42 }
0x137a   :  { %1988 = vrot.lane.b32.xlu1 %v1983_v3, %s4636_s21 }
0x137b   :  { %1986 = vrot.lane.b32.xlu0 %v1982_v8, %s4636_s21  ;;  %v1969_v44 = vpop.permute.xlu1 %1968 }
0x137c   :  { %v1967_v63 = vpop.permute.xlu0 %1966  ;;  %v1973_v39 = vmul.f32 %v4547_v56, %v1969_v44 }
0x137d   :  { %v1972_v10 = vmul.f32 %v4549_v15, %v1967_v63 }
0x13ec   :  { %v1989_v57 = vpop.permute.xlu1 %1988 }
0x13ed   :  { %v1993_v29 = vadd.f32 %v1989_v57, %v1973_v39  ;;  %v1987_v32 = vpop.permute.xlu0 %1986 }
0x13ee   :  { %v1992_v51 = vadd.f32 %v1987_v32, %v1972_v10 }
0x13ef   :  { %4550 = vtanh.f32 %v1993_v29 }
0x13f0   :  { %4552 = vtanh.f32 %v1992_v51 }
0x13f9   :  { %v4551_v37 = vpop.eup %4550 }
0x13fa   :  { %v4553_v11 = vpop.eup %4552  ;;  %2000 = vrot.lane.b32.xlu1 %v4551_v37, %s4635_s4 }
0x13fb   :  { %1998 = vrot.lane.b32.xlu0 %v4553_v11, %s4635_s4 }
0x146c   :  { %v2001_v35 = vpop.permute.xlu1 %2000 }
0x146d   :  { %v5609_v3 = vmul.f32 %v4547_v56, %v2001_v35  ;;  %v1999_v42 = vpop.permute.xlu0 %1998 }
0x146e   :  { %v5611_v8 = vmul.f32 %v4549_v15, %v1999_v42 }
0x146f   :  { %2020 = vrot.lane.b32.xlu1 %v5609_v3, %s4636_s21 }
0x1470   :  { %2018 = vrot.lane.b32.xlu0 %v5611_v8, %s4636_s21 }
0x1473   :  { %2010 = vrot.lane.b32.xlu1 %v1993_v29, %s4637_s22 }
0x1474   :  { %2008 = vrot.lane.b32.xlu0 %v1992_v51, %s4637_s22 }
0x14e1   :  { %v2021_v44 = vpop.permute.xlu1 %2020 }
0x14e2   :  { %2025 = vst.msk [vmem:[#allocation5 + $0x8] sm:$0xff] %vm726_vm1, %v2021_v44  ;;  %v2019_v56 = vpop.permute.xlu0 %2018 }
0x14e3   :  { %2028 = vst.msk [vmem:[#allocation3 + $0x68] sm:$0xff] %vm918_vm3, %v2021_v44  ;;  %2027 = vst.msk [vmem:[#allocation3 + $0x60] sm:$0xff] %vm918_vm3, %v2019_v56 }
0x14e4   :  { %2024 = vst.msk [vmem:[#allocation5] sm:$0xff] %vm726_vm1, %v2019_v56 }
0x14e5   :  { %v2011_v15 = vpop.permute.xlu1 %2010 }
0x14e6   :  { %2015 = vst.msk [vmem:[#allocation6 + $0x8] sm:$0xff] %vm726_vm1, %v2011_v15  ;;  %v2009_v63 = vpop.permute.xlu0 %2008 }
0x14e7   :  { %2014 = vst.msk [vmem:[#allocation6] sm:$0xff] %vm726_vm1, %v2009_v63 }
0x14e9   :  { %v2039_v10 = vld [vmem:[#allocation5 + $0x8] sm:$0xff] }
0x14eb   :  { %v2038_v39 = vld [vmem:[#allocation5] sm:$0xff] }
0x14ec   :  { %4156 = vmatprep.mubr.msk.f32.mxu1 %vm726_vm1, %v2038_v39 }
0x14ed   :  { %4157 = vmatmul.mubr.msk.f32.vlgmr.msra.gmra.mrb[12].mxu1 %vm726_vm1, %v2039_v10  ;;  %v2146_v12 = vld [vmem:[#allocation6 + $0x8] sm:$0xff] }
0x14ee   :  { %4360 = vmatpush3.bf16.msra.mxu1 %v5589_v34  ;;  %v2145_v26 = vld [vmem:[#allocation6] sm:$0xff] }
0x14ef   :  { %4362 = vmatprep.subr.bf16.mxu1 %v5601_v47 }
0x14f2   :  { %4364 = vmatpush3.bf16.msra.mxu1 %v5601_v47 }
0x14f3   :  { %4374 = vmatprep.subr.bf16.mxu1 %v5589_v34 }
0x15c0   :  { %v4158_v57 = vpop.f32.mrb[12].mxu1 }
0x15c1   :  { %v2128_v29 = vadd.f32 %v4158_v57, %v2049_v53  ;;  %v2122_v32 = vpop.f32.mrb[13].mxu1 }
0x15c2   :  { %v2123_v51 = vadd.f32 %v2122_v32, %v2048_v16 }
0x15c3   :  { %4554 = vtanh.f32 %v2128_v29  ;;  %v3816_v60 = vmul.f32 -1.442695, %v2128_v29 }
0x15c4   :  { %4556 = vtanh.f32 %v2123_v51  ;;  %v3815_v53 = vmul.f32 -1.442695, %v2123_v51 }
0x15c5   :  { %4558 = vpow2.f32 %v3816_v60 }
0x15c6   :  { %4560 = vpow2.f32 %v3815_v53 }
0x15cd   :  { %v4555_v37 = vpop.eup %4554 }
0x15ce   :  { %v4557_v11 = vpop.eup %4556  ;;  %2161 = vrot.lane.b32.xlu1 %v4555_v37, %s4635_s4 }
0x15cf   :  { %2159 = vrot.lane.b32.xlu0 %v4557_v11, %s4635_s4  ;;  %v4559_v28 = vpop.eup %4558 }
0x15d0   :  { %v4561_v49 = vpop.eup %4560  ;;  %v2138_v16 = vadd.f32 1.0, %v4559_v28 }
0x15d1   :  { %v2137_v25 = vadd.f32 1.0, %v4561_v49 }
0x15d2   :  { %2151 = vrot.lane.b32.xlu1 %v2146_v12, %s4636_s21  ;;  %4562 = vrcp.f32 %v2138_v16 }
0x15d3   :  { %2149 = vrot.lane.b32.xlu0 %v2145_v26, %s4636_s21  ;;  %4564 = vrcp.f32 %v2137_v25 }
0x15dc   :  { %v4563_v9 = vpop.eup %4562 }
0x15dd   :  { %v4565_v35 = vpop.eup %4564 }
0x1640   :  { %v2162_v27 = vpop.permute.xlu1 %2161 }
0x1641   :  { %v2166_v42 = vmul.f32 %v4563_v9, %v2162_v27  ;;  %v2160_v44 = vpop.permute.xlu0 %2159 }
0x1642   :  { %v2165_v56 = vmul.f32 %v4565_v35, %v2160_v44 }
0x1643   :  { %2171 = vrot.lane.b32.xlu1 %v2166_v42, %s4636_s21 }
0x1644   :  { %2169 = vrot.lane.b32.xlu0 %v2165_v56, %s4636_s21  ;;  %v2152_v15 = vpop.permute.xlu1 %2151 }
0x1645   :  { %v2150_v63 = vpop.permute.xlu0 %2149  ;;  %v2156_v39 = vmul.f32 %v4563_v9, %v2152_v15 }
0x1646   :  { %v2155_v10 = vmul.f32 %v4565_v35, %v2150_v63 }
0x16b5   :  { %v2172_v57 = vpop.permute.xlu1 %2171 }
0x16b6   :  { %v2176_v29 = vadd.f32 %v2172_v57, %v2156_v39  ;;  %v2170_v32 = vpop.permute.xlu0 %2169 }
0x16b7   :  { %v2175_v51 = vadd.f32 %v2170_v32, %v2155_v10 }
0x16b8   :  { %4566 = vtanh.f32 %v2176_v29 }
0x16b9   :  { %4568 = vtanh.f32 %v2175_v51 }
0x16c2   :  { %v4567_v37 = vpop.eup %4566 }
0x16c3   :  { %v4569_v11 = vpop.eup %4568  ;;  %2183 = vrot.lane.b32.xlu1 %v4567_v37, %s4635_s4 }
0x16c4   :  { %2181 = vrot.lane.b32.xlu0 %v4569_v11, %s4635_s4 }
0x1735   :  { %v2184_v12 = vpop.permute.xlu1 %2183 }
0x1736   :  { %v5649_v26 = vmul.f32 %v4563_v9, %v2184_v12  ;;  %v2182_v60 = vpop.permute.xlu0 %2181 }
0x1737   :  { %v5651_v53 = vmul.f32 %v4565_v35, %v2182_v60 }
0x1738   :  { %2203 = vrot.lane.b32.xlu1 %v5649_v26, %s4636_s21 }
0x1739   :  { %2201 = vrot.lane.b32.xlu0 %v5651_v53, %s4636_s21 }
0x173c   :  { %2193 = vrot.lane.b32.xlu1 %v2176_v29, %s4637_s22 }
0x173d   :  { %2191 = vrot.lane.b32.xlu0 %v2175_v51, %s4637_s22 }
0x17aa   :  { %v2204_v28 = vpop.permute.xlu1 %2203 }
0x17ab   :  { %2208 = vst.msk [vmem:[#allocation5 + $0x8] sm:$0xff] %vm726_vm1, %v2204_v28  ;;  %v2202_v49 = vpop.permute.xlu0 %2201 }
0x17ac   :  { %2211 = vst.msk [vmem:[#allocation3 + $0x78] sm:$0xff] %vm918_vm3, %v2204_v28  ;;  %2210 = vst.msk [vmem:[#allocation3 + $0x70] sm:$0xff] %vm918_vm3, %v2202_v49 }
0x17ad   :  { %2207 = vst.msk [vmem:[#allocation5] sm:$0xff] %vm726_vm1, %v2202_v49 }
0x17ae   :  { %v2194_v16 = vpop.permute.xlu1 %2193 }
0x17af   :  { %2198 = vst.msk [vmem:[#allocation6 + $0x8] sm:$0xff] %vm726_vm1, %v2194_v16  ;;  %v2192_v25 = vpop.permute.xlu0 %2191 }
0x17b0   :  { %2197 = vst.msk [vmem:[#allocation6] sm:$0xff] %vm726_vm1, %v2192_v25 }
0x17b2   :  { %v2222_v27 = vld [vmem:[#allocation5 + $0x8] sm:$0xff] }
0x17b4   :  { %v2221_v9 = vld [vmem:[#allocation5] sm:$0xff] }
0x17b5   :  { %4167 = vmatprep.mubr.msk.f32.mxu0 %vm726_vm1, %v2221_v9 }
0x17b6   :  { %4168 = vmatmul.mubr.msk.f32.vlgmr.msra.gmra.mrb[26].mxu0 %vm726_vm1, %v2222_v27  ;;  %v2329_v39 = vld [vmem:[#allocation6 + $0x8] sm:$0xff] }
0x17b7   :  { %4368 = vmatpush3.bf16.msra.mxu0 %v5589_v34  ;;  %v2328_v18 = vld [vmem:[#allocation6] sm:$0xff] }
0x17b8   :  { %4370 = vmatprep.subr.bf16.mxu0 %v5601_v47 }
0x17bb   :  { %4372 = vmatpush3.bf16.msra.mxu0 %v5601_v47 }
0x1889   :  { %v4169_v35 = vpop.f32.mrb[26].mxu0 }
0x188a   :  { %v2311_v42 = vadd.f32 %v4169_v35, %v2232_v13  ;;  %v2305_v44 = vpop.f32.mrb[27].mxu0 }
0x188b   :  { %v2306_v56 = vadd.f32 %v2305_v44, %v2231_v61 }
0x188c   :  { %4570 = vtanh.f32 %v2311_v42  ;;  %v3820_v43 = vmul.f32 -1.442695, %v2311_v42 }
0x188d   :  { %4572 = vtanh.f32 %v2306_v56  ;;  %v3819_v13 = vmul.f32 -1.442695, %v2306_v56 }
0x188e   :  { %4574 = vpow2.f32 %v3820_v43 }
0x188f   :  { %4576 = vpow2.f32 %v3819_v13 }
0x1896   :  { %v4571_v15 = vpop.eup %4570 }
0x1897   :  { %v4573_v63 = vpop.eup %4572  ;;  %2344 = vrot.lane.b32.xlu1 %v4571_v15, %s4635_s4 }
0x1898   :  { %2342 = vrot.lane.b32.xlu0 %v4573_v63, %s4635_s4  ;;  %v4575_v19 = vpop.eup %4574 }
0x1899   :  { %v4577_v36 = vpop.eup %4576  ;;  %v2321_v61 = vadd.f32 1.0, %v4575_v19 }
0x189a   :  { %v2320_v10 = vadd.f32 1.0, %v4577_v36 }
0x189b   :  { %2334 = vrot.lane.b32.xlu1 %v2329_v39, %s4636_s21  ;;  %4578 = vrcp.f32 %v2321_v61 }
0x189c   :  { %2332 = vrot.lane.b32.xlu0 %v2328_v18, %s4636_s21  ;;  %4580 = vrcp.f32 %v2320_v10 }
0x18a5   :  { %v4579_v57 = vpop.eup %4578 }
0x18a6   :  { %v4581_v32 = vpop.eup %4580 }
0x1909   :  { %v2345_v29 = vpop.permute.xlu1 %2344 }
0x190a   :  { %v2349_v51 = vmul.f32 %v4579_v57, %v2345_v29  ;;  %v2343_v37 = vpop.permute.xlu0 %2342 }
0x190b   :  { %v2348_v11 = vmul.f32 %v4581_v32, %v2343_v37 }
0x190c   :  { %2354 = vrot.lane.b32.xlu1 %v2349_v51, %s4636_s21 }
0x190d   :  { %2352 = vrot.lane.b32.xlu0 %v2348_v11, %s4636_s21  ;;  %v2335_v12 = vpop.permute.xlu1 %2334 }
0x190e   :  { %v2333_v60 = vpop.permute.xlu0 %2332  ;;  %v2339_v28 = vmul.f32 %v4579_v57, %v2335_v12 }
0x190f   :  { %v2338_v49 = vmul.f32 %v4581_v32, %v2333_v60 }
0x197e   :  { %v2355_v16 = vpop.permute.xlu1 %2354 }
0x197f   :  { %v2359_v25 = vadd.f32 %v2355_v16, %v2339_v28  ;;  %v2353_v9 = vpop.permute.xlu0 %2352 }
0x1980   :  { %v2358_v27 = vadd.f32 %v2353_v9, %v2338_v49 }
0x1981   :  { %4582 = vtanh.f32 %v2359_v25 }
0x1982   :  { %4584 = vtanh.f32 %v2358_v27 }
0x198b   :  { %v4583_v35 = vpop.eup %4582 }
0x198c   :  { %v4585_v42 = vpop.eup %4584  ;;  %2366 = vrot.lane.b32.xlu1 %v4583_v35, %s4635_s4 }
0x198d   :  { %2364 = vrot.lane.b32.xlu0 %v4585_v42, %s4635_s4 }
0x19fe   :  { %v2367_v44 = vpop.permute.xlu1 %2366 }
0x19ff   :  { %v5688_v56 = vmul.f32 %v4579_v57, %v2367_v44  ;;  %v2365_v15 = vpop.permute.xlu0 %2364 }
0x1a00   :  { %v5690_v63 = vmul.f32 %v4581_v32, %v2365_v15 }
0x1a01   :  { %2386 = vrot.lane.b32.xlu1 %v5688_v56, %s4636_s21 }
0x1a02   :  { %2384 = vrot.lane.b32.xlu0 %v5690_v63, %s4636_s21 }
0x1a05   :  { %2376 = vrot.lane.b32.xlu1 %v2359_v25, %s4637_s22 }
0x1a06   :  { %2374 = vrot.lane.b32.xlu0 %v2358_v27, %s4637_s22 }
0x1a73   :  { %v2387_v39 = vpop.permute.xlu1 %2386 }
0x1a74   :  { %2391 = vst.msk [vmem:[#allocation5 + $0x8] sm:$0xff] %vm726_vm1, %v2387_v39  ;;  %v2385_v18 = vpop.permute.xlu0 %2384 }
0x1a75   :  { %2394 = vst.msk [vmem:[#allocation3 + $0x88] sm:$0xff] %vm918_vm3, %v2387_v39  ;;  %2393 = vst.msk [vmem:[#allocation3 + $0x80] sm:$0xff] %vm918_vm3, %v2385_v18 }
0x1a76   :  { %2390 = vst.msk [vmem:[#allocation5] sm:$0xff] %vm726_vm1, %v2385_v18 }
0x1a77   :  { %v2377_v43 = vpop.permute.xlu1 %2376 }
0x1a78   :  { %2381 = vst.msk [vmem:[#allocation6 + $0x8] sm:$0xff] %vm726_vm1, %v2377_v43  ;;  %v2375_v13 = vpop.permute.xlu0 %2374 }
0x1a79   :  { %2380 = vst.msk [vmem:[#allocation6] sm:$0xff] %vm726_vm1, %v2375_v13 }
0x1a7b   :  { %v2405_v36 = vld [vmem:[#allocation5 + $0x8] sm:$0xff] }
0x1a7d   :  { %v2404_v19 = vld [vmem:[#allocation5] sm:$0xff] }
0x1a7e   :  { %4178 = vmatprep.mubr.msk.f32.mxu1 %vm726_vm1, %v2404_v19 }
0x1a7f   :  { %4179 = vmatmul.mubr.msk.f32.vlgmr.msra.gmra.mrb[14].mxu1 %vm726_vm1, %v2405_v36 }
0x1a80   :  { %4376 = vmatpush3.bf16.msra.mxu1 %v5589_v34  ;;  %v2511_v24 = vld [vmem:[#allocation6] sm:$0xff] }
0x1a81   :  { %4378 = vmatprep.subr.bf16.mxu1 %v5601_v47 }
0x1a84   :  { %4380 = vmatpush3.bf16.msra.mxu1 %v5601_v47  ;;  %v2512_v47 = vld [vmem:[#allocation6 + $0x8] sm:$0xff] }
0x1b52   :  { %v4180_v61 = vpop.f32.mrb[14].mxu1 }
0x1b53   :  { %v2494_v10 = vadd.f32 %v4180_v61, %v2415_v62  ;;  %v2488_v57 = vpop.f32.mrb[15].mxu1 }
0x1b54   :  { %v2489_v29 = vadd.f32 %v2488_v57, %v2414_v1 }
0x1b55   :  { %4586 = vtanh.f32 %v2494_v10  ;;  %v3824_v55 = vmul.f32 -1.442695, %v2494_v10 }
0x1b56   :  { %4588 = vtanh.f32 %v2489_v29  ;;  %v3823_v62 = vmul.f32 -1.442695, %v2489_v29 }
0x1b57   :  { %4590 = vpow2.f32 %v3824_v55 }
0x1b58   :  { %4592 = vpow2.f32 %v3823_v62 }
0x1b5f   :  { %v4587_v34 = vpop.eup %4586 }
0x1b60   :  { %v4589_v32 = vpop.eup %4588  ;;  %2527 = vrot.lane.b32.xlu1 %v4587_v34, %s4635_s4 }
0x1b61   :  { %2525 = vrot.lane.b32.xlu0 %v4589_v32, %s4635_s4  ;;  %v4591_v45 = vpop.eup %4590 }
0x1b62   :  { %v4593_v58 = vpop.eup %4592  ;;  %v2504_v1 = vadd.f32 1.0, %v4591_v45 }
0x1b63   :  { %v2503_v51 = vadd.f32 1.0, %v4593_v58 }
0x1b64   :  { %2517 = vrot.lane.b32.xlu1 %v2512_v47, %s4636_s21  ;;  %4594 = vrcp.f32 %v2504_v1 }
0x1b65   :  { %2515 = vrot.lane.b32.xlu0 %v2511_v24, %s4636_s21  ;;  %4596 = vrcp.f32 %v2503_v51 }
0x1b6e   :  { %v4595_v37 = vpop.eup %4594 }
0x1b6f   :  { %v4597_v12 = vpop.eup %4596 }
0x1bd2   :  { %v2528_v11 = vpop.permute.xlu1 %2527 }
0x1bd3   :  { %v2532_v60 = vmul.f32 %v4595_v37, %v2528_v11  ;;  %v2526_v28 = vpop.permute.xlu0 %2525 }
0x1bd4   :  { %v2531_v49 = vmul.f32 %v4597_v12, %v2526_v28 }
0x1bd5   :  { %2537 = vrot.lane.b32.xlu1 %v2532_v60, %s4636_s21 }
0x1bd6   :  { %2535 = vrot.lane.b32.xlu0 %v2531_v49, %s4636_s21  ;;  %v2518_v16 = vpop.permute.xlu1 %2517 }
0x1bd7   :  { %v2516_v25 = vpop.permute.xlu0 %2515  ;;  %v2522_v9 = vmul.f32 %v4595_v37, %v2518_v16 }
0x1bd8   :  { %v2521_v27 = vmul.f32 %v4597_v12, %v2516_v25 }
0x1c47   :  { %v2538_v35 = vpop.permute.xlu1 %2537 }
0x1c48   :  { %v2542_v42 = vadd.f32 %v2538_v35, %v2522_v9  ;;  %v2536_v44 = vpop.permute.xlu0 %2535 }
0x1c49   :  { %v2541_v15 = vadd.f32 %v2536_v44, %v2521_v27 }
0x1c4a   :  { %4598 = vtanh.f32 %v2542_v42 }
0x1c4b   :  { %4600 = vtanh.f32 %v2541_v15 }
0x1c54   :  { %v4599_v39 = vpop.eup %4598 }
0x1c55   :  { %v4601_v18 = vpop.eup %4600  ;;  %2549 = vrot.lane.b32.xlu1 %v4599_v39, %s4635_s4 }
0x1c56   :  { %2547 = vrot.lane.b32.xlu0 %v4601_v18, %s4635_s4 }
0x1cc7   :  { %v2550_v43 = vpop.permute.xlu1 %2549 }
0x1cc8   :  { %v5727_v13 = vmul.f32 %v4595_v37, %v2550_v43  ;;  %v2548_v19 = vpop.permute.xlu0 %2547 }
0x1cc9   :  { %v5729_v36 = vmul.f32 %v4597_v12, %v2548_v19 }
0x1cca   :  { %2569 = vrot.lane.b32.xlu1 %v5727_v13, %s4636_s21 }
0x1ccb   :  { %2567 = vrot.lane.b32.xlu0 %v5729_v36, %s4636_s21 }
0x1cce   :  { %2559 = vrot.lane.b32.xlu1 %v2542_v42, %s4637_s22 }
0x1ccf   :  { %2557 = vrot.lane.b32.xlu0 %v2541_v15, %s4637_s22 }
0x1d3c   :  { %v2570_v61 = vpop.permute.xlu1 %2569 }
0x1d3d   :  { %2574 = vst.msk [vmem:[#allocation5 + $0x8] sm:$0xff] %vm726_vm1, %v2570_v61  ;;  %v2568_v10 = vpop.permute.xlu0 %2567 }
0x1d3e   :  { %2577 = vst.msk [vmem:[#allocation3 + $0x98] sm:$0xff] %vm918_vm3, %v2570_v61  ;;  %2576 = vst.msk [vmem:[#allocation3 + $0x90] sm:$0xff] %vm918_vm3, %v2568_v10 }
0x1d3f   :  { %2573 = vst.msk [vmem:[#allocation5] sm:$0xff] %vm726_vm1, %v2568_v10 }
0x1d40   :  { %v2560_v57 = vpop.permute.xlu1 %2559 }
0x1d41   :  { %2564 = vst.msk [vmem:[#allocation6 + $0x8] sm:$0xff] %vm726_vm1, %v2560_v57  ;;  %v2558_v29 = vpop.permute.xlu0 %2557 }
0x1d42   :  { %2563 = vst.msk [vmem:[#allocation6] sm:$0xff] %vm726_vm1, %v2558_v29 }
0x1d44   :  { %v2588_v32 = vld [vmem:[#allocation5 + $0x8] sm:$0xff] }
0x1d46   :  { %v2587_v34 = vld [vmem:[#allocation5] sm:$0xff] }
0x1d47   :  { %4189 = vmatprep.mubr.msk.f32.mxu0 %vm726_vm1, %v2587_v34 }
0x1d48   :  { %4190 = vmatmul.mubr.msk.f32.vlgmr.msra.gmra.mrb[28].mxu0 %vm726_vm1, %v2588_v32  ;;  %v2695_v1 = vld [vmem:[#allocation6 + $0x8] sm:$0xff] }
0x1d49   :  { %v2694_v6 = vld [vmem:[#allocation6] sm:$0xff] }
0x1e1b   :  { %v4191_v47 = vpop.f32.mrb[28].mxu0 }
0x1e1c   :  { %v2677_v24 = vadd.f32 %v4191_v47, %v2598_v14  ;;  %v2671_v55 = vpop.f32.mrb[29].mxu0 }
0x1e1d   :  { %v2672_v62 = vadd.f32 %v2671_v55, %v2597_v23 }
0x1e1e   :  { %4602 = vtanh.f32 %v2677_v24  ;;  %v3828_v0 = vmul.f32 -1.442695, %v2677_v24 }
0x1e1f   :  { %4604 = vtanh.f32 %v2672_v62  ;;  %v3827_v14 = vmul.f32 -1.442695, %v2672_v62 }
0x1e20   :  { %4606 = vpow2.f32 %v3828_v0 }
0x1e21   :  { %4608 = vpow2.f32 %v3827_v14 }
0x1e28   :  { %v4603_v45 = vpop.eup %4602 }
0x1e29   :  { %v4605_v58 = vpop.eup %4604  ;;  %2710 = vrot.lane.b32.xlu1 %v4603_v45, %s4635_s4 }
0x1e2a   :  { %2708 = vrot.lane.b32.xlu0 %v4605_v58, %s4635_s4  ;;  %v4607_v7 = vpop.eup %4606  ;;  %v6342_v58 = vsel %vm5198_vm2, %v5324_v31, %v5321_v30 }
0x1e2b   :  { %v4609_v17 = vpop.eup %4608  ;;  %v2687_v23 = vadd.f32 1.0, %v4607_v7 }
0x1e2c   :  { %v2686_v51 = vadd.f32 1.0, %v4609_v17 }
0x1e2d   :  { %2700 = vrot.lane.b32.xlu1 %v2695_v1, %s4636_s21  ;;  %4610 = vrcp.f32 %v2687_v23 }
0x1e2e   :  { %2698 = vrot.lane.b32.xlu0 %v2694_v6, %s4636_s21  ;;  %4612 = vrcp.f32 %v2686_v51 }
0x1e37   :  { %v4611_v37 = vpop.eup %4610 }
0x1e38   :  { %v4613_v12 = vpop.eup %4612 }
0x1e9b   :  { %v2711_v11 = vpop.permute.xlu1 %2710 }
0x1e9c   :  { %v2715_v60 = vmul.f32 %v4611_v37, %v2711_v11  ;;  %v2709_v28 = vpop.permute.xlu0 %2708 }
0x1e9d   :  { %v2714_v49 = vmul.f32 %v4613_v12, %v2709_v28 }
0x1e9e   :  { %2720 = vrot.lane.b32.xlu1 %v2715_v60, %s4636_s21 }
0x1e9f   :  { %2718 = vrot.lane.b32.xlu0 %v2714_v49, %s4636_s21  ;;  %v2701_v16 = vpop.permute.xlu1 %2700 }
0x1ea0   :  { %v2699_v25 = vpop.permute.xlu0 %2698  ;;  %v2705_v9 = vmul.f32 %v4611_v37, %v2701_v16 }
0x1ea1   :  { %v2704_v27 = vmul.f32 %v4613_v12, %v2699_v25 }
0x1f10   :  { %v2721_v35 = vpop.permute.xlu1 %2720 }
0x1f11   :  { %v2725_v42 = vadd.f32 %v2721_v35, %v2705_v9  ;;  %v2719_v44 = vpop.permute.xlu0 %2718 }
0x1f12   :  { %v2724_v15 = vadd.f32 %v2719_v44, %v2704_v27 }
0x1f13   :  { %4614 = vtanh.f32 %v2725_v42 }
0x1f14   :  { %4616 = vtanh.f32 %v2724_v15 }
0x1f1d   :  { %v4615_v39 = vpop.eup %4614 }
0x1f1e   :  { %v4617_v18 = vpop.eup %4616  ;;  %2732 = vrot.lane.b32.xlu1 %v4615_v39, %s4635_s4 }
0x1f1f   :  { %2730 = vrot.lane.b32.xlu0 %v4617_v18, %s4635_s4 }
0x1f90   :  { %v2733_v43 = vpop.permute.xlu1 %2732 }
0x1f91   :  { %v5763_v19 = vmul.f32 %v4611_v37, %v2733_v43  ;;  %v2731_v61 = vpop.permute.xlu0 %2730 }
0x1f92   :  { %v5765_v10 = vmul.f32 %v4613_v12, %v2731_v61 }
0x1f93   :  { %2752 = vrot.lane.b32.xlu1 %v5763_v19, %s4636_s21 }
0x1f94   :  { %2750 = vrot.lane.b32.xlu0 %v5765_v10, %s4636_s21 }
0x1f97   :  { %2742 = vrot.lane.b32.xlu1 %v2725_v42, %s4637_s22 }
0x1f98   :  { %2740 = vrot.lane.b32.xlu0 %v2724_v15, %s4637_s22 }
0x2005   :  { %v2753_v57 = vpop.permute.xlu1 %2752 }
0x2006   :  { %2757 = vst.msk [vmem:[#allocation5 + $0x8] sm:$0xff] %vm726_vm1, %v2753_v57  ;;  %v2751_v29 = vpop.permute.xlu0 %2750 }
0x2007   :  { %2760 = vst.msk [vmem:[#allocation3 + $0xa8] sm:$0xff] %vm918_vm3, %v2753_v57  ;;  %2759 = vst.msk [vmem:[#allocation3 + $0xa0] sm:$0xff] %vm918_vm3, %v2751_v29 }
0x2008   :  { %2756 = vst.msk [vmem:[#allocation5] sm:$0xff] %vm726_vm1, %v2751_v29 }
0x2009   :  { %v2743_v34 = vpop.permute.xlu1 %2742 }
0x200a   :  { %2747 = vst.msk [vmem:[#allocation6 + $0x8] sm:$0xff] %vm726_vm1, %v2743_v34  ;;  %v2741_v32 = vpop.permute.xlu0 %2740 }
0x200b   :  { %2746 = vst.msk [vmem:[#allocation6] sm:$0xff] %vm726_vm1, %v2741_v32 }
0x200d   :  { %v2771_v24 = vld [vmem:[#allocation5 + $0x8] sm:$0xff] }
0x200f   :  { %v2770_v47 = vld [vmem:[#allocation5] sm:$0xff] }
0x2010   :  { %4200 = vmatprep.mubr.msk.f32.mxu1 %vm726_vm1, %v2770_v47 }
0x2011   :  { %4201 = vmatmul.mubr.msk.f32.vlgmr.msra.gmra.mrb[16].mxu1 %vm726_vm1, %v2771_v24  ;;  %v2878_v14 = vld [vmem:[#allocation6 + $0x8] sm:$0xff] }
0x2012   :  { %v2877_v22 = vld [vmem:[#allocation6] sm:$0xff] }
0x20e4   :  { %v4202_v55 = vpop.f32.mrb[16].mxu1 }
0x20e5   :  { %v2860_v62 = vadd.f32 %v4202_v55, %v2781_v41  ;;  %v2854_v45 = vpop.f32.mrb[17].mxu1 }
0x20e6   :  { %v2855_v1 = vadd.f32 %v2854_v45, %v6342_v58 }
0x20e7   :  { %4618 = vtanh.f32 %v2860_v62  ;;  %v3832_v52 = vmul.f32 -1.442695, %v2860_v62 }
0x20e8   :  { %4620 = vtanh.f32 %v2855_v1  ;;  %v3831_v38 = vmul.f32 -1.442695, %v2855_v1 }
0x20e9   :  { %4622 = vpow2.f32 %v3832_v52 }
0x20ea   :  { %4624 = vpow2.f32 %v3831_v38 }
0x20f1   :  { %v4619_v6 = vpop.eup %4618 }
0x20f2   :  { %v4621_v0 = vpop.eup %4620  ;;  %2893 = vrot.lane.b32.xlu1 %v4619_v6, %s4635_s4 }
0x20f3   :  { %2891 = vrot.lane.b32.xlu0 %v4621_v0, %s4635_s4  ;;  %v4623_v30 = vpop.eup %4622 }
0x20f4   :  { %v4625_v31 = vpop.eup %4624  ;;  %v2870_v41 = vadd.f32 1.0, %v4623_v30 }
0x20f5   :  { %v2869_v7 = vadd.f32 1.0, %v4625_v31 }
0x20f6   :  { %2883 = vrot.lane.b32.xlu1 %v2878_v14, %s4636_s21  ;;  %4626 = vrcp.f32 %v2870_v41 }
0x20f7   :  { %2881 = vrot.lane.b32.xlu0 %v2877_v22, %s4636_s21  ;;  %4628 = vrcp.f32 %v2869_v7 }
0x2100   :  { %v4627_v17 = vpop.eup %4626 }
0x2101   :  { %v4629_v51 = vpop.eup %4628 }
0x2164   :  { %v2894_v23 = vpop.permute.xlu1 %2893 }
0x2165   :  { %v2898_v37 = vmul.f32 %v4627_v17, %v2894_v23  ;;  %v2892_v11 = vpop.permute.xlu0 %2891 }
0x2166   :  { %v2897_v12 = vmul.f32 %v4629_v51, %v2892_v11 }
0x2167   :  { %2903 = vrot.lane.b32.xlu1 %v2898_v37, %s4636_s21 }
0x2168   :  { %2901 = vrot.lane.b32.xlu0 %v2897_v12, %s4636_s21  ;;  %v2884_v60 = vpop.permute.xlu1 %2883 }
0x2169   :  { %v2882_v28 = vpop.permute.xlu0 %2881  ;;  %v2888_v49 = vmul.f32 %v4627_v17, %v2884_v60 }
0x216a   :  { %v2887_v16 = vmul.f32 %v4629_v51, %v2882_v28 }
0x21d9   :  { %v2904_v25 = vpop.permute.xlu1 %2903 }
0x21da   :  { %v5797_v9 = vadd.f32 %v2904_v25, %v2888_v49  ;;  %v2902_v27 = vpop.permute.xlu0 %2901 }
0x21db   :  { %v5799_v35 = vadd.f32 %v2902_v27, %v2887_v16 }
0x21dc   :  { %4630 = vtanh.f32 %v5797_v9 }
0x21dd   :  { %4632 = vtanh.f32 %v5799_v35 }
0x21e6   :  { %v4631_v42 = vpop.eup %4630 }
0x21e7   :  { %v4633_v44 = vpop.eup %4632  ;;  %2915 = vrot.lane.b32.xlu1 %v4631_v42, %s4635_s4 }
0x21e8   :  { %2913 = vrot.lane.b32.xlu0 %v4633_v44, %s4635_s4  ;;  %v2952_v44 = vld [vmem:[#allocation3] sm:$0xff] }
0x2259   :  { %v2916_v15 = vpop.permute.xlu1 %2915 }
0x225a   :  { %v5805_v39 = vmul.f32 %v4627_v17, %v2916_v15  ;;  %v2914_v18 = vpop.permute.xlu0 %2913 }
0x225b   :  { %v5807_v43 = vmul.f32 %v4629_v51, %v2914_v18 }
0x225c   :  { %2946 = vrot.lane.b32.xlu1 %v5805_v39, %s4638_s5 }
0x225d   :  { %2944 = vrot.lane.b32.xlu0 %v5807_v43, %s4638_s5 }
0x2260   :  { %2763 = vrot.lane.b32.xlu1 %v5763_v19, %s4638_s5 }
0x2261   :  { %2761 = vrot.lane.b32.xlu0 %v5765_v10, %s4638_s5 }
0x2264   :  { %2580 = vrot.lane.b32.xlu1 %v5727_v13, %s4638_s5 }
0x2265   :  { %2578 = vrot.lane.b32.xlu0 %v5729_v36, %s4638_s5 }
0x2268   :  { %2397 = vrot.lane.b32.xlu1 %v5688_v56, %s4638_s5 }
0x2269   :  { %2395 = vrot.lane.b32.xlu0 %v5690_v63, %s4638_s5 }
0x226c   :  { %2214 = vrot.lane.b32.xlu1 %v5649_v26, %s4638_s5 }
0x226d   :  { %2212 = vrot.lane.b32.xlu0 %v5651_v53, %s4638_s5 }
0x2270   :  { %2031 = vrot.lane.b32.xlu1 %v5609_v3, %s4638_s5 }
0x2271   :  { %2029 = vrot.lane.b32.xlu0 %v5611_v8, %s4638_s5 }
0x2274   :  { %1848 = vrot.lane.b32.xlu1 %v5547_v59, %s4638_s5 }
0x2275   :  { %1846 = vrot.lane.b32.xlu0 %v5549_v33, %s4638_s5 }
0x2278   :  { %1663 = vrot.lane.b32.xlu1 %v5511_v54, %s4638_s5 }
0x2279   :  { %1661 = vrot.lane.b32.xlu0 %v5513_v4, %s4638_s5 }
0x227c   :  { %1478 = vrot.lane.b32.xlu1 %v5472_v40, %s4638_s5  ;;  %v3120_v40 = vld [vmem:[%s6334_s6] sm:$0xff] }
0x227d   :  { %1476 = vrot.lane.b32.xlu0 %v5474_v20, %s4638_s5 }
0x2280   :  { %1293 = vrot.lane.b32.xlu1 %v5432_v21, %s4638_s5  ;;  %v3121_v21 = vld [vmem:[%s6334_s6 + $0x8] sm:$0xff] }
0x2281   :  { %1291 = vrot.lane.b32.xlu0 %v5434_v46, %s4638_s5  ;;  %v4381_v46 = vpack.c.bf16 %v3121_v21, %v3120_v40 }
0x2283   :  { %4382 = vmatprep.subr.bf16.mxu0 %v4381_v46 }
0x2284   :  { %1108 = vrot.lane.b32.xlu1 %v5392_v2, %s4638_s5  ;;  %4384 = vmatpush3.bf16.msra.mxu0 %v4381_v46 }
0x2285   :  { %1106 = vrot.lane.b32.xlu0 %v5394_v5, %s4638_s5 }
0x2288   :  { %923 = vrot.lane.b32.xlu1 %v5352_v48, %s4638_s5  ;;  %v3122_v48 = vld [vmem:[%s6334_s6 + $0x10] sm:$0xff] }
0x2289   :  { %921 = vrot.lane.b32.xlu0 %v5354_v50, %s4638_s5  ;;  %v3123_v50 = vld [vmem:[%s6334_s6 + $0x18] sm:$0xff] }
0x228a   :  { %v4385_v20 = vpack.c.bf16 %v3123_v50, %v3122_v48 }
0x228c   :  { %4386 = vmatprep.subr.bf16.mxu0 %v4385_v20 }
0x228d   :  { %4388 = vmatpush3.bf16.msra.mxu0 %v4385_v20 }
0x22ce   :  { %v2947_v2 = vpop.permute.xlu1 %2946 }
0x22cf   :  { %2951 = vst.msk [vmem:[#allocation4 + $0x8] sm:$0xff] %vm918_vm3, %v2947_v2  ;;  %v2945_v5 = vpop.permute.xlu0 %2944 }
0x22d0   :  { %2950 = vst.msk [vmem:[#allocation4] sm:$0xff] %vm918_vm3, %v2945_v5  ;;  %v2956_v5 = vld [vmem:[#allocation3 + $0x20] sm:$0xff] }
0x22d2   :  { %v2764_v54 = vpop.permute.xlu1 %2763 }
0x22d3   :  { %2769 = vst.msk [vmem:[#allocation4 + $0x18] sm:$0xff] %vm918_vm3, %v2764_v54  ;;  %v2762_v4 = vpop.permute.xlu0 %2761  ;;  %v2957_v54 = vld [vmem:[#allocation3 + $0x28] sm:$0xff] }
0x22d4   :  { %2768 = vst.msk [vmem:[#allocation4 + $0x10] sm:$0xff] %vm918_vm3, %v2762_v4 }
0x22d6   :  { %v2581_v59 = vpop.permute.xlu1 %2580  ;;  %v2977_v63 = vld [vmem:[#allocation4 + $0x8] sm:$0xff] }
0x22d7   :  { %2586 = vst.msk [vmem:[#allocation4 + $0x28] sm:$0xff] %vm918_vm3, %v2581_v59  ;;  %v2579_v33 = vpop.permute.xlu0 %2578  ;;  %v2976_v36 = vld [vmem:[#allocation4] sm:$0xff]  ;;  %v2958_v59 = vld [vmem:[#allocation3 + $0x30] sm:$0xff] }
0x22d8   :  { %2585 = vst.msk [vmem:[#allocation4 + $0x20] sm:$0xff] %vm918_vm3, %v2579_v33 }
0x22da   :  { %v2398_v3 = vpop.permute.xlu1 %2397  ;;  %v2979_v8 = vld [vmem:[#allocation4 + $0x18] sm:$0xff] }
0x22db   :  { %2403 = vst.msk [vmem:[#allocation4 + $0x38] sm:$0xff] %vm918_vm3, %v2398_v3  ;;  %3030 = vrot.lane.b32.xlu1 %v2979_v8, %s4638_s5  ;;  %v2396_v26 = vpop.permute.xlu0 %2395  ;;  %v2978_v53 = vld [vmem:[#allocation4 + $0x10] sm:$0xff] }
0x22dc   :  { %2402 = vst.msk [vmem:[#allocation4 + $0x30] sm:$0xff] %vm918_vm3, %v2396_v26  ;;  %3028 = vrot.lane.b32.xlu0 %v2978_v53, %s4638_s5  ;;  %v2959_v26 = vld [vmem:[#allocation3 + $0x38] sm:$0xff] }
0x22de   :  { %v2215_v56 = vpop.permute.xlu1 %2214  ;;  %v2981_v61 = vld [vmem:[#allocation4 + $0x28] sm:$0xff] }
0x22df   :  { %2220 = vst.msk [vmem:[#allocation4 + $0x48] sm:$0xff] %vm918_vm3, %v2215_v56  ;;  %3026 = vrot.lane.b32.xlu1 %v2977_v63, %s4638_s5  ;;  %v2213_v13 = vpop.permute.xlu0 %2212  ;;  %v2980_v57 = vld [vmem:[#allocation4 + $0x20] sm:$0xff] }
0x22e0   :  { %2219 = vst.msk [vmem:[#allocation4 + $0x40] sm:$0xff] %vm918_vm3, %v2213_v13  ;;  %3024 = vrot.lane.b32.xlu0 %v2976_v36, %s4638_s5  ;;  %v2960_v56 = vld [vmem:[#allocation3 + $0x40] sm:$0xff] }
0x22e2   :  { %v2032_v19 = vpop.permute.xlu1 %2031  ;;  %v2983_v34 = vld [vmem:[#allocation4 + $0x38] sm:$0xff] }
0x22e3   :  { %2037 = vst.msk [vmem:[#allocation4 + $0x58] sm:$0xff] %vm918_vm3, %v2032_v19  ;;  %3034 = vrot.lane.b32.xlu1 %v2981_v61, %s4638_s5  ;;  %v2030_v10 = vpop.permute.xlu0 %2029  ;;  %v2982_v47 = vld [vmem:[#allocation4 + $0x30] sm:$0xff]  ;;  %v2961_v19 = vld [vmem:[#allocation3 + $0x48] sm:$0xff] }
0x22e4   :  { %2036 = vst.msk [vmem:[#allocation4 + $0x50] sm:$0xff] %vm918_vm3, %v2030_v10  ;;  %3032 = vrot.lane.b32.xlu0 %v2980_v57, %s4638_s5  ;;  %v2962_v10 = vld [vmem:[#allocation3 + $0x50] sm:$0xff] }
0x22e6   :  { %v1849_v29 = vpop.permute.xlu1 %1848  ;;  %v2985_v55 = vld [vmem:[#allocation4 + $0x48] sm:$0xff] }
0x22e7   :  { %1854 = vst.msk [vmem:[#allocation4 + $0x68] sm:$0xff] %vm918_vm3, %v1849_v29  ;;  %3038 = vrot.lane.b32.xlu1 %v2983_v34, %s4638_s5  ;;  %v1847_v32 = vpop.permute.xlu0 %1846  ;;  %v2984_v45 = vld [vmem:[#allocation4 + $0x40] sm:$0xff] }
0x22e8   :  { %1853 = vst.msk [vmem:[#allocation4 + $0x60] sm:$0xff] %vm918_vm3, %v1847_v32  ;;  %3036 = vrot.lane.b32.xlu0 %v2982_v47, %s4638_s5  ;;  %v2963_v32 = vld [vmem:[#allocation3 + $0x58] sm:$0xff] }
0x22ea   :  { %v1664_v24 = vpop.permute.xlu1 %1663  ;;  %v2987_v1 = vld [vmem:[#allocation4 + $0x58] sm:$0xff] }
0x22eb   :  { %1669 = vst.msk [vmem:[#allocation4 + $0x78] sm:$0xff] %vm918_vm3, %v1664_v24  ;;  %3042 = vrot.lane.b32.xlu1 %v2985_v55, %s4638_s5  ;;  %v1662_v62 = vpop.permute.xlu0 %1661  ;;  %v2986_v0 = vld [vmem:[#allocation4 + $0x50] sm:$0xff]  ;;  %v2964_v24 = vld [vmem:[#allocation3 + $0x60] sm:$0xff] }
0x22ec   :  { %1668 = vst.msk [vmem:[#allocation4 + $0x70] sm:$0xff] %vm918_vm3, %v1662_v62  ;;  %3040 = vrot.lane.b32.xlu0 %v2984_v45, %s4638_s5 }
0x22ee   :  { %v1479_v58 = vpop.permute.xlu1 %1478  ;;  %v2989_v22 = vld [vmem:[#allocation4 + $0x68] sm:$0xff] }
0x22ef   :  { %1484 = vst.msk [vmem:[#allocation4 + $0x88] sm:$0xff] %vm918_vm3, %v1479_v58  ;;  %3046 = vrot.lane.b32.xlu1 %v2987_v1, %s4638_s5  ;;  %v1477_v6 = vpop.permute.xlu0 %1476  ;;  %v2988_v38 = vld [vmem:[#allocation4 + $0x60] sm:$0xff]  ;;  %v2965_v58 = vld [vmem:[#allocation3 + $0x68] sm:$0xff] }
0x22f0   :  { %1483 = vst.msk [vmem:[#allocation4 + $0x80] sm:$0xff] %vm918_vm3, %v1477_v6  ;;  %3044 = vrot.lane.b32.xlu0 %v2986_v0, %s4638_s5  ;;  %v2966_v6 = vld [vmem:[#allocation3 + $0x70] sm:$0xff] }
0x22f2   :  { %v1294_v14 = vpop.permute.xlu1 %1293  ;;  %v2991_v31 = vld [vmem:[#allocation4 + $0x78] sm:$0xff] }
0x22f3   :  { %1299 = vst.msk [vmem:[#allocation4 + $0x98] sm:$0xff] %vm918_vm3, %v1294_v14  ;;  %3050 = vrot.lane.b32.xlu1 %v2989_v22, %s4638_s5  ;;  %v1292_v52 = vpop.permute.xlu0 %1291  ;;  %v2990_v7 = vld [vmem:[#allocation4 + $0x70] sm:$0xff] }
0x22f4   :  { %1298 = vst.msk [vmem:[#allocation4 + $0x90] sm:$0xff] %vm918_vm3, %v1292_v52  ;;  %3048 = vrot.lane.b32.xlu0 %v2988_v38, %s4638_s5  ;;  %v2967_v52 = vld [vmem:[#allocation3 + $0x78] sm:$0xff] }
0x22f6   :  { %v1109_v30 = vpop.permute.xlu1 %1108  ;;  %v2993_v23 = vld [vmem:[#allocation4 + $0x88] sm:$0xff] }
0x22f7   :  { %1114 = vst.msk [vmem:[#allocation4 + $0xa8] sm:$0xff] %vm918_vm3, %v1109_v30  ;;  %3054 = vrot.lane.b32.xlu1 %v2991_v31, %s4638_s5  ;;  %v1107_v41 = vpop.permute.xlu0 %1106  ;;  %v2992_v37 = vld [vmem:[#allocation4 + $0x80] sm:$0xff] }
0x22f8   :  { %1113 = vst.msk [vmem:[#allocation4 + $0xa0] sm:$0xff] %vm918_vm3, %v1107_v41  ;;  %3052 = vrot.lane.b32.xlu0 %v2990_v7, %s4638_s5  ;;  %v2968_v30 = vld [vmem:[#allocation3 + $0x80] sm:$0xff] }
0x22fa   :  { %v924_v17 = vpop.permute.xlu1 %923  ;;  %v2995_v12 = vld [vmem:[#allocation4 + $0x98] sm:$0xff] }
0x22fb   :  { %929 = vst.msk [vmem:[#allocation4 + $0xb8] sm:$0xff] %vm918_vm3, %v924_v17  ;;  %3058 = vrot.lane.b32.xlu1 %v2993_v23, %s4638_s5  ;;  %v922_v51 = vpop.permute.xlu0 %921  ;;  %v2994_v11 = vld [vmem:[#allocation4 + $0x90] sm:$0xff]  ;;  %v2969_v17 = vld [vmem:[#allocation3 + $0x88] sm:$0xff] }
0x22fc   :  { %928 = vst.msk [vmem:[#allocation4 + $0xb0] sm:$0xff] %vm918_vm3, %v922_v51  ;;  %3056 = vrot.lane.b32.xlu0 %v2992_v37, %s4638_s5  ;;  %v2970_v51 = vld [vmem:[#allocation3 + $0x90] sm:$0xff] }
0x22fe   :  { %v2997_v60 = vld [vmem:[#allocation4 + $0xa8] sm:$0xff] }
0x22ff   :  { %3060 = vrot.lane.b32.xlu1 %v2994_v11, %s4638_s5  ;;  %v2996_v28 = vld [vmem:[#allocation4 + $0xa0] sm:$0xff] }
0x2300   :  { %2933 = vrot.lane.b32.xlu0 %v5807_v43, %s4636_s21  ;;  %v2954_v43 = vld [vmem:[#allocation3 + $0x10] sm:$0xff] }
0x2302   :  { %v2999_v49 = vld [vmem:[#allocation4 + $0xb8] sm:$0xff] }
0x2303   :  { %3062 = vrot.lane.b32.xlu1 %v2995_v12, %s4638_s5  ;;  %v2998_v16 = vld [vmem:[#allocation4 + $0xb0] sm:$0xff] }
0x2304   :  { %2935 = vrot.lane.b32.xlu0 %v5805_v39, %s4636_s21  ;;  %v2953_v39 = vld [vmem:[#allocation3 + $0x8] sm:$0xff] }
0x2307   :  { %3066 = vrot.lane.b32.xlu1 %v2997_v60, %s4638_s5  ;;  %v2971_v60 = vld [vmem:[#allocation3 + $0x98] sm:$0xff] }
0x2308   :  { %3064 = vrot.lane.b32.xlu0 %v2996_v28, %s4638_s5 }
0x230b   :  { %3070 = vrot.lane.b32.xlu1 %v2999_v49, %s4638_s5 }
0x230c   :  { %3068 = vrot.lane.b32.xlu0 %v2998_v16, %s4638_s5  ;;  %v2972_v16 = vld [vmem:[#allocation3 + $0xa0] sm:$0xff] }
0x230f   :  { %2925 = vrot.lane.b32.xlu1 %v5797_v9, %s4637_s22 }
0x2310   :  { %2923 = vrot.lane.b32.xlu0 %v5799_v35, %s4637_s22  ;;  %v2955_v35 = vld [vmem:[#allocation3 + $0x18] sm:$0xff] }
0x234d   :  { %v3031_v25 = vpop.permute.xlu1 %3030 }
0x234e   :  { %v3029_v27 = vpop.permute.xlu0 %3028  ;;  %v3099_v2 = vsel %vm918_vm3, %v2955_v35, %v3031_v25  ;;  %v3460_v35 = vld [vmem:[%s6335_s8] sm:$0xff] }
0x234f   :  { %v3098_v21 = vsel %vm918_vm3, %v2954_v43, %v3029_v27  ;;  %v2973_v27 = vld [vmem:[#allocation3 + $0xa8] sm:$0xff]  ;;  %4247 = vmatprep.subr.mxu1 %v3460_v35 }
0x2350   :  { %4248 = vmatpush3.msra.mxu1 %v3460_v35 }
0x2351   :  { %v3027_v42 = vpop.permute.xlu1 %3026 }
0x2352   :  { %v3025_v15 = vpop.permute.xlu0 %3024  ;;  %v3097_v40 = vsel %vm918_vm3, %v2953_v39, %v3027_v42 }
0x2353   :  { %v3096_v18 = vsel %vm918_vm3, %v2952_v44, %v3025_v15 }
0x2354   :  { %4211 = vmatprep.mubr.msk.f32.mxu0 %vm726_vm1, %v3096_v18 }
0x2355   :  { %v3035_v46 = vpop.permute.xlu1 %3034  ;;  %4212 = vmatmul.mubr.msk.f32.vlgmr.msra.gmra.mrb[30].mxu0 %vm726_vm1, %v3097_v40 }
0x2356   :  { %4214 = vmatprep.mubr.msk.f32.mxu0 %vm726_vm1, %v3098_v21  ;;  %v3033_v9 = vpop.permute.xlu0 %3032  ;;  %v3101_v4 = vsel %vm918_vm3, %v2957_v54, %v3035_v46  ;;  %v3388_v54 = vld [vmem:[%s6328_s0] sm:$0xff] }
0x2357   :  { %v3100_v48 = vsel %vm918_vm3, %v2956_v5, %v3033_v9 }
0x2359   :  { %v3039_v50 = vpop.permute.xlu1 %3038  ;;  %4215 = vmatmul.mubr.msk.f32.gmra.mrb[32].mxu0 %vm726_vm1, %v3099_v2  ;;  %v5985_v2 = vld [vmem:[%s6336_s7] ss:$0 sm:$0xff] }
0x235a   :  { %4217 = vmatprep.mubr.msk.f32.mxu0 %vm726_vm1, %v3100_v48  ;;  %v3037_v20 = vpop.permute.xlu0 %3036  ;;  %v3103_v53 = vsel %vm918_vm3, %v2959_v26, %v3039_v50  ;;  %v3389_v48 = vld [vmem:[%s6328_s0 + $0x8] sm:$0xff] }
0x235b   :  { %v3102_v33 = vsel %vm918_vm3, %v2958_v59, %v3037_v20 }
0x235d   :  { %v3043_v3 = vpop.permute.xlu1 %3042  ;;  %4218 = vmatmul.mubr.msk.f32.gmra.mrb[34].mxu0 %vm726_vm1, %v3101_v4 }
0x235e   :  { %4220 = vmatprep.mubr.msk.f32.mxu0 %vm726_vm1, %v3102_v33  ;;  %v3041_v8 = vpop.permute.xlu0 %3040  ;;  %v3105_v61 = vsel %vm918_vm3, %v2961_v19, %v3043_v3 }
0x235f   :  { %v3104_v63 = vsel %vm918_vm3, %v2960_v56, %v3041_v8  ;;  %v3391_v8 = vld [vmem:[%s6328_s0 + $0x18] sm:$0xff]  ;;  %v3390_v56 = vld [vmem:[%s6328_s0 + $0x10] sm:$0xff] }
0x2361   :  { %v3047_v13 = vpop.permute.xlu1 %3046  ;;  %4221 = vmatmul.mubr.msk.f32.gmra.mrb[36].mxu0 %vm726_vm1, %v3103_v53 }
0x2362   :  { %4223 = vmatprep.mubr.msk.f32.mxu0 %vm726_vm1, %v3104_v63  ;;  %v3045_v36 = vpop.permute.xlu0 %3044  ;;  %v3107_v47 = vsel %vm918_vm3, %v2963_v32, %v3047_v13 }
0x2363   :  { %v3106_v57 = vsel %vm918_vm3, %v2962_v10, %v3045_v36 }
0x2365   :  { %v3051_v29 = vpop.permute.xlu1 %3050  ;;  %4224 = vmatmul.mubr.msk.f32.gmra.mrb[38].mxu0 %vm726_vm1, %v3105_v61  ;;  %v3393_v61 = vld [vmem:[%s6328_s0 + $0x28] sm:$0xff] }
0x2366   :  { %4226 = vmatprep.mubr.msk.f32.mxu0 %vm726_vm1, %v3106_v57  ;;  %v3049_v34 = vpop.permute.xlu0 %3048  ;;  %v3109_v1 = vsel %vm918_vm3, %v2965_v58, %v3051_v29  ;;  %v3392_v29 = vld [vmem:[%s6328_s0 + $0x20] sm:$0xff]  ;;  %v3394_v58 = vld [vmem:[%s6328_s0 + $0x30] sm:$0xff] }
0x2367   :  { %v3108_v55 = vsel %vm918_vm3, %v2964_v24, %v3049_v34 }
0x2369   :  { %v3055_v62 = vpop.permute.xlu1 %3054  ;;  %4227 = vmatmul.mubr.msk.f32.gmra.mrb[40].mxu0 %vm726_vm1, %v3107_v47 }
0x236a   :  { %4229 = vmatprep.mubr.msk.f32.mxu0 %vm726_vm1, %v3108_v55  ;;  %v3053_v45 = vpop.permute.xlu0 %3052  ;;  %v3111_v38 = vsel %vm918_vm3, %v2967_v52, %v3055_v62  ;;  %v3395_v55 = vld [vmem:[%s6328_s0 + $0x38] sm:$0xff] }
0x236b   :  { %v3110_v0 = vsel %vm918_vm3, %v2966_v6, %v3053_v45 }
0x236d   :  { %v3059_v14 = vpop.permute.xlu1 %3058  ;;  %4230 = vmatmul.mubr.msk.f32.gmra.mrb[42].mxu0 %vm726_vm1, %v3109_v1 }
0x236e   :  { %4232 = vmatprep.mubr.msk.f32.mxu0 %vm726_vm1, %v3110_v0  ;;  %v3057_v22 = vpop.permute.xlu0 %3056  ;;  %v3113_v23 = vsel %vm918_vm3, %v2969_v17, %v3059_v14 }
0x236f   :  { %v3112_v31 = vsel %vm918_vm3, %v2968_v30, %v3057_v22  ;;  %v3397_v22 = vld [vmem:[%s6328_s0 + $0x48] sm:$0xff]  ;;  %v3396_v30 = vld [vmem:[%s6328_s0 + $0x40] sm:$0xff] }
0x2371   :  { %v3061_v41 = vpop.permute.xlu1 %3060  ;;  %4233 = vmatmul.mubr.msk.f32.gmra.mrb[44].mxu0 %vm726_vm1, %v3111_v38 }
0x2372   :  { %4235 = vmatprep.mubr.msk.f32.mxu0 %vm726_vm1, %v3112_v31  ;;  %v2934_v7 = vpop.permute.xlu0 %2933  ;;  %v3114_v37 = vsel %vm918_vm3, %v2970_v51, %v3061_v41 }
0x2373   :  { %2939 = vst.msk [vmem:[#allocation5] sm:$0xff] %vm726_vm1, %v2934_v7 }
0x2374   :  { %2942 = vst.msk [vmem:[#allocation3 + $0xb0] sm:$0xff] %vm918_vm3, %v2934_v7 }
0x2375   :  { %v3063_v11 = vpop.permute.xlu1 %3062  ;;  %4236 = vmatmul.mubr.msk.f32.gmra.mrb[46].mxu0 %vm726_vm1, %v3113_v23  ;;  %v3399_v23 = vld [vmem:[%s6328_s0 + $0x58] sm:$0xff] }
0x2376   :  { %4238 = vmatprep.mubr.msk.f32.mxu0 %vm726_vm1, %v3114_v37  ;;  %v2936_v12 = vpop.permute.xlu0 %2935  ;;  %v3115_v28 = vsel %vm918_vm3, %v2971_v60, %v3063_v11  ;;  %v3398_v11 = vld [vmem:[%s6328_s0 + $0x50] sm:$0xff] }
0x2377   :  { %2940 = vst.msk [vmem:[#allocation5 + $0x8] sm:$0xff] %vm726_vm1, %v2936_v12 }
0x2378   :  { %2943 = vst.msk [vmem:[#allocation3 + $0xb8] sm:$0xff] %vm918_vm3, %v2936_v12 }
0x2379   :  { %v3067_v49 = vpop.permute.xlu1 %3066  ;;  %4239 = vmatmul.mubr.msk.f32.gmra.mrb[48].mxu0 %vm726_vm1, %v3115_v28 }
0x237a   :  { %v3065_v25 = vpop.permute.xlu0 %3064  ;;  %v3117_v44 = vsel %vm918_vm3, %v2973_v27, %v3067_v49 }
0x237b   :  { %v3116_v42 = vsel %vm918_vm3, %v2972_v16, %v3065_v25  ;;  %v2974_v18 = vld [vmem:[#allocation3 + $0xb0] sm:$0xff]  ;;  %v3401_v16 = vld [vmem:[%s6328_s0 + $0x68] sm:$0xff] }
0x237c   :  { %4241 = vmatprep.mubr.msk.f32.mxu0 %vm726_vm1, %v3116_v42  ;;  %v3400_v42 = vld [vmem:[%s6328_s0 + $0x60] sm:$0xff] }
0x237d   :  { %v3071_v15 = vpop.permute.xlu1 %3070  ;;  %4242 = vmatmul.mubr.msk.f32.gmra.mrb[50].mxu0 %vm726_vm1, %v3117_v44 }
0x237e   :  { %v3069_v43 = vpop.permute.xlu0 %3068 }
0x237f   :  { %v2975_v39 = vld [vmem:[#allocation3 + $0xb8] sm:$0xff]  ;;  %v3118_v21 = vsel %vm918_vm3, %v2974_v18, %v3069_v43 }
0x2380   :  { %v3119_v40 = vsel %vm918_vm3, %v2975_v39, %v3071_v15  ;;  %4244 = vmatprep.mubr.msk.f32.mxu0 %vm726_vm1, %v3118_v21  ;;  %v3403_v43 = vld [vmem:[%s6328_s0 + $0x78] sm:$0xff] }
0x2381   :  { %v2926_v46 = vpop.permute.xlu1 %2925  ;;  %4245 = vmatmul.mubr.msk.f32.gmra.mrb[52].mxu0 %vm726_vm1, %v3119_v40 }
0x2382   :  { %2930 = vst.msk [vmem:[#allocation6 + $0x8] sm:$0xff] %vm726_vm1, %v2926_v46  ;;  %v2924_v9 = vpop.permute.xlu0 %2923  ;;  %v3402_v46 = vld [vmem:[%s6328_s0 + $0x70] sm:$0xff] }
0x2383   :  { %2929 = vst.msk [vmem:[#allocation6] sm:$0xff] %vm726_vm1, %v2924_v9 }
0x2428   :  { %v4213_v5 = vpop.f32.mrb[30].mxu0 }
0x2429   :  { %v3275_v50 = vadd.f32 %v4213_v5, %v5985_v2  ;;  %v3269_v20 = vpop.f32.mrb[31].mxu0 }
0x242a   :  { %v3270_v4 = vadd.f32 %v5985_v2, %v3269_v20 }
0x242b   :  { %v3413_v59 = vadd.f32 %v3389_v48, %v3275_v50  ;;  %v3405_v50 = vld [vmem:[%s6328_s0 + $0x88] sm:$0xff] }
0x242c   :  { %v3412_v33 = vadd.f32 %v3388_v54, %v3270_v4  ;;  %v4216_v3 = vpop.f32.mrb[32].mxu0  ;;  %v3404_v4 = vld [vmem:[%s6328_s0 + $0x80] sm:$0xff] }
0x242d   :  { %3437 = vst.msk [vmem:[%s6337_s10 + $0x8] sm:$0xff] %vm61_vm0, %v3413_v59  ;;  %v3285_v26 = vadd.f32 %v4216_v3, %v5985_v2  ;;  %v3279_v53 = vpop.f32.mrb[33].mxu0 }
0x242e   :  { %3436 = vst.msk [vmem:[%s6337_s10] sm:$0xff] %vm61_vm0, %v3412_v33  ;;  %v3280_v63 = vadd.f32 %v5985_v2, %v3279_v53  ;;  %4249 = vmatprep.mubr.msk.f32.mxu1 %vm61_vm0, %v3412_v33 }
0x242f   :  { %v3415_v13 = vadd.f32 %v3391_v8, %v3285_v26  ;;  %4250 = vmatmul.mubr.msk.f32.vlgmr.msra.gmra.mrb[18].mxu1 %vm61_vm0, %v3413_v59  ;;  %v3407_v26 = vld [vmem:[%s6328_s0 + $0x98] sm:$0xff] }
0x2430   :  { %v3414_v36 = vadd.f32 %v3390_v56, %v3280_v63  ;;  %v4219_v19 = vpop.f32.mrb[34].mxu0  ;;  %v3406_v63 = vld [vmem:[%s6328_s0 + $0x90] sm:$0xff] }
0x2431   :  { %3439 = vst.msk [vmem:[%s6337_s10 + $0x18] sm:$0xff] %vm61_vm0, %v3415_v13  ;;  %v3295_v10 = vadd.f32 %v4219_v19, %v5985_v2  ;;  %v3289_v57 = vpop.f32.mrb[35].mxu0 }
0x2432   :  { %3438 = vst.msk [vmem:[%s6337_s10 + $0x10] sm:$0xff] %vm61_vm0, %v3414_v36  ;;  %v3290_v34 = vadd.f32 %v5985_v2, %v3289_v57  ;;  %4252 = vmatprep.mubr.msk.f32.mxu1 %vm61_vm0, %v3414_v36 }
0x2433   :  { %v3417_v32 = vadd.f32 %v3393_v61, %v3295_v10  ;;  %4253 = vmatmul.mubr.msk.f32.gmra.mrb[20].mxu1 %vm61_vm0, %v3415_v13  ;;  %v3409_v10 = vld [vmem:[%s6328_s0 + $0xa8] sm:$0xff] }
0x2434   :  { %v3416_v47 = vadd.f32 %v3392_v29, %v3290_v34  ;;  %v4222_v24 = vpop.f32.mrb[36].mxu0  ;;  %v3408_v34 = vld [vmem:[%s6328_s0 + $0xa0] sm:$0xff] }
0x2435   :  { %3441 = vst.msk [vmem:[%s6337_s10 + $0x28] sm:$0xff] %vm61_vm0, %v3417_v32  ;;  %v3305_v62 = vadd.f32 %v4222_v24, %v5985_v2  ;;  %v3299_v45 = vpop.f32.mrb[37].mxu0 }
0x2436   :  { %3440 = vst.msk [vmem:[%s6337_s10 + $0x20] sm:$0xff] %vm61_vm0, %v3416_v47  ;;  %v3300_v1 = vadd.f32 %v5985_v2, %v3299_v45  ;;  %4255 = vmatprep.mubr.msk.f32.mxu1 %vm61_vm0, %v3416_v47 }
0x2437   :  { %v3419_v6 = vadd.f32 %v3395_v55, %v3305_v62  ;;  %4256 = vmatmul.mubr.msk.f32.gmra.mrb[22].mxu1 %vm61_vm0, %v3417_v32  ;;  %v3411_v62 = vld [vmem:[%s6328_s0 + $0xb8] sm:$0xff] }
0x2438   :  { %v3418_v0 = vadd.f32 %v3394_v58, %v3300_v1  ;;  %v4225_v14 = vpop.f32.mrb[38].mxu0  ;;  %v3410_v1 = vld [vmem:[%s6328_s0 + $0xb0] sm:$0xff] }
0x2439   :  { %3443 = vst.msk [vmem:[%s6337_s10 + $0x38] sm:$0xff] %vm61_vm0, %v3419_v6  ;;  %v3315_v52 = vadd.f32 %v4225_v14, %v5985_v2  ;;  %v3309_v38 = vpop.f32.mrb[39].mxu0 }
0x243a   :  { %3442 = vst.msk [vmem:[%s6337_s10 + $0x30] sm:$0xff] %vm61_vm0, %v3418_v0  ;;  %v3310_v31 = vadd.f32 %v5985_v2, %v3309_v38  ;;  %4258 = vmatprep.mubr.msk.f32.mxu1 %vm61_vm0, %v3418_v0 }
0x243b   :  { %v3421_v41 = vadd.f32 %v3397_v22, %v3315_v52  ;;  %4259 = vmatmul.mubr.msk.f32.gmra.mrb[24].mxu1 %vm61_vm0, %v3419_v6 }
0x243c   :  { %v3420_v7 = vadd.f32 %v3396_v30, %v3310_v31  ;;  %v4228_v17 = vpop.f32.mrb[40].mxu0 }
0x243d   :  { %3445 = vst.msk [vmem:[%s6337_s10 + $0x48] sm:$0xff] %vm61_vm0, %v3421_v41  ;;  %v3325_v51 = vadd.f32 %v4228_v17, %v5985_v2  ;;  %v3319_v37 = vpop.f32.mrb[41].mxu0 }
0x243e   :  { %3444 = vst.msk [vmem:[%s6337_s10 + $0x40] sm:$0xff] %vm61_vm0, %v3420_v7  ;;  %v3320_v12 = vadd.f32 %v5985_v2, %v3319_v37  ;;  %4261 = vmatprep.mubr.msk.f32.mxu1 %vm61_vm0, %v3420_v7 }
0x243f   :  { %v3423_v60 = vadd.f32 %v3399_v23, %v3325_v51  ;;  %4262 = vmatmul.mubr.msk.f32.gmra.mrb[26].mxu1 %vm61_vm0, %v3421_v41 }
0x2440   :  { %v3422_v28 = vadd.f32 %v3398_v11, %v3320_v12  ;;  %v4231_v49 = vpop.f32.mrb[42].mxu0 }
0x2441   :  { %3447 = vst.msk [vmem:[%s6337_s10 + $0x58] sm:$0xff] %vm61_vm0, %v3423_v60  ;;  %v3335_v25 = vadd.f32 %v4231_v49, %v5985_v2  ;;  %v3329_v27 = vpop.f32.mrb[43].mxu0 }
0x2442   :  { %3446 = vst.msk [vmem:[%s6337_s10 + $0x50] sm:$0xff] %vm61_vm0, %v3422_v28  ;;  %v3330_v44 = vadd.f32 %v5985_v2, %v3329_v27  ;;  %4264 = vmatprep.mubr.msk.f32.mxu1 %vm61_vm0, %v3422_v28 }
0x2443   :  { %v3425_v15 = vadd.f32 %v3401_v16, %v3335_v25  ;;  %4265 = vmatmul.mubr.msk.f32.gmra.mrb[28].mxu1 %vm61_vm0, %v3423_v60 }
0x2444   :  { %v3424_v39 = vadd.f32 %v3400_v42, %v3330_v44  ;;  %v4234_v18 = vpop.f32.mrb[44].mxu0 }
0x2445   :  { %3449 = vst.msk [vmem:[%s6337_s10 + $0x68] sm:$0xff] %vm61_vm0, %v3425_v15  ;;  %v3345_v40 = vadd.f32 %v4234_v18, %v5985_v2  ;;  %v3339_v21 = vpop.f32.mrb[45].mxu0 }
0x2446   :  { %3448 = vst.msk [vmem:[%s6337_s10 + $0x60] sm:$0xff] %vm61_vm0, %v3424_v39  ;;  %v3340_v9 = vadd.f32 %v5985_v2, %v3339_v21  ;;  %4267 = vmatprep.mubr.msk.f32.mxu1 %vm61_vm0, %v3424_v39 }
0x2447   :  { %v3427_v35 = vadd.f32 %v3403_v43, %v3345_v40  ;;  %4268 = vmatmul.mubr.msk.f32.gmra.mrb[30].mxu1 %vm61_vm0, %v3425_v15 }
0x2448   :  { %v3426_v5 = vadd.f32 %v3402_v46, %v3340_v9  ;;  %v4237_v48 = vpop.f32.mrb[46].mxu0 }
0x2449   :  { %3451 = vst.msk [vmem:[%s6337_s10 + $0x78] sm:$0xff] %vm61_vm0, %v3427_v35  ;;  %v3355_v20 = vadd.f32 %v4237_v48, %v5985_v2  ;;  %v3349_v54 = vpop.f32.mrb[47].mxu0 }
0x244a   :  { %3450 = vst.msk [vmem:[%s6337_s10 + $0x70] sm:$0xff] %vm61_vm0, %v3426_v5  ;;  %v3350_v59 = vadd.f32 %v5985_v2, %v3349_v54  ;;  %4270 = vmatprep.mubr.msk.f32.mxu1 %vm61_vm0, %v3426_v5 }
0x244b   :  { %v3429_v33 = vadd.f32 %v3405_v50, %v3355_v20  ;;  %4271 = vmatmul.mubr.msk.f32.gmra.mrb[32].mxu1 %vm61_vm0, %v3427_v35 }
0x244c   :  { %v3428_v3 = vadd.f32 %v3404_v4, %v3350_v59  ;;  %v4240_v8 = vpop.f32.mrb[48].mxu0 }
0x244d   :  { %3453 = vst.msk [vmem:[%s6337_s10 + $0x88] sm:$0xff] %vm61_vm0, %v3429_v33  ;;  %v3365_v53 = vadd.f32 %v4240_v8, %v5985_v2  ;;  %v3359_v56 = vpop.f32.mrb[49].mxu0 }
0x244e   :  { %3452 = vst.msk [vmem:[%s6337_s10 + $0x80] sm:$0xff] %vm61_vm0, %v3428_v3  ;;  %v3360_v13 = vadd.f32 %v5985_v2, %v3359_v56  ;;  %4273 = vmatprep.mubr.msk.f32.mxu1 %vm61_vm0, %v3428_v3 }
0x244f   :  { %v3431_v36 = vadd.f32 %v3407_v26, %v3365_v53  ;;  %4274 = vmatmul.mubr.msk.f32.gmra.mrb[34].mxu1 %vm61_vm0, %v3429_v33 }
0x2450   :  { %v3430_v19 = vadd.f32 %v3406_v63, %v3360_v13  ;;  %v4243_v61 = vpop.f32.mrb[50].mxu0 }
0x2451   :  { %3455 = vst.msk [vmem:[%s6337_s10 + $0x98] sm:$0xff] %vm61_vm0, %v3431_v36  ;;  %v3375_v57 = vadd.f32 %v4243_v61, %v5985_v2  ;;  %v3369_v29 = vpop.f32.mrb[51].mxu0 }
0x2452   :  { %3454 = vst.msk [vmem:[%s6337_s10 + $0x90] sm:$0xff] %vm61_vm0, %v3430_v19  ;;  %v3370_v32 = vadd.f32 %v5985_v2, %v3369_v29  ;;  %4276 = vmatprep.mubr.msk.f32.mxu1 %vm61_vm0, %v3430_v19 }
0x2453   :  { %v3433_v47 = vadd.f32 %v3409_v10, %v3375_v57  ;;  %4277 = vmatmul.mubr.msk.f32.gmra.mrb[36].mxu1 %vm61_vm0, %v3431_v36 }
0x2454   :  { %v3432_v24 = vadd.f32 %v3408_v34, %v3370_v32  ;;  %v4246_v55 = vpop.f32.mrb[52].mxu0 }
0x2455   :  { %3457 = vst.msk [vmem:[%s6337_s10 + $0xa8] sm:$0xff] %vm61_vm0, %v3433_v47  ;;  %v3385_v45 = vadd.f32 %v4246_v55, %v5985_v2  ;;  %v3379_v58 = vpop.f32.mrb[53].mxu0 }
0x2456   :  { %3456 = vst.msk [vmem:[%s6337_s10 + $0xa0] sm:$0xff] %vm61_vm0, %v3432_v24  ;;  %v3380_v6 = vadd.f32 %v5985_v2, %v3379_v58  ;;  %4279 = vmatprep.mubr.msk.f32.mxu1 %vm61_vm0, %v3432_v24  ;;  %v6206_v2 = vld [vmem:[%s6338_s9] ss:$0 sm:$0xff] }
0x2457   :  { %v3435_v0 = vadd.f32 %v3411_v62, %v3385_v45  ;;  %4280 = vmatmul.mubr.msk.f32.gmra.mrb[38].mxu1 %vm61_vm0, %v3433_v47 }
0x2458   :  { %v3434_v14 = vadd.f32 %v3410_v1, %v3380_v6 }
0x2459   :  { %3459 = vst.msk [vmem:[%s6337_s10 + $0xb8] sm:$0xff] %vm61_vm0, %v3435_v0 }
0x245a   :  { %3458 = vst.msk [vmem:[%s6337_s10 + $0xb0] sm:$0xff] %vm61_vm0, %v3434_v14  ;;  %4282 = vmatprep.mubr.msk.f32.mxu1 %vm61_vm0, %v3434_v14 }
0x245b   :  { %4283 = vmatmul.mubr.msk.f32.gmra.mrb[40].mxu1 %vm61_vm0, %v3435_v0 }
0x2502   :  { %v4251_v22 = vpop.f32.mrb[18].mxu1 }
0x2503   :  { %v3612_v52 = vadd.f32 %v4251_v22, %v6206_v2  ;;  %v3606_v38 = vpop.f32.mrb[19].mxu1 }
0x2504   :  { %v3607_v30 = vadd.f32 %v6206_v2, %v3606_v38 }
0x2505   :  { %3727 = vst.msk [vmem:[%s6339_s11 + $0x8] sm:$0xff] %vm3725_vm4, %v3612_v52 }
0x2506   :  { %3726 = vst.msk [vmem:[%s6339_s11] sm:$0xff] %vm3725_vm4, %v3607_v30  ;;  %v4254_v31 = vpop.f32.mrb[20].mxu1 }
0x2507   :  { %v3622_v41 = vadd.f32 %v4254_v31, %v6206_v2  ;;  %v3616_v7 = vpop.f32.mrb[21].mxu1 }
0x2508   :  { %v3617_v17 = vadd.f32 %v6206_v2, %v3616_v7 }
0x2509   :  { %3729 = vst.msk [vmem:[%s6339_s11 + $0x18] sm:$0xff] %vm3725_vm4, %v3622_v41 }
0x250a   :  { %3728 = vst.msk [vmem:[%s6339_s11 + $0x10] sm:$0xff] %vm3725_vm4, %v3617_v17  ;;  %v4257_v23 = vpop.f32.mrb[22].mxu1 }
0x250b   :  { %v3632_v51 = vadd.f32 %v4257_v23, %v6206_v2  ;;  %v3626_v37 = vpop.f32.mrb[23].mxu1 }
0x250c   :  { %v3627_v11 = vadd.f32 %v6206_v2, %v3626_v37 }
0x250d   :  { %3731 = vst.msk [vmem:[%s6339_s11 + $0x28] sm:$0xff] %vm3725_vm4, %v3632_v51 }
0x250e   :  { %3730 = vst.msk [vmem:[%s6339_s11 + $0x20] sm:$0xff] %vm3725_vm4, %v3627_v11  ;;  %v4260_v12 = vpop.f32.mrb[24].mxu1 }
0x250f   :  { %v3642_v60 = vadd.f32 %v4260_v12, %v6206_v2  ;;  %v3636_v28 = vpop.f32.mrb[25].mxu1 }
0x2510   :  { %v3637_v49 = vadd.f32 %v6206_v2, %v3636_v28 }
0x2511   :  { %3733 = vst.msk [vmem:[%s6339_s11 + $0x38] sm:$0xff] %vm3725_vm4, %v3642_v60 }
0x2512   :  { %3732 = vst.msk [vmem:[%s6339_s11 + $0x30] sm:$0xff] %vm3725_vm4, %v3637_v49  ;;  %v4263_v16 = vpop.f32.mrb[26].mxu1 }
0x2513   :  { %v3652_v25 = vadd.f32 %v4263_v16, %v6206_v2  ;;  %v3646_v27 = vpop.f32.mrb[27].mxu1 }
0x2514   :  { %v3647_v42 = vadd.f32 %v6206_v2, %v3646_v27 }
0x2515   :  { %3735 = vst.msk [vmem:[%s6339_s11 + $0x48] sm:$0xff] %vm3725_vm4, %v3652_v25 }
0x2516   :  { %3734 = vst.msk [vmem:[%s6339_s11 + $0x40] sm:$0xff] %vm3725_vm4, %v3647_v42  ;;  %v4266_v44 = vpop.f32.mrb[28].mxu1 }
0x2517   :  { %v3662_v15 = vadd.f32 %v4266_v44, %v6206_v2  ;;  %v3656_v39 = vpop.f32.mrb[29].mxu1 }
0x2518   :  { %v3657_v18 = vadd.f32 %v6206_v2, %v3656_v39 }
0x2519   :  { %3737 = vst.msk [vmem:[%s6339_s11 + $0x58] sm:$0xff] %vm3725_vm4, %v3662_v15 }
0x251a   :  { %3736 = vst.msk [vmem:[%s6339_s11 + $0x50] sm:$0xff] %vm3725_vm4, %v3657_v18  ;;  %v4269_v43 = vpop.f32.mrb[30].mxu1 }
0x251b   :  { %v3672_v40 = vadd.f32 %v4269_v43, %v6206_v2  ;;  %v3666_v21 = vpop.f32.mrb[31].mxu1 }
0x251c   :  { %v3667_v46 = vadd.f32 %v6206_v2, %v3666_v21 }
0x251d   :  { %3739 = vst.msk [vmem:[%s6339_s11 + $0x68] sm:$0xff] %vm3725_vm4, %v3672_v40 }
0x251e   :  { %3738 = vst.msk [vmem:[%s6339_s11 + $0x60] sm:$0xff] %vm3725_vm4, %v3667_v46  ;;  %v4272_v9 = vpop.f32.mrb[32].mxu1 }
0x251f   :  { %v3682_v35 = vadd.f32 %v4272_v9, %v6206_v2  ;;  %v3676_v5 = vpop.f32.mrb[33].mxu1 }
0x2520   :  { %v3677_v48 = vadd.f32 %v6206_v2, %v3676_v5 }
0x2521   :  { %3741 = vst.msk [vmem:[%s6339_s11 + $0x78] sm:$0xff] %vm3725_vm4, %v3682_v35 }
0x2522   :  { %3740 = vst.msk [vmem:[%s6339_s11 + $0x70] sm:$0xff] %vm3725_vm4, %v3677_v48  ;;  %v4275_v50 = vpop.f32.mrb[34].mxu1 }
0x2523   :  { %v3692_v20 = vadd.f32 %v4275_v50, %v6206_v2  ;;  %v3686_v54 = vpop.f32.mrb[35].mxu1 }
0x2524   :  { %v3687_v4 = vadd.f32 %v6206_v2, %v3686_v54 }
0x2525   :  { %3743 = vst.msk [vmem:[%s6339_s11 + $0x88] sm:$0xff] %vm3725_vm4, %v3692_v20 }
0x2526   :  { %3742 = vst.msk [vmem:[%s6339_s11 + $0x80] sm:$0xff] %vm3725_vm4, %v3687_v4  ;;  %v4278_v59 = vpop.f32.mrb[36].mxu1 }
0x2527   :  { %v3702_v33 = vadd.f32 %v4278_v59, %v6206_v2  ;;  %v3696_v3 = vpop.f32.mrb[37].mxu1 }
0x2528   :  { %v3697_v8 = vadd.f32 %v6206_v2, %v3696_v3 }
0x2529   :  { %3745 = vst.msk [vmem:[%s6339_s11 + $0x98] sm:$0xff] %vm3725_vm4, %v3702_v33 }
0x252a   :  { %3744 = vst.msk [vmem:[%s6339_s11 + $0x90] sm:$0xff] %vm3725_vm4, %v3697_v8  ;;  %v4281_v26 = vpop.f32.mrb[38].mxu1 }
0x252b   :  { %v3712_v53 = vadd.f32 %v4281_v26, %v6206_v2  ;;  %v3706_v56 = vpop.f32.mrb[39].mxu1 }
0x252c   :  { %v3707_v63 = vadd.f32 %v6206_v2, %v3706_v56 }
0x252d   :  { %3747 = vst.msk [vmem:[%s6339_s11 + $0xa8] sm:$0xff] %vm3725_vm4, %v3712_v53 }
0x252e   :  { %3746 = vst.msk [vmem:[%s6339_s11 + $0xa0] sm:$0xff] %vm3725_vm4, %v3707_v63  ;;  %v4284_v13 = vpop.f32.mrb[40].mxu1 }
0x252f   :  { %v3722_v36 = vadd.f32 %v4284_v13, %v6206_v2  ;;  %v3716_v19 = vpop.f32.mrb[41].mxu1 }
0x2530   :  { %v3717_v61 = vadd.f32 %v6206_v2, %v3716_v19 }
0x2531   :  { %3749 = vst.msk [vmem:[%s6339_s11 + $0xb8] sm:$0xff] %vm3725_vm4, %v3722_v36 }
0x2532   :  { %3748 = vst.msk [vmem:[%s6339_s11 + $0xb0] sm:$0xff] %vm3725_vm4, %v3717_v61 }

// kernel: gridnet_v2_block.4
= control target key start
LH: loop header
LB: loop body
LE: loop exit
PB: predicated region body
PF: predicated region fallthrough
CT: control target
= control target key end

     0   :  { %vm53_vm0 = vcmask 64512   ;;  %vm718_vm1 = vcmask 261120   ;;  %vm3907_vm2 = vmmov 0   ;;  %s3908_s30 = smov 64   ;;  %s3909_s9 = smov 32   ;;  %vm963_vm4 = vcmask 130048   ;;  %s5388_s0 = inlined_call_operand.vmem [shape: f32[8,24,8], index: 0, kind: input, shape index: {}]   ;;  %s5389_s3 = inlined_call_operand.vmem [shape: f32[8,128], index: 3, kind: input, shape index: {}]   ;;  %s5390_s1 = inlined_call_operand.vmem [shape: f32[1,8], index: 1, kind: input, shape index: {}]   ;;  %s5391_s2 = inlined_call_operand.vmem [shape: f32[1,8], index: 2, kind: input, shape index: {}]   ;;  %s5392_s5 = inlined_call_operand.vmem [shape: f32[32,128], index: 5, kind: input, shape index: {}]   ;;  %s5393_s4 = inlined_call_operand.vmem [shape: f32[1,128], index: 4, kind: input, shape index: {}]   ;;  %s5394_s6 = inlined_call_operand.vmem [shape: f32[32,8], index: 6, kind: input, shape index: {}]   ;;  %s5395_s7 = inlined_call_operand.vmem [shape: f32[1,8], index: 7, kind: input, shape index: {}]   ;;  %s5396_s8 = inlined_call_operand.vmem [shape: f32[8,24,8], index: 8, kind: output, shape index: {}]  }
   0x1   :  { %v41_v0 = vld [vmem:[%s5388_s0 + $0x60] sm:$0xff]  ;;  %v43_v1 = vld [vmem:[%s5388_s0 + $0x70] sm:$0xff]  ;;  %v42_v2 = vld [vmem:[%s5388_s0 + $0x68] sm:$0xff]  ;;  %s3910_s14 = smov 96  }
   0x2   :  { %v90_v3 = vsel %vm53_vm0, %v41_v0, 0.0  ;;  %v96_v4 = vsel %vm53_vm0, %v43_v1, 0.0  ;;  %v44_v5 = vld [vmem:[%s5388_s0 + $0x78] sm:$0xff]  ;;  %v93_v6 = vsel %vm53_vm0, %v42_v2, 0.0  ;;  %v45_v8 = vld [vmem:[%s5388_s0 + $0x80] sm:$0xff]  ;;  %v46_v9 = vld [vmem:[%s5388_s0 + $0x88] sm:$0xff] }
   0x3   :  { %91 = vadd.xlane.f32.xlu0 %v90_v3  ;;  %97 = vadd.xlane.f32.xlu1 %v96_v4  ;;  %v99_v7 = vsel %vm53_vm0, %v44_v5, 0.0  ;;  %v102_v10 = vsel %vm53_vm0, %v45_v8, 0.0  ;;  %v105_v11 = vsel %vm53_vm0, %v46_v9, 0.0  ;;  %v3984_v12 = vld [vmem:[%s5388_s0 + $0x90] sm:$0xff]  ;;  %v3989_v13 = vld [vmem:[%s5388_s0 + $0x98] sm:$0xff]  ;;  %v3998_v16 = vld [vmem:[%s5388_s0 + $0xa0] sm:$0xff] }
   0x4   :  { %v108_v14 = vsel %vm53_vm0, %v3984_v12, 0.0  ;;  %v111_v15 = vsel %vm53_vm0, %v3989_v13, 0.0  ;;  %v4003_v17 = vld [vmem:[%s5388_s0 + $0xa8] sm:$0xff]  ;;  %v114_v18 = vsel %vm53_vm0, %v3998_v16, 0.0  ;;  %v4012_v20 = vld [vmem:[%s5388_s0] sm:$0xff]  ;;  %v4017_v21 = vld [vmem:[%s5388_s0 + $0xb0] sm:$0xff] }
   0x5   :  { %v117_v19 = vsel %vm53_vm0, %v4003_v17, 0.0  ;;  %v54_v22 = vsel %vm53_vm0, %v4012_v20, 0.0  ;;  %v120_v23 = vsel %vm53_vm0, %v4017_v21, 0.0  ;;  %v4026_v24 = vld [vmem:[%s5388_s0 + $0x8] sm:$0xff]  ;;  %v4031_v25 = vld [vmem:[%s5388_s0 + $0xb8] sm:$0xff]  ;;  %v4040_v28 = vld [vmem:[%s5388_s0 + $0x10] sm:$0xff] }
   0x6   :  { %v57_v26 = vsel %vm53_vm0, %v4026_v24, 0.0  ;;  %v123_v27 = vsel %vm53_vm0, %v4031_v25, 0.0  ;;  %v4045_v29 = vld [vmem:[%s5388_s0 + $0x18] sm:$0xff]  ;;  %v60_v30 = vsel %vm53_vm0, %v4040_v28, 0.0 }
   0x7   :  { %94 = vadd.xlane.f32.xlu0 %v93_v6  ;;  %100 = vadd.xlane.f32.xlu1 %v99_v7  ;;  %v63_v31 = vsel %vm53_vm0, %v4045_v29, 0.0 }
   0xb   :  { %103 = vadd.xlane.f32.xlu0 %v102_v10  ;;  %106 = vadd.xlane.f32.xlu1 %v105_v11 }
   0xf   :  { %109 = vadd.xlane.f32.xlu0 %v108_v14  ;;  %112 = vadd.xlane.f32.xlu1 %v111_v15 }
  0x13   :  { %115 = vadd.xlane.f32.xlu0 %v114_v18  ;;  %118 = vadd.xlane.f32.xlu1 %v117_v19 }
  0x17   :  { %55 = vadd.xlane.f32.xlu0 %v54_v22  ;;  %121 = vadd.xlane.f32.xlu1 %v120_v23 }
  0x1b   :  { %58 = vadd.xlane.f32.xlu0 %v57_v26  ;;  %124 = vadd.xlane.f32.xlu1 %v123_v27 }
  0x1f   :  { %61 = vadd.xlane.f32.xlu0 %v60_v30  ;;  %64 = vadd.xlane.f32.xlu1 %v63_v31 }
  0x90   :  { %v92_v32 = vpop.xlane.xlu0 %91  ;;  %v98_v33 = vpop.xlane.xlu1 %97 }
  0x91   :  { %v139_v34 = vmul.f32 0.125, %v92_v32  ;;  %v141_v35 = vmul.f32 0.125, %v98_v33 }
  0x93   :  { %v4051_v36 = vsub.f32 %v41_v0, %v139_v34  ;;  %v4053_v37 = vsub.f32 %v43_v1, %v141_v35 }
  0x94   :  { %v95_v38 = vpop.xlane.xlu0 %94  ;;  %v101_v39 = vpop.xlane.xlu1 %100 }
  0x95   :  { %v140_v40 = vmul.f32 0.125, %v95_v38  ;;  %v142_v41 = vmul.f32 0.125, %v101_v39  ;;  %v187_v42 = vmul.f32 %v4051_v36, %v4051_v36  ;;  %v189_v43 = vmul.f32 %v4053_v37, %v4053_v37 }
  0x97   :  { %v4059_v44 = vsub.f32 %v42_v2, %v140_v40  ;;  %v4061_v45 = vsub.f32 %v44_v5, %v142_v41  ;;  %v235_v46 = vsel %vm53_vm0, %v187_v42, 0.0  ;;  %v241_v49 = vsel %vm53_vm0, %v189_v43, 0.0 }
  0x98   :  { %v104_v47 = vpop.xlane.xlu0 %103  ;;  %236 = vadd.xlane.f32.xlu0 %v235_v46  ;;  %v107_v48 = vpop.xlane.xlu1 %106 }
  0x99   :  { %v143_v50 = vmul.f32 0.125, %v104_v47  ;;  %v144_v51 = vmul.f32 0.125, %v107_v48  ;;  %v188_v52 = vmul.f32 %v4059_v44, %v4059_v44  ;;  %v190_v53 = vmul.f32 %v4061_v45, %v4061_v45 }
  0x9b   :  { %v4069_v54 = vsub.f32 %v45_v8, %v143_v50  ;;  %v4071_v55 = vsub.f32 %v46_v9, %v144_v51  ;;  %v238_v56 = vsel %vm53_vm0, %v188_v52, 0.0  ;;  %v244_v59 = vsel %vm53_vm0, %v190_v53, 0.0 }
  0x9c   :  { %v110_v57 = vpop.xlane.xlu0 %109  ;;  %239 = vadd.xlane.f32.xlu1 %v238_v56  ;;  %242 = vadd.xlane.f32.xlu0 %v241_v49  ;;  %v113_v58 = vpop.xlane.xlu1 %112  ;;  %v3905_v53 = vmov 0.0|0.0   ;;  %v3906_v56 = vmov 0.0  }
  0x9d   :  { %v145_v60 = vmul.f32 0.125, %v110_v57  ;;  %v146_v61 = vmul.f32 0.125, %v113_v58  ;;  %v191_v62 = vmul.f32 %v4069_v54, %v4069_v54  ;;  %v192_v63 = vmul.f32 %v4071_v55, %v4071_v55  ;;  %719 = vst.msk [vmem:[#allocation5] sm:$0xff] %vm718_vm1, %v3906_v56  ;;  %720 = vst.msk [vmem:[#allocation5 + $0x8] sm:$0xff] %vm718_vm1, %v3906_v56 }
  0x9e   :  { %721 = vst.msk [vmem:[#allocation5 + $0x10] sm:$0xff] %vm718_vm1, %v3906_v56  ;;  %722 = vst.msk [vmem:[#allocation6] sm:$0xff] %vm718_vm1, %v3906_v56 }
  0x9f   :  { %v4080_v0 = vsub.f32 %v3984_v12, %v145_v60  ;;  %v4083_v1 = vsub.f32 %v3989_v13, %v146_v61  ;;  %v247_v2 = vsel %vm53_vm0, %v191_v62, 0.0  ;;  %v250_v5 = vsel %vm53_vm0, %v192_v63, 0.0  ;;  %723 = vst.msk [vmem:[#allocation6 + $0x8] sm:$0xff] %vm718_vm1, %v3906_v56  ;;  %724 = vst.msk [vmem:[#allocation6 + $0x10] sm:$0xff] %vm718_vm1, %v3906_v56 }
  0xa0   :  { %v116_v3 = vpop.xlane.xlu0 %115  ;;  %245 = vadd.xlane.f32.xlu1 %v244_v59  ;;  %248 = vadd.xlane.f32.xlu0 %v247_v2  ;;  %v119_v4 = vpop.xlane.xlu1 %118 }
  0xa1   :  { %v147_v6 = vmul.f32 0.125, %v116_v3  ;;  %v148_v7 = vmul.f32 0.125, %v119_v4  ;;  %v193_v8 = vmul.f32 %v4080_v0, %v4080_v0  ;;  %v194_v9 = vmul.f32 %v4083_v1, %v4083_v1 }
  0xa3   :  { %v4092_v10 = vsub.f32 %v3998_v16, %v147_v6  ;;  %v4095_v11 = vsub.f32 %v4003_v17, %v148_v7  ;;  %v253_v12 = vsel %vm53_vm0, %v193_v8, 0.0  ;;  %v256_v15 = vsel %vm53_vm0, %v194_v9, 0.0 }
  0xa4   :  { %251 = vadd.xlane.f32.xlu1 %v250_v5  ;;  %254 = vadd.xlane.f32.xlu0 %v253_v12  ;;  %v56_v13 = vpop.xlane.xlu0 %55  ;;  %v122_v14 = vpop.xlane.xlu1 %121 }
  0xa5   :  { %v127_v18 = vmul.f32 0.125, %v56_v13  ;;  %v149_v19 = vmul.f32 0.125, %v122_v14  ;;  %v195_v22 = vmul.f32 %v4092_v10, %v4092_v10  ;;  %v196_v16 = vmul.f32 %v4095_v11, %v4095_v11 }
  0xa7   :  { %v4104_v23 = vsub.f32 %v4012_v20, %v127_v18  ;;  %v4107_v17 = vsub.f32 %v4017_v21, %v149_v19  ;;  %v259_v26 = vsel %vm53_vm0, %v195_v22, 0.0  ;;  %v262_v31 = vsel %vm53_vm0, %v196_v16, 0.0  ;;  %v4161_v16 = vld [vmem:[%s5390_s1] ss:$0 sm:$0xff] }
  0xa8   :  { %257 = vadd.xlane.f32.xlu1 %v256_v15  ;;  %260 = vadd.xlane.f32.xlu0 %v259_v26  ;;  %v59_v27 = vpop.xlane.xlu0 %58  ;;  %v125_v30 = vpop.xlane.xlu1 %124 }
  0xa9   :  { %v128_v32 = vmul.f32 0.125, %v59_v27  ;;  %v150_v33 = vmul.f32 0.125, %v125_v30  ;;  %v175_v34 = vmul.f32 %v4104_v23, %v4104_v23  ;;  %v197_v20 = vmul.f32 %v4107_v17, %v4107_v17 }
  0xab   :  { %v4116_v35 = vsub.f32 %v4026_v24, %v128_v32  ;;  %v4119_v21 = vsub.f32 %v4031_v25, %v150_v33  ;;  %v199_v38 = vsel %vm53_vm0, %v175_v34, 0.0  ;;  %v265_v40 = vsel %vm53_vm0, %v197_v20, 0.0  ;;  %v4167_v33 = vld [vmem:[%s5391_s2] ss:$0 sm:$0xff] }
  0xac   :  { %263 = vadd.xlane.f32.xlu1 %v262_v31  ;;  %200 = vadd.xlane.f32.xlu0 %v199_v38  ;;  %v62_v39 = vpop.xlane.xlu0 %61  ;;  %v65_v41 = vpop.xlane.xlu1 %64 }
  0xad   :  { %v129_v42 = vmul.f32 0.125, %v62_v39  ;;  %v130_v43 = vmul.f32 0.125, %v65_v41  ;;  %v176_v46 = vmul.f32 %v4116_v35, %v4116_v35  ;;  %v198_v24 = vmul.f32 %v4119_v21, %v4119_v21 }
  0xaf   :  { %v4128_v47 = vsub.f32 %v4040_v28, %v129_v42  ;;  %v4131_v25 = vsub.f32 %v4045_v29, %v130_v43  ;;  %v202_v48 = vsel %vm53_vm0, %v176_v46, 0.0  ;;  %v268_v49 = vsel %vm53_vm0, %v198_v24, 0.0  ;;  %v429_v29 = vld [vmem:[%s5389_s3] sm:$0xff]  ;;  %v744_v24 = vld [vmem:[%s5392_s5 + $0x8] sm:$0xff] }
  0xb0   :  { %266 = vadd.xlane.f32.xlu1 %v265_v40  ;;  %203 = vadd.xlane.f32.xlu0 %v202_v48  ;;  %v743_v46 = vld [vmem:[%s5392_s5] sm:$0xff] }
  0xb1   :  { %v177_v50 = vmul.f32 %v4128_v47, %v4128_v47  ;;  %v178_v51 = vmul.f32 %v4131_v25, %v4131_v25  ;;  %3653 = vmatprep.subr.mxu1 %v429_v29  ;;  %3379 = vmatprep.subr.mxu0 %v429_v29 }
  0xb2   :  { %3654 = vmatpush3.msra.mxu1 %v429_v29  ;;  %3380 = vmatpush3.msra.mxu0 %v429_v29 }
  0xb3   :  { %v205_v52 = vsel %vm53_vm0, %v177_v50, 0.0  ;;  %v208_v28 = vsel %vm53_vm0, %v178_v51, 0.0  ;;  %3597 = vmatprep.subr.bf16.mxu1 %v3905_v53  ;;  %3621 = vmatprep.subr.bf16.mxu0 %v3905_v53 }
  0xb4   :  { %269 = vadd.xlane.f32.xlu1 %v268_v49  ;;  %206 = vadd.xlane.f32.xlu0 %v205_v52 }
  0xb8   :  { %209 = vadd.xlane.f32.xlu1 %v208_v28 }
 0x125   :  { %v237_v57 = vpop.xlane.xlu0 %236 }
 0x126   :  { %v283_v58 = vmul.f32 0.125, %v237_v57  ;;  %v4182_v57 = vpack.c.bf16 %v744_v24, %v743_v46 }
 0x128   :  { %v307_v59 = vadd.f32 1e-05, %v283_v58 }
 0x129   :  { %v240_v60 = vpop.xlane.xlu1 %239  ;;  %v243_v61 = vpop.xlane.xlu0 %242 }
 0x12a   :  { %3662 = vrsqrt.f32 %v307_v59  ;;  %v284_v62 = vmul.f32 0.125, %v240_v60  ;;  %v285_v63 = vmul.f32 0.125, %v243_v61 }
 0x12c   :  { %v308_v2 = vadd.f32 1e-05, %v284_v62  ;;  %v309_v3 = vadd.f32 1e-05, %v285_v63  ;;  %v746_v63 = vld [vmem:[%s5392_s5 + $0x18] sm:$0xff] }
 0x12d   :  { %v246_v4 = vpop.xlane.xlu1 %245  ;;  %v249_v5 = vpop.xlane.xlu0 %248 }
 0x12e   :  { %3664 = vrsqrt.f32 %v308_v2  ;;  %v286_v6 = vmul.f32 0.125, %v246_v4  ;;  %v287_v7 = vmul.f32 0.125, %v249_v5 }
 0x12f   :  { %3666 = vrsqrt.f32 %v309_v3 }
 0x130   :  { %v310_v8 = vadd.f32 1e-05, %v286_v6  ;;  %v311_v9 = vadd.f32 1e-05, %v287_v7 }
 0x131   :  { %v252_v12 = vpop.xlane.xlu1 %251  ;;  %v255_v13 = vpop.xlane.xlu0 %254 }
 0x132   :  { %3668 = vrsqrt.f32 %v310_v8  ;;  %v288_v14 = vmul.f32 0.125, %v252_v12  ;;  %v289_v15 = vmul.f32 0.125, %v255_v13 }
 0x133   :  { %3670 = vrsqrt.f32 %v311_v9 }
 0x134   :  { %v3663_v18 = vpop.eup %3662  ;;  %v312_v19 = vadd.f32 1e-05, %v288_v14  ;;  %v313_v22 = vadd.f32 1e-05, %v289_v15 }
 0x135   :  { %v258_v26 = vpop.xlane.xlu1 %257  ;;  %v261_v27 = vpop.xlane.xlu0 %260  ;;  %v355_v30 = vmul.f32 %v3663_v18, %v4051_v36 }
 0x136   :  { %3672 = vrsqrt.f32 %v312_v19  ;;  %v290_v31 = vmul.f32 0.125, %v258_v26  ;;  %v291_v32 = vmul.f32 0.125, %v261_v27 }
 0x137   :  { %3674 = vrsqrt.f32 %v313_v22  ;;  %v386_v34 = vmul.f32 %v4161_v16, %v355_v30 }
 0x138   :  { %v3665_v20 = vpop.eup %3664  ;;  %v314_v38 = vadd.f32 1e-05, %v290_v31  ;;  %v315_v39 = vadd.f32 1e-05, %v291_v32 }
 0x139   :  { %v3667_v40 = vpop.eup %3666  ;;  %v264_v41 = vpop.xlane.xlu1 %263  ;;  %v417_v43 = vadd.f32 %v4167_v33, %v386_v34  ;;  %v356_v36 = vmul.f32 %v3665_v20, %v4059_v44 }
 0x13a   :  { %v201_v42 = vpop.xlane.xlu0 %200  ;;  %3676 = vrsqrt.f32 %v314_v38  ;;  %v292_v48 = vmul.f32 0.125, %v264_v41  ;;  %v357_v50 = vmul.f32 %v3667_v40, %v4053_v37  ;;  %v745_v37 = vld [vmem:[%s5392_s5 + $0x10] sm:$0xff] }
 0x13b   :  { %v271_v49 = vmul.f32 0.125, %v201_v42  ;;  %3678 = vrsqrt.f32 %v315_v39  ;;  %3399 = vmatprep.mubr.msk.f32.mxu1 %vm53_vm0, %v417_v43  ;;  %v387_v51 = vmul.f32 %v4161_v16, %v356_v36  ;;  %v4198_v9 = vpack.c.bf16 %v746_v63, %v745_v37 }
 0x13c   :  { %v3669_v52 = vpop.eup %3668  ;;  %v316_v44 = vadd.f32 1e-05, %v292_v48  ;;  %v388_v29 = vmul.f32 %v4161_v16, %v357_v50 }
 0x13d   :  { %v295_v28 = vadd.f32 1e-05, %v271_v49  ;;  %v3671_v58 = vpop.eup %3670  ;;  %v267_v59 = vpop.xlane.xlu1 %266  ;;  %v418_v61 = vadd.f32 %v4167_v33, %v387_v51  ;;  %v358_v62 = vmul.f32 %v3669_v52, %v4061_v45 }
 0x13e   :  { %v204_v60 = vpop.xlane.xlu0 %203  ;;  %3680 = vrsqrt.f32 %v316_v44  ;;  %v293_v2 = vmul.f32 0.125, %v267_v59  ;;  %v419_v4 = vadd.f32 %v4167_v33, %v388_v29  ;;  %v359_v45 = vmul.f32 %v3671_v58, %v4069_v54 }
 0x13f   :  { %v272_v3 = vmul.f32 0.125, %v204_v60  ;;  %3682 = vrsqrt.f32 %v295_v28  ;;  %3400 = vmatmul.mubr.msk.f32.vlgmr.msra.gmra.mrb[0].mxu1 %vm53_vm0, %v418_v61  ;;  %v389_v5 = vmul.f32 %v4161_v16, %v358_v62 }
 0x140   :  { %v3673_v6 = vpop.eup %3672  ;;  %v317_v7 = vadd.f32 1e-05, %v293_v2  ;;  %3402 = vmatprep.mubr.msk.f32.mxu1 %vm53_vm0, %v419_v4  ;;  %3599 = vmatpush3.bf16.msra.mxu1 %v4182_v57  ;;  %v390_v18 = vmul.f32 %v4161_v16, %v359_v45 }
 0x141   :  { %v296_v8 = vadd.f32 1e-05, %v272_v3  ;;  %v3675_v12 = vpop.eup %3674  ;;  %v270_v13 = vpop.xlane.xlu1 %269  ;;  %v420_v15 = vadd.f32 %v4167_v33, %v389_v5  ;;  %v360_v19 = vmul.f32 %v3673_v6, %v4071_v55  ;;  %3600 = vmatprep.subr.bf16.mxu1 %v3905_v53 }
 0x142   :  { %v207_v14 = vpop.xlane.xlu0 %206  ;;  %3684 = vrsqrt.f32 %v317_v7  ;;  %v294_v54 = vmul.f32 0.125, %v270_v13  ;;  %v361_v26 = vmul.f32 %v3675_v12, %v4080_v0  ;;  %v421_v27 = vadd.f32 %v4167_v33, %v390_v18 }
 0x143   :  { %v273_v22 = vmul.f32 0.125, %v207_v14  ;;  %3686 = vrsqrt.f32 %v296_v8  ;;  %3403 = vmatmul.mubr.msk.f32.gmra.mrb[2].mxu1 %vm53_vm0, %v420_v15  ;;  %v391_v30 = vmul.f32 %v4161_v16, %v360_v19  ;;  %v742_v8 = vld [vmem:[#allocation5 + $0x10] sm:$0xff] }
 0x144   :  { %v3677_v31 = vpop.eup %3676  ;;  %v318_v32 = vadd.f32 1e-05, %v294_v54  ;;  %v392_v20 = vmul.f32 %v4161_v16, %v361_v26  ;;  %3602 = vmatpush3.bf16.msra.mxu1 %v4198_v9  ;;  %3405 = vmatprep.mubr.msk.f32.mxu1 %vm53_vm0, %v421_v27  ;;  %v725_v54 = vlaneseq }
 0x145   :  { %v297_v34 = vadd.f32 1e-05, %v273_v22  ;;  %v3679_v55 = vpop.eup %3678  ;;  %v210_v38 = vpop.xlane.xlu1 %209  ;;  %v422_v0 = vadd.f32 %v4167_v33, %v391_v30  ;;  %v362_v39 = vmul.f32 %v3677_v31, %v4083_v1  ;;  %3603 = vmatprep.subr.bf16.mxu1 %v3905_v53 }
 0x146   :  { %3688 = vrsqrt.f32 %v318_v32  ;;  %v274_v40 = vmul.f32 0.125, %v210_v38  ;;  %v423_v41 = vadd.f32 %v4167_v33, %v392_v20  ;;  %v363_v42 = vmul.f32 %v3679_v55, %v4092_v10  ;;  %v4286_v20 = vld [vmem:[%s5393_s4] ss:$0 sm:$0xff] }
 0x147   :  { %3690 = vrsqrt.f32 %v297_v34  ;;  %3406 = vmatmul.mubr.msk.f32.gmra.mrb[4].mxu1 %vm53_vm0, %v422_v0  ;;  %v393_v43 = vmul.f32 %v4161_v16, %v362_v39  ;;  %v726_v27 = vand.u32 127, %v725_v54 }
 0x148   :  { %v3681_v36 = vpop.eup %3680  ;;  %v298_v46 = vadd.f32 1e-05, %v274_v40  ;;  %3408 = vmatprep.mubr.msk.f32.mxu1 %vm53_vm0, %v423_v41  ;;  %v394_v24 = vmul.f32 %v4161_v16, %v363_v42 }
 0x149   :  { %v3683_v1 = vpop.eup %3682  ;;  %v424_v48 = vadd.f32 %v4167_v33, %v393_v43  ;;  %v364_v49 = vmul.f32 %v3681_v36, %v4095_v11  ;;  %v731_v32 = vand.u32 31, %v726_v27 }
 0x14a   :  { %3692 = vrsqrt.f32 %v298_v46  ;;  %v425_v50 = vadd.f32 %v4167_v33, %v394_v24  ;;  %v343_v10 = vmul.f32 %v3683_v1, %v4104_v23 }
 0x14b   :  { %3409 = vmatmul.mubr.msk.f32.gmra.mrb[6].mxu1 %vm53_vm0, %v424_v48  ;;  %v395_v51 = vmul.f32 %v4161_v16, %v364_v49  ;;  %vm4288_vm3 = vcmp.lt.s32.totalorder %v731_v32, 16 }
 0x14c   :  { %v3685_v52 = vpop.eup %3684  ;;  %3411 = vmatprep.mubr.msk.f32.mxu1 %vm53_vm0, %v425_v50  ;;  %v374_v44 = vmul.f32 %v4161_v16, %v343_v10 }
 0x14d   :  { %v3687_v28 = vpop.eup %3686  ;;  %v426_v29 = vadd.f32 %v4167_v33, %v395_v51  ;;  %v365_v58 = vmul.f32 %v3685_v52, %v4107_v17 }
 0x14e   :  { %v405_v11 = vadd.f32 %v4167_v33, %v374_v44  ;;  %v344_v59 = vmul.f32 %v3687_v28, %v4116_v35 }
 0x14f   :  { %3412 = vmatmul.mubr.msk.f32.gmra.mrb[8].mxu1 %vm53_vm0, %v426_v29  ;;  %v396_v23 = vmul.f32 %v4161_v16, %v365_v58 }
 0x150   :  { %v3689_v60 = vpop.eup %3688  ;;  %3381 = vmatprep.mubr.msk.f32.mxu0 %vm53_vm0, %v405_v11  ;;  %v375_v61 = vmul.f32 %v4161_v16, %v344_v59 }
 0x151   :  { %v3691_v62 = vpop.eup %3690  ;;  %v427_v37 = vadd.f32 %v4167_v33, %v396_v23  ;;  %v366_v63 = vmul.f32 %v3689_v60, %v4119_v21 }
 0x152   :  { %v406_v17 = vadd.f32 %v4167_v33, %v375_v61  ;;  %v345_v2 = vmul.f32 %v3691_v62, %v4128_v47  ;;  %v740_v47 = vld [vmem:[#allocation5] sm:$0xff] }
 0x153   :  { %3414 = vmatprep.mubr.msk.f32.mxu1 %vm53_vm0, %v427_v37  ;;  %v397_v35 = vmul.f32 %v4161_v16, %v366_v63 }
 0x154   :  { %v3693_v3 = vpop.eup %3692  ;;  %3382 = vmatmul.mubr.msk.f32.vlgmr.msra.gmra.mrb[0].mxu0 %vm53_vm0, %v406_v17  ;;  %v376_v4 = vmul.f32 %v4161_v16, %v345_v2 }
 0x155   :  { %v428_v5 = vadd.f32 %v4167_v33, %v397_v35  ;;  %v346_v45 = vmul.f32 %v3693_v3, %v4131_v25  ;;  %v741_v25 = vld [vmem:[#allocation5 + $0x8] sm:$0xff] }
 0x156   :  { %v407_v6 = vadd.f32 %v4167_v33, %v376_v4  ;;  %v867_v4 = vld [vmem:[#allocation6] sm:$0xff] }
 0x157   :  { %3415 = vmatmul.mubr.msk.f32.gmra.mrb[10].mxu1 %vm53_vm0, %v428_v5  ;;  %v377_v21 = vmul.f32 %v4161_v16, %v346_v45  ;;  %v868_v5 = vld [vmem:[#allocation6 + $0x8] sm:$0xff]  ;;  %v869_v45 = vld [vmem:[#allocation6 + $0x10] sm:$0xff] }
 0x158   :  { %3384 = vmatprep.mubr.msk.f32.mxu0 %vm53_vm0, %v407_v6  ;;  %3425 = vmatprep.mubr.msk.f32.mxu1 %vm3907_vm2, %v3906_v56  ;;  %v33_v6 = vld [vmem:[%s5388_s0 + $0x20] sm:$0xff] }
 0x159   :  { %v408_v7 = vadd.f32 %v4167_v33, %v377_v21  ;;  %v66_v21 = vsel %vm53_vm0, %v33_v6, 0.0 }
 0x15b   :  { %3385 = vmatmul.mubr.msk.f32.gmra.mrb[2].mxu0 %vm53_vm0, %v408_v7  ;;  %3426 = vmatmul.mubr.msk.f32.vlgmr.msra.gmra.mrb[12].mxu1 %vm718_vm1, %v740_v47 }
 0x15c   :  { %3428 = vmatprep.mubr.msk.f32.mxu1 %vm3907_vm2, %v3906_v56  ;;  %3605 = vmatpush3.bf16.msra.mxu1 %v4182_v57 }
 0x15d   :  { %3606 = vmatprep.subr.bf16.mxu1 %v3905_v53 }
 0x15f   :  { %3429 = vmatmul.mubr.msk.f32.gmra.mrb[14].mxu1 %vm718_vm1, %v741_v25 }
 0x160   :  { %3431 = vmatprep.mubr.msk.f32.mxu1 %vm3907_vm2, %v3906_v56  ;;  %3608 = vmatpush3.bf16.msra.mxu1 %v4198_v9 }
 0x161   :  { %3609 = vmatprep.subr.bf16.mxu1 %v3905_v53 }
 0x163   :  { %3432 = vmatmul.mubr.msk.f32.gmra.mrb[16].mxu1 %vm718_vm1, %v742_v8 }
 0x164   :  { %3442 = vmatprep.mubr.msk.f32.mxu1 %vm3907_vm2, %v3906_v56 }
 0x212   :  { %v4267_v12 = vpop.f32.mrb[0].mxu1 }
 0x213   :  { %v4269_v13 = vpop.f32.mrb[1].mxu1 }
 0x216   :  { %v4271_v14 = vpop.f32.mrb[2].mxu1 }
 0x217   :  { %v4273_v15 = vpop.f32.mrb[3].mxu1 }
 0x21a   :  { %v4275_v18 = vpop.f32.mrb[4].mxu1 }
 0x21b   :  { %v4277_v19 = vpop.f32.mrb[5].mxu1 }
 0x21e   :  { %v4279_v22 = vpop.f32.mrb[6].mxu1 }
 0x21f   :  { %v665_v26 = vpop.f32.mrb[7].mxu1 }
 0x220   :  { %v4321_v50 = vadd.f32 %v4286_v20, %v665_v26 }
 0x222   :  { %v3413_v30 = vpop.f32.mrb[8].mxu1 }
 0x223   :  { %v4281_v31 = vpop.f32.mrb[9].mxu1  ;;  %v4293_v0 = vadd.f32 %v3413_v30, %v4286_v20 }
 0x227   :  { %v3383_v34 = vpop.f32.mrb[0].mxu0 }
 0x228   :  { %v575_v55 = vpop.f32.mrb[1].mxu0  ;;  %v4307_v36 = vadd.f32 %v3383_v34, %v4286_v20 }
 0x229   :  { %v4296_v39 = vadd.f32 %v4286_v20, %v575_v55 }
 0x22a   :  { %v3416_v40 = vpop.f32.mrb[10].mxu1 }
 0x22b   :  { %v685_v41 = vpop.f32.mrb[11].mxu1  ;;  %v754_v42 = vsel %vm4288_vm3, %v4296_v39, %v4293_v0  ;;  %v4327_v28 = vadd.f32 %v3416_v40, %v4286_v20 }
 0x22c   :  { %v4310_v46 = vadd.f32 %v4286_v20, %v685_v41 }
 0x22e   :  { %v3386_v24 = vpop.f32.mrb[2].mxu0  ;;  %v832_v1 = vpop.f32.mrb[12].mxu1  ;;  %v755_v48 = vsel %vm4288_vm3, %v4307_v36, %v4310_v46 }
 0x22f   :  { %v4324_v10 = vadd.f32 %v3386_v24, %v4286_v20  ;;  %v833_v51 = vadd.f32 %v832_v1, %v754_v42  ;;  %v585_v52 = vpop.f32.mrb[3].mxu0  ;;  %v3427_v44 = vpop.f32.mrb[13].mxu1 }
 0x230   :  { %v4330_v29 = vadd.f32 %v4286_v20, %v585_v52  ;;  %v34_v52 = vld [vmem:[%s5388_s0 + $0x28] sm:$0xff] }
 0x231   :  { %3694 = vtanh.f32 %v833_v51  ;;  %v995_v58 = vsel %vm4288_vm3, %v4324_v10, %v4321_v50  ;;  %v2194_v11 = vsel %vm4288_vm3, %v4321_v50, %v4324_v10  ;;  %v3200_v47 = vmul.f32 -1.442695, %v833_v51 }
 0x232   :  { %v837_v59 = vpop.f32.mrb[14].mxu1  ;;  %v756_v23 = vsel %vm4288_vm3, %v4330_v29, %v4327_v28  ;;  %v69_v44 = vsel %vm53_vm0, %v34_v52, 0.0 }
 0x233   :  { %v838_v61 = vadd.f32 %v837_v59, %v755_v48  ;;  %v3430_v62 = vpop.f32.mrb[15].mxu1 }
 0x235   :  { %3696 = vtanh.f32 %v838_v61  ;;  %v3201_v7 = vmul.f32 -1.442695, %v838_v61 }
 0x236   :  { %v842_v37 = vpop.f32.mrb[16].mxu1 }
 0x237   :  { %v843_v63 = vadd.f32 %v842_v37, %v756_v23  ;;  %v3433_v17 = vpop.f32.mrb[17].mxu1 }
 0x239   :  { %3698 = vtanh.f32 %v843_v63  ;;  %v3202_v25 = vmul.f32 -1.442695, %v843_v63 }
 0x23a   :  { %3700 = vpow2.f32 %v3200_v47 }
 0x23b   :  { %v3695_v2 = vpop.eup %3694  ;;  %3702 = vpow2.f32 %v3201_v7 }
 0x23c   :  { %888 = vrot.lane.b32.xlu0 %v3695_v2, %s3908_s30  ;;  %3704 = vpow2.f32 %v3202_v25 }
 0x23f   :  { %v3697_v35 = vpop.eup %3696 }
 0x240   :  { %890 = vrot.lane.b32.xlu1 %v3697_v35, %s3908_s30 }
 0x243   :  { %v3699_v3 = vpop.eup %3698 }
 0x244   :  { %892 = vrot.lane.b32.xlu1 %v3699_v3, %s3908_s30  ;;  %v3701_v8 = vpop.eup %3700 }
 0x245   :  { %v855_v54 = vadd.f32 1.0, %v3701_v8  ;;  %v3703_v26 = vpop.eup %3702 }
 0x246   :  { %v856_v27 = vadd.f32 1.0, %v3703_v26  ;;  %v3705_v30 = vpop.eup %3704 }
 0x247   :  { %3706 = vrcp.f32 %v855_v54  ;;  %v857_v32 = vadd.f32 1.0, %v3705_v30 }
 0x248   :  { %873 = vrot.lane.b32.xlu1 %v867_v4, %s3909_s9  ;;  %3708 = vrcp.f32 %v856_v27 }
 0x249   :  { %3710 = vrcp.f32 %v857_v32 }
 0x24c   :  { %875 = vrot.lane.b32.xlu1 %v868_v5, %s3909_s9 }
 0x250   :  { %877 = vrot.lane.b32.xlu1 %v869_v45, %s3909_s9 }
 0x251   :  { %v3707_v34 = vpop.eup %3706 }
 0x252   :  { %v3709_v41 = vpop.eup %3708 }
 0x253   :  { %v3711_v1 = vpop.eup %3710 }
 0x274   :  { %67 = vadd.xlane.f32.xlu1 %v66_v21 }
 0x2ae   :  { %v889_v55 = vpop.permute.xlu0 %888 }
 0x2af   :  { %v897_v40 = vmul.f32 %v3707_v34, %v889_v55 }
 0x2b1   :  { %903 = vrot.lane.b32.xlu0 %v897_v40, %s3909_s9 }
 0x2b2   :  { %v891_v42 = vpop.permute.xlu1 %890 }
 0x2b3   :  { %v898_v24 = vmul.f32 %v3709_v41, %v891_v42 }
 0x2b5   :  { %905 = vrot.lane.b32.xlu0 %v898_v24, %s3909_s9 }
 0x2b6   :  { %v893_v48 = vpop.permute.xlu1 %892 }
 0x2b7   :  { %v899_v51 = vmul.f32 %v3711_v1, %v893_v48 }
 0x2b9   :  { %907 = vrot.lane.b32.xlu0 %v899_v51, %s3909_s9 }
 0x2ba   :  { %v874_v59 = vpop.permute.xlu1 %873 }
 0x2bb   :  { %v882_v61 = vmul.f32 %v3707_v34, %v874_v59 }
 0x2be   :  { %v876_v23 = vpop.permute.xlu1 %875 }
 0x2bf   :  { %v883_v63 = vmul.f32 %v3709_v41, %v876_v23 }
 0x2c2   :  { %v878_v17 = vpop.permute.xlu1 %877 }
 0x2c3   :  { %v884_v3 = vmul.f32 %v3711_v1, %v878_v17 }
 0x2d8   :  { %70 = vadd.xlane.f32.xlu0 %v69_v44 }
 0x301   :  { %v68_v7 = vpop.xlane.xlu1 %67 }
 0x302   :  { %v131_v25 = vmul.f32 0.125, %v68_v7 }
 0x304   :  { %v155_v8 = vsub.f32 %v33_v6, %v131_v25 }
 0x306   :  { %v179_v54 = vmul.f32 %v155_v8, %v155_v8 }
 0x308   :  { %v211_v26 = vsel %vm53_vm0, %v179_v54, 0.0 }
 0x323   :  { %v904_v62 = vpop.permute.xlu0 %903 }
 0x324   :  { %v912_v37 = vadd.f32 %v904_v62, %v882_v61 }
 0x326   :  { %3712 = vtanh.f32 %v912_v37 }
 0x327   :  { %v906_v2 = vpop.permute.xlu0 %905 }
 0x328   :  { %v913_v35 = vadd.f32 %v906_v2, %v883_v63 }
 0x32a   :  { %3714 = vtanh.f32 %v913_v35 }
 0x32b   :  { %v908_v4 = vpop.permute.xlu0 %907 }
 0x32c   :  { %v914_v5 = vadd.f32 %v908_v4, %v884_v3 }
 0x32e   :  { %3716 = vtanh.f32 %v914_v5 }
 0x330   :  { %v3713_v45 = vpop.eup %3712 }
 0x331   :  { %921 = vrot.lane.b32.xlu0 %v3713_v45, %s3908_s30 }
 0x334   :  { %v3715_v21 = vpop.eup %3714 }
 0x335   :  { %923 = vrot.lane.b32.xlu1 %v3715_v21, %s3908_s30 }
 0x338   :  { %v3717_v47 = vpop.eup %3716 }
 0x339   :  { %925 = vrot.lane.b32.xlu1 %v3717_v47, %s3908_s30 }
 0x350   :  { %212 = vadd.xlane.f32.xlu0 %v211_v26  ;;  %v4415_v26 = vadd.f32 %v4286_v20, %v4281_v31 }
 0x365   :  { %v71_v27 = vpop.xlane.xlu0 %70 }
 0x366   :  { %v132_v30 = vmul.f32 0.125, %v71_v27 }
 0x368   :  { %v156_v32 = vsub.f32 %v34_v52, %v132_v30 }
 0x36a   :  { %v180_v55 = vmul.f32 %v156_v32, %v156_v32 }
 0x36c   :  { %v214_v40 = vsel %vm53_vm0, %v180_v55, 0.0 }
 0x36d   :  { %215 = vadd.xlane.f32.xlu1 %v214_v40 }
 0x3a3   :  { %v922_v42 = vpop.permute.xlu0 %921 }
 0x3a4   :  { %v4370_v24 = vmul.f32 %v3707_v34, %v922_v42 }
 0x3a6   :  { %951 = vrot.lane.b32.xlu0 %v4370_v24, %s3909_s9 }
 0x3a7   :  { %v924_v48 = vpop.permute.xlu1 %923 }
 0x3a8   :  { %v4374_v51 = vmul.f32 %v3709_v41, %v924_v48 }
 0x3aa   :  { %953 = vrot.lane.b32.xlu1 %v4374_v51, %s3909_s9 }
 0x3ab   :  { %v926_v6 = vpop.permute.xlu1 %925 }
 0x3ac   :  { %v4378_v44 = vmul.f32 %v3711_v1, %v926_v6 }
 0x3ae   :  { %936 = vrot.lane.b32.xlu1 %v912_v37, %s3910_s14  ;;  %955 = vrot.lane.b32.xlu0 %v4378_v44, %s3909_s9 }
 0x3b2   :  { %940 = vrot.lane.b32.xlu1 %v914_v5, %s3910_s14  ;;  %938 = vrot.lane.b32.xlu0 %v913_v35, %s3910_s14 }
 0x3dd   :  { %v213_v34 = vpop.xlane.xlu0 %212 }
 0x3de   :  { %v275_v52 = vmul.f32 0.125, %v213_v34 }
 0x3e0   :  { %v299_v41 = vadd.f32 1e-05, %v275_v52 }
 0x3e2   :  { %3718 = vrsqrt.f32 %v299_v41 }
 0x3ec   :  { %v3719_v59 = vpop.eup %3718 }
 0x3ed   :  { %v347_v23 = vmul.f32 %v3719_v59, %v155_v8 }
 0x3ef   :  { %v378_v61 = vmul.f32 %v4161_v16, %v347_v23 }
 0x3f1   :  { %v409_v1 = vadd.f32 %v4167_v33, %v378_v61 }
 0x3f3   :  { %3387 = vmatprep.mubr.msk.f32.mxu0 %vm53_vm0, %v409_v1 }
 0x3fa   :  { %v216_v62 = vpop.xlane.xlu1 %215 }
 0x3fb   :  { %v276_v37 = vmul.f32 0.125, %v216_v62 }
 0x3fd   :  { %v300_v63 = vadd.f32 1e-05, %v276_v37 }
 0x3ff   :  { %3720 = vrsqrt.f32 %v300_v63 }
 0x409   :  { %v3721_v17 = vpop.eup %3720 }
 0x40a   :  { %v348_v2 = vmul.f32 %v3721_v17, %v156_v32  ;;  %v36_v17 = vld [vmem:[%s5388_s0 + $0x38] sm:$0xff] }
 0x40c   :  { %v379_v35 = vmul.f32 %v4161_v16, %v348_v2  ;;  %v75_v2 = vsel %vm53_vm0, %v36_v17, 0.0 }
 0x40e   :  { %v410_v3 = vadd.f32 %v4167_v33, %v379_v35  ;;  %v4460_v35 = vld [vmem:[%s5388_s0 + $0x30] sm:$0xff] }
 0x410   :  { %3388 = vmatmul.mubr.msk.f32.gmra.mrb[4].mxu0 %vm53_vm0, %v410_v3 }
 0x418   :  { %v952_v4 = vpop.permute.xlu0 %951 }
 0x419   :  { %960 = vst.msk [vmem:[#allocation5] sm:$0xff] %vm718_vm1, %v952_v4 }
 0x41a   :  { %964 = vst.msk [vmem:[#allocation3] sm:$0xff] %vm963_vm4, %v952_v4  ;;  %v72_v4 = vsel %vm53_vm0, %v4460_v35, 0.0 }
 0x41c   :  { %v954_v5 = vpop.permute.xlu1 %953 }
 0x41d   :  { %961 = vst.msk [vmem:[#allocation5 + $0x8] sm:$0xff] %vm718_vm1, %v954_v5 }
 0x41e   :  { %965 = vst.msk [vmem:[#allocation3 + $0x8] sm:$0xff] %vm963_vm4, %v954_v5  ;;  %v37_v5 = vld [vmem:[%s5388_s0 + $0x40] sm:$0xff] }
 0x420   :  { %v937_v45 = vpop.permute.xlu1 %936  ;;  %v956_v21 = vpop.permute.xlu0 %955  ;;  %v980_v47 = vld [vmem:[#allocation5] sm:$0xff] }
 0x421   :  { %945 = vst.msk [vmem:[#allocation6] sm:$0xff] %vm718_vm1, %v937_v45  ;;  %962 = vst.msk [vmem:[#allocation5 + $0x10] sm:$0xff] %vm718_vm1, %v956_v21  ;;  %3443 = vmatmul.mubr.msk.f32.vlgmr.msra.gmra.mrb[18].mxu1 %vm718_vm1, %v980_v47  ;;  %v78_v45 = vsel %vm53_vm0, %v37_v5, 0.0 }
 0x422   :  { %966 = vst.msk [vmem:[#allocation3 + $0x10] sm:$0xff] %vm963_vm4, %v956_v21  ;;  %3445 = vmatprep.mubr.msk.f32.mxu1 %vm3907_vm2, %v3906_v56  ;;  %3611 = vmatpush3.bf16.msra.mxu1 %v4182_v57 }
 0x423   :  { %3612 = vmatprep.subr.bf16.mxu1 %v3905_v53 }
 0x424   :  { %v941_v7 = vpop.permute.xlu1 %940  ;;  %v939_v25 = vpop.permute.xlu0 %938  ;;  %v981_v8 = vld [vmem:[#allocation5 + $0x8] sm:$0xff] }
 0x425   :  { %947 = vst.msk [vmem:[#allocation6 + $0x10] sm:$0xff] %vm718_vm1, %v941_v7  ;;  %946 = vst.msk [vmem:[#allocation6 + $0x8] sm:$0xff] %vm718_vm1, %v939_v25  ;;  %3446 = vmatmul.mubr.msk.f32.gmra.mrb[20].mxu1 %vm718_vm1, %v981_v8 }
 0x426   :  { %3448 = vmatprep.mubr.msk.f32.mxu1 %vm3907_vm2, %v3906_v56  ;;  %3614 = vmatpush3.bf16.msra.mxu1 %v4198_v9  ;;  %v4422_v9 = vadd.f32 %v4279_v22, %v4286_v20 }
 0x427   :  { %3615 = vmatprep.subr.bf16.mxu1 %v3905_v53 }
 0x428   :  { %v982_v54 = vld [vmem:[#allocation5 + $0x10] sm:$0xff]  ;;  %v1108_v37 = vld [vmem:[#allocation6] sm:$0xff] }
 0x429   :  { %3449 = vmatmul.mubr.msk.f32.gmra.mrb[22].mxu1 %vm718_vm1, %v982_v54 }
 0x42a   :  { %3459 = vmatprep.mubr.msk.f32.mxu1 %vm3907_vm2, %v3906_v56 }
 0x42c   :  { %v1109_v63 = vld [vmem:[#allocation6 + $0x8] sm:$0xff] }
 0x4e3   :  { %v3389_v57 = vpop.f32.mrb[4].mxu0 }
 0x4e4   :  { %v4418_v27 = vadd.f32 %v3389_v57, %v4286_v20  ;;  %v595_v30 = vpop.f32.mrb[5].mxu0 }
 0x4e5   :  { %v4425_v32 = vadd.f32 %v4286_v20, %v595_v30 }
 0x4e6   :  { %v997_v55 = vsel %vm4288_vm3, %v4418_v27, %v4415_v26  ;;  %v2196_v31 = vsel %vm4288_vm3, %v4415_v26, %v4418_v27 }
 0x4e7   :  { %v996_v40 = vsel %vm4288_vm3, %v4425_v32, %v4422_v9  ;;  %v2195_v22 = vsel %vm4288_vm3, %v4422_v9, %v4425_v32 }
 0x4f4   :  { %v1073_v42 = vpop.f32.mrb[18].mxu1 }
 0x4f5   :  { %v1074_v48 = vadd.f32 %v1073_v42, %v995_v58  ;;  %v3444_v6 = vpop.f32.mrb[19].mxu1  ;;  %v1110_v58 = vld [vmem:[#allocation6 + $0x10] sm:$0xff] }
 0x4f7   :  { %3722 = vtanh.f32 %v1074_v48  ;;  %v3206_v21 = vmul.f32 -1.442695, %v1074_v48 }
 0x4f8   :  { %v1078_v34 = vpop.f32.mrb[20].mxu1 }
 0x4f9   :  { %v1079_v52 = vadd.f32 %v1078_v34, %v996_v40  ;;  %v3447_v41 = vpop.f32.mrb[21].mxu1 }
 0x4fb   :  { %3724 = vtanh.f32 %v1079_v52  ;;  %v3207_v47 = vmul.f32 -1.442695, %v1079_v52 }
 0x4fc   :  { %v1083_v59 = vpop.f32.mrb[22].mxu1 }
 0x4fd   :  { %v1084_v23 = vadd.f32 %v1083_v59, %v997_v55  ;;  %v3450_v61 = vpop.f32.mrb[23].mxu1 }
 0x4ff   :  { %3726 = vtanh.f32 %v1084_v23  ;;  %v3208_v6 = vmul.f32 -1.442695, %v1084_v23 }
 0x500   :  { %3728 = vpow2.f32 %v3206_v21 }
 0x501   :  { %v3723_v1 = vpop.eup %3722  ;;  %3730 = vpow2.f32 %v3207_v47 }
 0x502   :  { %1129 = vrot.lane.b32.xlu0 %v3723_v1, %s3908_s30 }
 0x505   :  { %v3725_v62 = vpop.eup %3724 }
 0x506   :  { %1131 = vrot.lane.b32.xlu1 %v3725_v62, %s3908_s30  ;;  %v38_v62 = vld [vmem:[%s5388_s0 + $0x48] sm:$0xff] }
 0x509   :  { %v3727_v3 = vpop.eup %3726 }
 0x50a   :  { %1114 = vrot.lane.b32.xlu1 %v1108_v37, %s3909_s9  ;;  %v3729_v7 = vpop.eup %3728  ;;  %v81_v37 = vsel %vm53_vm0, %v38_v62, 0.0 }
 0x50b   :  { %v1096_v25 = vadd.f32 1.0, %v3729_v7  ;;  %v3731_v8 = vpop.eup %3730 }
 0x50c   :  { %v1097_v54 = vadd.f32 1.0, %v3731_v8 }
 0x50d   :  { %3732 = vrcp.f32 %v1096_v25 }
 0x50e   :  { %1116 = vrot.lane.b32.xlu1 %v1109_v63, %s3909_s9  ;;  %3734 = vrcp.f32 %v1097_v54 }
 0x50f   :  { %3736 = vpow2.f32 %v3208_v6 }
 0x512   :  { %1118 = vrot.lane.b32.xlu1 %v1110_v58, %s3909_s9 }
 0x517   :  { %v4469_v57 = vpop.eup %3732 }
 0x518   :  { %v4473_v40 = vpop.eup %3734 }
 0x519   :  { %v3737_v34 = vpop.eup %3736 }
 0x51a   :  { %v1098_v52 = vadd.f32 1.0, %v3737_v34 }
 0x51c   :  { %3738 = vrcp.f32 %v1098_v52 }
 0x521   :  { %76 = vadd.xlane.f32.xlu0 %v75_v2 }
 0x526   :  { %v3739_v59 = vpop.eup %3738 }
 0x536   :  { %73 = vadd.xlane.f32.xlu1 %v72_v4 }
 0x537   :  { %1133 = vrot.lane.b32.xlu0 %v3727_v3, %s3908_s30 }
 0x556   :  { %79 = vadd.xlane.f32.xlu0 %v78_v45 }
 0x574   :  { %v1130_v30 = vpop.permute.xlu0 %1129 }
 0x575   :  { %v1138_v55 = vmul.f32 %v4469_v57, %v1130_v30 }
 0x577   :  { %1144 = vrot.lane.b32.xlu0 %v1138_v55, %s3909_s9 }
 0x578   :  { %v1132_v42 = vpop.permute.xlu1 %1131 }
 0x579   :  { %v1139_v48 = vmul.f32 %v4473_v40, %v1132_v42 }
 0x57b   :  { %1146 = vrot.lane.b32.xlu0 %v1139_v48, %s3909_s9 }
 0x57c   :  { %v1115_v63 = vpop.permute.xlu1 %1114 }
 0x57d   :  { %v1123_v23 = vmul.f32 %v4469_v57, %v1115_v63 }
 0x580   :  { %v1117_v2 = vpop.permute.xlu1 %1116 }
 0x581   :  { %v1124_v45 = vmul.f32 %v4473_v40, %v1117_v2 }
 0x584   :  { %v1119_v52 = vpop.permute.xlu1 %1118 }
 0x5ae   :  { %v77_v41 = vpop.xlane.xlu0 %76 }
 0x5af   :  { %v134_v8 = vmul.f32 0.125, %v77_v41 }
 0x5b1   :  { %v158_v30 = vsub.f32 %v36_v17, %v134_v8 }
 0x5b2   :  { %v1134_v61 = vpop.permute.xlu0 %1133 }
 0x5b3   :  { %v1140_v1 = vmul.f32 %v3739_v59, %v1134_v61  ;;  %v182_v42 = vmul.f32 %v158_v30, %v158_v30  ;;  %v1125_v61 = vmul.f32 %v3739_v59, %v1119_v52 }
 0x5b5   :  { %1148 = vrot.lane.b32.xlu0 %v1140_v1, %s3909_s9  ;;  %v220_v6 = vsel %vm53_vm0, %v182_v42, 0.0 }
 0x5c3   :  { %v74_v41 = vpop.xlane.xlu1 %73 }
 0x5d4   :  { %82 = vadd.xlane.f32.xlu0 %v81_v37 }
 0x5e3   :  { %v80_v58 = vpop.xlane.xlu0 %79 }
 0x5e4   :  { %v135_v54 = vmul.f32 0.125, %v80_v58  ;;  %v133_v58 = vmul.f32 0.125, %v74_v41 }
 0x5e6   :  { %v159_v55 = vsub.f32 %v37_v5, %v135_v54  ;;  %v157_v17 = vsub.f32 %v4460_v35, %v133_v58 }
 0x5e8   :  { %v183_v48 = vmul.f32 %v159_v55, %v159_v55  ;;  %v181_v5 = vmul.f32 %v157_v17, %v157_v17 }
 0x5e9   :  { %v1145_v3 = vpop.permute.xlu0 %1144 }
 0x5ea   :  { %v1153_v4 = vadd.f32 %v1145_v3, %v1123_v23  ;;  %v223_v34 = vsel %vm53_vm0, %v183_v48, 0.0  ;;  %v217_v23 = vsel %vm53_vm0, %v181_v5, 0.0 }
 0x5ec   :  { %3740 = vtanh.f32 %v1153_v4 }
 0x5ed   :  { %v1147_v21 = vpop.permute.xlu0 %1146 }
 0x5ee   :  { %v1154_v47 = vadd.f32 %v1147_v21, %v1124_v45 }
 0x5f0   :  { %3742 = vtanh.f32 %v1154_v47 }
 0x5f6   :  { %v3741_v7 = vpop.eup %3740 }
 0x5f7   :  { %1162 = vrot.lane.b32.xlu1 %v3741_v7, %s3908_s30 }
 0x5fa   :  { %v3743_v25 = vpop.eup %3742 }
 0x5fb   :  { %1164 = vrot.lane.b32.xlu0 %v3743_v25, %s3908_s30 }
 0x61a   :  { %221 = vadd.xlane.f32.xlu0 %v220_v6 }
 0x61e   :  { %224 = vadd.xlane.f32.xlu0 %v223_v34 }
 0x627   :  { %v1149_v1 = vpop.permute.xlu0 %1148 }
 0x628   :  { %v1155_v37 = vadd.f32 %v1149_v1, %v1125_v61 }
 0x62a   :  { %3744 = vtanh.f32 %v1155_v37 }
 0x634   :  { %v3745_v63 = vpop.eup %3744 }
 0x635   :  { %1166 = vrot.lane.b32.xlu1 %v3745_v63, %s3908_s30 }
 0x659   :  { %218 = vadd.xlane.f32.xlu1 %v217_v23 }
 0x661   :  { %v83_v2 = vpop.xlane.xlu0 %82 }
 0x662   :  { %v136_v3 = vmul.f32 0.125, %v83_v2 }
 0x664   :  { %v160_v45 = vsub.f32 %v38_v62, %v136_v3 }
 0x666   :  { %v184_v21 = vmul.f32 %v160_v45, %v160_v45 }
 0x668   :  { %v226_v7 = vsel %vm53_vm0, %v184_v21, 0.0 }
 0x669   :  { %v1163_v25 = vpop.permute.xlu1 %1162  ;;  %227 = vadd.xlane.f32.xlu1 %v226_v7 }
 0x66a   :  { %v4493_v8 = vmul.f32 %v4469_v57, %v1163_v25 }
 0x66c   :  { %1192 = vrot.lane.b32.xlu0 %v4493_v8, %s3909_s9 }
 0x66d   :  { %v1165_v35 = vpop.permute.xlu0 %1164 }
 0x66e   :  { %v4499_v54 = vmul.f32 %v4473_v40, %v1165_v35 }
 0x670   :  { %1179 = vrot.lane.b32.xlu0 %v1154_v47, %s3910_s14 }
 0x67a   :  { %1194 = vrot.lane.b32.xlu1 %v4499_v54, %s3909_s9 }
 0x6a7   :  { %v1167_v62 = vpop.permute.xlu1 %1166  ;;  %v222_v57 = vpop.xlane.xlu0 %221 }
 0x6a8   :  { %v4503_v42 = vmul.f32 %v3739_v59, %v1167_v62  ;;  %v278_v47 = vmul.f32 0.125, %v222_v57 }
 0x6aa   :  { %1196 = vrot.lane.b32.xlu1 %v4503_v42, %s3909_s9  ;;  %v302_v40 = vadd.f32 1e-05, %v278_v47 }
 0x6ab   :  { %v225_v48 = vpop.xlane.xlu0 %224 }
 0x6ac   :  { %v279_v34 = vmul.f32 0.125, %v225_v48  ;;  %3746 = vrsqrt.f32 %v302_v40 }
 0x6ae   :  { %1177 = vrot.lane.b32.xlu1 %v1153_v4, %s3910_s14  ;;  %v303_v59 = vadd.f32 1e-05, %v279_v34 }
 0x6b0   :  { %3748 = vrsqrt.f32 %v303_v59 }
 0x6b2   :  { %1181 = vrot.lane.b32.xlu1 %v1155_v37, %s3910_s14 }
 0x6b6   :  { %v3747_v63 = vpop.eup %3746 }
 0x6b7   :  { %v350_v58 = vmul.f32 %v3747_v63, %v158_v30 }
 0x6b9   :  { %v381_v7 = vmul.f32 %v4161_v16, %v350_v58  ;;  %v4553_v58 = vadd.f32 %v4271_v14, %v4286_v20 }
 0x6ba   :  { %v3749_v41 = vpop.eup %3748 }
 0x6bb   :  { %v351_v5 = vmul.f32 %v3749_v41, %v159_v55  ;;  %v412_v30 = vadd.f32 %v4167_v33, %v381_v7 }
 0x6bd   :  { %v382_v35 = vmul.f32 %v4161_v16, %v351_v5 }
 0x6bf   :  { %v413_v55 = vadd.f32 %v4167_v33, %v382_v35 }
 0x6de   :  { %v1193_v6 = vpop.permute.xlu0 %1192 }
 0x6df   :  { %1201 = vst.msk [vmem:[#allocation5] sm:$0xff] %vm718_vm1, %v1193_v6 }
 0x6e0   :  { %1205 = vst.msk [vmem:[#allocation3 + $0x18] sm:$0xff] %vm963_vm4, %v1193_v6  ;;  %v4532_v6 = vld [vmem:[%s5390_s1] ss:$0 sm:$0xff] }
 0x6e2   :  { %v1180_v52 = vpop.permute.xlu0 %1179 }
 0x6e3   :  { %1187 = vst.msk [vmem:[#allocation6 + $0x8] sm:$0xff] %vm718_vm1, %v1180_v52 }
 0x6e6   :  { %v219_v61 = vpop.xlane.xlu1 %218  ;;  %v1221_v1 = vld [vmem:[#allocation5] sm:$0xff] }
 0x6e7   :  { %v277_v4 = vmul.f32 0.125, %v219_v61  ;;  %3460 = vmatmul.mubr.msk.f32.vlgmr.msra.gmra.mrb[24].mxu1 %vm718_vm1, %v1221_v1 }
 0x6e8   :  { %3462 = vmatprep.mubr.msk.f32.mxu1 %vm3907_vm2, %v3906_v56 }
 0x6e9   :  { %v301_v37 = vadd.f32 1e-05, %v277_v4 }
 0x6eb   :  { %3750 = vrsqrt.f32 %v301_v37  ;;  %v4546_v37 = vadd.f32 %v4286_v20, %v4277_v19 }
 0x6f5   :  { %v3751_v23 = vpop.eup %3750 }
 0x6f6   :  { %v228_v2 = vpop.xlane.xlu1 %227  ;;  %v349_v3 = vmul.f32 %v3751_v23, %v157_v17 }
 0x6f7   :  { %v280_v21 = vmul.f32 0.125, %v228_v2 }
 0x6f8   :  { %v380_v25 = vmul.f32 %v4161_v16, %v349_v3 }
 0x6f9   :  { %v304_v62 = vadd.f32 1e-05, %v280_v21 }
 0x6fa   :  { %v1195_v57 = vpop.permute.xlu1 %1194  ;;  %v411_v48 = vadd.f32 %v4167_v33, %v380_v25 }
 0x6fb   :  { %3752 = vrsqrt.f32 %v304_v62  ;;  %1202 = vst.msk [vmem:[#allocation5 + $0x8] sm:$0xff] %vm718_vm1, %v1195_v57  ;;  %v4576_v62 = vadd.f32 %v4286_v20, %v4269_v13 }
 0x6fc   :  { %1206 = vst.msk [vmem:[#allocation3 + $0x20] sm:$0xff] %vm963_vm4, %v1195_v57  ;;  %3390 = vmatprep.mubr.msk.f32.mxu0 %vm53_vm0, %v411_v48 }
 0x6fd   :  { %3391 = vmatmul.mubr.msk.f32.gmra.mrb[6].mxu0 %vm53_vm0, %v412_v30 }
 0x6fe   :  { %3393 = vmatprep.mubr.msk.f32.mxu0 %vm53_vm0, %v413_v55  ;;  %v4583_v55 = vadd.f32 %v4275_v18, %v4286_v20 }
 0x702   :  { %v1222_v16 = vld [vmem:[#allocation5 + $0x8] sm:$0xff] }
 0x703   :  { %3463 = vmatmul.mubr.msk.f32.gmra.mrb[26].mxu1 %vm718_vm1, %v1222_v16 }
 0x704   :  { %3465 = vmatprep.mubr.msk.f32.mxu1 %vm3907_vm2, %v3906_v56 }
 0x705   :  { %v3753_v17 = vpop.eup %3752 }
 0x706   :  { %v352_v47 = vmul.f32 %v3753_v17, %v160_v45 }
 0x708   :  { %v383_v34 = vmul.f32 %v4532_v6, %v352_v47 }
 0x70a   :  { %v414_v40 = vadd.f32 %v4167_v33, %v383_v34 }
 0x70c   :  { %3394 = vmatmul.mubr.msk.f32.gmra.mrb[8].mxu0 %vm53_vm0, %v414_v40  ;;  %v1350_v40 = vld [vmem:[#allocation6 + $0x8] sm:$0xff] }
 0x71c   :  { %v1197_v52 = vpop.permute.xlu1 %1196 }
 0x71d   :  { %1203 = vst.msk [vmem:[#allocation5 + $0x10] sm:$0xff] %vm718_vm1, %v1197_v52 }
 0x71e   :  { %1207 = vst.msk [vmem:[#allocation3 + $0x28] sm:$0xff] %vm963_vm4, %v1197_v52 }
 0x720   :  { %v1178_v59 = vpop.permute.xlu1 %1177 }
 0x721   :  { %1186 = vst.msk [vmem:[#allocation6] sm:$0xff] %vm718_vm1, %v1178_v59 }
 0x724   :  { %v1182_v45 = vpop.permute.xlu1 %1181  ;;  %v1223_v61 = vld [vmem:[#allocation5 + $0x10] sm:$0xff] }
 0x725   :  { %1188 = vst.msk [vmem:[#allocation6 + $0x10] sm:$0xff] %vm718_vm1, %v1182_v45  ;;  %3466 = vmatmul.mubr.msk.f32.gmra.mrb[28].mxu1 %vm718_vm1, %v1223_v61 }
 0x726   :  { %3476 = vmatprep.mubr.msk.f32.mxu1 %vm3907_vm2, %v3906_v56 }
 0x728   :  { %v1349_v34 = vld [vmem:[#allocation6] sm:$0xff] }
 0x72c   :  { %v1351_v52 = vld [vmem:[#allocation6 + $0x10] sm:$0xff] }
 0x7ba   :  { %v1314_v33 = vpop.f32.mrb[24].mxu1 }
 0x7bb   :  { %v3461_v1 = vpop.f32.mrb[25].mxu1 }
 0x7bc   :  { %v39_v1 = vld [vmem:[%s5388_s0 + $0x50] sm:$0xff] }
 0x7d0   :  { %v3392_v4 = vpop.f32.mrb[6].mxu0 }
 0x7d1   :  { %v4549_v63 = vadd.f32 %v3392_v4, %v4286_v20  ;;  %v605_v41 = vpop.f32.mrb[7].mxu0  ;;  %v84_v4 = vsel %vm53_vm0, %v39_v1, 0.0 }
 0x7d2   :  { %v4556_v5 = vadd.f32 %v4286_v20, %v605_v41 }
 0x7d3   :  { %v1237_v23 = vsel %vm4288_vm3, %v4549_v63, %v4546_v37  ;;  %v1956_v19 = vsel %vm4288_vm3, %v4546_v37, %v4549_v63 }
 0x7d4   :  { %v1236_v2 = vsel %vm4288_vm3, %v4556_v5, %v4553_v58  ;;  %v1955_v14 = vsel %vm4288_vm3, %v4553_v58, %v4556_v5 }
 0x7d5   :  { %v1315_v3 = vadd.f32 %v1314_v33, %v1236_v2 }
 0x7d6   :  { %v1319_v21 = vpop.f32.mrb[26].mxu1 }
 0x7d7   :  { %3754 = vtanh.f32 %v1315_v3  ;;  %v1320_v7 = vadd.f32 %v1319_v21, %v1237_v23  ;;  %v3464_v25 = vpop.f32.mrb[27].mxu1  ;;  %v3212_v41 = vmul.f32 -1.442695, %v1315_v3 }
 0x7d9   :  { %3756 = vtanh.f32 %v1320_v7  ;;  %v3213_v23 = vmul.f32 -1.442695, %v1320_v7 }
 0x7df   :  { %v3395_v35 = vpop.f32.mrb[8].mxu0 }
 0x7e0   :  { %v4579_v57 = vadd.f32 %v3395_v35, %v4286_v20  ;;  %v615_v48 = vpop.f32.mrb[9].mxu0 }
 0x7e1   :  { %v3755_v30 = vpop.eup %3754  ;;  %v4586_v16 = vadd.f32 %v4286_v20, %v615_v48 }
 0x7e2   :  { %1370 = vrot.lane.b32.xlu0 %v3755_v30, %s3908_s30  ;;  %v1477_v13 = vsel %vm4288_vm3, %v4579_v57, %v4576_v62  ;;  %v1716_v17 = vsel %vm4288_vm3, %v4576_v62, %v4579_v57 }
 0x7e3   :  { %v1238_v18 = vsel %vm4288_vm3, %v4586_v16, %v4583_v55  ;;  %v1957_v20 = vsel %vm4288_vm3, %v4583_v55, %v4586_v16  ;;  %v3757_v47 = vpop.eup %3756 }
 0x7e4   :  { %1372 = vrot.lane.b32.xlu1 %v3757_v47, %s3908_s30 }
 0x7e8   :  { %1355 = vrot.lane.b32.xlu1 %v1349_v34, %s3909_s9 }
 0x7ec   :  { %1357 = vrot.lane.b32.xlu1 %v1350_v40, %s3909_s9 }
 0x7f0   :  { %1359 = vrot.lane.b32.xlu1 %v1351_v52, %s3909_s9 }
 0x7f8   :  { %v1324_v59 = vpop.f32.mrb[28].mxu1 }
 0x7f9   :  { %v1325_v45 = vadd.f32 %v1324_v59, %v1238_v18  ;;  %v3467_v61 = vpop.f32.mrb[29].mxu1 }
 0x7fb   :  { %3758 = vtanh.f32 %v1325_v45  ;;  %v3214_v3 = vmul.f32 -1.442695, %v1325_v45 }
 0x7fc   :  { %3760 = vpow2.f32 %v3212_v41 }
 0x7fd   :  { %3762 = vpow2.f32 %v3213_v23 }
 0x805   :  { %v3759_v33 = vpop.eup %3758 }
 0x806   :  { %1374 = vrot.lane.b32.xlu0 %v3759_v33, %s3908_s30  ;;  %v3761_v2 = vpop.eup %3760 }
 0x807   :  { %v1337_v21 = vadd.f32 1.0, %v3761_v2  ;;  %v3763_v25 = vpop.eup %3762 }
 0x808   :  { %v1338_v35 = vadd.f32 1.0, %v3763_v25 }
 0x809   :  { %3764 = vrcp.f32 %v1337_v21 }
 0x80a   :  { %3766 = vrcp.f32 %v1338_v35 }
 0x80b   :  { %3768 = vpow2.f32 %v3214_v3 }
 0x813   :  { %v4614_v48 = vpop.eup %3764 }
 0x814   :  { %85 = vadd.xlane.f32.xlu1 %v84_v4  ;;  %v4618_v34 = vpop.eup %3766  ;;  %v40_v4 = vld [vmem:[%s5388_s0 + $0x58] sm:$0xff] }
 0x815   :  { %v3769_v40 = vpop.eup %3768  ;;  %v87_v45 = vsel %vm53_vm0, %v40_v4, 0.0 }
 0x816   :  { %v1339_v52 = vadd.f32 1.0, %v3769_v40 }
 0x818   :  { %3770 = vrcp.f32 %v1339_v52 }
 0x822   :  { %v4622_v59 = vpop.eup %3770 }
 0x854   :  { %v1371_v30 = vpop.permute.xlu0 %1370 }
 0x855   :  { %v1379_v18 = vmul.f32 %v4614_v48, %v1371_v30 }
 0x856   :  { %v1373_v47 = vpop.permute.xlu1 %1372 }
 0x857   :  { %1385 = vrot.lane.b32.xlu0 %v1379_v18, %s3909_s9  ;;  %v1380_v7 = vmul.f32 %v4618_v34, %v1373_v47 }
 0x85a   :  { %v1356_v41 = vpop.permute.xlu1 %1355 }
 0x85b   :  { %1387 = vrot.lane.b32.xlu0 %v1380_v7, %s3909_s9  ;;  %v1364_v23 = vmul.f32 %v4614_v48, %v1356_v41 }
 0x85e   :  { %v1358_v2 = vpop.permute.xlu1 %1357 }
 0x85f   :  { %v1365_v35 = vmul.f32 %v4618_v34, %v1358_v2 }
 0x862   :  { %v1360_v7 = vpop.permute.xlu1 %1359 }
 0x878   :  { %v1375_v61 = vpop.permute.xlu0 %1374 }
 0x879   :  { %v1381_v33 = vmul.f32 %v4622_v59, %v1375_v61 }
 0x87b   :  { %1389 = vrot.lane.b32.xlu0 %v1381_v33, %s3909_s9  ;;  %v1366_v33 = vmul.f32 %v4622_v59, %v1360_v7  ;;  %v1466_v7 = vld [vmem:[%s5392_s5 + $0x8] sm:$0xff] }
 0x89a   :  { %88 = vadd.xlane.f32.xlu0 %v87_v45 }
 0x8a1   :  { %v86_v40 = vpop.xlane.xlu1 %85 }
 0x8a2   :  { %v137_v52 = vmul.f32 0.125, %v86_v40 }
 0x8a4   :  { %v161_v61 = vsub.f32 %v39_v1, %v137_v52  ;;  %v1465_v1 = vld [vmem:[%s5392_s5] sm:$0xff] }
 0x8a5   :  { %v4644_v40 = vpack.c.bf16 %v1466_v7, %v1465_v1 }
 0x8a7   :  { %3617 = vmatpush3.bf16.msra.mxu1 %v4644_v40  ;;  %3623 = vmatpush3.bf16.msra.mxu0 %v4644_v40 }
 0x8a8   :  { %3618 = vmatprep.subr.bf16.mxu1 %v3905_v53  ;;  %3624 = vmatprep.subr.bf16.mxu0 %v3905_v53 }
 0x8c9   :  { %v1386_v21 = vpop.permute.xlu0 %1385 }
 0x8ca   :  { %v1394_v25 = vadd.f32 %v1386_v21, %v1364_v23  ;;  %v185_v23 = vmul.f32 %v161_v61, %v161_v61 }
 0x8cc   :  { %3772 = vtanh.f32 %v1394_v25  ;;  %v229_v2 = vsel %vm53_vm0, %v185_v23, 0.0 }
 0x8cd   :  { %v1388_v30 = vpop.permute.xlu0 %1387 }
 0x8ce   :  { %v1395_v18 = vadd.f32 %v1388_v30, %v1365_v35 }
 0x8d0   :  { %3774 = vtanh.f32 %v1395_v18 }
 0x8d6   :  { %v3773_v47 = vpop.eup %3772 }
 0x8d7   :  { %1403 = vrot.lane.b32.xlu0 %v3773_v47, %s3908_s30 }
 0x8da   :  { %v3775_v3 = vpop.eup %3774 }
 0x8db   :  { %1405 = vrot.lane.b32.xlu1 %v3775_v3, %s3908_s30 }
 0x8ed   :  { %v1390_v45 = vpop.permute.xlu0 %1389 }
 0x8ee   :  { %v1396_v41 = vadd.f32 %v1390_v45, %v1366_v33 }
 0x8f0   :  { %3776 = vtanh.f32 %v1396_v41 }
 0x8f6   :  { %230 = vadd.xlane.f32.xlu0 %v229_v2 }
 0x8fa   :  { %v3777_v21 = vpop.eup %3776 }
 0x8fb   :  { %1407 = vrot.lane.b32.xlu1 %v3777_v21, %s3908_s30 }
 0x927   :  { %v89_v35 = vpop.xlane.xlu0 %88 }
 0x928   :  { %v138_v30 = vmul.f32 0.125, %v89_v35 }
 0x92a   :  { %v162_v47 = vsub.f32 %v40_v4, %v138_v30  ;;  %v1468_v4 = vld [vmem:[%s5392_s5 + $0x18] sm:$0xff] }
 0x92c   :  { %v186_v3 = vmul.f32 %v162_v47, %v162_v47 }
 0x92e   :  { %v232_v60 = vsel %vm53_vm0, %v186_v3, 0.0 }
 0x92f   :  { %233 = vadd.xlane.f32.xlu1 %v232_v60  ;;  %v1467_v60 = vld [vmem:[%s5392_s5 + $0x10] sm:$0xff] }
 0x930   :  { %v4656_v52 = vpack.c.bf16 %v1468_v4, %v1467_v60 }
 0x932   :  { %3620 = vmatpush3.bf16.msra.mxu1 %v4656_v52  ;;  %3626 = vmatpush3.bf16.msra.mxu0 %v4656_v52 }
 0x933   :  { %3627 = vmatprep.subr.bf16.mxu1 %v3905_v53  ;;  %3633 = vmatprep.subr.bf16.mxu0 %v3905_v53 }
 0x949   :  { %v1404_v33 = vpop.permute.xlu0 %1403 }
 0x94a   :  { %v4663_v45 = vmul.f32 %v4614_v48, %v1404_v33 }
 0x94c   :  { %1433 = vrot.lane.b32.xlu0 %v4663_v45, %s3909_s9 }
 0x94d   :  { %v1406_v23 = vpop.permute.xlu1 %1405 }
 0x94e   :  { %v4668_v2 = vmul.f32 %v4618_v34, %v1406_v23 }
 0x950   :  { %1435 = vrot.lane.b32.xlu1 %v4668_v2, %s3909_s9 }
 0x954   :  { %1418 = vrot.lane.b32.xlu1 %v1394_v25, %s3910_s14  ;;  %v3903_v25 = vld [vmem:[%s5391_s2] ss:$0 sm:$0xff] }
 0x958   :  { %1422 = vrot.lane.b32.xlu1 %v1396_v41, %s3910_s14 }
 0x96d   :  { %v1408_v21 = vpop.permute.xlu1 %1407 }
 0x96e   :  { %v4675_v35 = vmul.f32 %v4622_v59, %v1408_v21 }
 0x970   :  { %1437 = vrot.lane.b32.xlu0 %v4675_v35, %s3909_s9 }
 0x974   :  { %1420 = vrot.lane.b32.xlu0 %v1395_v18, %s3910_s14 }
 0x983   :  { %v231_v48 = vpop.xlane.xlu0 %230 }
 0x984   :  { %v281_v30 = vmul.f32 0.125, %v231_v48 }
 0x986   :  { %v305_v34 = vadd.f32 1e-05, %v281_v30 }
 0x988   :  { %3778 = vrsqrt.f32 %v305_v34 }
 0x992   :  { %v3779_v3 = vpop.eup %3778 }
 0x993   :  { %v353_v1 = vmul.f32 %v3779_v3, %v161_v61 }
 0x995   :  { %v384_v7 = vmul.f32 %v4532_v6, %v353_v1 }
 0x997   :  { %v415_v41 = vadd.f32 %v3903_v25, %v384_v7 }
 0x999   :  { %3396 = vmatprep.mubr.msk.f32.mxu0 %vm53_vm0, %v415_v41 }
 0x9bc   :  { %v234_v59 = vpop.xlane.xlu1 %233 }
 0x9bd   :  { %v282_v60 = vmul.f32 0.125, %v234_v59 }
 0x9be   :  { %v1434_v4 = vpop.permute.xlu0 %1433 }
 0x9bf   :  { %v306_v33 = vadd.f32 1e-05, %v282_v60  ;;  %1442 = vst.msk [vmem:[#allocation5] sm:$0xff] %vm718_vm1, %v1434_v4 }
 0x9c0   :  { %1446 = vst.msk [vmem:[#allocation3 + $0x30] sm:$0xff] %vm963_vm4, %v1434_v4 }
 0x9c1   :  { %3780 = vrsqrt.f32 %v306_v33 }
 0x9c2   :  { %v1436_v18 = vpop.permute.xlu1 %1435 }
 0x9c3   :  { %1443 = vst.msk [vmem:[#allocation5 + $0x8] sm:$0xff] %vm718_vm1, %v1436_v18 }
 0x9c4   :  { %1447 = vst.msk [vmem:[#allocation3 + $0x38] sm:$0xff] %vm963_vm4, %v1436_v18  ;;  %v3904_v18 = vld [vmem:[%s5393_s4] ss:$0 sm:$0xff]  ;;  %s3911_s4 = smov 16  }
 0x9c6   :  { %v1419_v61 = vpop.permute.xlu1 %1418  ;;  %v1462_v23 = vld [vmem:[#allocation5] sm:$0xff] }
 0x9c7   :  { %1427 = vst.msk [vmem:[#allocation6] sm:$0xff] %vm718_vm1, %v1419_v61  ;;  %3477 = vmatmul.mubr.msk.f32.vlgmr.msra.gmra.mrb[30].mxu1 %vm718_vm1, %v1462_v23  ;;  %v4720_v61 = vadd.f32 %v3904_v18, %v4273_v15 }
 0x9c8   :  { %3479 = vmatprep.mubr.msk.f32.mxu1 %vm3907_vm2, %v3906_v56  ;;  %3629 = vmatpush3.bf16.msra.mxu1 %v4644_v40 }
 0x9c9   :  { %3630 = vmatprep.subr.bf16.mxu1 %v3905_v53 }
 0x9ca   :  { %v1423_v21 = vpop.permute.xlu1 %1422  ;;  %v1463_v48 = vld [vmem:[#allocation5 + $0x8] sm:$0xff] }
 0x9cb   :  { %v3781_v30 = vpop.eup %3780  ;;  %1429 = vst.msk [vmem:[#allocation6 + $0x10] sm:$0xff] %vm718_vm1, %v1423_v21  ;;  %3480 = vmatmul.mubr.msk.f32.gmra.mrb[32].mxu1 %vm718_vm1, %v1463_v48 }
 0x9cc   :  { %v354_v34 = vmul.f32 %v3781_v30, %v162_v47  ;;  %3482 = vmatprep.mubr.msk.f32.mxu1 %vm3907_vm2, %v3906_v56  ;;  %3632 = vmatpush3.bf16.msra.mxu1 %v4656_v52  ;;  %v4725_v30 = vadd.f32 %v3904_v18, %v4267_v12 }
 0x9cd   :  { %3639 = vmatprep.subr.bf16.mxu1 %v3905_v53 }
 0x9ce   :  { %v385_v3 = vmul.f32 %v4532_v6, %v354_v34 }
 0x9d0   :  { %v416_v1 = vadd.f32 %v3903_v25, %v385_v3 }
 0x9d2   :  { %3397 = vmatmul.mubr.msk.f32.gmra.mrb[10].mxu0 %vm53_vm0, %v416_v1 }
 0x9d3   :  { %3493 = vmatprep.mubr.msk.f32.mxu0 %vm3907_vm2, %v3906_v56 }
 0x9e2   :  { %v1438_v7 = vpop.permute.xlu0 %1437 }
 0x9e3   :  { %1444 = vst.msk [vmem:[#allocation5 + $0x10] sm:$0xff] %vm718_vm1, %v1438_v7 }
 0x9e4   :  { %1448 = vst.msk [vmem:[#allocation3 + $0x40] sm:$0xff] %vm963_vm4, %v1438_v7 }
 0x9e6   :  { %v1421_v47 = vpop.permute.xlu0 %1420 }
 0x9e7   :  { %1428 = vst.msk [vmem:[#allocation6 + $0x8] sm:$0xff] %vm718_vm1, %v1421_v47  ;;  %v1590_v47 = vld [vmem:[#allocation6] sm:$0xff] }
 0x9ea   :  { %v1464_v41 = vld [vmem:[#allocation5 + $0x10] sm:$0xff] }
 0x9eb   :  { %3483 = vmatmul.mubr.msk.f32.gmra.mrb[34].mxu1 %vm718_vm1, %v1464_v41 }
 0x9ec   :  { %3510 = vmatprep.mubr.msk.f32.mxu1 %vm3907_vm2, %v3906_v56 }
 0xa9a   :  { %v1555_v6 = vpop.f32.mrb[30].mxu1 }
 0xa9b   :  { %v1556_v25 = vadd.f32 %v1555_v6, %v1477_v13  ;;  %v3478_v59 = vpop.f32.mrb[31].mxu1 }
 0xa9d   :  { %3782 = vtanh.f32 %v1556_v25 }
 0xa9e   :  { %v1560_v60 = vpop.f32.mrb[32].mxu1 }
 0xa9f   :  { %v3481_v4 = vpop.f32.mrb[33].mxu1 }
 0xaa0   :  { %v1591_v4 = vld [vmem:[#allocation6 + $0x8] sm:$0xff] }
 0xaa5   :  { %v3398_v33 = vpop.f32.mrb[10].mxu0 }
 0xaa6   :  { %v4722_v23 = vadd.f32 %v3904_v18, %v3398_v33  ;;  %v625_v21 = vpop.f32.mrb[11].mxu0  ;;  %v1592_v33 = vld [vmem:[#allocation6 + $0x10] sm:$0xff] }
 0xaa7   :  { %v3783_v48 = vpop.eup %3782  ;;  %v4727_v13 = vadd.f32 %v3904_v18, %v625_v21 }
 0xaa8   :  { %1611 = vrot.lane.b32.xlu0 %v3783_v48, %s3908_s30  ;;  %v1479_v34 = vsel %vm4288_vm3, %v4722_v23, %v4720_v61  ;;  %v1718_v15 = vsel %vm4288_vm3, %v4720_v61, %v4722_v23 }
 0xaa9   :  { %v1478_v12 = vsel %vm4288_vm3, %v4727_v13, %v4725_v30  ;;  %v1717_v3 = vsel %vm4288_vm3, %v4725_v30, %v4727_v13 }
 0xaaa   :  { %v1561_v1 = vadd.f32 %v1560_v60, %v1478_v12  ;;  %v3218_v60 = vmul.f32 -1.442695, %v1556_v25 }
 0xaac   :  { %3784 = vtanh.f32 %v1561_v1  ;;  %v3219_v48 = vmul.f32 -1.442695, %v1561_v1 }
 0xab6   :  { %v3785_v7 = vpop.eup %3784 }
 0xab7   :  { %1613 = vrot.lane.b32.xlu1 %v3785_v7, %s3908_s30 }
 0xabb   :  { %1596 = vrot.lane.b32.xlu1 %v1590_v47, %s3909_s9 }
 0xabe   :  { %v1565_v41 = vpop.f32.mrb[34].mxu1 }
 0xabf   :  { %v1566_v6 = vadd.f32 %v1565_v41, %v1479_v34  ;;  %v3484_v59 = vpop.f32.mrb[35].mxu1  ;;  %1598 = vrot.lane.b32.xlu1 %v1591_v4, %s3909_s9 }
 0xac1   :  { %3786 = vtanh.f32 %v1566_v6  ;;  %v3220_v4 = vmul.f32 -1.442695, %v1566_v6 }
 0xac2   :  { %3788 = vpow2.f32 %v3218_v60 }
 0xac3   :  { %1600 = vrot.lane.b32.xlu1 %v1592_v33, %s3909_s9  ;;  %3790 = vpow2.f32 %v3219_v48 }
 0xacb   :  { %v3787_v18 = vpop.eup %3786 }
 0xacc   :  { %1615 = vrot.lane.b32.xlu0 %v3787_v18, %s3908_s30  ;;  %v3789_v21 = vpop.eup %3788 }
 0xacd   :  { %v1578_v12 = vadd.f32 1.0, %v3789_v21  ;;  %v3791_v7 = vpop.eup %3790 }
 0xace   :  { %v1579_v59 = vadd.f32 1.0, %v3791_v7 }
 0xacf   :  { %3792 = vrcp.f32 %v1578_v12 }
 0xad0   :  { %3794 = vrcp.f32 %v1579_v59 }
 0xad1   :  { %3796 = vpow2.f32 %v3220_v4 }
 0xad9   :  { %v3793_v34 = vpop.eup %3792 }
 0xada   :  { %v3795_v33 = vpop.eup %3794 }
 0xadb   :  { %v3797_v25 = vpop.eup %3796 }
 0xadc   :  { %v1580_v1 = vadd.f32 1.0, %v3797_v25 }
 0xade   :  { %3798 = vrcp.f32 %v1580_v1 }
 0xae8   :  { %v3799_v60 = vpop.eup %3798 }
 0xb1a   :  { %v1612_v47 = vpop.permute.xlu0 %1611 }
 0xb1b   :  { %v1620_v41 = vmul.f32 %v3793_v34, %v1612_v47 }
 0xb1d   :  { %1626 = vrot.lane.b32.xlu0 %v1620_v41, %s3909_s9 }
 0xb29   :  { %v1614_v49 = vpop.permute.xlu1 %1613 }
 0xb2a   :  { %v1621_v18 = vmul.f32 %v3795_v33, %v1614_v49 }
 0xb2c   :  { %1628 = vrot.lane.b32.xlu0 %v1621_v18, %s3909_s9 }
 0xb2d   :  { %v1597_v12 = vpop.permute.xlu1 %1596 }
 0xb2e   :  { %v1605_v7 = vmul.f32 %v3793_v34, %v1597_v12 }
 0xb31   :  { %v1599_v6 = vpop.permute.xlu1 %1598 }
 0xb32   :  { %v1606_v49 = vmul.f32 %v3795_v33, %v1599_v6 }
 0xb35   :  { %v1601_v25 = vpop.permute.xlu1 %1600 }
 0xb36   :  { %v1607_v1 = vmul.f32 %v3799_v60, %v1601_v25 }
 0xb3e   :  { %v1616_v21 = vpop.permute.xlu0 %1615 }
 0xb3f   :  { %v1622_v48 = vmul.f32 %v3799_v60, %v1616_v21 }
 0xb41   :  { %1630 = vrot.lane.b32.xlu0 %v1622_v48, %s3909_s9 }
 0xb8f   :  { %v1627_v47 = vpop.permute.xlu0 %1626 }
 0xb90   :  { %v1635_v41 = vadd.f32 %v1627_v47, %v1605_v7 }
 0xb92   :  { %3800 = vtanh.f32 %v1635_v41 }
 0xb9c   :  { %v3801_v59 = vpop.eup %3800 }
 0xb9d   :  { %1644 = vrot.lane.b32.xlu1 %v3801_v59, %s3908_s30 }
 0xb9e   :  { %v1629_v4 = vpop.permute.xlu0 %1628 }
 0xb9f   :  { %v1636_v43 = vadd.f32 %v1629_v4, %v1606_v49 }
 0xba1   :  { %3802 = vtanh.f32 %v1636_v43 }
 0xbab   :  { %v3803_v18 = vpop.eup %3802 }
 0xbac   :  { %1646 = vrot.lane.b32.xlu0 %v3803_v18, %s3908_s30 }
 0xbb3   :  { %v1631_v21 = vpop.permute.xlu0 %1630 }
 0xbb4   :  { %v1637_v48 = vadd.f32 %v1631_v21, %v1607_v1 }
 0xbb6   :  { %3804 = vtanh.f32 %v1637_v48 }
 0xbc0   :  { %v3805_v12 = vpop.eup %3804 }
 0xbc1   :  { %1648 = vrot.lane.b32.xlu1 %v3805_v12, %s3908_s30 }
 0xc0f   :  { %v1645_v7 = vpop.permute.xlu1 %1644 }
 0xc10   :  { %v4757_v47 = vmul.f32 %v3793_v34, %v1645_v7 }
 0xc12   :  { %1674 = vrot.lane.b32.xlu0 %v4757_v47, %s3909_s9 }
 0xc1e   :  { %v1647_v6 = vpop.permute.xlu0 %1646 }
 0xc1f   :  { %v4761_v59 = vmul.f32 %v3795_v33, %v1647_v6 }
 0xc21   :  { %1676 = vrot.lane.b32.xlu1 %v4761_v59, %s3909_s9 }
 0xc25   :  { %1659 = vrot.lane.b32.xlu1 %v1635_v41, %s3910_s14 }
 0xc29   :  { %1663 = vrot.lane.b32.xlu1 %v1637_v48, %s3910_s14 }
 0xc33   :  { %v1649_v49 = vpop.permute.xlu1 %1648 }
 0xc34   :  { %v4767_v4 = vmul.f32 %v3799_v60, %v1649_v49 }
 0xc36   :  { %1678 = vrot.lane.b32.xlu0 %v4767_v4, %s3909_s9 }
 0xc3a   :  { %1661 = vrot.lane.b32.xlu0 %v1636_v43, %s3910_s14 }
 0xc84   :  { %v1675_v34 = vpop.permute.xlu0 %1674 }
 0xc85   :  { %1683 = vst.msk [vmem:[#allocation5] sm:$0xff] %vm718_vm1, %v1675_v34 }
 0xc86   :  { %1687 = vst.msk [vmem:[#allocation3 + $0x48] sm:$0xff] %vm963_vm4, %v1675_v34 }
 0xc8c   :  { %v1703_v33 = vld [vmem:[#allocation5] sm:$0xff] }
 0xc8d   :  { %3494 = vmatmul.mubr.msk.f32.vlgmr.msra.gmra.mrb[12].mxu0 %vm718_vm1, %v1703_v33 }
 0xc8e   :  { %3496 = vmatprep.mubr.msk.f32.mxu0 %vm3907_vm2, %v3906_v56  ;;  %3635 = vmatpush3.bf16.msra.mxu0 %v4644_v40 }
 0xc8f   :  { %3636 = vmatprep.subr.bf16.mxu0 %v3905_v53 }
 0xc92   :  { %3638 = vmatpush3.bf16.msra.mxu0 %v4656_v52 }
 0xc93   :  { %v1677_v60 = vpop.permute.xlu1 %1676 }
 0xc94   :  { %1684 = vst.msk [vmem:[#allocation5 + $0x8] sm:$0xff] %vm718_vm1, %v1677_v60 }
 0xc95   :  { %1688 = vst.msk [vmem:[#allocation3 + $0x50] sm:$0xff] %vm963_vm4, %v1677_v60 }
 0xc97   :  { %v1660_v43 = vpop.permute.xlu1 %1659 }
 0xc98   :  { %1668 = vst.msk [vmem:[#allocation6] sm:$0xff] %vm718_vm1, %v1660_v43 }
 0xc9b   :  { %v1664_v41 = vpop.permute.xlu1 %1663  ;;  %v1704_v18 = vld [vmem:[#allocation5 + $0x8] sm:$0xff] }
 0xc9c   :  { %1670 = vst.msk [vmem:[#allocation6 + $0x10] sm:$0xff] %vm718_vm1, %v1664_v41  ;;  %3497 = vmatmul.mubr.msk.f32.gmra.mrb[14].mxu0 %vm718_vm1, %v1704_v18 }
 0xc9d   :  { %3499 = vmatprep.mubr.msk.f32.mxu0 %vm3907_vm2, %v3906_v56 }
 0xc9f   :  { %v1829_v43 = vld [vmem:[#allocation6] sm:$0xff] }
 0xca3   :  { %v1831_v30 = vld [vmem:[#allocation6 + $0x10] sm:$0xff] }
 0xca8   :  { %v1679_v25 = vpop.permute.xlu0 %1678 }
 0xca9   :  { %1685 = vst.msk [vmem:[#allocation5 + $0x10] sm:$0xff] %vm718_vm1, %v1679_v25 }
 0xcaa   :  { %1689 = vst.msk [vmem:[#allocation3 + $0x58] sm:$0xff] %vm963_vm4, %v1679_v25 }
 0xcac   :  { %v1662_v1 = vpop.permute.xlu0 %1661 }
 0xcad   :  { %1669 = vst.msk [vmem:[#allocation6 + $0x8] sm:$0xff] %vm718_vm1, %v1662_v1 }
 0xcb0   :  { %v1705_v21 = vld [vmem:[#allocation5 + $0x10] sm:$0xff] }
 0xcb1   :  { %3500 = vmatmul.mubr.msk.f32.gmra.mrb[16].mxu0 %vm718_vm1, %v1705_v21 }
 0xcb2   :  { %3527 = vmatprep.mubr.msk.f32.mxu0 %vm3907_vm2, %v3906_v56 }
 0xcb4   :  { %v1830_v41 = vld [vmem:[#allocation6 + $0x8] sm:$0xff] }
 0xd60   :  { %v1794_v48 = vpop.f32.mrb[12].mxu0 }
 0xd61   :  { %v1795_v12 = vadd.f32 %v1794_v48, %v1716_v17  ;;  %v3495_v7 = vpop.f32.mrb[13].mxu0 }
 0xd63   :  { %3806 = vtanh.f32 %v1795_v12 }
 0xd6d   :  { %v3807_v6 = vpop.eup %3806 }
 0xd6e   :  { %1850 = vrot.lane.b32.xlu0 %v3807_v6, %s3908_s30 }
 0xd6f   :  { %v1799_v49 = vpop.f32.mrb[14].mxu0 }
 0xd70   :  { %v1800_v34 = vadd.f32 %v1799_v49, %v1717_v3  ;;  %v3498_v33 = vpop.f32.mrb[15].mxu0  ;;  %v3224_v3 = vmul.f32 -1.442695, %v1795_v12 }
 0xd72   :  { %3808 = vtanh.f32 %v1800_v34  ;;  %v3225_v25 = vmul.f32 -1.442695, %v1800_v34 }
 0xd7c   :  { %v3809_v60 = vpop.eup %3808 }
 0xd7d   :  { %1852 = vrot.lane.b32.xlu1 %v3809_v60, %s3908_s30 }
 0xd81   :  { %1835 = vrot.lane.b32.xlu1 %v1829_v43, %s3909_s9 }
 0xd84   :  { %v1804_v62 = vpop.f32.mrb[16].mxu0 }
 0xd85   :  { %v1805_v57 = vadd.f32 %v1804_v62, %v1718_v15  ;;  %v3501_v17 = vpop.f32.mrb[17].mxu0  ;;  %1837 = vrot.lane.b32.xlu1 %v1830_v41, %s3909_s9 }
 0xd87   :  { %3810 = vtanh.f32 %v1805_v57  ;;  %v3226_v7 = vmul.f32 -1.442695, %v1805_v57 }
 0xd88   :  { %3812 = vpow2.f32 %v3224_v3 }
 0xd89   :  { %1839 = vrot.lane.b32.xlu1 %v1831_v30, %s3909_s9  ;;  %3814 = vpow2.f32 %v3225_v25 }
 0xd91   :  { %v3811_v13 = vpop.eup %3810 }
 0xd92   :  { %1854 = vrot.lane.b32.xlu0 %v3811_v13, %s3908_s30  ;;  %v3813_v18 = vpop.eup %3812 }
 0xd93   :  { %v1817_v1 = vadd.f32 1.0, %v3813_v18  ;;  %v3815_v61 = vpop.eup %3814 }
 0xd94   :  { %v1818_v48 = vadd.f32 1.0, %v3815_v61 }
 0xd95   :  { %3816 = vrcp.f32 %v1817_v1 }
 0xd96   :  { %3818 = vrcp.f32 %v1818_v48 }
 0xd97   :  { %3820 = vpow2.f32 %v3226_v7 }
 0xd9f   :  { %v3817_v23 = vpop.eup %3816 }
 0xda0   :  { %v3819_v6 = vpop.eup %3818 }
 0xda1   :  { %v3821_v12 = vpop.eup %3820 }
 0xda2   :  { %v1819_v34 = vadd.f32 1.0, %v3821_v12 }
 0xda4   :  { %3822 = vrcp.f32 %v1819_v34 }
 0xdae   :  { %v3823_v60 = vpop.eup %3822 }
 0xde0   :  { %v1851_v15 = vpop.permute.xlu0 %1850 }
 0xde1   :  { %v1859_v21 = vmul.f32 %v3817_v23, %v1851_v15 }
 0xde3   :  { %1865 = vrot.lane.b32.xlu0 %v1859_v21, %s3909_s9 }
 0xdef   :  { %v1853_v49 = vpop.permute.xlu1 %1852 }
 0xdf0   :  { %v1860_v33 = vmul.f32 %v3819_v6, %v1853_v49 }
 0xdf2   :  { %1867 = vrot.lane.b32.xlu0 %v1860_v33, %s3909_s9 }
 0xdf3   :  { %v1836_v17 = vpop.permute.xlu1 %1835 }
 0xdf4   :  { %v1844_v41 = vmul.f32 %v3817_v23, %v1836_v17 }
 0xdf7   :  { %v1838_v57 = vpop.permute.xlu1 %1837 }
 0xdf8   :  { %v1845_v18 = vmul.f32 %v3819_v6, %v1838_v57 }
 0xdfb   :  { %v1840_v15 = vpop.permute.xlu1 %1839 }
 0xdfc   :  { %v1846_v21 = vmul.f32 %v3823_v60, %v1840_v15 }
 0xe04   :  { %v1855_v43 = vpop.permute.xlu0 %1854 }
 0xe05   :  { %v1861_v62 = vmul.f32 %v3823_v60, %v1855_v43 }
 0xe07   :  { %1869 = vrot.lane.b32.xlu0 %v1861_v62, %s3909_s9 }
 0xe55   :  { %v1866_v30 = vpop.permute.xlu0 %1865 }
 0xe56   :  { %v1874_v13 = vadd.f32 %v1866_v30, %v1844_v41 }
 0xe58   :  { %3824 = vtanh.f32 %v1874_v13 }
 0xe62   :  { %v3825_v3 = vpop.eup %3824 }
 0xe63   :  { %1883 = vrot.lane.b32.xlu1 %v3825_v3, %s3908_s30 }
 0xe64   :  { %v1868_v25 = vpop.permute.xlu0 %1867 }
 0xe65   :  { %v1875_v1 = vadd.f32 %v1868_v25, %v1845_v18 }
 0xe67   :  { %3826 = vtanh.f32 %v1875_v1 }
 0xe71   :  { %v3827_v61 = vpop.eup %3826 }
 0xe72   :  { %1885 = vrot.lane.b32.xlu0 %v3827_v61, %s3908_s30 }
 0xe79   :  { %v1870_v48 = vpop.permute.xlu0 %1869 }
 0xe7a   :  { %v1876_v7 = vadd.f32 %v1870_v48, %v1846_v21 }
 0xe7c   :  { %3828 = vtanh.f32 %v1876_v7 }
 0xe86   :  { %v3829_v49 = vpop.eup %3828 }
 0xe87   :  { %1887 = vrot.lane.b32.xlu1 %v3829_v49, %s3908_s30 }
 0xed5   :  { %v1884_v33 = vpop.permute.xlu1 %1883 }
 0xed6   :  { %v4820_v12 = vmul.f32 %v3817_v23, %v1884_v33 }
 0xed8   :  { %1913 = vrot.lane.b32.xlu0 %v4820_v12, %s3909_s9 }
 0xee4   :  { %v1886_v34 = vpop.permute.xlu0 %1885 }
 0xee5   :  { %v4824_v43 = vmul.f32 %v3819_v6, %v1886_v34 }
 0xee7   :  { %1915 = vrot.lane.b32.xlu1 %v4824_v43, %s3909_s9 }
 0xeeb   :  { %1898 = vrot.lane.b32.xlu1 %v1874_v13, %s3910_s14 }
 0xeef   :  { %1902 = vrot.lane.b32.xlu1 %v1876_v7, %s3910_s14 }
 0xef9   :  { %v1888_v62 = vpop.permute.xlu1 %1887 }
 0xefa   :  { %v4830_v17 = vmul.f32 %v3823_v60, %v1888_v62 }
 0xefc   :  { %1917 = vrot.lane.b32.xlu0 %v4830_v17, %s3909_s9 }
 0xf00   :  { %1900 = vrot.lane.b32.xlu0 %v1875_v1, %s3910_s14 }
 0xf4a   :  { %v1914_v23 = vpop.permute.xlu0 %1913 }
 0xf4b   :  { %1922 = vst.msk [vmem:[#allocation5] sm:$0xff] %vm718_vm1, %v1914_v23 }
 0xf4c   :  { %1926 = vst.msk [vmem:[#allocation3 + $0x60] sm:$0xff] %vm963_vm4, %v1914_v23 }
 0xf52   :  { %v1942_v6 = vld [vmem:[#allocation5] sm:$0xff] }
 0xf53   :  { %3511 = vmatmul.mubr.msk.f32.vlgmr.msra.gmra.mrb[36].mxu1 %vm718_vm1, %v1942_v6 }
 0xf54   :  { %3513 = vmatprep.mubr.msk.f32.mxu1 %vm3907_vm2, %v3906_v56  ;;  %3641 = vmatpush3.bf16.msra.mxu1 %v4644_v40 }
 0xf55   :  { %3642 = vmatprep.subr.bf16.mxu1 %v3905_v53 }
 0xf58   :  { %3644 = vmatpush3.bf16.msra.mxu1 %v4656_v52 }
 0xf59   :  { %v1916_v60 = vpop.permute.xlu1 %1915 }
 0xf5a   :  { %1923 = vst.msk [vmem:[#allocation5 + $0x8] sm:$0xff] %vm718_vm1, %v1916_v60 }
 0xf5b   :  { %1927 = vst.msk [vmem:[#allocation3 + $0x68] sm:$0xff] %vm963_vm4, %v1916_v60 }
 0xf5d   :  { %v1899_v41 = vpop.permute.xlu1 %1898 }
 0xf5e   :  { %1907 = vst.msk [vmem:[#allocation6] sm:$0xff] %vm718_vm1, %v1899_v41 }
 0xf61   :  { %v1903_v30 = vpop.permute.xlu1 %1902  ;;  %v1943_v13 = vld [vmem:[#allocation5 + $0x8] sm:$0xff] }
 0xf62   :  { %1909 = vst.msk [vmem:[#allocation6 + $0x10] sm:$0xff] %vm718_vm1, %v1903_v30  ;;  %3514 = vmatmul.mubr.msk.f32.gmra.mrb[38].mxu1 %vm718_vm1, %v1943_v13 }
 0xf63   :  { %3516 = vmatprep.mubr.msk.f32.mxu1 %vm3907_vm2, %v3906_v56 }
 0xf65   :  { %v2068_v48 = vld [vmem:[#allocation6] sm:$0xff] }
 0xf69   :  { %v2070_v37 = vld [vmem:[#allocation6 + $0x10] sm:$0xff] }
 0xf6e   :  { %v1918_v53 = vpop.permute.xlu0 %1917 }
 0xf6f   :  { %1924 = vst.msk [vmem:[#allocation5 + $0x10] sm:$0xff] %vm718_vm1, %v1918_v53 }
 0xf70   :  { %1928 = vst.msk [vmem:[#allocation3 + $0x70] sm:$0xff] %vm963_vm4, %v1918_v53 }
 0xf72   :  { %v1901_v40 = vpop.permute.xlu0 %1900 }
 0xf73   :  { %1908 = vst.msk [vmem:[#allocation6 + $0x8] sm:$0xff] %vm718_vm1, %v1901_v40 }
 0xf76   :  { %v1944_v52 = vld [vmem:[#allocation5 + $0x10] sm:$0xff] }
 0xf77   :  { %3517 = vmatmul.mubr.msk.f32.gmra.mrb[40].mxu1 %vm718_vm1, %v1944_v52 }
 0xf78   :  { %3544 = vmatprep.mubr.msk.f32.mxu1 %vm3907_vm2, %v3906_v56 }
 0xf7a   :  { %v2069_v7 = vld [vmem:[#allocation6 + $0x8] sm:$0xff] }
0x1026   :  { %v2033_v57 = vpop.f32.mrb[36].mxu1 }
0x1027   :  { %v2034_v3 = vadd.f32 %v2033_v57, %v1955_v14  ;;  %v3512_v18 = vpop.f32.mrb[37].mxu1 }
0x1029   :  { %3830 = vtanh.f32 %v2034_v3 }
0x1033   :  { %v3831_v25 = vpop.eup %3830 }
0x1034   :  { %2089 = vrot.lane.b32.xlu0 %v3831_v25, %s3908_s30 }
0x1035   :  { %v2038_v1 = vpop.f32.mrb[38].mxu1 }
0x1036   :  { %v2039_v61 = vadd.f32 %v2038_v1, %v1956_v19  ;;  %v3515_v15 = vpop.f32.mrb[39].mxu1  ;;  %v3230_v19 = vmul.f32 -1.442695, %v2034_v3 }
0x1038   :  { %3832 = vtanh.f32 %v2039_v61  ;;  %v3231_v33 = vmul.f32 -1.442695, %v2039_v61 }
0x1042   :  { %v3833_v21 = vpop.eup %3832 }
0x1043   :  { %2091 = vrot.lane.b32.xlu1 %v3833_v21, %s3908_s30 }
0x1047   :  { %2074 = vrot.lane.b32.xlu1 %v2068_v48, %s3909_s9 }
0x104a   :  { %v2043_v58 = vpop.f32.mrb[40].mxu1 }
0x104b   :  { %v2044_v5 = vadd.f32 %v2043_v58, %v1957_v20  ;;  %v3518_v14 = vpop.f32.mrb[41].mxu1  ;;  %2076 = vrot.lane.b32.xlu1 %v2069_v7, %s3909_s9 }
0x104d   :  { %3834 = vtanh.f32 %v2044_v5  ;;  %v3232_v6 = vmul.f32 -1.442695, %v2044_v5 }
0x104e   :  { %3836 = vpow2.f32 %v3230_v19 }
0x104f   :  { %2078 = vrot.lane.b32.xlu1 %v2070_v37, %s3909_s9  ;;  %3838 = vpow2.f32 %v3231_v33 }
0x1057   :  { %v3835_v63 = vpop.eup %3834 }
0x1058   :  { %2093 = vrot.lane.b32.xlu0 %v3835_v63, %s3908_s30  ;;  %v3837_v49 = vpop.eup %3836 }
0x1059   :  { %v2056_v34 = vadd.f32 1.0, %v3837_v49  ;;  %v3839_v55 = vpop.eup %3838 }
0x105a   :  { %v2057_v23 = vadd.f32 1.0, %v3839_v55 }
0x105b   :  { %3840 = vrcp.f32 %v2056_v34 }
0x105c   :  { %3842 = vrcp.f32 %v2057_v23 }
0x105d   :  { %3844 = vpow2.f32 %v3232_v6 }
0x1065   :  { %v3841_v16 = vpop.eup %3840 }
0x1066   :  { %v3843_v60 = vpop.eup %3842 }
0x1067   :  { %v3845_v13 = vpop.eup %3844 }
0x1068   :  { %v2058_v53 = vadd.f32 1.0, %v3845_v13 }
0x106a   :  { %3846 = vrcp.f32 %v2058_v53 }
0x1074   :  { %v3847_v40 = vpop.eup %3846 }
0x10a6   :  { %v2090_v20 = vpop.permute.xlu0 %2089 }
0x10a7   :  { %v2098_v62 = vmul.f32 %v3841_v16, %v2090_v20 }
0x10a9   :  { %2104 = vrot.lane.b32.xlu0 %v2098_v62, %s3909_s9 }
0x10b5   :  { %v2092_v41 = vpop.permute.xlu1 %2091 }
0x10b6   :  { %v2099_v30 = vmul.f32 %v3843_v60, %v2092_v41 }
0x10b8   :  { %2106 = vrot.lane.b32.xlu0 %v2099_v30, %s3909_s9 }
0x10b9   :  { %v2075_v3 = vpop.permute.xlu1 %2074 }
0x10ba   :  { %v2083_v18 = vmul.f32 %v3841_v16, %v2075_v3 }
0x10bd   :  { %v2077_v61 = vpop.permute.xlu1 %2076 }
0x10be   :  { %v2084_v21 = vmul.f32 %v3843_v60, %v2077_v61 }
0x10c1   :  { %v2079_v14 = vpop.permute.xlu1 %2078 }
0x10c2   :  { %v2085_v7 = vmul.f32 %v3847_v40, %v2079_v14 }
0x10ca   :  { %v2094_v52 = vpop.permute.xlu0 %2093 }
0x10cb   :  { %v2100_v57 = vmul.f32 %v3847_v40, %v2094_v52 }
0x10cd   :  { %2108 = vrot.lane.b32.xlu0 %v2100_v57, %s3909_s9 }
0x111b   :  { %v2105_v25 = vpop.permute.xlu0 %2104 }
0x111c   :  { %v2113_v1 = vadd.f32 %v2105_v25, %v2083_v18 }
0x111e   :  { %3848 = vtanh.f32 %v2113_v1 }
0x1128   :  { %v3849_v15 = vpop.eup %3848 }
0x1129   :  { %2122 = vrot.lane.b32.xlu1 %v3849_v15, %s3908_s30 }
0x112a   :  { %v2107_v48 = vpop.permute.xlu0 %2106 }
0x112b   :  { %v2114_v58 = vadd.f32 %v2107_v48, %v2084_v21 }
0x112d   :  { %3850 = vtanh.f32 %v2114_v58 }
0x1137   :  { %v3851_v5 = vpop.eup %3850 }
0x1138   :  { %2124 = vrot.lane.b32.xlu0 %v3851_v5, %s3908_s30 }
0x113f   :  { %v2109_v37 = vpop.permute.xlu0 %2108 }
0x1140   :  { %v2115_v63 = vadd.f32 %v2109_v37, %v2085_v7 }
0x1142   :  { %3852 = vtanh.f32 %v2115_v63 }
0x114c   :  { %v3853_v19 = vpop.eup %3852 }
0x114d   :  { %2126 = vrot.lane.b32.xlu1 %v3853_v19, %s3908_s30 }
0x119b   :  { %v2123_v49 = vpop.permute.xlu1 %2122 }
0x119c   :  { %v4883_v33 = vmul.f32 %v3841_v16, %v2123_v49 }
0x119e   :  { %2152 = vrot.lane.b32.xlu0 %v4883_v33, %s3909_s9 }
0x11aa   :  { %v2125_v34 = vpop.permute.xlu0 %2124 }
0x11ab   :  { %v4887_v55 = vmul.f32 %v3843_v60, %v2125_v34 }
0x11ad   :  { %2154 = vrot.lane.b32.xlu1 %v4887_v55, %s3909_s9 }
0x11b1   :  { %2137 = vrot.lane.b32.xlu1 %v2113_v1, %s3910_s14 }
0x11b5   :  { %2141 = vrot.lane.b32.xlu1 %v2115_v63, %s3910_s14 }
0x11bf   :  { %v2127_v20 = vpop.permute.xlu1 %2126 }
0x11c0   :  { %v4893_v62 = vmul.f32 %v3847_v40, %v2127_v20 }
0x11c2   :  { %2156 = vrot.lane.b32.xlu0 %v4893_v62, %s3909_s9 }
0x11c6   :  { %2139 = vrot.lane.b32.xlu0 %v2114_v58, %s3910_s14 }
0x1210   :  { %v2153_v16 = vpop.permute.xlu0 %2152 }
0x1211   :  { %2161 = vst.msk [vmem:[#allocation5] sm:$0xff] %vm718_vm1, %v2153_v16 }
0x1212   :  { %2165 = vst.msk [vmem:[#allocation3 + $0x78] sm:$0xff] %vm963_vm4, %v2153_v16 }
0x1218   :  { %v2181_v23 = vld [vmem:[#allocation5] sm:$0xff] }
0x1219   :  { %3528 = vmatmul.mubr.msk.f32.vlgmr.msra.gmra.mrb[18].mxu0 %vm718_vm1, %v2181_v23 }
0x121a   :  { %3530 = vmatprep.mubr.msk.f32.mxu0 %vm3907_vm2, %v3906_v56 }
0x121f   :  { %v2155_v6 = vpop.permute.xlu1 %2154 }
0x1220   :  { %2162 = vst.msk [vmem:[#allocation5 + $0x8] sm:$0xff] %vm718_vm1, %v2155_v6 }
0x1221   :  { %2166 = vst.msk [vmem:[#allocation3 + $0x80] sm:$0xff] %vm963_vm4, %v2155_v6 }
0x1223   :  { %v2138_v60 = vpop.permute.xlu1 %2137 }
0x1224   :  { %2146 = vst.msk [vmem:[#allocation6] sm:$0xff] %vm718_vm1, %v2138_v60 }
0x1227   :  { %v2142_v41 = vpop.permute.xlu1 %2141  ;;  %v2182_v30 = vld [vmem:[#allocation5 + $0x8] sm:$0xff] }
0x1228   :  { %2148 = vst.msk [vmem:[#allocation6 + $0x10] sm:$0xff] %vm718_vm1, %v2142_v41  ;;  %3531 = vmatmul.mubr.msk.f32.gmra.mrb[20].mxu0 %vm718_vm1, %v2182_v30 }
0x1229   :  { %3533 = vmatprep.mubr.msk.f32.mxu0 %vm3907_vm2, %v3906_v56 }
0x122b   :  { %v2307_v21 = vld [vmem:[#allocation6] sm:$0xff] }
0x122f   :  { %v2309_v9 = vld [vmem:[#allocation6 + $0x10] sm:$0xff] }
0x1234   :  { %v2157_v13 = vpop.permute.xlu0 %2156 }
0x1235   :  { %2163 = vst.msk [vmem:[#allocation5 + $0x10] sm:$0xff] %vm718_vm1, %v2157_v13 }
0x1236   :  { %2167 = vst.msk [vmem:[#allocation3 + $0x88] sm:$0xff] %vm963_vm4, %v2157_v13 }
0x1238   :  { %v2140_v53 = vpop.permute.xlu0 %2139 }
0x1239   :  { %2147 = vst.msk [vmem:[#allocation6 + $0x8] sm:$0xff] %vm718_vm1, %v2140_v53 }
0x123c   :  { %v2183_v40 = vld [vmem:[#allocation5 + $0x10] sm:$0xff] }
0x123d   :  { %3534 = vmatmul.mubr.msk.f32.gmra.mrb[22].mxu0 %vm718_vm1, %v2183_v40 }
0x1240   :  { %v2308_v48 = vld [vmem:[#allocation6 + $0x8] sm:$0xff] }
0x12ec   :  { %v2272_v52 = vpop.f32.mrb[18].mxu0 }
0x12ed   :  { %v2273_v57 = vadd.f32 %v2272_v52, %v2194_v11  ;;  %v3529_v3 = vpop.f32.mrb[19].mxu0 }
0x12ef   :  { %3854 = vtanh.f32 %v2273_v57 }
0x12f9   :  { %v3855_v18 = vpop.eup %3854 }
0x12fa   :  { %2328 = vrot.lane.b32.xlu0 %v3855_v18, %s3908_s30 }
0x12fb   :  { %v2277_v25 = vpop.f32.mrb[20].mxu0 }
0x12fc   :  { %v2278_v1 = vadd.f32 %v2277_v25, %v2195_v22  ;;  %v3532_v61 = vpop.f32.mrb[21].mxu0  ;;  %v3236_v22 = vmul.f32 -1.442695, %v2273_v57 }
0x12fe   :  { %3856 = vtanh.f32 %v2278_v1  ;;  %v3237_v5 = vmul.f32 -1.442695, %v2278_v1 }
0x1308   :  { %v3857_v15 = vpop.eup %3856 }
0x1309   :  { %2330 = vrot.lane.b32.xlu1 %v3857_v15, %s3908_s30 }
0x130d   :  { %2313 = vrot.lane.b32.xlu1 %v2307_v21, %s3909_s9 }
0x1310   :  { %v2282_v50 = vpop.f32.mrb[22].mxu0 }
0x1311   :  { %v2283_v10 = vadd.f32 %v2282_v50, %v2196_v31  ;;  %v3535_v11 = vpop.f32.mrb[23].mxu0  ;;  %2315 = vrot.lane.b32.xlu1 %v2308_v48, %s3909_s9 }
0x1313   :  { %3858 = vtanh.f32 %v2283_v10  ;;  %v3238_v63 = vmul.f32 -1.442695, %v2283_v10 }
0x1314   :  { %3860 = vpow2.f32 %v3236_v22 }
0x1315   :  { %2317 = vrot.lane.b32.xlu1 %v2309_v9, %s3909_s9  ;;  %3862 = vpow2.f32 %v3237_v5 }
0x131d   :  { %v3859_v32 = vpop.eup %3858 }
0x131e   :  { %2332 = vrot.lane.b32.xlu0 %v3859_v32, %s3908_s30  ;;  %v3861_v58 = vpop.eup %3860 }
0x131f   :  { %v2295_v14 = vadd.f32 1.0, %v3861_v58  ;;  %v3863_v26 = vpop.eup %3862 }
0x1320   :  { %v2296_v37 = vadd.f32 1.0, %v3863_v26 }
0x1321   :  { %3864 = vrcp.f32 %v2295_v14 }
0x1322   :  { %3866 = vrcp.f32 %v2296_v37 }
0x1323   :  { %3868 = vpow2.f32 %v3238_v63 }
0x132b   :  { %v3865_v27 = vpop.eup %3864 }
0x132c   :  { %v3867_v19 = vpop.eup %3866 }
0x132d   :  { %v3869_v20 = vpop.eup %3868 }
0x132e   :  { %v2297_v16 = vadd.f32 1.0, %v3869_v20 }
0x1330   :  { %3870 = vrcp.f32 %v2297_v16 }
0x133a   :  { %v3871_v23 = vpop.eup %3870 }
0x136c   :  { %v2329_v31 = vpop.permute.xlu0 %2328 }
0x136d   :  { %v2337_v7 = vmul.f32 %v3865_v27, %v2329_v31 }
0x136f   :  { %2343 = vrot.lane.b32.xlu0 %v2337_v7, %s3909_s9 }
0x137b   :  { %v2331_v49 = vpop.permute.xlu1 %2330 }
0x137c   :  { %v2338_v34 = vmul.f32 %v3867_v19, %v2331_v49  ;;  %v5399_v49 = vsel %vm4288_vm3, %v4293_v0, %v4296_v39  ;;  %v5401_v39 = vsel %vm4288_vm3, %v4327_v28, %v4330_v29 }
0x137e   :  { %2345 = vrot.lane.b32.xlu0 %v2338_v34, %s3909_s9 }
0x137f   :  { %v2314_v41 = vpop.permute.xlu1 %2313 }
0x1380   :  { %v2322_v30 = vmul.f32 %v3865_v27, %v2314_v41 }
0x1383   :  { %v2316_v40 = vpop.permute.xlu1 %2315 }
0x1384   :  { %v2323_v57 = vmul.f32 %v3867_v19, %v2316_v40 }
0x1387   :  { %v2318_v1 = vpop.permute.xlu1 %2317 }
0x1388   :  { %v2324_v61 = vmul.f32 %v3871_v23, %v2318_v1 }
0x1390   :  { %v2333_v6 = vpop.permute.xlu0 %2332 }
0x1391   :  { %v2339_v60 = vmul.f32 %v3871_v23, %v2333_v6 }
0x1393   :  { %2347 = vrot.lane.b32.xlu0 %v2339_v60, %s3909_s9 }
0x13e1   :  { %v2344_v13 = vpop.permute.xlu0 %2343 }
0x13e2   :  { %v2352_v53 = vadd.f32 %v2344_v13, %v2322_v30 }
0x13e4   :  { %3872 = vtanh.f32 %v2352_v53 }
0x13ee   :  { %v3873_v52 = vpop.eup %3872 }
0x13ef   :  { %2361 = vrot.lane.b32.xlu1 %v3873_v52, %s3908_s30 }
0x13f0   :  { %v2346_v3 = vpop.permute.xlu0 %2345 }
0x13f1   :  { %v2353_v18 = vadd.f32 %v2346_v3, %v2323_v57 }
0x13f3   :  { %3874 = vtanh.f32 %v2353_v18 }
0x13fd   :  { %v3875_v25 = vpop.eup %3874 }
0x13fe   :  { %2363 = vrot.lane.b32.xlu0 %v3875_v25, %s3908_s30 }
0x1405   :  { %v2348_v15 = vpop.permute.xlu0 %2347 }
0x1406   :  { %v2354_v21 = vadd.f32 %v2348_v15, %v2324_v61 }
0x1408   :  { %3876 = vtanh.f32 %v2354_v21 }
0x1412   :  { %v3877_v50 = vpop.eup %3876 }
0x1413   :  { %2365 = vrot.lane.b32.xlu1 %v3877_v50, %s3908_s30 }
0x1461   :  { %v2362_v10 = vpop.permute.xlu1 %2361 }
0x1462   :  { %v4941_v11 = vmul.f32 %v3865_v27, %v2362_v10 }
0x1464   :  { %2391 = vrot.lane.b32.xlu0 %v4941_v11, %s3909_s9 }
0x1470   :  { %v2364_v48 = vpop.permute.xlu0 %2363 }
0x1471   :  { %v4945_v9 = vmul.f32 %v3867_v19, %v2364_v48 }
0x1473   :  { %2393 = vrot.lane.b32.xlu1 %v4945_v9, %s3909_s9 }
0x1477   :  { %2376 = vrot.lane.b32.xlu1 %v2352_v53, %s3910_s14 }
0x147b   :  { %2380 = vrot.lane.b32.xlu1 %v2354_v21, %s3910_s14 }
0x1485   :  { %v2366_v32 = vpop.permute.xlu1 %2365 }
0x1486   :  { %v4951_v22 = vmul.f32 %v3871_v23, %v2366_v32  ;;  %v5400_v23 = vsel %vm4288_vm3, %v4310_v46, %v4307_v36 }
0x1488   :  { %2395 = vrot.lane.b32.xlu0 %v4951_v22, %s3909_s9 }
0x148c   :  { %2378 = vrot.lane.b32.xlu0 %v2353_v18, %s3910_s14 }
0x14d6   :  { %v2392_v58 = vpop.permute.xlu0 %2391 }
0x14d7   :  { %2400 = vst.msk [vmem:[#allocation5] sm:$0xff] %vm718_vm1, %v2392_v58 }
0x14d8   :  { %2404 = vst.msk [vmem:[#allocation3 + $0x90] sm:$0xff] %vm963_vm4, %v2392_v58 }
0x14de   :  { %v2420_v5 = vld [vmem:[#allocation5] sm:$0xff] }
0x14df   :  { %3545 = vmatmul.mubr.msk.f32.vlgmr.msra.gmra.mrb[42].mxu1 %vm718_vm1, %v2420_v5 }
0x14e0   :  { %3547 = vmatprep.mubr.msk.f32.mxu1 %vm3907_vm2, %v3906_v56 }
0x14e5   :  { %v2394_v14 = vpop.permute.xlu1 %2393 }
0x14e6   :  { %2401 = vst.msk [vmem:[#allocation5 + $0x8] sm:$0xff] %vm718_vm1, %v2394_v14 }
0x14e7   :  { %2405 = vst.msk [vmem:[#allocation3 + $0x98] sm:$0xff] %vm963_vm4, %v2394_v14 }
0x14e9   :  { %v2377_v26 = vpop.permute.xlu1 %2376 }
0x14ea   :  { %2385 = vst.msk [vmem:[#allocation6] sm:$0xff] %vm718_vm1, %v2377_v26 }
0x14ed   :  { %v2381_v27 = vpop.permute.xlu1 %2380  ;;  %v2421_v31 = vld [vmem:[#allocation5 + $0x8] sm:$0xff] }
0x14ee   :  { %2387 = vst.msk [vmem:[#allocation6 + $0x10] sm:$0xff] %vm718_vm1, %v2381_v27  ;;  %3548 = vmatmul.mubr.msk.f32.gmra.mrb[44].mxu1 %vm718_vm1, %v2421_v31 }
0x14ef   :  { %3550 = vmatprep.mubr.msk.f32.mxu1 %vm3907_vm2, %v3906_v56 }
0x14f1   :  { %v2546_v30 = vld [vmem:[#allocation6] sm:$0xff] }
0x14f5   :  { %v2548_v61 = vld [vmem:[#allocation6 + $0x10] sm:$0xff] }
0x14fa   :  { %v2396_v7 = vpop.permute.xlu0 %2395 }
0x14fb   :  { %2402 = vst.msk [vmem:[#allocation5 + $0x10] sm:$0xff] %vm718_vm1, %v2396_v7 }
0x14fc   :  { %2406 = vst.msk [vmem:[#allocation3 + $0xa0] sm:$0xff] %vm963_vm4, %v2396_v7 }
0x14fe   :  { %v2379_v37 = vpop.permute.xlu0 %2378 }
0x14ff   :  { %2386 = vst.msk [vmem:[#allocation6 + $0x8] sm:$0xff] %vm718_vm1, %v2379_v37 }
0x1502   :  { %v2422_v63 = vld [vmem:[#allocation5 + $0x10] sm:$0xff] }
0x1503   :  { %3551 = vmatmul.mubr.msk.f32.gmra.mrb[46].mxu1 %vm718_vm1, %v2422_v63 }
0x1506   :  { %v2547_v36 = vld [vmem:[#allocation6 + $0x8] sm:$0xff] }
0x15b2   :  { %v2511_v19 = vpop.f32.mrb[42].mxu1 }
0x15b3   :  { %v2512_v34 = vadd.f32 %v2511_v19, %v5399_v49  ;;  %v3546_v20 = vpop.f32.mrb[43].mxu1 }
0x15b5   :  { %3878 = vtanh.f32 %v2512_v34  ;;  %v3242_v46 = vmul.f32 -1.442695, %v2512_v34 }
0x15bf   :  { %v3879_v56 = vpop.eup %3878 }
0x15c0   :  { %2567 = vrot.lane.b32.xlu0 %v3879_v56, %s3908_s30 }
0x15c1   :  { %v2516_v16 = vpop.f32.mrb[44].mxu1 }
0x15c2   :  { %v2517_v6 = vadd.f32 %v2516_v16, %v5400_v23  ;;  %v3549_v60 = vpop.f32.mrb[45].mxu1 }
0x15c4   :  { %3880 = vtanh.f32 %v2517_v6  ;;  %v3243_v57 = vmul.f32 -1.442695, %v2517_v6 }
0x15ce   :  { %v3881_v41 = vpop.eup %3880 }
0x15cf   :  { %2569 = vrot.lane.b32.xlu1 %v3881_v41, %s3908_s30 }
0x15d3   :  { %2552 = vrot.lane.b32.xlu1 %v2546_v30, %s3909_s9 }
0x15d6   :  { %v2521_v0 = vpop.f32.mrb[46].mxu1 }
0x15d7   :  { %v2522_v13 = vadd.f32 %v2521_v0, %v5401_v39  ;;  %v3552_v53 = vpop.f32.mrb[47].mxu1 }
0x15d9   :  { %3882 = vtanh.f32 %v2522_v13  ;;  %v3244_v1 = vmul.f32 -1.442695, %v2522_v13 }
0x15da   :  { %3884 = vpow2.f32 %v3242_v46 }
0x15db   :  { %3886 = vpow2.f32 %v3243_v57 }
0x15e3   :  { %v3883_v40 = vpop.eup %3882 }
0x15e4   :  { %2571 = vrot.lane.b32.xlu0 %v3883_v40, %s3908_s30  ;;  %v3885_v52 = vpop.eup %3884 }
0x15e5   :  { %v2534_v3 = vadd.f32 1.0, %v3885_v52  ;;  %v3887_v38 = vpop.eup %3886 }
0x15e6   :  { %v2535_v29 = vadd.f32 1.0, %v3887_v38 }
0x15e7   :  { %3888 = vrcp.f32 %v2534_v3 }
0x15e8   :  { %2554 = vrot.lane.b32.xlu0 %v2547_v36, %s3909_s9  ;;  %3890 = vrcp.f32 %v2535_v29 }
0x15e9   :  { %3892 = vpow2.f32 %v3244_v1 }
0x15f1   :  { %v3889_v18 = vpop.eup %3888 }
0x15f2   :  { %v3891_v15 = vpop.eup %3890 }
0x15f3   :  { %v3893_v10 = vpop.eup %3892 }
0x15f4   :  { %v2536_v48 = vadd.f32 1.0, %v3893_v10 }
0x15f6   :  { %3894 = vrcp.f32 %v2536_v48 }
0x1600   :  { %v3895_v32 = vpop.eup %3894 }
0x1632   :  { %v2568_v25 = vpop.permute.xlu0 %2567 }
0x1633   :  { %v2576_v28 = vmul.f32 %v3889_v18, %v2568_v25 }
0x1635   :  { %2582 = vrot.lane.b32.xlu1 %v2576_v28, %s3909_s9 }
0x1639   :  { %2556 = vrot.lane.b32.xlu1 %v2548_v61, %s3909_s9 }
0x1641   :  { %v2570_v21 = vpop.permute.xlu1 %2569 }
0x1642   :  { %v2577_v50 = vmul.f32 %v3891_v15, %v2570_v21 }
0x1644   :  { %2584 = vrot.lane.b32.xlu0 %v2577_v50, %s3909_s9 }
0x1645   :  { %v2553_v14 = vpop.permute.xlu1 %2552 }
0x1646   :  { %v2561_v26 = vmul.f32 %v3889_v18, %v2553_v14 }
0x1656   :  { %v2572_v58 = vpop.permute.xlu0 %2571 }
0x1657   :  { %v2578_v5 = vmul.f32 %v3895_v32, %v2572_v58 }
0x1659   :  { %2586 = vrot.lane.b32.xlu0 %v2578_v5, %s3909_s9 }
0x165a   :  { %v2555_v7 = vpop.permute.xlu0 %2554 }
0x165b   :  { %v2562_v63 = vmul.f32 %v3891_v15, %v2555_v7 }
0x16a7   :  { %v2583_v27 = vpop.permute.xlu1 %2582 }
0x16a8   :  { %v4996_v31 = vadd.f32 %v2583_v27, %v2561_v26 }
0x16aa   :  { %3896 = vtanh.f32 %v4996_v31 }
0x16ab   :  { %v2557_v20 = vpop.permute.xlu1 %2556 }
0x16ac   :  { %v2563_v56 = vmul.f32 %v3895_v32, %v2557_v20 }
0x16b4   :  { %v3897_v37 = vpop.eup %3896 }
0x16b5   :  { %2600 = vrot.lane.b32.xlu1 %v3897_v37, %s3908_s30 }
0x16b6   :  { %v2585_v19 = vpop.permute.xlu0 %2584 }
0x16b7   :  { %v5000_v49 = vadd.f32 %v2585_v19, %v2562_v63 }
0x16b9   :  { %3898 = vtanh.f32 %v5000_v49 }
0x16c3   :  { %v3899_v34 = vpop.eup %3898 }
0x16c4   :  { %2602 = vrot.lane.b32.xlu0 %v3899_v34, %s3908_s30 }
0x16cb   :  { %v2587_v16 = vpop.permute.xlu0 %2586 }
0x16cc   :  { %v5004_v23 = vadd.f32 %v2587_v16, %v2563_v56 }
0x16ce   :  { %3900 = vtanh.f32 %v5004_v23 }
0x16d8   :  { %v3901_v6 = vpop.eup %3900 }
0x16d9   :  { %2604 = vrot.lane.b32.xlu1 %v3901_v6, %s3908_s30 }
0x1727   :  { %v2601_v60 = vpop.permute.xlu1 %2600 }
0x1728   :  { %v5008_v41 = vmul.f32 %v3889_v18, %v2601_v60 }
0x172a   :  { %2646 = vrot.lane.b32.xlu0 %v5008_v41, %s3911_s4 }
0x1736   :  { %v2603_v30 = vpop.permute.xlu0 %2602 }
0x1737   :  { %v5012_v0 = vmul.f32 %v3891_v15, %v2603_v30 }
0x1739   :  { %2648 = vrot.lane.b32.xlu1 %v5012_v0, %s3911_s4 }
0x173d   :  { %2407 = vrot.lane.b32.xlu1 %v4941_v11, %s3911_s4 }
0x1741   :  { %2411 = vrot.lane.b32.xlu1 %v4951_v22, %s3911_s4 }
0x1745   :  { %2170 = vrot.lane.b32.xlu1 %v4887_v55, %s3911_s4 }
0x1749   :  { %1929 = vrot.lane.b32.xlu1 %v4820_v12, %s3911_s4 }
0x174b   :  { %v2605_v39 = vpop.permute.xlu1 %2604 }
0x174c   :  { %v5024_v13 = vmul.f32 %v3895_v32, %v2605_v39 }
0x174d   :  { %1933 = vrot.lane.b32.xlu1 %v4830_v17, %s3911_s4  ;;  %v2828_v17 = vld [vmem:[%s5394_s6 + $0x10] sm:$0xff] }
0x174e   :  { %2650 = vrot.lane.b32.xlu0 %v5024_v13, %s3911_s4 }
0x1751   :  { %1692 = vrot.lane.b32.xlu1 %v4761_v59, %s3911_s4 }
0x1752   :  { %2409 = vrot.lane.b32.xlu0 %v4945_v9, %s3911_s4 }
0x1755   :  { %1449 = vrot.lane.b32.xlu1 %v4663_v45, %s3911_s4 }
0x1756   :  { %2168 = vrot.lane.b32.xlu0 %v4883_v33, %s3911_s4  ;;  %v2829_v33 = vld [vmem:[%s5394_s6 + $0x18] sm:$0xff] }
0x1757   :  { %v3649_v55 = vpack.c.bf16 %v2829_v33, %v2828_v17  ;;  %v2664_v33 = vld [vmem:[#allocation3 + $0x30] sm:$0xff] }
0x1759   :  { %1453 = vrot.lane.b32.xlu1 %v4675_v35, %s3911_s4  ;;  %v2826_v35 = vld [vmem:[%s5394_s6] sm:$0xff] }
0x175a   :  { %2172 = vrot.lane.b32.xlu0 %v4893_v62, %s3911_s4 }
0x175d   :  { %1210 = vrot.lane.b32.xlu1 %v4499_v54, %s3911_s4 }
0x175e   :  { %1931 = vrot.lane.b32.xlu0 %v4824_v43, %s3911_s4 }
0x1761   :  { %967 = vrot.lane.b32.xlu1 %v4370_v24, %s3911_s4 }
0x1762   :  { %1690 = vrot.lane.b32.xlu0 %v4757_v47, %s3911_s4  ;;  %v2827_v47 = vld [vmem:[%s5394_s6 + $0x8] sm:$0xff] }
0x1763   :  { %v3645_v59 = vpack.c.bf16 %v2827_v47, %v2826_v35  ;;  %v2662_v47 = vld [vmem:[#allocation3 + $0x20] sm:$0xff] }
0x1765   :  { %971 = vrot.lane.b32.xlu1 %v4378_v44, %s3911_s4  ;;  %3646 = vmatprep.subr.bf16.mxu0 %v3645_v59 }
0x1766   :  { %1694 = vrot.lane.b32.xlu0 %v4767_v4, %s3911_s4  ;;  %3648 = vmatpush3.bf16.msra.mxu0 %v3645_v59 }
0x1767   :  { %3650 = vmatprep.subr.bf16.mxu0 %v3649_v55 }
0x176a   :  { %1451 = vrot.lane.b32.xlu0 %v4668_v2, %s3911_s4  ;;  %3652 = vmatpush3.bf16.msra.mxu0 %v3649_v55 }
0x176e   :  { %1208 = vrot.lane.b32.xlu0 %v4493_v8, %s3911_s4 }
0x1772   :  { %1212 = vrot.lane.b32.xlu0 %v4503_v42, %s3911_s4 }
0x1776   :  { %969 = vrot.lane.b32.xlu0 %v4374_v51, %s3911_s4 }
0x179c   :  { %v2647_v24 = vpop.permute.xlu0 %2646 }
0x179d   :  { %2655 = vst.msk [vmem:[#allocation4] sm:$0xff] %vm963_vm4, %v2647_v24  ;;  %v2658_v24 = vld [vmem:[#allocation3] sm:$0xff] }
0x17a4   :  { %v2682_v25 = vld [vmem:[#allocation4] sm:$0xff] }
0x17ab   :  { %v2649_v54 = vpop.permute.xlu1 %2648 }
0x17ac   :  { %2656 = vst.msk [vmem:[#allocation4 + $0x8] sm:$0xff] %vm963_vm4, %v2649_v54 }
0x17af   :  { %v2408_v44 = vpop.permute.xlu1 %2407 }
0x17b0   :  { %2417 = vst.msk [vmem:[#allocation4 + $0x18] sm:$0xff] %vm963_vm4, %v2408_v44 }
0x17b3   :  { %v2412_v45 = vpop.permute.xlu1 %2411  ;;  %v2683_v51 = vld [vmem:[#allocation4 + $0x8] sm:$0xff] }
0x17b4   :  { %2419 = vst.msk [vmem:[#allocation4 + $0x28] sm:$0xff] %vm963_vm4, %v2412_v45 }
0x17b7   :  { %v2171_v2 = vpop.permute.xlu1 %2170  ;;  %v2685_v8 = vld [vmem:[#allocation4 + $0x18] sm:$0xff] }
0x17b8   :  { %2179 = vst.msk [vmem:[#allocation4 + $0x38] sm:$0xff] %vm963_vm4, %v2171_v2  ;;  %2736 = vrot.lane.b32.xlu1 %v2685_v8, %s3911_s4  ;;  %v2660_v2 = vld [vmem:[#allocation3 + $0x10] sm:$0xff] }
0x17bb   :  { %v1930_v42 = vpop.permute.xlu1 %1929  ;;  %v2687_v12 = vld [vmem:[#allocation4 + $0x28] sm:$0xff] }
0x17bc   :  { %1939 = vst.msk [vmem:[#allocation4 + $0x48] sm:$0xff] %vm963_vm4, %v1930_v42  ;;  %2732 = vrot.lane.b32.xlu1 %v2683_v51, %s3911_s4  ;;  %v2661_v42 = vld [vmem:[#allocation3 + $0x18] sm:$0xff] }
0x17bf   :  { %v1934_v4 = vpop.permute.xlu1 %1933  ;;  %v2689_v11 = vld [vmem:[#allocation4 + $0x38] sm:$0xff] }
0x17c0   :  { %v2651_v43 = vpop.permute.xlu0 %2650  ;;  %1941 = vst.msk [vmem:[#allocation4 + $0x58] sm:$0xff] %vm963_vm4, %v1934_v4  ;;  %2740 = vrot.lane.b32.xlu1 %v2687_v12, %s3911_s4 }
0x17c1   :  { %2657 = vst.msk [vmem:[#allocation4 + $0x10] sm:$0xff] %vm963_vm4, %v2651_v43  ;;  %v2663_v43 = vld [vmem:[#allocation3 + $0x28] sm:$0xff] }
0x17c3   :  { %v1693_v62 = vpop.permute.xlu1 %1692  ;;  %v2691_v53 = vld [vmem:[#allocation4 + $0x48] sm:$0xff] }
0x17c4   :  { %v2410_v9 = vpop.permute.xlu0 %2409  ;;  %1701 = vst.msk [vmem:[#allocation4 + $0x68] sm:$0xff] %vm963_vm4, %v1693_v62  ;;  %2744 = vrot.lane.b32.xlu1 %v2689_v11, %s3911_s4 }
0x17c5   :  { %2418 = vst.msk [vmem:[#allocation4 + $0x20] sm:$0xff] %vm963_vm4, %v2410_v9  ;;  %v2665_v9 = vld [vmem:[#allocation3 + $0x38] sm:$0xff] }
0x17c7   :  { %v1450_v22 = vpop.permute.xlu1 %1449  ;;  %v2693_v46 = vld [vmem:[#allocation4 + $0x58] sm:$0xff] }
0x17c8   :  { %v2169_v40 = vpop.permute.xlu0 %2168  ;;  %1459 = vst.msk [vmem:[#allocation4 + $0x78] sm:$0xff] %vm963_vm4, %v1450_v22  ;;  %2748 = vrot.lane.b32.xlu1 %v2691_v53, %s3911_s4  ;;  %v2684_v61 = vld [vmem:[#allocation4 + $0x10] sm:$0xff]  ;;  %v2666_v53 = vld [vmem:[#allocation3 + $0x40] sm:$0xff] }
0x17c9   :  { %2178 = vst.msk [vmem:[#allocation4 + $0x30] sm:$0xff] %vm963_vm4, %v2169_v40 }
0x17cb   :  { %v1454_v36 = vpop.permute.xlu1 %1453  ;;  %v2695_v38 = vld [vmem:[#allocation4 + $0x68] sm:$0xff] }
0x17cc   :  { %v2173_v52 = vpop.permute.xlu0 %2172  ;;  %v2686_v57 = vld [vmem:[#allocation4 + $0x20] sm:$0xff]  ;;  %1461 = vst.msk [vmem:[#allocation4 + $0x88] sm:$0xff] %vm963_vm4, %v1454_v36  ;;  %2752 = vrot.lane.b32.xlu1 %v2693_v46, %s3911_s4 }
0x17cd   :  { %2180 = vst.msk [vmem:[#allocation4 + $0x40] sm:$0xff] %vm963_vm4, %v2173_v52  ;;  %2738 = vrot.lane.b32.xlu0 %v2686_v57, %s3911_s4  ;;  %v2667_v52 = vld [vmem:[#allocation3 + $0x48] sm:$0xff] }
0x17cf   :  { %v1211_v3 = vpop.permute.xlu1 %1210  ;;  %v2697_v29 = vld [vmem:[#allocation4 + $0x78] sm:$0xff] }
0x17d0   :  { %v1932_v18 = vpop.permute.xlu0 %1931  ;;  %1219 = vst.msk [vmem:[#allocation4 + $0x98] sm:$0xff] %vm963_vm4, %v1211_v3  ;;  %2756 = vrot.lane.b32.xlu1 %v2695_v38, %s3911_s4  ;;  %v2688_v50 = vld [vmem:[#allocation4 + $0x30] sm:$0xff] }
0x17d1   :  { %1940 = vst.msk [vmem:[#allocation4 + $0x50] sm:$0xff] %vm963_vm4, %v1932_v18  ;;  %2730 = vrot.lane.b32.xlu0 %v2682_v25, %s3911_s4  ;;  %v2668_v3 = vld [vmem:[#allocation3 + $0x50] sm:$0xff]  ;;  %v2669_v25 = vld [vmem:[#allocation3 + $0x58] sm:$0xff] }
0x17d3   :  { %v968_v28 = vpop.permute.xlu1 %967  ;;  %v2699_v63 = vld [vmem:[#allocation4 + $0x88] sm:$0xff] }
0x17d4   :  { %v1691_v1 = vpop.permute.xlu0 %1690  ;;  %977 = vst.msk [vmem:[#allocation4 + $0xa8] sm:$0xff] %vm963_vm4, %v968_v28  ;;  %2760 = vrot.lane.b32.xlu1 %v2697_v29, %s3911_s4  ;;  %v2690_v48 = vld [vmem:[#allocation4 + $0x40] sm:$0xff] }
0x17d5   :  { %1700 = vst.msk [vmem:[#allocation4 + $0x60] sm:$0xff] %vm963_vm4, %v1691_v1  ;;  %2734 = vrot.lane.b32.xlu0 %v2684_v61, %s3911_s4  ;;  %v2670_v29 = vld [vmem:[#allocation3 + $0x60] sm:$0xff] }
0x17d7   :  { %v972_v15 = vpop.permute.xlu1 %971  ;;  %v2701_v20 = vld [vmem:[#allocation4 + $0x98] sm:$0xff] }
0x17d8   :  { %v1695_v21 = vpop.permute.xlu0 %1694  ;;  %979 = vst.msk [vmem:[#allocation4 + $0xb8] sm:$0xff] %vm963_vm4, %v972_v15  ;;  %2630 = vrot.lane.b32.xlu1 %v5008_v41, %s3909_s9  ;;  %v2692_v58 = vld [vmem:[#allocation4 + $0x50] sm:$0xff]  ;;  %v2671_v15 = vld [vmem:[#allocation3 + $0x68] sm:$0xff] }
0x17d9   :  { %1702 = vst.msk [vmem:[#allocation4 + $0x70] sm:$0xff] %vm963_vm4, %v1695_v21  ;;  %2742 = vrot.lane.b32.xlu0 %v2688_v50, %s3911_s4  ;;  %v2672_v50 = vld [vmem:[#allocation3 + $0x70] sm:$0xff] }
0x17db   :  { %v2703_v56 = vld [vmem:[#allocation4 + $0xa8] sm:$0xff] }
0x17dc   :  { %v1452_v10 = vpop.permute.xlu0 %1451  ;;  %2632 = vrot.lane.b32.xlu1 %v5012_v0, %s3909_s9  ;;  %v2694_v14 = vld [vmem:[#allocation4 + $0x60] sm:$0xff] }
0x17dd   :  { %1460 = vst.msk [vmem:[#allocation4 + $0x80] sm:$0xff] %vm963_vm4, %v1452_v10  ;;  %2746 = vrot.lane.b32.xlu0 %v2690_v48, %s3911_s4 }
0x17df   :  { %v2705_v16 = vld [vmem:[#allocation4 + $0xb8] sm:$0xff] }
0x17e0   :  { %v1209_v32 = vpop.permute.xlu0 %1208  ;;  %2634 = vrot.lane.b32.xlu1 %v5024_v13, %s3909_s9  ;;  %v2696_v27 = vld [vmem:[#allocation4 + $0x70] sm:$0xff] }
0x17e1   :  { %1218 = vst.msk [vmem:[#allocation4 + $0x90] sm:$0xff] %vm963_vm4, %v1209_v32  ;;  %2750 = vrot.lane.b32.xlu0 %v2692_v58, %s3911_s4  ;;  %v2673_v58 = vld [vmem:[#allocation3 + $0x78] sm:$0xff] }
0x17e4   :  { %v1213_v5 = vpop.permute.xlu0 %1212  ;;  %v2698_v7 = vld [vmem:[#allocation4 + $0x80] sm:$0xff] }
0x17e5   :  { %1220 = vst.msk [vmem:[#allocation4 + $0xa0] sm:$0xff] %vm963_vm4, %v1213_v5  ;;  %2754 = vrot.lane.b32.xlu0 %v2694_v14, %s3911_s4  ;;  %v2674_v14 = vld [vmem:[#allocation3 + $0x80] sm:$0xff] }
0x17e8   :  { %v970_v26 = vpop.permute.xlu0 %969  ;;  %v2700_v34 = vld [vmem:[#allocation4 + $0x90] sm:$0xff] }
0x17e9   :  { %978 = vst.msk [vmem:[#allocation4 + $0xb0] sm:$0xff] %vm963_vm4, %v970_v26  ;;  %2758 = vrot.lane.b32.xlu0 %v2696_v27, %s3911_s4 }
0x17ec   :  { %v2702_v37 = vld [vmem:[#allocation4 + $0xa0] sm:$0xff] }
0x17ed   :  { %2762 = vrot.lane.b32.xlu0 %v2698_v7, %s3911_s4  ;;  %2770 = vrot.lane.b32.xlu1 %v2702_v37, %s3911_s4  ;;  %v2675_v7 = vld [vmem:[#allocation3 + $0x88] sm:$0xff] }
0x17f0   :  { %v2704_v19 = vld [vmem:[#allocation4 + $0xb0] sm:$0xff] }
0x17f1   :  { %2764 = vrot.lane.b32.xlu0 %v2699_v63, %s3911_s4  ;;  %2774 = vrot.lane.b32.xlu1 %v2704_v19, %s3911_s4 }
0x17f5   :  { %2766 = vrot.lane.b32.xlu0 %v2700_v34, %s3911_s4  ;;  %2615 = vrot.lane.b32.xlu1 %v4996_v31, %s3910_s14  ;;  %v2676_v34 = vld [vmem:[#allocation3 + $0x90] sm:$0xff] }
0x17f9   :  { %2768 = vrot.lane.b32.xlu0 %v2701_v20, %s3911_s4  ;;  %2619 = vrot.lane.b32.xlu1 %v5004_v23, %s3910_s14  ;;  %v2659_v23 = vld [vmem:[#allocation3 + $0x8] sm:$0xff] }
0x17fd   :  { %2772 = vrot.lane.b32.xlu0 %v2703_v56, %s3911_s4 }
0x1801   :  { %2776 = vrot.lane.b32.xlu0 %v2705_v16, %s3911_s4 }
0x1805   :  { %2617 = vrot.lane.b32.xlu0 %v5000_v49, %s3910_s14 }
0x182a   :  { %v2737_v6 = vpop.permute.xlu1 %2736 }
0x182b   :  { %v2805_v35 = vsel %vm963_vm4, %v2661_v42, %v2737_v6  ;;  %v2677_v6 = vld [vmem:[#allocation3 + $0x98] sm:$0xff]  ;;  %v3095_v42 = vld [vmem:[%s5388_s0 + $0x8] sm:$0xff] }
0x182e   :  { %v2733_v60 = vpop.permute.xlu1 %2732 }
0x182f   :  { %v2803_v45 = vsel %vm963_vm4, %v2659_v23, %v2733_v60 }
0x1832   :  { %v2741_v41 = vpop.permute.xlu1 %2740 }
0x1833   :  { %v2807_v17 = vsel %vm963_vm4, %v2663_v43, %v2741_v41  ;;  %v2678_v41 = vld [vmem:[#allocation3 + $0xa0] sm:$0xff] }
0x1836   :  { %v2745_v30 = vpop.permute.xlu1 %2744 }
0x1837   :  { %v2809_v22 = vsel %vm963_vm4, %v2665_v9, %v2745_v30 }
0x183a   :  { %v2749_v31 = vpop.permute.xlu1 %2748 }
0x183b   :  { %v2811_v57 = vsel %vm963_vm4, %v2667_v52, %v2749_v31  ;;  %v3098_v52 = vld [vmem:[%s5388_s0 + $0x20] sm:$0xff] }
0x183e   :  { %v2753_v0 = vpop.permute.xlu1 %2752 }
0x183f   :  { %v2739_v39 = vpop.permute.xlu0 %2738  ;;  %v2813_v28 = vsel %vm963_vm4, %v2669_v25, %v2753_v0  ;;  %v3101_v25 = vld [vmem:[%s5388_s0 + $0x38] sm:$0xff] }
0x1840   :  { %v2806_v59 = vsel %vm963_vm4, %v2662_v47, %v2739_v39  ;;  %v3094_v47 = vld [vmem:[%s5388_s0] sm:$0xff] }
0x1842   :  { %v2757_v13 = vpop.permute.xlu1 %2756 }
0x1843   :  { %v2731_v54 = vpop.permute.xlu0 %2730  ;;  %v2815_v21 = vsel %vm963_vm4, %v2671_v15, %v2757_v13 }
0x1844   :  { %v2802_v44 = vsel %vm963_vm4, %v2658_v24, %v2731_v54 }
0x1845   :  { %3561 = vmatprep.mubr.msk.f32.mxu0 %vm718_vm1, %v2802_v44 }
0x1846   :  { %3562 = vmatmul.mubr.msk.f32.vlgmr.msra.gmra.mrb[24].mxu0 %vm718_vm1, %v2803_v45  ;;  %v2761_v49 = vpop.permute.xlu1 %2760 }
0x1847   :  { %v2735_v8 = vpop.permute.xlu0 %2734  ;;  %v2817_v5 = vsel %vm963_vm4, %v2673_v58, %v2761_v49  ;;  %v3102_v58 = vld [vmem:[%s5388_s0 + $0x40] sm:$0xff] }
0x1848   :  { %v2804_v51 = vsel %vm963_vm4, %v2660_v2, %v2735_v8  ;;  %v5194_v2 = vld [vmem:[%s5395_s7] ss:$0 sm:$0xff] }
0x1849   :  { %3564 = vmatprep.mubr.msk.f32.mxu0 %vm718_vm1, %v2804_v51 }
0x184a   :  { %3565 = vmatmul.mubr.msk.f32.gmra.mrb[26].mxu0 %vm718_vm1, %v2805_v35  ;;  %v2631_v4 = vpop.permute.xlu1 %2630 }
0x184b   :  { %3567 = vmatprep.mubr.msk.f32.mxu0 %vm718_vm1, %v2806_v59  ;;  %v2743_v12 = vpop.permute.xlu0 %2742  ;;  %2639 = vst.msk [vmem:[#allocation5] sm:$0xff] %vm718_vm1, %v2631_v4 }
0x184c   :  { %2643 = vst.msk [vmem:[#allocation3 + $0xa8] sm:$0xff] %vm963_vm4, %v2631_v4  ;;  %v2808_v55 = vsel %vm963_vm4, %v2664_v33, %v2743_v12 }
0x184e   :  { %3568 = vmatmul.mubr.msk.f32.gmra.mrb[28].mxu0 %vm718_vm1, %v2807_v17  ;;  %v2633_v62 = vpop.permute.xlu1 %2632  ;;  %v3097_v17 = vld [vmem:[%s5388_s0 + $0x18] sm:$0xff] }
0x184f   :  { %3570 = vmatprep.mubr.msk.f32.mxu0 %vm718_vm1, %v2808_v55  ;;  %v2747_v11 = vpop.permute.xlu0 %2746  ;;  %2640 = vst.msk [vmem:[#allocation5 + $0x8] sm:$0xff] %vm718_vm1, %v2633_v62 }
0x1850   :  { %2644 = vst.msk [vmem:[#allocation3 + $0xb0] sm:$0xff] %vm963_vm4, %v2633_v62  ;;  %v2810_v40 = vsel %vm963_vm4, %v2666_v53, %v2747_v11  ;;  %v3096_v62 = vld [vmem:[%s5388_s0 + $0x10] sm:$0xff] }
0x1852   :  { %3571 = vmatmul.mubr.msk.f32.gmra.mrb[30].mxu0 %vm718_vm1, %v2809_v22  ;;  %v2635_v36 = vpop.permute.xlu1 %2634 }
0x1853   :  { %3573 = vmatprep.mubr.msk.f32.mxu0 %vm718_vm1, %v2810_v40  ;;  %v2751_v46 = vpop.permute.xlu0 %2750  ;;  %2641 = vst.msk [vmem:[#allocation5 + $0x10] sm:$0xff] %vm718_vm1, %v2635_v36  ;;  %v2679_v0 = vld [vmem:[#allocation3 + $0xa8] sm:$0xff] }
0x1854   :  { %2645 = vst.msk [vmem:[#allocation3 + $0xb8] sm:$0xff] %vm963_vm4, %v2635_v36  ;;  %v2812_v38 = vsel %vm963_vm4, %v2668_v3, %v2751_v46  ;;  %v3099_v40 = vld [vmem:[%s5388_s0 + $0x28] sm:$0xff] }
0x1856   :  { %3574 = vmatmul.mubr.msk.f32.gmra.mrb[32].mxu0 %vm718_vm1, %v2811_v57 }
0x1857   :  { %3576 = vmatprep.mubr.msk.f32.mxu0 %vm718_vm1, %v2812_v38  ;;  %v2755_v18 = vpop.permute.xlu0 %2754  ;;  %v2680_v13 = vld [vmem:[#allocation3 + $0xb0] sm:$0xff] }
0x1858   :  { %v2814_v1 = vsel %vm963_vm4, %v2670_v29, %v2755_v18 }
0x185a   :  { %3577 = vmatmul.mubr.msk.f32.gmra.mrb[34].mxu0 %vm718_vm1, %v2813_v28 }
0x185b   :  { %3579 = vmatprep.mubr.msk.f32.mxu0 %vm718_vm1, %v2814_v1  ;;  %v2759_v61 = vpop.permute.xlu0 %2758  ;;  %v2681_v23 = vld [vmem:[#allocation3 + $0xb8] sm:$0xff]  ;;  %v3100_v1 = vld [vmem:[%s5388_s0 + $0x30] sm:$0xff] }
0x185c   :  { %v2816_v10 = vsel %vm963_vm4, %v2672_v50, %v2759_v61 }
0x185e   :  { %3580 = vmatmul.mubr.msk.f32.gmra.mrb[36].mxu0 %vm718_vm1, %v2815_v21 }
0x185f   :  { %v2771_v48 = vpop.permute.xlu1 %2770  ;;  %3582 = vmatprep.mubr.msk.f32.mxu0 %vm718_vm1, %v2816_v10  ;;  %v2763_v32 = vpop.permute.xlu0 %2762  ;;  %v3103_v10 = vld [vmem:[%s5388_s0 + $0x48] sm:$0xff] }
0x1860   :  { %v2818_v26 = vsel %vm963_vm4, %v2674_v14, %v2763_v32  ;;  %v2822_v31 = vsel %vm963_vm4, %v2678_v41, %v2771_v48 }
0x1862   :  { %3583 = vmatmul.mubr.msk.f32.gmra.mrb[38].mxu0 %vm718_vm1, %v2817_v5 }
0x1863   :  { %v2775_v27 = vpop.permute.xlu1 %2774  ;;  %3585 = vmatprep.mubr.msk.f32.mxu0 %vm718_vm1, %v2818_v26  ;;  %v2765_v37 = vpop.permute.xlu0 %2764 }
0x1864   :  { %v2819_v63 = vsel %vm963_vm4, %v2675_v7, %v2765_v37  ;;  %v2824_v54 = vsel %vm963_vm4, %v2680_v13, %v2775_v27  ;;  %v3105_v7 = vld [vmem:[%s5388_s0 + $0x58] sm:$0xff] }
0x1866   :  { %3586 = vmatmul.mubr.msk.f32.gmra.mrb[40].mxu0 %vm718_vm1, %v2819_v63 }
0x1867   :  { %v2616_v19 = vpop.permute.xlu1 %2615  ;;  %v2767_v20 = vpop.permute.xlu0 %2766 }
0x1868   :  { %2624 = vst.msk [vmem:[#allocation6] sm:$0xff] %vm718_vm1, %v2616_v19  ;;  %v2820_v56 = vsel %vm963_vm4, %v2676_v34, %v2767_v20  ;;  %v3104_v19 = vld [vmem:[%s5388_s0 + $0x50] sm:$0xff] }
0x1869   :  { %3588 = vmatprep.mubr.msk.f32.mxu0 %vm718_vm1, %v2820_v56 }
0x186b   :  { %v2620_v16 = vpop.permute.xlu1 %2619  ;;  %v2769_v60 = vpop.permute.xlu0 %2768 }
0x186c   :  { %2626 = vst.msk [vmem:[#allocation6 + $0x10] sm:$0xff] %vm718_vm1, %v2620_v16  ;;  %v2821_v30 = vsel %vm963_vm4, %v2677_v6, %v2769_v60  ;;  %v3107_v6 = vld [vmem:[%s5388_s0 + $0x68] sm:$0xff] }
0x186d   :  { %3589 = vmatmul.mubr.msk.f32.gmra.mrb[42].mxu0 %vm718_vm1, %v2821_v30  ;;  %v3106_v30 = vld [vmem:[%s5388_s0 + $0x60] sm:$0xff] }
0x186e   :  { %3591 = vmatprep.mubr.msk.f32.mxu0 %vm718_vm1, %v2822_v31 }
0x186f   :  { %v2773_v39 = vpop.permute.xlu0 %2772 }
0x1870   :  { %v2823_v24 = vsel %vm963_vm4, %v2679_v0, %v2773_v39 }
0x1871   :  { %3592 = vmatmul.mubr.msk.f32.gmra.mrb[44].mxu0 %vm718_vm1, %v2823_v24  ;;  %v3109_v24 = vld [vmem:[%s5388_s0 + $0x78] sm:$0xff] }
0x1872   :  { %3594 = vmatprep.mubr.msk.f32.mxu0 %vm718_vm1, %v2824_v54 }
0x1873   :  { %v2777_v44 = vpop.permute.xlu0 %2776 }
0x1874   :  { %v2825_v45 = vsel %vm963_vm4, %v2681_v23, %v2777_v44  ;;  %v3108_v44 = vld [vmem:[%s5388_s0 + $0x70] sm:$0xff] }
0x1875   :  { %3595 = vmatmul.mubr.msk.f32.gmra.mrb[46].mxu0 %vm718_vm1, %v2825_v45 }
0x1877   :  { %v2618_v49 = vpop.permute.xlu0 %2617 }
0x1878   :  { %2625 = vst.msk [vmem:[#allocation6 + $0x8] sm:$0xff] %vm718_vm1, %v2618_v49 }
0x1919   :  { %v3563_v8 = vpop.f32.mrb[24].mxu0 }
0x191a   :  { %v2981_v51 = vadd.f32 %v3563_v8, %v5194_v2  ;;  %v2975_v35 = vpop.f32.mrb[25].mxu0 }
0x191b   :  { %v2976_v59 = vadd.f32 %v5194_v2, %v2975_v35 }
0x191c   :  { %v3119_v4 = vadd.f32 %v3095_v42, %v2981_v51  ;;  %v3111_v51 = vld [vmem:[%s5388_s0 + $0x88] sm:$0xff] }
0x191d   :  { %v3118_v12 = vadd.f32 %v3094_v47, %v2976_v59  ;;  %v3566_v43 = vpop.f32.mrb[26].mxu0  ;;  %v3110_v59 = vld [vmem:[%s5388_s0 + $0x80] sm:$0xff] }
0x191e   :  { %3143 = vst.msk [vmem:[%s5396_s8 + $0x8] sm:$0xff] %vm53_vm0, %v3119_v4  ;;  %v2991_v33 = vadd.f32 %v3566_v43, %v5194_v2  ;;  %v2985_v55 = vpop.f32.mrb[27].mxu0 }
0x191f   :  { %3142 = vst.msk [vmem:[%s5396_s8] sm:$0xff] %vm53_vm0, %v3118_v12  ;;  %v2986_v11 = vadd.f32 %v5194_v2, %v2985_v55 }
0x1920   :  { %v3121_v9 = vadd.f32 %v3097_v17, %v2991_v33  ;;  %v3113_v33 = vld [vmem:[%s5388_s0 + $0x98] sm:$0xff] }
0x1921   :  { %v3120_v22 = vadd.f32 %v3096_v62, %v2986_v11  ;;  %v3569_v53 = vpop.f32.mrb[28].mxu0  ;;  %v3112_v11 = vld [vmem:[%s5388_s0 + $0x90] sm:$0xff] }
0x1922   :  { %3145 = vst.msk [vmem:[%s5396_s8 + $0x18] sm:$0xff] %vm53_vm0, %v3121_v9  ;;  %v3001_v36 = vadd.f32 %v3569_v53, %v5194_v2  ;;  %v2995_v46 = vpop.f32.mrb[29].mxu0 }
0x1923   :  { %3144 = vst.msk [vmem:[%s5396_s8 + $0x10] sm:$0xff] %vm53_vm0, %v3120_v22  ;;  %v2996_v57 = vadd.f32 %v5194_v2, %v2995_v46 }
0x1924   :  { %v3123_v3 = vadd.f32 %v3099_v40, %v3001_v36  ;;  %v3115_v36 = vld [vmem:[%s5388_s0 + $0xa8] sm:$0xff] }
0x1925   :  { %v3122_v38 = vadd.f32 %v3098_v52, %v2996_v57  ;;  %v3572_v18 = vpop.f32.mrb[30].mxu0  ;;  %v3114_v57 = vld [vmem:[%s5388_s0 + $0xa0] sm:$0xff] }
0x1926   :  { %3147 = vst.msk [vmem:[%s5396_s8 + $0x28] sm:$0xff] %vm53_vm0, %v3123_v3  ;;  %v3011_v28 = vadd.f32 %v3572_v18, %v5194_v2  ;;  %v3005_v29 = vpop.f32.mrb[31].mxu0 }
0x1927   :  { %3146 = vst.msk [vmem:[%s5396_s8 + $0x20] sm:$0xff] %vm53_vm0, %v3122_v38  ;;  %v3006_v61 = vadd.f32 %v5194_v2, %v3005_v29 }
0x1928   :  { %v3125_v15 = vadd.f32 %v3101_v25, %v3011_v28  ;;  %v3117_v28 = vld [vmem:[%s5388_s0 + $0xb8] sm:$0xff] }
0x1929   :  { %v3124_v21 = vadd.f32 %v3100_v1, %v3006_v61  ;;  %v3575_v50 = vpop.f32.mrb[32].mxu0  ;;  %v3116_v61 = vld [vmem:[%s5388_s0 + $0xb0] sm:$0xff] }
0x192a   :  { %3149 = vst.msk [vmem:[%s5396_s8 + $0x38] sm:$0xff] %vm53_vm0, %v3125_v15  ;;  %v3021_v48 = vadd.f32 %v3575_v50, %v5194_v2  ;;  %v3015_v32 = vpop.f32.mrb[33].mxu0 }
0x192b   :  { %3148 = vst.msk [vmem:[%s5396_s8 + $0x30] sm:$0xff] %vm53_vm0, %v3124_v21  ;;  %v3016_v5 = vadd.f32 %v5194_v2, %v3015_v32 }
0x192c   :  { %v3127_v14 = vadd.f32 %v3103_v10, %v3021_v48 }
0x192d   :  { %v3126_v26 = vadd.f32 %v3102_v58, %v3016_v5  ;;  %v3578_v27 = vpop.f32.mrb[34].mxu0 }
0x192e   :  { %3151 = vst.msk [vmem:[%s5396_s8 + $0x48] sm:$0xff] %vm53_vm0, %v3127_v14  ;;  %v3031_v37 = vadd.f32 %v3578_v27, %v5194_v2  ;;  %v3025_v63 = vpop.f32.mrb[35].mxu0 }
0x192f   :  { %3150 = vst.msk [vmem:[%s5396_s8 + $0x40] sm:$0xff] %vm53_vm0, %v3126_v26  ;;  %v3026_v34 = vadd.f32 %v5194_v2, %v3025_v63 }
0x1930   :  { %v3129_v20 = vadd.f32 %v3105_v7, %v3031_v37 }
0x1931   :  { %v3128_v56 = vadd.f32 %v3104_v19, %v3026_v34  ;;  %v3581_v16 = vpop.f32.mrb[36].mxu0 }
0x1932   :  { %3153 = vst.msk [vmem:[%s5396_s8 + $0x58] sm:$0xff] %vm53_vm0, %v3129_v20  ;;  %v3041_v60 = vadd.f32 %v3581_v16, %v5194_v2  ;;  %v3035_v41 = vpop.f32.mrb[37].mxu0 }
0x1933   :  { %3152 = vst.msk [vmem:[%s5396_s8 + $0x50] sm:$0xff] %vm53_vm0, %v3128_v56  ;;  %v3036_v31 = vadd.f32 %v5194_v2, %v3035_v41 }
0x1934   :  { %v3131_v0 = vadd.f32 %v3107_v6, %v3041_v60 }
0x1935   :  { %v3130_v39 = vadd.f32 %v3106_v30, %v3036_v31  ;;  %v3584_v13 = vpop.f32.mrb[38].mxu0 }
0x1936   :  { %3155 = vst.msk [vmem:[%s5396_s8 + $0x68] sm:$0xff] %vm53_vm0, %v3131_v0  ;;  %v3051_v54 = vadd.f32 %v3584_v13, %v5194_v2  ;;  %v3045_v23 = vpop.f32.mrb[39].mxu0 }
0x1937   :  { %3154 = vst.msk [vmem:[%s5396_s8 + $0x60] sm:$0xff] %vm53_vm0, %v3130_v39  ;;  %v3046_v45 = vadd.f32 %v5194_v2, %v3045_v23 }
0x1938   :  { %v3133_v49 = vadd.f32 %v3109_v24, %v3051_v54 }
0x1939   :  { %v3132_v8 = vadd.f32 %v3108_v44, %v3046_v45  ;;  %v3587_v42 = vpop.f32.mrb[40].mxu0 }
0x193a   :  { %3157 = vst.msk [vmem:[%s5396_s8 + $0x78] sm:$0xff] %vm53_vm0, %v3133_v49  ;;  %v3061_v35 = vadd.f32 %v3587_v42, %v5194_v2  ;;  %v3055_v47 = vpop.f32.mrb[41].mxu0 }
0x193b   :  { %3156 = vst.msk [vmem:[%s5396_s8 + $0x70] sm:$0xff] %vm53_vm0, %v3132_v8  ;;  %v3056_v4 = vadd.f32 %v5194_v2, %v3055_v47 }
0x193c   :  { %v3135_v12 = vadd.f32 %v3111_v51, %v3061_v35 }
0x193d   :  { %v3134_v43 = vadd.f32 %v3110_v59, %v3056_v4 }
0x193e   :  { %3159 = vst.msk [vmem:[%s5396_s8 + $0x88] sm:$0xff] %vm53_vm0, %v3135_v12 }
0x193f   :  { %3158 = vst.msk [vmem:[%s5396_s8 + $0x80] sm:$0xff] %vm53_vm0, %v3134_v43 }
0x1940   :  { %v3590_v17 = vpop.f32.mrb[42].mxu0 }
0x1941   :  { %v3071_v55 = vadd.f32 %v3590_v17, %v5194_v2  ;;  %v3065_v62 = vpop.f32.mrb[43].mxu0 }
0x1942   :  { %v3066_v9 = vadd.f32 %v5194_v2, %v3065_v62 }
0x1943   :  { %v3137_v22 = vadd.f32 %v3113_v33, %v3071_v55 }
0x1944   :  { %v3136_v53 = vadd.f32 %v3112_v11, %v3066_v9  ;;  %v3593_v40 = vpop.f32.mrb[44].mxu0 }
0x1945   :  { %3161 = vst.msk [vmem:[%s5396_s8 + $0x98] sm:$0xff] %vm53_vm0, %v3137_v22  ;;  %v3081_v46 = vadd.f32 %v3593_v40, %v5194_v2  ;;  %v3075_v52 = vpop.f32.mrb[45].mxu0 }
0x1946   :  { %3160 = vst.msk [vmem:[%s5396_s8 + $0x90] sm:$0xff] %vm53_vm0, %v3136_v53  ;;  %v3076_v3 = vadd.f32 %v5194_v2, %v3075_v52 }
0x1947   :  { %v3139_v38 = vadd.f32 %v3115_v36, %v3081_v46 }
0x1948   :  { %v3138_v18 = vadd.f32 %v3114_v57, %v3076_v3  ;;  %v3596_v25 = vpop.f32.mrb[46].mxu0 }
0x1949   :  { %3163 = vst.msk [vmem:[%s5396_s8 + $0xa8] sm:$0xff] %vm53_vm0, %v3139_v38  ;;  %v3091_v29 = vadd.f32 %v3596_v25, %v5194_v2  ;;  %v3085_v1 = vpop.f32.mrb[47].mxu0 }
0x194a   :  { %3162 = vst.msk [vmem:[%s5396_s8 + $0xa0] sm:$0xff] %vm53_vm0, %v3138_v18  ;;  %v3086_v15 = vadd.f32 %v5194_v2, %v3085_v1 }
0x194b   :  { %v3141_v21 = vadd.f32 %v3117_v28, %v3091_v29 }
0x194c   :  { %v3140_v50 = vadd.f32 %v3116_v61, %v3086_v15 }
0x194d   :  { %3165 = vst.msk [vmem:[%s5396_s8 + $0xb8] sm:$0xff] %vm53_vm0, %v3141_v21 }
0x194e   :  { %3164 = vst.msk [vmem:[%s5396_s8 + $0xb0] sm:$0xff] %vm53_vm0, %v3140_v50 }

</bundles_post_ra>
